<compile_context>
chip_gen: v7x
topology: tpu7x:2x2x1
jax: 0.10.0
libtpu: 0.0.40
codegen_flags: <defaults>
</compile_context>

<pallas_src>
import functools

import jax
import jax.numpy as jnp
from jax.experimental import pallas as pl
from jax.experimental.pallas import tpu as pltpu

LN_EPS = 1e-5


def _silu(x):
    return x * jax.nn.sigmoid(x)


def _layernorm(x, w, b):
    mu = jnp.mean(x, axis=-1, keepdims=True)
    var = jnp.mean((x - mu) ** 2, axis=-1, keepdims=True)
    return (x - mu) * jax.lax.rsqrt(var + LN_EPS) * w + b


def residual_block_kernel(*refs, use_attention, identity_res):
    it = iter(refs)
    x_ref = next(it)
    t_ref = next(it)
    ln1w = next(it); ln1b = next(it)
    w1t = next(it); b1t = next(it)            # fused [Cin+Ct, Cout], folded bias
    ln2w = next(it); ln2b = next(it)
    w2 = next(it); b2 = next(it)
    if not identity_res:
        wres = next(it); bres = next(it)
    if use_attention:
        lnaw = next(it); lnab = next(it)
        wqkv = next(it); bqkv = next(it)
        oh_ch = next(it); oh_hc = next(it)    # [C,H] / [H,C] one-hot head masks (f32)
        wo = next(it); bo = next(it)
    out_ref = next(it)

    x = x_ref[...]                            # [TB, Cin]  f32
    t = t_ref[...]                            # [TB, Ct]   f32
    cd = w1t.dtype                            # matmul operand dtype (bf16)

    # ---- residual path (Identity is free: no matmul) ----
    if identity_res:
        residual = x
    else:
        residual = jnp.dot(x.astype(cd), wres[...],
                           preferred_element_type=jnp.float32) + bres[...]

    # ---- fused (linear1 | time_proj): single K=(Cin+Ct) MXU pass, folded bias ----
    xt = jnp.concatenate(
        [_silu(_layernorm(x, ln1w[...], ln1b[...])), _silu(t)], axis=-1)
    h = jnp.dot(xt.astype(cd), w1t[...],
                preferred_element_type=jnp.float32) + b1t[...]

    # ---- norm2 -> SiLU -> linear2 ----
    h = _silu(_layernorm(h, ln2w[...], ln2b[...]))
    h = jnp.dot(h.astype(cd), w2[...], preferred_element_type=jnp.float32) + b2[...]

    # ---- per-head attention over the feature vector ----
    if use_attention:
        C = h.shape[-1]
        hn = _layernorm(h, lnaw[...], lnab[...])

        # fused QKV projection: one MXU pass, N = 3C
        qkv = jnp.dot(hn.astype(cd), wqkv[...],
                      preferred_element_type=jnp.float32) + bqkv[...]
        q = qkv[:, :C]
        k = qkv[:, C:2 * C]
        v = qkv[:, 2 * C:]

        # per-head score via one-hot matmul on the MXU: [TB,C] x [C,H] -> [TB,H]
        s = jnp.dot(q * k, oh_ch[...], preferred_element_type=jnp.float32)

        # exact softmax over the (tiny) head axis
        s = s - jnp.max(s, axis=-1, keepdims=True)
        e = jnp.exp(s)
        p = e / jnp.sum(e, axis=-1, keepdims=True)                 # [TB, H]

        # broadcast softmax weights back to feature layout on the MXU: [TB,H]x[H,C]
        p_full = jnp.dot(p, oh_hc[...], preferred_element_type=jnp.float32)

        attn = jnp.dot((p_full * v).astype(cd), wo[...],
                       preferred_element_type=jnp.float32) + bo[...]
        h = h + attn

    out_ref[...] = (h + residual).astype(out_ref.dtype)


def init_params(key, in_channels, out_channels, time_channels, num_heads):
    """Deterministic synthetic torch-like parameters (f32). Linear weights are
    stored as [in, out] so the kernel does x @ W + b."""
    del num_heads  # head split is a view; no extra params

    def lin(k, cin, cout):
        kw, kb = jax.random.split(k)
        bound = 1.0 / jnp.sqrt(cin)
        w = jax.random.uniform(kw, (cin, cout), jnp.float32, -bound, bound)
        b = jax.random.uniform(kb, (1, cout), jnp.float32, -bound, bound)
        return w, b

    def ln(k, c):
        kw, kb = jax.random.split(k)
        w = 1.0 + 0.1 * jax.random.normal(kw, (1, c), jnp.float32)
        b = 0.1 * jax.random.normal(kb, (1, c), jnp.float32)
        return w, b

    keys = jax.random.split(key, 11)
    p = {}
    p["ln1_w"], p["ln1_b"] = ln(keys[8], in_channels)
    p["w1"], p["b1"] = lin(keys[0], in_channels, out_channels)
    p["wt"], p["bt"] = lin(keys[1], time_channels, out_channels)
    p["ln2_w"], p["ln2_b"] = ln(keys[9], out_channels)
    p["w2"], p["b2"] = lin(keys[2], out_channels, out_channels)
    if in_channels != out_channels:
        p["wres"], p["bres"] = lin(keys[3], in_channels, out_channels)
    p["lna_w"], p["lna_b"] = ln(keys[10], out_channels)
    p["wq"], p["bq"] = lin(keys[4], out_channels, out_channels)
    p["wk"], p["bk"] = lin(keys[5], out_channels, out_channels)
    p["wv"], p["bv"] = lin(keys[6], out_channels, out_channels)
    p["wo"], p["bo"] = lin(keys[7], out_channels, out_channels)
    return p


def prep_params(params, *, num_heads, use_attention, compute_dtype=jnp.bfloat16):
    """Fold biases, fuse w1|wt and QKV, build one-hot head masks, cast matmul
    weights to bf16 (MXU operand dtype)."""
    cd = compute_dtype
    C = params["w2"].shape[1]
    p = {
        "ln1_w": params["ln1_w"], "ln1_b": params["ln1_b"],
        # fused (linear1 | time_proj) weight + folded bias
        "w1t": jnp.concatenate([params["w1"], params["wt"]], axis=0).astype(cd),
        "b1t": params["b1"] + params["bt"],
        "ln2_w": params["ln2_w"], "ln2_b": params["ln2_b"],
        "w2": params["w2"].astype(cd), "b2": params["b2"],
    }
    if "wres" in params:                      # real residual Linear
        p["wres"] = params["wres"].astype(cd)
        p["bres"] = params["bres"]
    if use_attention:
        assert C % num_heads == 0, "channels must be divisible by num_heads"
        head_dim = C // num_heads
        p["lna_w"] = params["lna_w"]; p["lna_b"] = params["lna_b"]
        p["wqkv"] = jnp.concatenate(
            [params["wq"], params["wk"], params["wv"]], axis=1).astype(cd)
        p["bqkv"] = jnp.concatenate(
            [params["bq"], params["bk"], params["bv"]], axis=1)
        head_id = jnp.arange(C, dtype=jnp.int32) // head_dim
        oh = jax.nn.one_hot(head_id, num_heads, dtype=jnp.float32)   # [C, H]
        p["oh_ch"] = oh
        p["oh_hc"] = jnp.transpose(oh)                                # [H, C]
        p["wo"] = params["wo"].astype(cd)
        p["bo"] = params["bo"]
    return p


def _round_up(v, m):
    return ((v + m - 1) // m) * m


def residual_block_forward(x, time_emb, prepped, *, num_heads, use_attention,
                           tile_b=512):
    B, Cin = x.shape
    Ct = time_emb.shape[1]
    Cout = prepped["w2"].shape[1]
    identity_res = "wres" not in prepped
    if identity_res:
        assert Cin == Cout, "identity residual requires in_channels == out_channels"
    if use_attention:
        assert Cout % num_heads == 0, "channels must be divisible by num_heads"

    # Batch tiling: multiple of 8, and >= 2 grid steps whenever B > 16 so the
    # "parallel" batch axis can shard across both v7x TensorCores and pipeline.
    if B <= 16:
        tb = B
    else:
        tb = min(tile_b, _round_up(pl.cdiv(B, 2), 8))
        tb = _round_up(tb, 8)
    B_pad = _round_up(B, tb)
    if B_pad != B:
        pad = B_pad - B
        x = jnp.pad(x, ((0, pad), (0, 0)))
        time_emb = jnp.pad(time_emb, ((0, pad), (0, 0)))
    grid = (B_pad // tb,)

    weight_order = ["ln1_w", "ln1_b", "w1t", "b1t", "ln2_w", "ln2_b", "w2", "b2"]
    if not identity_res:
        weight_order += ["wres", "bres"]
    if use_attention:
        weight_order += ["lna_w", "lna_b", "wqkv", "bqkv", "oh_ch", "oh_hc",
                         "wo", "bo"]

    inputs = [x, time_emb] + [prepped[n] for n in weight_order]

    # advisory cost estimate
    mm = [(Cin + Ct, Cout), (Cout, Cout)]
    if not identity_res:
        mm.append((Cin, Cout))
    if use_attention:
        mm += [(Cout, 3 * Cout), (Cout, num_heads), (num_heads, Cout),
               (Cout, Cout)]
    flops = sum(2 * B_pad * k * n for k, n in mm) + 20 * B_pad * Cout
    transcendentals = B_pad * (Cin + Ct + 2 * Cout
                               + (num_heads + Cout if use_attention else 0))
    bytes_accessed = sum(int(a.size) * a.dtype.itemsize for a in inputs) \
        + B_pad * Cout * 4

    # VMEM budget: resident weights (budget 2x to also cover the fallback path)
    # + double-buffered activation/output tiles + headroom; cap at 48 MiB so we
    # stay under the v7x 64 MiB physical VMEM per TensorCore.
    weight_bytes = sum(int(prepped[n].size) * prepped[n].dtype.itemsize
                       for n in weight_order)
    act_bytes = 2 * tb * (Cin + Ct + Cout) * 4
    vmem_limit = int(min(max(2 * weight_bytes + act_bytes + (8 << 20), 32 << 20),
                         48 << 20))

    kernel = functools.partial(
        residual_block_kernel,
        use_attention=use_attention,
        identity_res=identity_res,
    )

    def _run(single_buffer_weights):
        in_specs = [
            pl.BlockSpec((tb, Cin), lambda i: (i, 0)),
            pl.BlockSpec((tb, Ct), lambda i: (i, 0)),
        ]
        for name in weight_order:
            shape = prepped[name].shape
            if single_buffer_weights:
                # constant-index blocks: fetched once, no need to double-buffer
                spec = pl.BlockSpec(shape, lambda i: (0, 0),
                                    pipeline_mode=pl.Buffered(1))
            else:
                spec = pl.BlockSpec(shape, lambda i: (0, 0))
            in_specs.append(spec)
        out_specs = pl.BlockSpec((tb, Cout), lambda i: (i, 0))

        return pl.pallas_call(
            kernel,
            out_shape=jax.ShapeDtypeStruct((B_pad, Cout), jnp.float32),
            grid_spec=pltpu.PrefetchScalarGridSpec(
                num_scalar_prefetch=0,
                grid=grid,
                in_specs=in_specs,
                out_specs=out_specs,
            ),
            compiler_params=pltpu.CompilerParams(
                dimension_semantics=("parallel",),
                vmem_limit_bytes=vmem_limit,
            ),
            cost_estimate=pl.CostEstimate(
                flops=int(flops),
                transcendentals=int(transcendentals),
                bytes_accessed=int(bytes_accessed),
            ),
        )(*inputs)

    try:
        out = _run(single_buffer_weights=True)
    except Exception:
        # pl.Buffered(1) not supported on this jax/Mosaic build -> default buffering
        out = _run(single_buffer_weights=False)

    if B_pad != B:
        out = out[:B]
    return out


def residual_block_reference(x, time_emb, prepped, *, num_heads, use_attention):
    """Pure-JAX reference mirroring the PyTorch forward with the same
    mixed-precision policy (bf16 matmul operands, f32 accumulation)."""
    identity_res = "wres" not in prepped
    cd = prepped["w1t"].dtype
    if identity_res:
        residual = x
    else:
        residual = jnp.dot(x.astype(cd), prepped["wres"],
                           preferred_element_type=jnp.float32) + prepped["bres"]
    xt = jnp.concatenate(
        [_silu(_layernorm(x, prepped["ln1_w"], prepped["ln1_b"])),
         _silu(time_emb)], axis=-1)
    h = jnp.dot(xt.astype(cd), prepped["w1t"],
                preferred_element_type=jnp.float32) + prepped["b1t"]
    h = _silu(_layernorm(h, prepped["ln2_w"], prepped["ln2_b"]))
    h = jnp.dot(h.astype(cd), prepped["w2"],
                preferred_element_type=jnp.float32) + prepped["b2"]
    if use_attention:
        B, C = h.shape
        D = C // num_heads
        hn = _layernorm(h, prepped["lna_w"], prepped["lna_b"])
        qkv = jnp.dot(hn.astype(cd), prepped["wqkv"],
                      preferred_element_type=jnp.float32) + prepped["bqkv"]
        q = qkv[:, :C].reshape(B, num_heads, D)
        k = qkv[:, C:2 * C].reshape(B, num_heads, D)
        v = qkv[:, 2 * C:].reshape(B, num_heads, D)
        att = jax.nn.softmax(jnp.einsum("bhd,bhd->bh", q, k), axis=-1)
        o = (att[:, :, None] * v).reshape(B, C)
        h = h + jnp.dot(o.astype(cd), prepped["wo"],
                        preferred_element_type=jnp.float32) + prepped["bo"]
    return h + residual


if __name__ == "__main__":
    # config 1: in != out (real residual Linear) + attention; grid of 2 tiles
    B = 256
    in_channels = 64
    out_channels = 128
    time_channels = 32
    num_heads = 4

    key = jax.random.PRNGKey(0)
    kx, kt, kp = jax.random.split(key, 3)
    x = jax.random.normal(kx, (B, in_channels), jnp.float32)
    time_emb = jax.random.normal(kt, (B, time_channels), jnp.float32)

    params = init_params(kp, in_channels, out_channels, time_channels, num_heads)
    prepped = prep_params(params, num_heads=num_heads, use_attention=True)

    out = residual_block_forward(x, time_emb, prepped, num_heads=num_heads,
                                 use_attention=True)
    out = jax.block_until_ready(out)
    ref = residual_block_reference(x, time_emb, prepped, num_heads=num_heads,
                                   use_attention=True)
    assert out.shape == (B, out_channels)
    err = float(jnp.max(jnp.abs(out - ref)))
    assert jnp.allclose(out, ref, atol=1e-2, rtol=1e-2), \
        f"mismatch: max abs diff {err}"

    # config 2: in == out (Identity residual, no matmul), no attention
    in2 = out2 = 64
    B2 = 32
    params2 = init_params(jax.random.PRNGKey(1), in2, out2, time_channels,
                          num_heads)
    prepped2 = prep_params(params2, num_heads=num_heads, use_attention=False)
    x2 = jax.random.normal(jax.random.PRNGKey(2), (B2, in2), jnp.float32)
    t2 = jax.random.normal(jax.random.PRNGKey(3), (B2, time_channels), jnp.float32)
    out2_arr = jax.block_until_ready(
        residual_block_forward(x2, t2, prepped2, num_heads=num_heads,
                               use_attention=False))
    ref2 = residual_block_reference(x2, t2, prepped2, num_heads=num_heads,
                                    use_attention=False)
    err2 = float(jnp.max(jnp.abs(out2_arr - ref2)))
    assert jnp.allclose(out2_arr, ref2, atol=1e-2, rtol=1e-2), \
        f"identity-res mismatch: max abs diff {err2}"

    print("KERNEL_OK")
</pallas_src>

<mosaic_0001>
module attributes {stable_mosaic.version = 11 : i64} {
  func.func @residual_block_kernel(%arg0: i32, %arg1: memref<128x64xf32, #tpu.memory_space<vmem>>, %arg2: memref<128x32xf32, #tpu.memory_space<vmem>>, %arg3: memref<1x64xf32, #tpu.memory_space<vmem>>, %arg4: memref<1x64xf32, #tpu.memory_space<vmem>>, %arg5: memref<96x128xbf16, #tpu.memory_space<vmem>>, %arg6: memref<1x128xf32, #tpu.memory_space<vmem>>, %arg7: memref<1x128xf32, #tpu.memory_space<vmem>>, %arg8: memref<1x128xf32, #tpu.memory_space<vmem>>, %arg9: memref<128x128xbf16, #tpu.memory_space<vmem>>, %arg10: memref<1x128xf32, #tpu.memory_space<vmem>>, %arg11: memref<64x128xbf16, #tpu.memory_space<vmem>>, %arg12: memref<1x128xf32, #tpu.memory_space<vmem>>, %arg13: memref<1x128xf32, #tpu.memory_space<vmem>>, %arg14: memref<1x128xf32, #tpu.memory_space<vmem>>, %arg15: memref<128x384xbf16, #tpu.memory_space<vmem>>, %arg16: memref<1x384xf32, #tpu.memory_space<vmem>>, %arg17: memref<128x4xf32, #tpu.memory_space<vmem>>, %arg18: memref<4x128xf32, #tpu.memory_space<vmem>>, %arg19: memref<128x128xbf16, #tpu.memory_space<vmem>>, %arg20: memref<1x128xf32, #tpu.memory_space<vmem>>, %arg21: memref<128x128xf32, #tpu.memory_space<vmem>>) attributes {dimension_semantics = [#tpu.dimension_semantics<parallel>], iteration_bounds = array<i64: 2>, scalar_prefetch = 0 : i64, scratch_operands = 0 : i64, tpu.core_type = #tpu.core_type<tc>, window_params = [{transform_indices = @transform_0, window_bounds = array<i64: 128, 64>}, {transform_indices = @transform_1, window_bounds = array<i64: 128, 32>}, {pipeline_mode = #tpu.pipeline_mode<synchronous>, transform_indices = @transform_2, window_bounds = array<i64: 1, 64>}, {pipeline_mode = #tpu.pipeline_mode<synchronous>, transform_indices = @transform_3, window_bounds = array<i64: 1, 64>}, {pipeline_mode = #tpu.pipeline_mode<synchronous>, transform_indices = @transform_4, window_bounds = array<i64: 96, 128>}, {pipeline_mode = #tpu.pipeline_mode<synchronous>, transform_indices = @transform_5, window_bounds = array<i64: 1, 128>}, {pipeline_mode = #tpu.pipeline_mode<synchronous>, transform_indices = @transform_6, window_bounds = array<i64: 1, 128>}, {pipeline_mode = #tpu.pipeline_mode<synchronous>, transform_indices = @transform_7, window_bounds = array<i64: 1, 128>}, {pipeline_mode = #tpu.pipeline_mode<synchronous>, transform_indices = @transform_8, window_bounds = array<i64: 128, 128>}, {pipeline_mode = #tpu.pipeline_mode<synchronous>, transform_indices = @transform_9, window_bounds = array<i64: 1, 128>}, {pipeline_mode = #tpu.pipeline_mode<synchronous>, transform_indices = @transform_10, window_bounds = array<i64: 64, 128>}, {pipeline_mode = #tpu.pipeline_mode<synchronous>, transform_indices = @transform_11, window_bounds = array<i64: 1, 128>}, {pipeline_mode = #tpu.pipeline_mode<synchronous>, transform_indices = @transform_12, window_bounds = array<i64: 1, 128>}, {pipeline_mode = #tpu.pipeline_mode<synchronous>, transform_indices = @transform_13, window_bounds = array<i64: 1, 128>}, {pipeline_mode = #tpu.pipeline_mode<synchronous>, transform_indices = @transform_14, window_bounds = array<i64: 128, 384>}, {pipeline_mode = #tpu.pipeline_mode<synchronous>, transform_indices = @transform_15, window_bounds = array<i64: 1, 384>}, {pipeline_mode = #tpu.pipeline_mode<synchronous>, transform_indices = @transform_16, window_bounds = array<i64: 128, 4>}, {pipeline_mode = #tpu.pipeline_mode<synchronous>, transform_indices = @transform_17, window_bounds = array<i64: 4, 128>}, {pipeline_mode = #tpu.pipeline_mode<synchronous>, transform_indices = @transform_18, window_bounds = array<i64: 128, 128>}, {pipeline_mode = #tpu.pipeline_mode<synchronous>, transform_indices = @transform_19, window_bounds = array<i64: 1, 128>}, {transform_indices = @transform_20, window_bounds = array<i64: 128, 128>}]} {
    %c0 = arith.constant 0 : index
    %c0_0 = arith.constant 0 : index
    %0 = vector.load %arg1[%c0, %c0_0] : memref<128x64xf32, #tpu.memory_space<vmem>>, vector<128x64xf32>
    %c0_1 = arith.constant 0 : index
    %c0_2 = arith.constant 0 : index
    %1 = vector.load %arg2[%c0_1, %c0_2] : memref<128x32xf32, #tpu.memory_space<vmem>>, vector<128x32xf32>
    %2 = arith.truncf %0 : vector<128x64xf32> to vector<128x64xbf16>
    %c0_3 = arith.constant 0 : index
    %c0_4 = arith.constant 0 : index
    %3 = vector.load %arg11[%c0_3, %c0_4] : memref<64x128xbf16, #tpu.memory_space<vmem>>, vector<64x128xbf16>
    %cst = arith.constant dense<0.000000e+00> : vector<128x128xf32>
    %4 = tpu.matmul %2, %3, %cst {dimension_numbers = #tpu.dot_dimension_numbers<[1], [0], [0], [1], [0, 0, 1, 1], [], []>} : vector<128x64xbf16>, vector<64x128xbf16>, vector<128x128xf32> -> vector<128x128xf32>
    %c0_5 = arith.constant 0 : index
    %c0_6 = arith.constant 0 : index
    %5 = vector.load %arg12[%c0_5, %c0_6] : memref<1x128xf32, #tpu.memory_space<vmem>>, vector<1x128xf32>
    %6 = vector.broadcast %5 : vector<1x128xf32> to vector<128x128xf32>
    %7 = arith.addf %4, %6 : vector<128x128xf32>
    %c0_7 = arith.constant 0 : index
    %c0_8 = arith.constant 0 : index
    %8 = vector.load %arg3[%c0_7, %c0_8] : memref<1x64xf32, #tpu.memory_space<vmem>>, vector<1x64xf32>
    %c0_9 = arith.constant 0 : index
    %c0_10 = arith.constant 0 : index
    %9 = vector.load %arg4[%c0_9, %c0_10] : memref<1x64xf32, #tpu.memory_space<vmem>>, vector<1x64xf32>
    %cst_11 = arith.constant dense<0.000000e+00> : vector<128xf32>
    %10 = vector.multi_reduction <add>, %0, %cst_11 [1] : vector<128x64xf32> to vector<128xf32>
    %11 = vector.shape_cast %10 : vector<128xf32> to vector<128x1xf32>
    %cst_12 = arith.constant 6.400000e+01 : f32
    %12 = vector.broadcast %cst_12 : f32 to vector<128x1xf32>
    %13 = arith.divf %11, %12 : vector<128x1xf32>
    %14 = vector.broadcast %13 : vector<128x1xf32> to vector<128x64xf32>
    %15 = arith.subf %0, %14 : vector<128x64xf32>
    %16 = arith.mulf %15, %15 : vector<128x64xf32>
    %cst_13 = arith.constant dense<0.000000e+00> : vector<128xf32>
    %17 = vector.multi_reduction <add>, %16, %cst_13 [1] : vector<128x64xf32> to vector<128xf32>
    %18 = vector.shape_cast %17 : vector<128xf32> to vector<128x1xf32>
    %cst_14 = arith.constant 6.400000e+01 : f32
    %19 = vector.broadcast %cst_14 : f32 to vector<128x1xf32>
    %20 = arith.divf %18, %19 : vector<128x1xf32>
    %21 = vector.broadcast %13 : vector<128x1xf32> to vector<128x64xf32>
    %22 = arith.subf %0, %21 : vector<128x64xf32>
    %cst_15 = arith.constant 9.99999974E-6 : f32
    %23 = vector.broadcast %cst_15 : f32 to vector<128x1xf32>
    %24 = arith.addf %20, %23 : vector<128x1xf32>
    %25 = math.rsqrt %24 : vector<128x1xf32>
    %26 = vector.broadcast %25 : vector<128x1xf32> to vector<128x64xf32>
    %27 = arith.mulf %22, %26 : vector<128x64xf32>
    %28 = vector.broadcast %8 : vector<1x64xf32> to vector<128x64xf32>
    %29 = arith.mulf %27, %28 : vector<128x64xf32>
    %30 = vector.broadcast %9 : vector<1x64xf32> to vector<128x64xf32>
    %31 = arith.addf %29, %30 : vector<128x64xf32>
    %32 = arith.negf %31 : vector<128x64xf32>
    %33 = math.exp %32 : vector<128x64xf32>
    %cst_16 = arith.constant 1.000000e+00 : f32
    %34 = vector.broadcast %cst_16 : f32 to vector<128x64xf32>
    %35 = arith.addf %34, %33 : vector<128x64xf32>
    %36 = arith.divf %34, %35 : vector<128x64xf32>
    %37 = arith.mulf %31, %36 : vector<128x64xf32>
    %38 = arith.negf %1 : vector<128x32xf32>
    %39 = math.exp %38 : vector<128x32xf32>
    %cst_17 = arith.constant 1.000000e+00 : f32
    %40 = vector.broadcast %cst_17 : f32 to vector<128x32xf32>
    %41 = arith.addf %40, %39 : vector<128x32xf32>
    %42 = arith.divf %40, %41 : vector<128x32xf32>
    %43 = arith.mulf %1, %42 : vector<128x32xf32>
    %44 = tpu.concatenate %37, %43 in 1 : vector<128x64xf32>, vector<128x32xf32> -> vector<128x96xf32>
    %45 = arith.truncf %44 : vector<128x96xf32> to vector<128x96xbf16>
    %c0_18 = arith.constant 0 : index
    %c0_19 = arith.constant 0 : index
    %46 = vector.load %arg5[%c0_18, %c0_19] : memref<96x128xbf16, #tpu.memory_space<vmem>>, vector<96x128xbf16>
    %cst_20 = arith.constant dense<0.000000e+00> : vector<128x128xf32>
    %47 = tpu.matmul %45, %46, %cst_20 {dimension_numbers = #tpu.dot_dimension_numbers<[1], [0], [0], [1], [0, 0, 1, 1], [], []>} : vector<128x96xbf16>, vector<96x128xbf16>, vector<128x128xf32> -> vector<128x128xf32>
    %c0_21 = arith.constant 0 : index
    %c0_22 = arith.constant 0 : index
    %48 = vector.load %arg6[%c0_21, %c0_22] : memref<1x128xf32, #tpu.memory_space<vmem>>, vector<1x128xf32>
    %49 = vector.broadcast %48 : vector<1x128xf32> to vector<128x128xf32>
    %50 = arith.addf %47, %49 : vector<128x128xf32>
    %c0_23 = arith.constant 0 : index
    %c0_24 = arith.constant 0 : index
    %51 = vector.load %arg7[%c0_23, %c0_24] : memref<1x128xf32, #tpu.memory_space<vmem>>, vector<1x128xf32>
    %c0_25 = arith.constant 0 : index
    %c0_26 = arith.constant 0 : index
    %52 = vector.load %arg8[%c0_25, %c0_26] : memref<1x128xf32, #tpu.memory_space<vmem>>, vector<1x128xf32>
    %cst_27 = arith.constant dense<0.000000e+00> : vector<128xf32>
    %53 = vector.multi_reduction <add>, %50, %cst_27 [1] : vector<128x128xf32> to vector<128xf32>
    %54 = vector.shape_cast %53 : vector<128xf32> to vector<128x1xf32>
    %cst_28 = arith.constant 1.280000e+02 : f32
    %55 = vector.broadcast %cst_28 : f32 to vector<128x1xf32>
    %56 = arith.divf %54, %55 : vector<128x1xf32>
    %57 = vector.broadcast %56 : vector<128x1xf32> to vector<128x128xf32>
    %58 = arith.subf %50, %57 : vector<128x128xf32>
    %59 = arith.mulf %58, %58 : vector<128x128xf32>
    %cst_29 = arith.constant dense<0.000000e+00> : vector<128xf32>
    %60 = vector.multi_reduction <add>, %59, %cst_29 [1] : vector<128x128xf32> to vector<128xf32>
    %61 = vector.shape_cast %60 : vector<128xf32> to vector<128x1xf32>
    %cst_30 = arith.constant 1.280000e+02 : f32
    %62 = vector.broadcast %cst_30 : f32 to vector<128x1xf32>
    %63 = arith.divf %61, %62 : vector<128x1xf32>
    %64 = vector.broadcast %56 : vector<128x1xf32> to vector<128x128xf32>
    %65 = arith.subf %50, %64 : vector<128x128xf32>
    %cst_31 = arith.constant 9.99999974E-6 : f32
    %66 = vector.broadcast %cst_31 : f32 to vector<128x1xf32>
    %67 = arith.addf %63, %66 : vector<128x1xf32>
    %68 = math.rsqrt %67 : vector<128x1xf32>
    %69 = vector.broadcast %68 : vector<128x1xf32> to vector<128x128xf32>
    %70 = arith.mulf %65, %69 : vector<128x128xf32>
    %71 = vector.broadcast %51 : vector<1x128xf32> to vector<128x128xf32>
    %72 = arith.mulf %70, %71 : vector<128x128xf32>
    %73 = vector.broadcast %52 : vector<1x128xf32> to vector<128x128xf32>
    %74 = arith.addf %72, %73 : vector<128x128xf32>
    %75 = arith.negf %74 : vector<128x128xf32>
    %76 = math.exp %75 : vector<128x128xf32>
    %cst_32 = arith.constant 1.000000e+00 : f32
    %77 = vector.broadcast %cst_32 : f32 to vector<128x128xf32>
    %78 = arith.addf %77, %76 : vector<128x128xf32>
    %79 = arith.divf %77, %78 : vector<128x128xf32>
    %80 = arith.mulf %74, %79 : vector<128x128xf32>
    %81 = arith.truncf %80 : vector<128x128xf32> to vector<128x128xbf16>
    %c0_33 = arith.constant 0 : index
    %c0_34 = arith.constant 0 : index
    %82 = vector.load %arg9[%c0_33, %c0_34] : memref<128x128xbf16, #tpu.memory_space<vmem>>, vector<128x128xbf16>
    %cst_35 = arith.constant dense<0.000000e+00> : vector<128x128xf32>
    %83 = tpu.matmul %81, %82, %cst_35 {dimension_numbers = #tpu.dot_dimension_numbers<[1], [0], [0], [1], [0, 0, 1, 1], [], []>} : vector<128x128xbf16>, vector<128x128xbf16>, vector<128x128xf32> -> vector<128x128xf32>
    %c0_36 = arith.constant 0 : index
    %c0_37 = arith.constant 0 : index
    %84 = vector.load %arg10[%c0_36, %c0_37] : memref<1x128xf32, #tpu.memory_space<vmem>>, vector<1x128xf32>
    %85 = vector.broadcast %84 : vector<1x128xf32> to vector<128x128xf32>
    %86 = arith.addf %83, %85 : vector<128x128xf32>
    %c0_38 = arith.constant 0 : index
    %c0_39 = arith.constant 0 : index
    %87 = vector.load %arg13[%c0_38, %c0_39] : memref<1x128xf32, #tpu.memory_space<vmem>>, vector<1x128xf32>
    %c0_40 = arith.constant 0 : index
    %c0_41 = arith.constant 0 : index
    %88 = vector.load %arg14[%c0_40, %c0_41] : memref<1x128xf32, #tpu.memory_space<vmem>>, vector<1x128xf32>
    %cst_42 = arith.constant dense<0.000000e+00> : vector<128xf32>
    %89 = vector.multi_reduction <add>, %86, %cst_42 [1] : vector<128x128xf32> to vector<128xf32>
    %90 = vector.shape_cast %89 : vector<128xf32> to vector<128x1xf32>
    %cst_43 = arith.constant 1.280000e+02 : f32
    %91 = vector.broadcast %cst_43 : f32 to vector<128x1xf32>
    %92 = arith.divf %90, %91 : vector<128x1xf32>
    %93 = vector.broadcast %92 : vector<128x1xf32> to vector<128x128xf32>
    %94 = arith.subf %86, %93 : vector<128x128xf32>
    %95 = arith.mulf %94, %94 : vector<128x128xf32>
    %cst_44 = arith.constant dense<0.000000e+00> : vector<128xf32>
    %96 = vector.multi_reduction <add>, %95, %cst_44 [1] : vector<128x128xf32> to vector<128xf32>
    %97 = vector.shape_cast %96 : vector<128xf32> to vector<128x1xf32>
    %cst_45 = arith.constant 1.280000e+02 : f32
    %98 = vector.broadcast %cst_45 : f32 to vector<128x1xf32>
    %99 = arith.divf %97, %98 : vector<128x1xf32>
    %100 = vector.broadcast %92 : vector<128x1xf32> to vector<128x128xf32>
    %101 = arith.subf %86, %100 : vector<128x128xf32>
    %cst_46 = arith.constant 9.99999974E-6 : f32
    %102 = vector.broadcast %cst_46 : f32 to vector<128x1xf32>
    %103 = arith.addf %99, %102 : vector<128x1xf32>
    %104 = math.rsqrt %103 : vector<128x1xf32>
    %105 = vector.broadcast %104 : vector<128x1xf32> to vector<128x128xf32>
    %106 = arith.mulf %101, %105 : vector<128x128xf32>
    %107 = vector.broadcast %87 : vector<1x128xf32> to vector<128x128xf32>
    %108 = arith.mulf %106, %107 : vector<128x128xf32>
    %109 = vector.broadcast %88 : vector<1x128xf32> to vector<128x128xf32>
    %110 = arith.addf %108, %109 : vector<128x128xf32>
    %111 = arith.truncf %110 : vector<128x128xf32> to vector<128x128xbf16>
    %c0_47 = arith.constant 0 : index
    %c0_48 = arith.constant 0 : index
    %112 = vector.load %arg15[%c0_47, %c0_48] : memref<128x384xbf16, #tpu.memory_space<vmem>>, vector<128x384xbf16>
    %cst_49 = arith.constant dense<0.000000e+00> : vector<128x384xf32>
    %113 = tpu.matmul %111, %112, %cst_49 {dimension_numbers = #tpu.dot_dimension_numbers<[1], [0], [0], [1], [0, 0, 1, 1], [], []>} : vector<128x128xbf16>, vector<128x384xbf16>, vector<128x384xf32> -> vector<128x384xf32>
    %c0_50 = arith.constant 0 : index
    %c0_51 = arith.constant 0 : index
    %114 = vector.load %arg16[%c0_50, %c0_51] : memref<1x384xf32, #tpu.memory_space<vmem>>, vector<1x384xf32>
    %115 = vector.broadcast %114 : vector<1x384xf32> to vector<128x384xf32>
    %116 = arith.addf %113, %115 : vector<128x384xf32>
    %117 = vector.extract_strided_slice %116 {offsets = [0, 0], sizes = [128, 128], strides = [1, 1]} : vector<128x384xf32> to vector<128x128xf32>
    %118 = vector.extract_strided_slice %116 {offsets = [0, 128], sizes = [128, 128], strides = [1, 1]} : vector<128x384xf32> to vector<128x128xf32>
    %119 = vector.extract_strided_slice %116 {offsets = [0, 256], sizes = [128, 128], strides = [1, 1]} : vector<128x384xf32> to vector<128x128xf32>
    %120 = arith.mulf %117, %118 : vector<128x128xf32>
    %c0_52 = arith.constant 0 : index
    %c0_53 = arith.constant 0 : index
    %121 = vector.load %arg17[%c0_52, %c0_53] : memref<128x4xf32, #tpu.memory_space<vmem>>, vector<128x4xf32>
    %cst_54 = arith.constant dense<0.000000e+00> : vector<128x4xf32>
    %122 = tpu.matmul %120, %121, %cst_54 {dimension_numbers = #tpu.dot_dimension_numbers<[1], [0], [0], [1], [0, 0, 1, 1], [], []>} : vector<128x128xf32>, vector<128x4xf32>, vector<128x4xf32> -> vector<128x4xf32>
    %cst_55 = arith.constant dense<0xFF800000> : vector<128xf32>
    %123 = vector.multi_reduction <maximumf>, %122, %cst_55 [1] : vector<128x4xf32> to vector<128xf32>
    %124 = vector.shape_cast %123 : vector<128xf32> to vector<128x1xf32>
    %125 = vector.broadcast %124 : vector<128x1xf32> to vector<128x4xf32>
    %126 = arith.subf %122, %125 : vector<128x4xf32>
    %127 = math.exp %126 : vector<128x4xf32>
    %cst_56 = arith.constant dense<0.000000e+00> : vector<128xf32>
    %128 = vector.multi_reduction <add>, %127, %cst_56 [1] : vector<128x4xf32> to vector<128xf32>
    %129 = vector.shape_cast %128 : vector<128xf32> to vector<128x1xf32>
    %130 = vector.broadcast %129 : vector<128x1xf32> to vector<128x4xf32>
    %131 = arith.divf %127, %130 : vector<128x4xf32>
    %c0_57 = arith.constant 0 : index
    %c0_58 = arith.constant 0 : index
    %132 = vector.load %arg18[%c0_57, %c0_58] : memref<4x128xf32, #tpu.memory_space<vmem>>, vector<4x128xf32>
    %cst_59 = arith.constant dense<0.000000e+00> : vector<128x128xf32>
    %133 = tpu.matmul %131, %132, %cst_59 {dimension_numbers = #tpu.dot_dimension_numbers<[1], [0], [0], [1], [0, 0, 1, 1], [], []>} : vector<128x4xf32>, vector<4x128xf32>, vector<128x128xf32> -> vector<128x128xf32>
    %134 = arith.mulf %133, %119 : vector<128x128xf32>
    %135 = arith.truncf %134 : vector<128x128xf32> to vector<128x128xbf16>
    %c0_60 = arith.constant 0 : index
    %c0_61 = arith.constant 0 : index
    %136 = vector.load %arg19[%c0_60, %c0_61] : memref<128x128xbf16, #tpu.memory_space<vmem>>, vector<128x128xbf16>
    %cst_62 = arith.constant dense<0.000000e+00> : vector<128x128xf32>
    %137 = tpu.matmul %135, %136, %cst_62 {dimension_numbers = #tpu.dot_dimension_numbers<[1], [0], [0], [1], [0, 0, 1, 1], [], []>} : vector<128x128xbf16>, vector<128x128xbf16>, vector<128x128xf32> -> vector<128x128xf32>
    %c0_63 = arith.constant 0 : index
    %c0_64 = arith.constant 0 : index
    %138 = vector.load %arg20[%c0_63, %c0_64] : memref<1x128xf32, #tpu.memory_space<vmem>>, vector<1x128xf32>
    %139 = vector.broadcast %138 : vector<1x128xf32> to vector<128x128xf32>
    %140 = arith.addf %137, %139 : vector<128x128xf32>
    %141 = arith.addf %86, %140 : vector<128x128xf32>
    %142 = arith.addf %141, %7 : vector<128x128xf32>
    %c0_65 = arith.constant 0 : index
    %c0_66 = arith.constant 0 : index
    %143 = vector.load %arg21[%c0_65, %c0_66] : memref<128x128xf32, #tpu.memory_space<vmem>>, vector<128x128xf32>
    tpu.vector_store %arg21[%c0_65, %c0_66], %142 {strides = array<i32>} : memref<128x128xf32, #tpu.memory_space<vmem>>, vector<128x128xf32>,
    return
  }
  func.func @transform_0(%arg0: i32) -> (i32, i32) {
    %c0_i32 = arith.constant 0 : i32
    %c0_i32_0 = arith.constant 0 : i32
    return %arg0, %c0_i32 : i32, i32
  }
  func.func @transform_1(%arg0: i32) -> (i32, i32) {
    %c0_i32 = arith.constant 0 : i32
    %c0_i32_0 = arith.constant 0 : i32
    return %arg0, %c0_i32 : i32, i32
  }
  func.func @transform_2(%arg0: i32) -> (i32, i32) {
    %c0_i32 = arith.constant 0 : i32
    %c0_i32_0 = arith.constant 0 : i32
    %c0_i32_1 = arith.constant 0 : i32
    return %c0_i32, %c0_i32_0 : i32, i32
  }
  func.func @transform_3(%arg0: i32) -> (i32, i32) {
    %c0_i32 = arith.constant 0 : i32
    %c0_i32_0 = arith.constant 0 : i32
    %c0_i32_1 = arith.constant 0 : i32
    return %c0_i32, %c0_i32_0 : i32, i32
  }
  func.func @transform_4(%arg0: i32) -> (i32, i32) {
    %c0_i32 = arith.constant 0 : i32
    %c0_i32_0 = arith.constant 0 : i32
    %c0_i32_1 = arith.constant 0 : i32
    return %c0_i32, %c0_i32_0 : i32, i32
  }
  func.func @transform_5(%arg0: i32) -> (i32, i32) {
    %c0_i32 = arith.constant 0 : i32
    %c0_i32_0 = arith.constant 0 : i32
    %c0_i32_1 = arith.constant 0 : i32
    return %c0_i32, %c0_i32_0 : i32, i32
  }
  func.func @transform_6(%arg0: i32) -> (i32, i32) {
    %c0_i32 = arith.constant 0 : i32
    %c0_i32_0 = arith.constant 0 : i32
    %c0_i32_1 = arith.constant 0 : i32
    return %c0_i32, %c0_i32_0 : i32, i32
  }
  func.func @transform_7(%arg0: i32) -> (i32, i32) {
    %c0_i32 = arith.constant 0 : i32
    %c0_i32_0 = arith.constant 0 : i32
    %c0_i32_1 = arith.constant 0 : i32
    return %c0_i32, %c0_i32_0 : i32, i32
  }
  func.func @transform_8(%arg0: i32) -> (i32, i32) {
    %c0_i32 = arith.constant 0 : i32
    %c0_i32_0 = arith.constant 0 : i32
    %c0_i32_1 = arith.constant 0 : i32
    return %c0_i32, %c0_i32_0 : i32, i32
  }
  func.func @transform_9(%arg0: i32) -> (i32, i32) {
    %c0_i32 = arith.constant 0 : i32
    %c0_i32_0 = arith.constant 0 : i32
    %c0_i32_1 = arith.constant 0 : i32
    return %c0_i32, %c0_i32_0 : i32, i32
  }
  func.func @transform_10(%arg0: i32) -> (i32, i32) {
    %c0_i32 = arith.constant 0 : i32
    %c0_i32_0 = arith.constant 0 : i32
    %c0_i32_1 = arith.constant 0 : i32
    return %c0_i32, %c0_i32_0 : i32, i32
  }
  func.func @transform_11(%arg0: i32) -> (i32, i32) {
    %c0_i32 = arith.constant 0 : i32
    %c0_i32_0 = arith.constant 0 : i32
    %c0_i32_1 = arith.constant 0 : i32
    return %c0_i32, %c0_i32_0 : i32, i32
  }
  func.func @transform_12(%arg0: i32) -> (i32, i32) {
    %c0_i32 = arith.constant 0 : i32
    %c0_i32_0 = arith.constant 0 : i32
    %c0_i32_1 = arith.constant 0 : i32
    return %c0_i32, %c0_i32_0 : i32, i32
  }
  func.func @transform_13(%arg0: i32) -> (i32, i32) {
    %c0_i32 = arith.constant 0 : i32
    %c0_i32_0 = arith.constant 0 : i32
    %c0_i32_1 = arith.constant 0 : i32
    return %c0_i32, %c0_i32_0 : i32, i32
  }
  func.func @transform_14(%arg0: i32) -> (i32, i32) {
    %c0_i32 = arith.constant 0 : i32
    %c0_i32_0 = arith.constant 0 : i32
    %c0_i32_1 = arith.constant 0 : i32
    return %c0_i32, %c0_i32_0 : i32, i32
  }
  func.func @transform_15(%arg0: i32) -> (i32, i32) {
    %c0_i32 = arith.constant 0 : i32
    %c0_i32_0 = arith.constant 0 : i32
    %c0_i32_1 = arith.constant 0 : i32
    return %c0_i32, %c0_i32_0 : i32, i32
  }
  func.func @transform_16(%arg0: i32) -> (i32, i32) {
    %c0_i32 = arith.constant 0 : i32
    %c0_i32_0 = arith.constant 0 : i32
    %c0_i32_1 = arith.constant 0 : i32
    return %c0_i32, %c0_i32_0 : i32, i32
  }
  func.func @transform_17(%arg0: i32) -> (i32, i32) {
    %c0_i32 = arith.constant 0 : i32
    %c0_i32_0 = arith.constant 0 : i32
    %c0_i32_1 = arith.constant 0 : i32
    return %c0_i32, %c0_i32_0 : i32, i32
  }
  func.func @transform_18(%arg0: i32) -> (i32, i32) {
    %c0_i32 = arith.constant 0 : i32
    %c0_i32_0 = arith.constant 0 : i32
    %c0_i32_1 = arith.constant 0 : i32
    return %c0_i32, %c0_i32_0 : i32, i32
  }
  func.func @transform_19(%arg0: i32) -> (i32, i32) {
    %c0_i32 = arith.constant 0 : i32
    %c0_i32_0 = arith.constant 0 : i32
    %c0_i32_1 = arith.constant 0 : i32
    return %c0_i32, %c0_i32_0 : i32, i32
  }
  func.func @transform_20(%arg0: i32) -> (i32, i32) {
    %c0_i32 = arith.constant 0 : i32
    %c0_i32_0 = arith.constant 0 : i32
    return %arg0, %c0_i32 : i32, i32
  }
}

module attributes {stable_mosaic.version = 11 : i64} {
  func.func @residual_block_kernel(%arg0: i32, %arg1: memref<128x64xf32, #tpu.memory_space<vmem>>, %arg2: memref<128x32xf32, #tpu.memory_space<vmem>>, %arg3: memref<1x64xf32, #tpu.memory_space<vmem>>, %arg4: memref<1x64xf32, #tpu.memory_space<vmem>>, %arg5: memref<96x128xbf16, #tpu.memory_space<vmem>>, %arg6: memref<1x128xf32, #tpu.memory_space<vmem>>, %arg7: memref<1x128xf32, #tpu.memory_space<vmem>>, %arg8: memref<1x128xf32, #tpu.memory_space<vmem>>, %arg9: memref<128x128xbf16, #tpu.memory_space<vmem>>, %arg10: memref<1x128xf32, #tpu.memory_space<vmem>>, %arg11: memref<64x128xbf16, #tpu.memory_space<vmem>>, %arg12: memref<1x128xf32, #tpu.memory_space<vmem>>, %arg13: memref<1x128xf32, #tpu.memory_space<vmem>>, %arg14: memref<1x128xf32, #tpu.memory_space<vmem>>, %arg15: memref<128x384xbf16, #tpu.memory_space<vmem>>, %arg16: memref<1x384xf32, #tpu.memory_space<vmem>>, %arg17: memref<128x4xf32, #tpu.memory_space<vmem>>, %arg18: memref<4x128xf32, #tpu.memory_space<vmem>>, %arg19: memref<128x128xbf16, #tpu.memory_space<vmem>>, %arg20: memref<1x128xf32, #tpu.memory_space<vmem>>, %arg21: memref<128x128xf32, #tpu.memory_space<vmem>>) attributes {dimension_semantics = [#tpu.dimension_semantics<parallel>], iteration_bounds = array<i64: 2>, scalar_prefetch = 0 : i64, scratch_operands = 0 : i64, tpu.core_type = #tpu.core_type<tc>, window_params = [{transform_indices = @transform_0, window_bounds = array<i64: 128, 64>}, {transform_indices = @transform_1, window_bounds = array<i64: 128, 32>}, {pipeline_mode = #tpu.pipeline_mode<synchronous>, transform_indices = @transform_2, window_bounds = array<i64: 1, 64>}, {pipeline_mode = #tpu.pipeline_mode<synchronous>, transform_indices = @transform_3, window_bounds = array<i64: 1, 64>}, {pipeline_mode = #tpu.pipeline_mode<synchronous>, transform_indices = @transform_4, window_bounds = array<i64: 96, 128>}, {pipeline_mode = #tpu.pipeline_mode<synchronous>, transform_indices = @transform_5, window_bounds = array<i64: 1, 128>}, {pipeline_mode = #tpu.pipeline_mode<synchronous>, transform_indices = @transform_6, window_bounds = array<i64: 1, 128>}, {pipeline_mode = #tpu.pipeline_mode<synchronous>, transform_indices = @transform_7, window_bounds = array<i64: 1, 128>}, {pipeline_mode = #tpu.pipeline_mode<synchronous>, transform_indices = @transform_8, window_bounds = array<i64: 128, 128>}, {pipeline_mode = #tpu.pipeline_mode<synchronous>, transform_indices = @transform_9, window_bounds = array<i64: 1, 128>}, {pipeline_mode = #tpu.pipeline_mode<synchronous>, transform_indices = @transform_10, window_bounds = array<i64: 64, 128>}, {pipeline_mode = #tpu.pipeline_mode<synchronous>, transform_indices = @transform_11, window_bounds = array<i64: 1, 128>}, {pipeline_mode = #tpu.pipeline_mode<synchronous>, transform_indices = @transform_12, window_bounds = array<i64: 1, 128>}, {pipeline_mode = #tpu.pipeline_mode<synchronous>, transform_indices = @transform_13, window_bounds = array<i64: 1, 128>}, {pipeline_mode = #tpu.pipeline_mode<synchronous>, transform_indices = @transform_14, window_bounds = array<i64: 128, 384>}, {pipeline_mode = #tpu.pipeline_mode<synchronous>, transform_indices = @transform_15, window_bounds = array<i64: 1, 384>}, {pipeline_mode = #tpu.pipeline_mode<synchronous>, transform_indices = @transform_16, window_bounds = array<i64: 128, 4>}, {pipeline_mode = #tpu.pipeline_mode<synchronous>, transform_indices = @transform_17, window_bounds = array<i64: 4, 128>}, {pipeline_mode = #tpu.pipeline_mode<synchronous>, transform_indices = @transform_18, window_bounds = array<i64: 128, 128>}, {pipeline_mode = #tpu.pipeline_mode<synchronous>, transform_indices = @transform_19, window_bounds = array<i64: 1, 128>}, {transform_indices = @transform_20, window_bounds = array<i64: 128, 128>}]} {
    %c0 = arith.constant 0 : index
    %c0_0 = arith.constant 0 : index
    %0 = vector.load %arg1[%c0, %c0_0] : memref<128x64xf32, #tpu.memory_space<vmem>>, vector<128x64xf32>
    %c0_1 = arith.constant 0 : index
    %c0_2 = arith.constant 0 : index
    %1 = vector.load %arg2[%c0_1, %c0_2] : memref<128x32xf32, #tpu.memory_space<vmem>>, vector<128x32xf32>
    %2 = arith.truncf %0 : vector<128x64xf32> to vector<128x64xbf16>
    %c0_3 = arith.constant 0 : index
    %c0_4 = arith.constant 0 : index
    %3 = vector.load %arg11[%c0_3, %c0_4] : memref<64x128xbf16, #tpu.memory_space<vmem>>, vector<64x128xbf16>
    %cst = arith.constant dense<0.000000e+00> : vector<128x128xf32>
    %4 = tpu.matmul %2, %3, %cst {dimension_numbers = #tpu.dot_dimension_numbers<[1], [0], [0], [1], [0, 0, 1, 1], [], []>} : vector<128x64xbf16>, vector<64x128xbf16>, vector<128x128xf32> -> vector<128x128xf32>
    %c0_5 = arith.constant 0 : index
    %c0_6 = arith.constant 0 : index
    %5 = vector.load %arg12[%c0_5, %c0_6] : memref<1x128xf32, #tpu.memory_space<vmem>>, vector<1x128xf32>
    %6 = vector.broadcast %5 : vector<1x128xf32> to vector<128x128xf32>
    %7 = arith.addf %4, %6 : vector<128x128xf32>
    %c0_7 = arith.constant 0 : index
    %c0_8 = arith.constant 0 : index
    %8 = vector.load %arg3[%c0_7, %c0_8] : memref<1x64xf32, #tpu.memory_space<vmem>>, vector<1x64xf32>
    %c0_9 = arith.constant 0 : index
    %c0_10 = arith.constant 0 : index
    %9 = vector.load %arg4[%c0_9, %c0_10] : memref<1x64xf32, #tpu.memory_space<vmem>>, vector<1x64xf32>
    %cst_11 = arith.constant dense<0.000000e+00> : vector<128xf32>
    %10 = vector.multi_reduction <add>, %0, %cst_11 [1] : vector<128x64xf32> to vector<128xf32>
    %11 = vector.shape_cast %10 : vector<128xf32> to vector<128x1xf32>
    %cst_12 = arith.constant 6.400000e+01 : f32
    %12 = vector.broadcast %cst_12 : f32 to vector<128x1xf32>
    %13 = arith.divf %11, %12 : vector<128x1xf32>
    %14 = vector.broadcast %13 : vector<128x1xf32> to vector<128x64xf32>
    %15 = arith.subf %0, %14 : vector<128x64xf32>
    %16 = arith.mulf %15, %15 : vector<128x64xf32>
    %cst_13 = arith.constant dense<0.000000e+00> : vector<128xf32>
    %17 = vector.multi_reduction <add>, %16, %cst_13 [1] : vector<128x64xf32> to vector<128xf32>
    %18 = vector.shape_cast %17 : vector<128xf32> to vector<128x1xf32>
    %cst_14 = arith.constant 6.400000e+01 : f32
    %19 = vector.broadcast %cst_14 : f32 to vector<128x1xf32>
    %20 = arith.divf %18, %19 : vector<128x1xf32>
    %21 = vector.broadcast %13 : vector<128x1xf32> to vector<128x64xf32>
    %22 = arith.subf %0, %21 : vector<128x64xf32>
    %cst_15 = arith.constant 9.99999974E-6 : f32
    %23 = vector.broadcast %cst_15 : f32 to vector<128x1xf32>
    %24 = arith.addf %20, %23 : vector<128x1xf32>
    %25 = math.rsqrt %24 : vector<128x1xf32>
    %26 = vector.broadcast %25 : vector<128x1xf32> to vector<128x64xf32>
    %27 = arith.mulf %22, %26 : vector<128x64xf32>
    %28 = vector.broadcast %8 : vector<1x64xf32> to vector<128x64xf32>
    %29 = arith.mulf %27, %28 : vector<128x64xf32>
    %30 = vector.broadcast %9 : vector<1x64xf32> to vector<128x64xf32>
    %31 = arith.addf %29, %30 : vector<128x64xf32>
    %32 = arith.negf %31 : vector<128x64xf32>
    %33 = math.exp %32 : vector<128x64xf32>
    %cst_16 = arith.constant 1.000000e+00 : f32
    %34 = vector.broadcast %cst_16 : f32 to vector<128x64xf32>
    %35 = arith.addf %34, %33 : vector<128x64xf32>
    %36 = arith.divf %34, %35 : vector<128x64xf32>
    %37 = arith.mulf %31, %36 : vector<128x64xf32>
    %38 = arith.negf %1 : vector<128x32xf32>
    %39 = math.exp %38 : vector<128x32xf32>
    %cst_17 = arith.constant 1.000000e+00 : f32
    %40 = vector.broadcast %cst_17 : f32 to vector<128x32xf32>
    %41 = arith.addf %40, %39 : vector<128x32xf32>
    %42 = arith.divf %40, %41 : vector<128x32xf32>
    %43 = arith.mulf %1, %42 : vector<128x32xf32>
    %44 = tpu.concatenate %37, %43 in 1 : vector<128x64xf32>, vector<128x32xf32> -> vector<128x96xf32>
    %45 = arith.truncf %44 : vector<128x96xf32> to vector<128x96xbf16>
    %c0_18 = arith.constant 0 : index
    %c0_19 = arith.constant 0 : index
    %46 = vector.load %arg5[%c0_18, %c0_19] : memref<96x128xbf16, #tpu.memory_space<vmem>>, vector<96x128xbf16>
    %cst_20 = arith.constant dense<0.000000e+00> : vector<128x128xf32>
    %47 = tpu.matmul %45, %46, %cst_20 {dimension_numbers = #tpu.dot_dimension_numbers<[1], [0], [0], [1], [0, 0, 1, 1], [], []>} : vector<128x96xbf16>, vector<96x128xbf16>, vector<128x128xf32> -> vector<128x128xf32>
    %c0_21 = arith.constant 0 : index
    %c0_22 = arith.constant 0 : index
    %48 = vector.load %arg6[%c0_21, %c0_22] : memref<1x128xf32, #tpu.memory_space<vmem>>, vector<1x128xf32>
    %49 = vector.broadcast %48 : vector<1x128xf32> to vector<128x128xf32>
    %50 = arith.addf %47, %49 : vector<128x128xf32>
    %c0_23 = arith.constant 0 : index
    %c0_24 = arith.constant 0 : index
    %51 = vector.load %arg7[%c0_23, %c0_24] : memref<1x128xf32, #tpu.memory_space<vmem>>, vector<1x128xf32>
    %c0_25 = arith.constant 0 : index
    %c0_26 = arith.constant 0 : index
    %52 = vector.load %arg8[%c0_25, %c0_26] : memref<1x128xf32, #tpu.memory_space<vmem>>, vector<1x128xf32>
    %cst_27 = arith.constant dense<0.000000e+00> : vector<128xf32>
    %53 = vector.multi_reduction <add>, %50, %cst_27 [1] : vector<128x128xf32> to vector<128xf32>
    %54 = vector.shape_cast %53 : vector<128xf32> to vector<128x1xf32>
    %cst_28 = arith.constant 1.280000e+02 : f32
    %55 = vector.broadcast %cst_28 : f32 to vector<128x1xf32>
    %56 = arith.divf %54, %55 : vector<128x1xf32>
    %57 = vector.broadcast %56 : vector<128x1xf32> to vector<128x128xf32>
    %58 = arith.subf %50, %57 : vector<128x128xf32>
    %59 = arith.mulf %58, %58 : vector<128x128xf32>
    %cst_29 = arith.constant dense<0.000000e+00> : vector<128xf32>
    %60 = vector.multi_reduction <add>, %59, %cst_29 [1] : vector<128x128xf32> to vector<128xf32>
    %61 = vector.shape_cast %60 : vector<128xf32> to vector<128x1xf32>
    %cst_30 = arith.constant 1.280000e+02 : f32
    %62 = vector.broadcast %cst_30 : f32 to vector<128x1xf32>
    %63 = arith.divf %61, %62 : vector<128x1xf32>
    %64 = vector.broadcast %56 : vector<128x1xf32> to vector<128x128xf32>
    %65 = arith.subf %50, %64 : vector<128x128xf32>
    %cst_31 = arith.constant 9.99999974E-6 : f32
    %66 = vector.broadcast %cst_31 : f32 to vector<128x1xf32>
    %67 = arith.addf %63, %66 : vector<128x1xf32>
    %68 = math.rsqrt %67 : vector<128x1xf32>
    %69 = vector.broadcast %68 : vector<128x1xf32> to vector<128x128xf32>
    %70 = arith.mulf %65, %69 : vector<128x128xf32>
    %71 = vector.broadcast %51 : vector<1x128xf32> to vector<128x128xf32>
    %72 = arith.mulf %70, %71 : vector<128x128xf32>
    %73 = vector.broadcast %52 : vector<1x128xf32> to vector<128x128xf32>
    %74 = arith.addf %72, %73 : vector<128x128xf32>
    %75 = arith.negf %74 : vector<128x128xf32>
    %76 = math.exp %75 : vector<128x128xf32>
    %cst_32 = arith.constant 1.000000e+00 : f32
    %77 = vector.broadcast %cst_32 : f32 to vector<128x128xf32>
    %78 = arith.addf %77, %76 : vector<128x128xf32>
    %79 = arith.divf %77, %78 : vector<128x128xf32>
    %80 = arith.mulf %74, %79 : vector<128x128xf32>
    %81 = arith.truncf %80 : vector<128x128xf32> to vector<128x128xbf16>
    %c0_33 = arith.constant 0 : index
    %c0_34 = arith.constant 0 : index
    %82 = vector.load %arg9[%c0_33, %c0_34] : memref<128x128xbf16, #tpu.memory_space<vmem>>, vector<128x128xbf16>
    %cst_35 = arith.constant dense<0.000000e+00> : vector<128x128xf32>
    %83 = tpu.matmul %81, %82, %cst_35 {dimension_numbers = #tpu.dot_dimension_numbers<[1], [0], [0], [1], [0, 0, 1, 1], [], []>} : vector<128x128xbf16>, vector<128x128xbf16>, vector<128x128xf32> -> vector<128x128xf32>
    %c0_36 = arith.constant 0 : index
    %c0_37 = arith.constant 0 : index
    %84 = vector.load %arg10[%c0_36, %c0_37] : memref<1x128xf32, #tpu.memory_space<vmem>>, vector<1x128xf32>
    %85 = vector.broadcast %84 : vector<1x128xf32> to vector<128x128xf32>
    %86 = arith.addf %83, %85 : vector<128x128xf32>
    %c0_38 = arith.constant 0 : index
    %c0_39 = arith.constant 0 : index
    %87 = vector.load %arg13[%c0_38, %c0_39] : memref<1x128xf32, #tpu.memory_space<vmem>>, vector<1x128xf32>
    %c0_40 = arith.constant 0 : index
    %c0_41 = arith.constant 0 : index
    %88 = vector.load %arg14[%c0_40, %c0_41] : memref<1x128xf32, #tpu.memory_space<vmem>>, vector<1x128xf32>
    %cst_42 = arith.constant dense<0.000000e+00> : vector<128xf32>
    %89 = vector.multi_reduction <add>, %86, %cst_42 [1] : vector<128x128xf32> to vector<128xf32>
    %90 = vector.shape_cast %89 : vector<128xf32> to vector<128x1xf32>
    %cst_43 = arith.constant 1.280000e+02 : f32
    %91 = vector.broadcast %cst_43 : f32 to vector<128x1xf32>
    %92 = arith.divf %90, %91 : vector<128x1xf32>
    %93 = vector.broadcast %92 : vector<128x1xf32> to vector<128x128xf32>
    %94 = arith.subf %86, %93 : vector<128x128xf32>
    %95 = arith.mulf %94, %94 : vector<128x128xf32>
    %cst_44 = arith.constant dense<0.000000e+00> : vector<128xf32>
    %96 = vector.multi_reduction <add>, %95, %cst_44 [1] : vector<128x128xf32> to vector<128xf32>
    %97 = vector.shape_cast %96 : vector<128xf32> to vector<128x1xf32>
    %cst_45 = arith.constant 1.280000e+02 : f32
    %98 = vector.broadcast %cst_45 : f32 to vector<128x1xf32>
    %99 = arith.divf %97, %98 : vector<128x1xf32>
    %100 = vector.broadcast %92 : vector<128x1xf32> to vector<128x128xf32>
    %101 = arith.subf %86, %100 : vector<128x128xf32>
    %cst_46 = arith.constant 9.99999974E-6 : f32
    %102 = vector.broadcast %cst_46 : f32 to vector<128x1xf32>
    %103 = arith.addf %99, %102 : vector<128x1xf32>
    %104 = math.rsqrt %103 : vector<128x1xf32>
    %105 = vector.broadcast %104 : vector<128x1xf32> to vector<128x128xf32>
    %106 = arith.mulf %101, %105 : vector<128x128xf32>
    %107 = vector.broadcast %87 : vector<1x128xf32> to vector<128x128xf32>
    %108 = arith.mulf %106, %107 : vector<128x128xf32>
    %109 = vector.broadcast %88 : vector<1x128xf32> to vector<128x128xf32>
    %110 = arith.addf %108, %109 : vector<128x128xf32>
    %111 = arith.truncf %110 : vector<128x128xf32> to vector<128x128xbf16>
    %c0_47 = arith.constant 0 : index
    %c0_48 = arith.constant 0 : index
    %112 = vector.load %arg15[%c0_47, %c0_48] : memref<128x384xbf16, #tpu.memory_space<vmem>>, vector<128x384xbf16>
    %cst_49 = arith.constant dense<0.000000e+00> : vector<128x384xf32>
    %113 = tpu.matmul %111, %112, %cst_49 {dimension_numbers = #tpu.dot_dimension_numbers<[1], [0], [0], [1], [0, 0, 1, 1], [], []>} : vector<128x128xbf16>, vector<128x384xbf16>, vector<128x384xf32> -> vector<128x384xf32>
    %c0_50 = arith.constant 0 : index
    %c0_51 = arith.constant 0 : index
    %114 = vector.load %arg16[%c0_50, %c0_51] : memref<1x384xf32, #tpu.memory_space<vmem>>, vector<1x384xf32>
    %115 = vector.broadcast %114 : vector<1x384xf32> to vector<128x384xf32>
    %116 = arith.addf %113, %115 : vector<128x384xf32>
    %117 = vector.extract_strided_slice %116 {offsets = [0, 0], sizes = [128, 128], strides = [1, 1]} : vector<128x384xf32> to vector<128x128xf32>
    %118 = vector.extract_strided_slice %116 {offsets = [0, 128], sizes = [128, 128], strides = [1, 1]} : vector<128x384xf32> to vector<128x128xf32>
    %119 = vector.extract_strided_slice %116 {offsets = [0, 256], sizes = [128, 128], strides = [1, 1]} : vector<128x384xf32> to vector<128x128xf32>
    %120 = arith.mulf %117, %118 : vector<128x128xf32>
    %c0_52 = arith.constant 0 : index
    %c0_53 = arith.constant 0 : index
    %121 = vector.load %arg17[%c0_52, %c0_53] : memref<128x4xf32, #tpu.memory_space<vmem>>, vector<128x4xf32>
    %cst_54 = arith.constant dense<0.000000e+00> : vector<128x4xf32>
    %122 = tpu.matmul %120, %121, %cst_54 {dimension_numbers = #tpu.dot_dimension_numbers<[1], [0], [0], [1], [0, 0, 1, 1], [], []>} : vector<128x128xf32>, vector<128x4xf32>, vector<128x4xf32> -> vector<128x4xf32>
    %cst_55 = arith.constant dense<0xFF800000> : vector<128xf32>
    %123 = vector.multi_reduction <maximumf>, %122, %cst_55 [1] : vector<128x4xf32> to vector<128xf32>
    %124 = vector.shape_cast %123 : vector<128xf32> to vector<128x1xf32>
    %125 = vector.broadcast %124 : vector<128x1xf32> to vector<128x4xf32>
    %126 = arith.subf %122, %125 : vector<128x4xf32>
    %127 = math.exp %126 : vector<128x4xf32>
    %cst_56 = arith.constant dense<0.000000e+00> : vector<128xf32>
    %128 = vector.multi_reduction <add>, %127, %cst_56 [1] : vector<128x4xf32> to vector<128xf32>
    %129 = vector.shape_cast %128 : vector<128xf32> to vector<128x1xf32>
    %130 = vector.broadcast %129 : vector<128x1xf32> to vector<128x4xf32>
    %131 = arith.divf %127, %130 : vector<128x4xf32>
    %c0_57 = arith.constant 0 : index
    %c0_58 = arith.constant 0 : index
    %132 = vector.load %arg18[%c0_57, %c0_58] : memref<4x128xf32, #tpu.memory_space<vmem>>, vector<4x128xf32>
    %cst_59 = arith.constant dense<0.000000e+00> : vector<128x128xf32>
    %133 = tpu.matmul %131, %132, %cst_59 {dimension_numbers = #tpu.dot_dimension_numbers<[1], [0], [0], [1], [0, 0, 1, 1], [], []>} : vector<128x4xf32>, vector<4x128xf32>, vector<128x128xf32> -> vector<128x128xf32>
    %134 = arith.mulf %133, %119 : vector<128x128xf32>
    %135 = arith.truncf %134 : vector<128x128xf32> to vector<128x128xbf16>
    %c0_60 = arith.constant 0 : index
    %c0_61 = arith.constant 0 : index
    %136 = vector.load %arg19[%c0_60, %c0_61] : memref<128x128xbf16, #tpu.memory_space<vmem>>, vector<128x128xbf16>
    %cst_62 = arith.constant dense<0.000000e+00> : vector<128x128xf32>
    %137 = tpu.matmul %135, %136, %cst_62 {dimension_numbers = #tpu.dot_dimension_numbers<[1], [0], [0], [1], [0, 0, 1, 1], [], []>} : vector<128x128xbf16>, vector<128x128xbf16>, vector<128x128xf32> -> vector<128x128xf32>
    %c0_63 = arith.constant 0 : index
    %c0_64 = arith.constant 0 : index
    %138 = vector.load %arg20[%c0_63, %c0_64] : memref<1x128xf32, #tpu.memory_space<vmem>>, vector<1x128xf32>
    %139 = vector.broadcast %138 : vector<1x128xf32> to vector<128x128xf32>
    %140 = arith.addf %137, %139 : vector<128x128xf32>
    %141 = arith.addf %86, %140 : vector<128x128xf32>
    %142 = arith.addf %141, %7 : vector<128x128xf32>
    %c0_65 = arith.constant 0 : index
    %c0_66 = arith.constant 0 : index
    %143 = vector.load %arg21[%c0_65, %c0_66] : memref<128x128xf32, #tpu.memory_space<vmem>>, vector<128x128xf32>
    tpu.vector_store %arg21[%c0_65, %c0_66], %142 {strides = array<i32>} : memref<128x128xf32, #tpu.memory_space<vmem>>, vector<128x128xf32>,
    return
  }
  func.func @transform_0(%arg0: i32) -> (i32, i32) {
    %c0_i32 = arith.constant 0 : i32
    %c0_i32_0 = arith.constant 0 : i32
    return %arg0, %c0_i32 : i32, i32
  }
  func.func @transform_1(%arg0: i32) -> (i32, i32) {
    %c0_i32 = arith.constant 0 : i32
    %c0_i32_0 = arith.constant 0 : i32
    return %arg0, %c0_i32 : i32, i32
  }
  func.func @transform_2(%arg0: i32) -> (i32, i32) {
    %c0_i32 = arith.constant 0 : i32
    %c0_i32_0 = arith.constant 0 : i32
    %c0_i32_1 = arith.constant 0 : i32
    return %c0_i32, %c0_i32_0 : i32, i32
  }
  func.func @transform_3(%arg0: i32) -> (i32, i32) {
    %c0_i32 = arith.constant 0 : i32
    %c0_i32_0 = arith.constant 0 : i32
    %c0_i32_1 = arith.constant 0 : i32
    return %c0_i32, %c0_i32_0 : i32, i32
  }
  func.func @transform_4(%arg0: i32) -> (i32, i32) {
    %c0_i32 = arith.constant 0 : i32
    %c0_i32_0 = arith.constant 0 : i32
    %c0_i32_1 = arith.constant 0 : i32
    return %c0_i32, %c0_i32_0 : i32, i32
  }
  func.func @transform_5(%arg0: i32) -> (i32, i32) {
    %c0_i32 = arith.constant 0 : i32
    %c0_i32_0 = arith.constant 0 : i32
    %c0_i32_1 = arith.constant 0 : i32
    return %c0_i32, %c0_i32_0 : i32, i32
  }
  func.func @transform_6(%arg0: i32) -> (i32, i32) {
    %c0_i32 = arith.constant 0 : i32
    %c0_i32_0 = arith.constant 0 : i32
    %c0_i32_1 = arith.constant 0 : i32
    return %c0_i32, %c0_i32_0 : i32, i32
  }
  func.func @transform_7(%arg0: i32) -> (i32, i32) {
    %c0_i32 = arith.constant 0 : i32
    %c0_i32_0 = arith.constant 0 : i32
    %c0_i32_1 = arith.constant 0 : i32
    return %c0_i32, %c0_i32_0 : i32, i32
  }
  func.func @transform_8(%arg0: i32) -> (i32, i32) {
    %c0_i32 = arith.constant 0 : i32
    %c0_i32_0 = arith.constant 0 : i32
    %c0_i32_1 = arith.constant 0 : i32
    return %c0_i32, %c0_i32_0 : i32, i32
  }
  func.func @transform_9(%arg0: i32) -> (i32, i32) {
    %c0_i32 = arith.constant 0 : i32
    %c0_i32_0 = arith.constant 0 : i32
    %c0_i32_1 = arith.constant 0 : i32
    return %c0_i32, %c0_i32_0 : i32, i32
  }
  func.func @transform_10(%arg0: i32) -> (i32, i32) {
    %c0_i32 = arith.constant 0 : i32
    %c0_i32_0 = arith.constant 0 : i32
    %c0_i32_1 = arith.constant 0 : i32
    return %c0_i32, %c0_i32_0 : i32, i32
  }
  func.func @transform_11(%arg0: i32) -> (i32, i32) {
    %c0_i32 = arith.constant 0 : i32
    %c0_i32_0 = arith.constant 0 : i32
    %c0_i32_1 = arith.constant 0 : i32
    return %c0_i32, %c0_i32_0 : i32, i32
  }
  func.func @transform_12(%arg0: i32) -> (i32, i32) {
    %c0_i32 = arith.constant 0 : i32
    %c0_i32_0 = arith.constant 0 : i32
    %c0_i32_1 = arith.constant 0 : i32
    return %c0_i32, %c0_i32_0 : i32, i32
  }
  func.func @transform_13(%arg0: i32) -> (i32, i32) {
    %c0_i32 = arith.constant 0 : i32
    %c0_i32_0 = arith.constant 0 : i32
    %c0_i32_1 = arith.constant 0 : i32
    return %c0_i32, %c0_i32_0 : i32, i32
  }
  func.func @transform_14(%arg0: i32) -> (i32, i32) {
    %c0_i32 = arith.constant 0 : i32
    %c0_i32_0 = arith.constant 0 : i32
    %c0_i32_1 = arith.constant 0 : i32
    return %c0_i32, %c0_i32_0 : i32, i32
  }
  func.func @transform_15(%arg0: i32) -> (i32, i32) {
    %c0_i32 = arith.constant 0 : i32
    %c0_i32_0 = arith.constant 0 : i32
    %c0_i32_1 = arith.constant 0 : i32
    return %c0_i32, %c0_i32_0 : i32, i32
  }
  func.func @transform_16(%arg0: i32) -> (i32, i32) {
    %c0_i32 = arith.constant 0 : i32
    %c0_i32_0 = arith.constant 0 : i32
    %c0_i32_1 = arith.constant 0 : i32
    return %c0_i32, %c0_i32_0 : i32, i32
  }
  func.func @transform_17(%arg0: i32) -> (i32, i32) {
    %c0_i32 = arith.constant 0 : i32
    %c0_i32_0 = arith.constant 0 : i32
    %c0_i32_1 = arith.constant 0 : i32
    return %c0_i32, %c0_i32_0 : i32, i32
  }
  func.func @transform_18(%arg0: i32) -> (i32, i32) {
    %c0_i32 = arith.constant 0 : i32
    %c0_i32_0 = arith.constant 0 : i32
    %c0_i32_1 = arith.constant 0 : i32
    return %c0_i32, %c0_i32_0 : i32, i32
  }
  func.func @transform_19(%arg0: i32) -> (i32, i32) {
    %c0_i32 = arith.constant 0 : i32
    %c0_i32_0 = arith.constant 0 : i32
    %c0_i32_1 = arith.constant 0 : i32
    return %c0_i32, %c0_i32_0 : i32, i32
  }
  func.func @transform_20(%arg0: i32) -> (i32, i32) {
    %c0_i32 = arith.constant 0 : i32
    %c0_i32_0 = arith.constant 0 : i32
    return %arg0, %c0_i32 : i32, i32
  }
}

</mosaic_0001>

<bundles_post_ra>
// kernel: tpu_custom_call.1
= control target key start
LH: loop header
LB: loop body
LE: loop exit
PB: predicated region body
PF: predicated region fallthrough
CT: control target
= control target key end

     0   :  { %s6373_s0 = inlined_call_operand.vmem [shape: f32[256,64], index: 0, kind: input, shape index: {}]   ;;  %s6374_s1 = inlined_call_operand.vmem [shape: f32[256,32], index: 1, kind: input, shape index: {}]   ;;  %s6375_s2 = inlined_call_operand.vmem [shape: f32[1,64], index: 2, kind: input, shape index: {}]   ;;  %s6376_s3 = inlined_call_operand.vmem [shape: f32[1,64], index: 3, kind: input, shape index: {}]   ;;  %s6377_s4 = inlined_call_operand.vmem [shape: bf16[96,128], index: 4, kind: input, shape index: {}]   ;;  %s6378_s5 = inlined_call_operand.vmem [shape: f32[1,128], index: 5, kind: input, shape index: {}]   ;;  %s6379_s6 = inlined_call_operand.vmem [shape: f32[1,128], index: 6, kind: input, shape index: {}]   ;;  %s6380_s7 = inlined_call_operand.vmem [shape: f32[1,128], index: 7, kind: input, shape index: {}]   ;;  %s6381_s8 = inlined_call_operand.vmem [shape: bf16[128,128], index: 8, kind: input, shape index: {}]   ;;  %s6382_s9 = inlined_call_operand.vmem [shape: f32[1,128], index: 9, kind: input, shape index: {}]   ;;  %s6383_s10 = inlined_call_operand.vmem [shape: bf16[64,128], index: 10, kind: input, shape index: {}]   ;;  %s6384_s11 = inlined_call_operand.vmem [shape: f32[1,128], index: 11, kind: input, shape index: {}]   ;;  %s6385_s12 = inlined_call_operand.vmem [shape: f32[1,128], index: 12, kind: input, shape index: {}]   ;;  %s6386_s13 = inlined_call_operand.vmem [shape: f32[1,128], index: 13, kind: input, shape index: {}]   ;;  %s6387_s14 = inlined_call_operand.vmem [shape: bf16[128,384], index: 14, kind: input, shape index: {}]   ;;  %s6388_s15 = inlined_call_operand.vmem [shape: f32[1,384], index: 15, kind: input, shape index: {}]   ;;  %s6389_s16 = inlined_call_operand.vmem [shape: f32[128,4], index: 16, kind: input, shape index: {}]   ;;  %s6390_s17 = inlined_call_operand.vmem [shape: f32[4,128], index: 17, kind: input, shape index: {}]   ;;  %s6391_s18 = inlined_call_operand.vmem [shape: bf16[128,128], index: 18, kind: input, shape index: {}]   ;;  %s6392_s19 = inlined_call_operand.vmem [shape: f32[1,128], index: 19, kind: input, shape index: {}]   ;;  %s6393_s20 = inlined_call_operand.hbm [shape: f32[256,128], index: 20, kind: output, shape index: {}]  }
   0x1   :  { %6400 = sst [smem:[#allocation12_spill]] %s6373_s0 }
   0x2   :  { %6401 = sst [smem:[#allocation13_spill]] %s6374_s1 }
   0x3   :  { %6402 = sst [smem:[#allocation14_spill]] %s6375_s2 }
   0x4   :  { %6403 = sst [smem:[#allocation15_spill]] %s6376_s3 }
   0x5   :  { %6404 = sst [smem:[#allocation16_spill]] %s6377_s4 }
   0x6   :  { %6405 = sst [smem:[#allocation17_spill]] %s6378_s5 }
   0x7   :  { %6406 = sst [smem:[#allocation18_spill]] %s6379_s6 }
   0x8   :  { %6407 = sst [smem:[#allocation19_spill]] %s6380_s7 }
   0x9   :  { %25 = vsyncpa [#allocation3], 0 }
   0xa   :  { %27 = vsyncpa [#allocation3 + $0x1], 0  ;;  %s4911_s1 = smov 0   ;;  %s4913_s22 = smov 0  }
   0xb   :  { %s4915_s23 = smov 0   ;;  %s4917_s24 = smov 0  }
   0xc LB: > { %6408 = sst [smem:[#allocation5_spill]] %s4795_s23  ;;  %s4932_s2 = sadd.s32 4294967295, %s4799_s24   ;;  %s4799_s24 = sphi %s4917_s24, %s6434_s24   ;;  %s4795_s23 = sphi %s4915_s23, %s6431_s23   ;;  %s4791_s22 = sphi %s4913_s22, %s6433_s22   ;;  %s4787_s1 = sphi %s4911_s1, %s6432_s1  }
   0xd   : > { %s3607_s25 = sadd.s32 4294967294, %s4799_s24   ;;  %s4936_s3 = sadd.s32 1, %s4799_s24  }
   0xe   : > { %s470_s26 = sadd.s32 1, %s4795_s23  ;;  %s467_s27 = ssub.s32 %s4799_s24, %s4936_s3 }
   0xf   : > { %p480_p0 = scmp.ne.s32.totalorder %s4795_s23, %s4791_s22  ;;  %p468_p1 = scmp.eq.s32.totalorder %s467_s27, 0 }
  0x10   : > { %p481_p2 = scmp.eq.s32.totalorder %s4932_s2, 1  ;;  %p486_p3 = scmp.ne.s32.totalorder %s4791_s22, %s4787_s1 }
  0x11   : > { %p487_p4 = scmp.eq.s32.totalorder %s3607_s25, 1  ;;  %p3610_p7 = scmp.ge.s32.totalorder %s4799_s24, 1 }
  0x12   : > { %s4947_s28 = scalar_select %p468_p1, %s4795_s23, %s470_s26  }
  0x13   : > { %p4949_p5 = por %p481_p2, %p480_p0  ;;  %p4953_p6 = por %p487_p4, %p486_p3 }
  0x14   : > { %6409 = sst [smem:[#allocation6_spill]] %s4947_s28  ;;  %p577_p8 = scmp.lt.s32.totalorder %s4799_s24, 3 }
  0x16   : > { %p578_p9 = pnand %p3610_p7, %p577_p8 }
  0x18   : > { %581 = sbr.rel (%p578_p9) target bundleno = 2764 (0xacc), region = 100 }
  0x1f   : > { %s3612_s30 = sshll.u32 %s4932_s2, 4  ;;  %vm733_vm0 = vcmask 523264   ;;  %s6412_s26 = sld [smem:[#allocation12_spill]]  ;;  %vm1477_vm1 = vcmask 785408   ;;  %vm2904_vm2 = vcmask 31744   ;;  %vm3130_vm3 = vcmask 1043456  }
  0x20   : > { %p641_p10 = scmp.lt.s32.totalorder %s3612_s30, 31  ;;  %s6414_s25 = sld [smem:[#allocation16_spill]] }
  0x21   : > { %s6417_s5 = sld [smem:[#allocation17_spill]]  ;;  %s6418_s6 = sld [smem:[#allocation18_spill]] }
  0x22   : > { %s6436_s30 = smov (!%p641_p10, %s3612_s30), 31  ;;  %s6419_s7 = sld [smem:[#allocation19_spill]] }
  0x23   : > { %s3613_s0 = sshll.u32 %s6436_s30, 3  ;;  %s4801_s30 = smov 64  }
  0x24   : > { %s637_s21 = sand.u32 1, %s4791_s22  }
  0x25   : > { %s4968_s27 = scalar_lea.vmem %s6412_s26, %s3613_s0  ;;  %s6413_s26 = sld [smem:[#allocation13_spill]] }
  0x26   : > { %v654_v0 = vld [vmem:[%s4968_s27] sm:$0xff]  ;;  %v656_v1 = vld [vmem:[%s4968_s27 + $0x10] sm:$0xff]  ;;  %v655_v2 = vld [vmem:[%s4968_s27 + $0x8] sm:$0xff] }
  0x27   : > { %v857_v3 = vsel %vm733_vm0, %v654_v0, 0.0  ;;  %v863_v4 = vsel %vm733_vm0, %v656_v1, 0.0  ;;  %v657_v5 = vld [vmem:[%s4968_s27 + $0x18] sm:$0xff]  ;;  %v4977_v6 = vld [vmem:[%s4968_s27 + $0x20] sm:$0xff]  ;;  %v860_v7 = vsel %vm733_vm0, %v655_v2, 0.0  ;;  %v4982_v9 = vld [vmem:[%s4968_s27 + $0x28] sm:$0xff] }
  0x28   : > { %858 = vadd.xlane.f32.xlu0 %v857_v3  ;;  %864 = vadd.xlane.f32.xlu1 %v863_v4  ;;  %v866_v8 = vsel %vm733_vm0, %v657_v5, 0.0  ;;  %v4985_v10 = vld [vmem:[%s4968_s27 + $0x30] sm:$0xff]  ;;  %v4988_v11 = vld [vmem:[%s4968_s27 + $0x38] sm:$0xff]  ;;  %v869_v12 = vsel %vm733_vm0, %v4977_v6, 0.0  ;;  %v872_v13 = vsel %vm733_vm0, %v4982_v9, 0.0  ;;  %v4999_v16 = vld [vmem:[%s4968_s27 + $0x40] sm:$0xff] }
  0x29   : > { %v875_v14 = vsel %vm733_vm0, %v4985_v10, 0.0  ;;  %v878_v15 = vsel %vm733_vm0, %v4988_v11, 0.0  ;;  %v5002_v17 = vld [vmem:[%s4968_s27 + $0x48] sm:$0xff]  ;;  %v5005_v18 = vld [vmem:[%s4968_s27 + $0x50] sm:$0xff]  ;;  %v5008_v19 = vld [vmem:[%s4968_s27 + $0x58] sm:$0xff]  ;;  %v881_v20 = vsel %vm733_vm0, %v4999_v16, 0.0 }
  0x2a   : > { %v5013_v21 = vld [vmem:[%s4968_s27 + $0x60] sm:$0xff]  ;;  %v884_v22 = vsel %vm733_vm0, %v5002_v17, 0.0  ;;  %v5018_v23 = vld [vmem:[%s4968_s27 + $0x68] sm:$0xff]  ;;  %v887_v24 = vsel %vm733_vm0, %v5005_v18, 0.0  ;;  %v890_v25 = vsel %vm733_vm0, %v5008_v19, 0.0  ;;  %v5029_v28 = vld [vmem:[%s4968_s27 + $0x70] sm:$0xff] }
  0x2b   : > { %v893_v26 = vsel %vm733_vm0, %v5013_v21, 0.0  ;;  %v896_v27 = vsel %vm733_vm0, %v5018_v23, 0.0  ;;  %v5032_v29 = vld [vmem:[%s4968_s27 + $0x78] sm:$0xff]  ;;  %v899_v30 = vsel %vm733_vm0, %v5029_v28, 0.0  ;;  %s5043_s28 = scalar_lea.vmem %s6413_s26, %s3613_s0  ;;  %s6415_s0 = sld [smem:[#allocation14_spill]] }
  0x2c   : > { %861 = vadd.xlane.f32.xlu0 %v860_v7  ;;  %867 = vadd.xlane.f32.xlu1 %v866_v8  ;;  %v902_v31 = vsel %vm733_vm0, %v5032_v29, 0.0  ;;  %v5054_v44 = vld [vmem:[%s5043_s28 + $0x10] sm:$0xff]  ;;  %v5062_v48 = vld [vmem:[%s5043_s28 + $0x18] sm:$0xff]  ;;  %v5071_v57 = vld [vmem:[%s5043_s28 + $0x20] sm:$0xff]  ;;  %s6416_s26 = sld [smem:[#allocation15_spill]] }
  0x2d   : > { %v3649_v52 = vmul.f32 -1.442695, %v5054_v44  ;;  %v3650_v58 = vmul.f32 -1.442695, %v5062_v48  ;;  %v5082_v62 = vld [vmem:[%s5043_s28 + $0x28] sm:$0xff]  ;;  %v5087_v3 = vld [vmem:[%s5043_s28] sm:$0xff] }
  0x2e   : > { %v5094_v8 = vld [vmem:[%s5043_s28 + $0x8] sm:$0xff] }
  0x2f   : > { %4369 = vpow2.f32 %v3649_v52 }
  0x30   : > { %870 = vadd.xlane.f32.xlu0 %v869_v12  ;;  %873 = vadd.xlane.f32.xlu1 %v872_v13  ;;  %4371 = vpow2.f32 %v3650_v58 }
  0x34   : > { %876 = vadd.xlane.f32.xlu0 %v875_v14  ;;  %879 = vadd.xlane.f32.xlu1 %v878_v15  ;;  %v3647_v15 = vmul.f32 -1.442695, %v5087_v3 }
  0x38   : > { %882 = vadd.xlane.f32.xlu0 %v881_v20  ;;  %885 = vadd.xlane.f32.xlu1 %v884_v22  ;;  %v5106_v20 = vld [vmem:[%s5043_s28 + $0x40] sm:$0xff] }
  0x3c   : > { %888 = vadd.xlane.f32.xlu0 %v887_v24  ;;  %891 = vadd.xlane.f32.xlu1 %v890_v25 }
  0x40   : > { %894 = vadd.xlane.f32.xlu0 %v893_v26  ;;  %897 = vadd.xlane.f32.xlu1 %v896_v27 }
  0x44   : > { %900 = vadd.xlane.f32.xlu0 %v899_v30  ;;  %903 = vadd.xlane.f32.xlu1 %v902_v31  ;;  %v5115_v31 = vld [vmem:[%s5043_s28 + $0x48] sm:$0xff] }
  0xb5   : > { %v859_v32 = vpop.xlane.xlu0 %858  ;;  %v865_v33 = vpop.xlane.xlu1 %864 }
  0xb6   : > { %v906_v34 = vmul.f32 0.015625, %v859_v32  ;;  %v908_v35 = vmul.f32 0.015625, %v865_v33  ;;  %v3655_v32 = vmul.f32 -1.442695, %v5106_v20 }
  0xb8   : > { %v5045_v36 = vsub.f32 %v654_v0, %v906_v34  ;;  %v5047_v37 = vsub.f32 %v656_v1, %v908_v35 }
  0xb9   : > { %v862_v38 = vpop.xlane.xlu0 %861  ;;  %v868_v39 = vpop.xlane.xlu1 %867 }
  0xba   : > { %v907_v40 = vmul.f32 0.015625, %v862_v38  ;;  %v909_v41 = vmul.f32 0.015625, %v868_v39  ;;  %v938_v42 = vmul.f32 %v5045_v36, %v5045_v36  ;;  %v940_v43 = vmul.f32 %v5047_v37, %v5047_v37 }
  0xbc   : > { %v5056_v45 = vsub.f32 %v655_v2, %v907_v40  ;;  %v5058_v46 = vsub.f32 %v657_v5, %v909_v41  ;;  %v954_v47 = vsel %vm733_vm0, %v938_v42, 0.0  ;;  %v960_v51 = vsel %vm733_vm0, %v940_v43, 0.0  ;;  %v5128_v42 = vld [vmem:[%s5043_s28 + $0x60] sm:$0xff] }
  0xbd   : > { %955 = vadd.xlane.f32.xlu0 %v954_v47  ;;  %v871_v49 = vpop.xlane.xlu0 %870  ;;  %v874_v50 = vpop.xlane.xlu1 %873  ;;  %v3651_v2 = vmul.f32 -1.442695, %v5071_v57  ;;  %v3656_v41 = vmul.f32 -1.442695, %v5115_v31 }
  0xbe   : > { %v910_v53 = vmul.f32 0.015625, %v871_v49  ;;  %v911_v54 = vmul.f32 0.015625, %v874_v50  ;;  %v939_v55 = vmul.f32 %v5056_v45, %v5056_v45  ;;  %v941_v56 = vmul.f32 %v5058_v46, %v5058_v46  ;;  %v5135_v49 = vld [vmem:[%s5043_s28 + $0x68] sm:$0xff]  ;;  %v4370_v50 = vpop.eup %4369 }
  0xbf   : > { %4373 = vpow2.f32 %v3651_v2 }
  0xc0   : > { %v5075_v59 = vsub.f32 %v4977_v6, %v910_v53  ;;  %v5078_v60 = vsub.f32 %v4982_v9, %v911_v54  ;;  %v957_v61 = vsel %vm733_vm0, %v939_v55, 0.0  ;;  %v963_v1 = vsel %vm733_vm0, %v941_v56, 0.0  ;;  %v4372_v55 = vpop.eup %4371 }
  0xc1   : > { %961 = vadd.xlane.f32.xlu0 %v960_v51  ;;  %958 = vadd.xlane.f32.xlu1 %v957_v61  ;;  %v877_v63 = vpop.xlane.xlu0 %876  ;;  %v880_v0 = vpop.xlane.xlu1 %879  ;;  %v3652_v9 = vmul.f32 -1.442695, %v5082_v62  ;;  %v3659_v54 = vmul.f32 -1.442695, %v5128_v42 }
  0xc2   : > { %v912_v4 = vmul.f32 0.015625, %v877_v63  ;;  %v913_v5 = vmul.f32 0.015625, %v880_v0  ;;  %v942_v6 = vmul.f32 %v5075_v59, %v5075_v59  ;;  %v943_v7 = vmul.f32 %v5078_v60, %v5078_v60 }
  0xc3   : > { %4375 = vpow2.f32 %v3652_v9  ;;  %v3660_v63 = vmul.f32 -1.442695, %v5135_v49 }
  0xc4   : > { %v5098_v12 = vsub.f32 %v4985_v10, %v912_v4  ;;  %v5101_v13 = vsub.f32 %v4988_v11, %v913_v5  ;;  %v966_v14 = vsel %vm733_vm0, %v942_v6, 0.0  ;;  %v969_v25 = vsel %vm733_vm0, %v943_v7, 0.0 }
  0xc5   : > { %964 = vadd.xlane.f32.xlu1 %v963_v1  ;;  %967 = vadd.xlane.f32.xlu0 %v966_v14  ;;  %v883_v22 = vpop.xlane.xlu0 %882  ;;  %v886_v24 = vpop.xlane.xlu1 %885  ;;  %v3648_v10 = vmul.f32 -1.442695, %v5094_v8  ;;  %4377 = vpow2.f32 %v3647_v15  ;;  %v1272_v4 = vadd.f32 1.0, %v4370_v50  ;;  %v1273_v15 = vadd.f32 1.0, %v4372_v55 }
  0xc6   : > { %v914_v26 = vmul.f32 0.015625, %v883_v22  ;;  %v915_v27 = vmul.f32 0.015625, %v886_v24  ;;  %v944_v11 = vmul.f32 %v5098_v12, %v5098_v12  ;;  %v945_v30 = vmul.f32 %v5101_v13, %v5101_v13 }
  0xc7   : > { %4379 = vpow2.f32 %v3648_v10 }
  0xc8   : > { %v5119_v33 = vsub.f32 %v4999_v16, %v914_v26  ;;  %v5122_v34 = vsub.f32 %v5002_v17, %v915_v27  ;;  %v972_v35 = vsel %vm733_vm0, %v944_v11, 0.0  ;;  %v975_v40 = vsel %vm733_vm0, %v945_v30, 0.0 }
  0xc9   : > { %970 = vadd.xlane.f32.xlu1 %v969_v25  ;;  %973 = vadd.xlane.f32.xlu0 %v972_v35  ;;  %v889_v38 = vpop.xlane.xlu0 %888  ;;  %v892_v39 = vpop.xlane.xlu1 %891  ;;  %4381 = vpow2.f32 %v3655_v32 }
  0xca   : > { %v916_v16 = vmul.f32 0.015625, %v889_v38  ;;  %v917_v43 = vmul.f32 0.015625, %v892_v39  ;;  %v946_v17 = vmul.f32 %v5119_v33, %v5119_v33  ;;  %v947_v47 = vmul.f32 %v5122_v34, %v5122_v34  ;;  %v4374_v2 = vpop.eup %4373 }
  0xcb   : > { %4383 = vpow2.f32 %v3656_v41  ;;  %v1274_v26 = vadd.f32 1.0, %v4374_v2 }
  0xcc   : > { %v5138_v51 = vsub.f32 %v5005_v18, %v916_v16  ;;  %v5141_v52 = vsub.f32 %v5008_v19, %v917_v43  ;;  %v978_v53 = vsel %vm733_vm0, %v946_v17, 0.0  ;;  %v981_v61 = vsel %vm733_vm0, %v947_v47, 0.0 }
  0xcd   : > { %976 = vadd.xlane.f32.xlu1 %v975_v40  ;;  %979 = vadd.xlane.f32.xlu0 %v978_v53  ;;  %v895_v56 = vpop.xlane.xlu0 %894  ;;  %v898_v58 = vpop.xlane.xlu1 %897  ;;  %4385 = vpow2.f32 %v3659_v54 }
  0xce   : > { %v918_v0 = vmul.f32 0.015625, %v895_v56  ;;  %v919_v18 = vmul.f32 0.015625, %v898_v58  ;;  %v948_v19 = vmul.f32 %v5138_v51, %v5138_v51  ;;  %v949_v1 = vmul.f32 %v5141_v52, %v5141_v52  ;;  %v4376_v9 = vpop.eup %4375 }
  0xcf   : > { %4387 = vpow2.f32 %v3660_v63  ;;  %v4378_v22 = vpop.eup %4377  ;;  %v1275_v30 = vadd.f32 1.0, %v4376_v9 }
  0xd0   : > { %v5152_v5 = vsub.f32 %v5013_v21, %v918_v0  ;;  %v5155_v6 = vsub.f32 %v5018_v23, %v919_v18  ;;  %v984_v7 = vsel %vm733_vm0, %v948_v19, 0.0  ;;  %v987_v25 = vsel %vm733_vm0, %v949_v1, 0.0 }
  0xd1   : > { %982 = vadd.xlane.f32.xlu1 %v981_v61  ;;  %985 = vadd.xlane.f32.xlu0 %v984_v7  ;;  %v901_v14 = vpop.xlane.xlu0 %900  ;;  %v4380_v10 = vpop.eup %4379  ;;  %4389 = vrcp.f32 %v1272_v4  ;;  %v1270_v35 = vadd.f32 1.0, %v4378_v22 }
  0xd2   : > { %v920_v24 = vmul.f32 0.015625, %v901_v14  ;;  %v950_v21 = vmul.f32 %v5152_v5, %v5152_v5  ;;  %v951_v23 = vmul.f32 %v5155_v6, %v5155_v6  ;;  %4391 = vrcp.f32 %v1273_v15 }
  0xd3   : > { %v4382_v32 = vpop.eup %4381  ;;  %v1271_v40 = vadd.f32 1.0, %v4380_v10  ;;  %4393 = vrcp.f32 %v1274_v26  ;;  %v680_v26 = vld [vmem:[%s5043_s28 + $0x50] sm:$0xff] }
  0xd4   : > { %v5164_v27 = vsub.f32 %v5029_v28, %v920_v24  ;;  %v990_v11 = vsel %vm733_vm0, %v950_v21, 0.0  ;;  %v993_v38 = vsel %vm733_vm0, %v951_v23, 0.0  ;;  %4395 = vrcp.f32 %v1275_v30  ;;  %v676_v21 = vld [vmem:[%s5043_s28 + $0x30] sm:$0xff]  ;;  %v677_v23 = vld [vmem:[%s5043_s28 + $0x38] sm:$0xff] }
  0xd5   : > { %988 = vadd.xlane.f32.xlu1 %v987_v25  ;;  %991 = vadd.xlane.f32.xlu0 %v990_v11  ;;  %v4384_v41 = vpop.eup %4383  ;;  %4397 = vrcp.f32 %v1270_v35  ;;  %v1278_v16 = vadd.f32 1.0, %v4382_v32  ;;  %v4311_v25 = vld [vmem:[%s6414_s25] sm:$0xff]   ;;  %v3654_v10 = vmul.f32 -1.442695, %v677_v23  ;;  %v681_v11 = vld [vmem:[%s5043_s28 + $0x58] sm:$0xff] }
  0xd6   : > { %v952_v39 = vmul.f32 %v5164_v27, %v5164_v27  ;;  %4399 = vrcp.f32 %v1271_v40  ;;  %v1279_v17 = vadd.f32 1.0, %v4384_v41  ;;  %3910 = vmatprep.subr.bf16.mxu1 %v4311_v25  ;;  %v3657_v30 = vmul.f32 -1.442695, %v680_v26  ;;  %v4314_v32 = vld [vmem:[%s6414_s25 + $0x18] sm:$0xff]   ;;  %v904_v40 = vpop.xlane.xlu1 %903 }
  0xd7   : > { %v4386_v43 = vpop.eup %4385  ;;  %4401 = vrcp.f32 %v1278_v16  ;;  %3911 = vmatpush3.bf16.msra.mxu1 %v4311_v25  ;;  %v3658_v35 = vmul.f32 -1.442695, %v681_v11 }
  0xd8   : > { %v996_v28 = vsel %vm733_vm0, %v952_v39, 0.0  ;;  %v1282_v50 = vadd.f32 1.0, %v4386_v43  ;;  %4403 = vrcp.f32 %v1279_v17  ;;  %v685_v39 = vld [vmem:[%s5043_s28 + $0x78] sm:$0xff]  ;;  %v921_v43 = vmul.f32 0.015625, %v904_v40  ;;  %v4316_v17 = vld [vmem:[%s6414_s25 + $0x28] sm:$0xff]  }
  0xd9   : > { %994 = vadd.xlane.f32.xlu1 %v993_v38  ;;  %997 = vadd.xlane.f32.xlu0 %v996_v28  ;;  %v4388_v47 = vpop.eup %4387  ;;  %v684_v38 = vld [vmem:[%s5043_s28 + $0x70] sm:$0xff]  ;;  %v4315_v28 = vld [vmem:[%s6414_s25 + $0x20] sm:$0xff]   ;;  %v3662_v16 = vmul.f32 -1.442695, %v685_v39  ;;  %s3611_s28 = sshll.u32 %s637_s21, 7 }
  0xda   : > { %v1283_v54 = vadd.f32 1.0, %v4388_v47  ;;  %4405 = vrcp.f32 %v1282_v50  ;;  %v3661_v41 = vmul.f32 -1.442695, %v684_v38 }
  0xdb   : > { %v4390_v53 = vpop.eup %4389 }
  0xdc   : > { %v4392_v55 = vpop.eup %4391  ;;  %v1320_v61 = vmul.f32 %v4390_v53, %v5054_v44  ;;  %4407 = vrcp.f32 %v1283_v54  ;;  %v5211_v53 = vsub.f32 %v5032_v29, %v921_v43 }
  0xdd   : > { %v4394_v56 = vpop.eup %4393  ;;  %v1321_v63 = vmul.f32 %v4392_v55, %v5062_v48 }
  0xde   : > { %v4396_v58 = vpop.eup %4395  ;;  %v1322_v1 = vmul.f32 %v4394_v56, %v5071_v57 }
  0xdf   : > { %v4398_v0 = vpop.eup %4397  ;;  %v4276_v19 = vpack.i.bf16 %v1321_v63, %v1320_v61  ;;  %v1323_v2 = vmul.f32 %v4396_v58, %v5082_v62  ;;  %v953_v61 = vmul.f32 %v5211_v53, %v5211_v53 }
  0xe0   : > { %v4400_v18 = vpop.eup %4399  ;;  %v1318_v7 = vmul.f32 %v4398_v0, %v5087_v3 }
  0xe1   : > { %v4402_v4 = vpop.eup %4401  ;;  %v1319_v9 = vmul.f32 %v4400_v18, %v5094_v8  ;;  %v4281_v44 = vpack.i.bf16 %v1323_v2, %v1322_v1  ;;  %v999_v1 = vsel %vm733_vm0, %v953_v61, 0.0 }
  0xe2   : > { %v4404_v14 = vpop.eup %4403  ;;  %v1326_v22 = vmul.f32 %v4402_v4, %v5106_v20 }
  0xe3   : > { %v4271_v48 = vpack.i.bf16 %v1319_v9, %v1318_v7  ;;  %v1327_v57 = vmul.f32 %v4404_v14, %v5115_v31  ;;  %v4312_v31 = vld [vmem:[%s6414_s25 + $0x8] sm:$0xff]  }
  0xe4   : > { %v4406_v15 = vpop.eup %4405  ;;  %3912 = vmatprep.subr.bf16.mxu1 %v4312_v31 }
  0xe5   : > { %v4291_v62 = vpack.i.bf16 %v1327_v57, %v1326_v22  ;;  %v1330_v3 = vmul.f32 %v4406_v15, %v5128_v42  ;;  %3913 = vmatpush3.bf16.msra.mxu1 %v4312_v31  ;;  %v3653_v42 = vmul.f32 -1.442695, %v676_v21 }
  0xe6   : > { %v4408_v24 = vpop.eup %4407 }
  0xe7   : > { %v1331_v8 = vmul.f32 %v4408_v24, %v5135_v49  ;;  %v4313_v49 = vld [vmem:[%s6414_s25 + $0x10] sm:$0xff]   ;;  %4409 = vpow2.f32 %v3653_v42 }
  0xe8   : > { %3914 = vmatprep.subr.bf16.mxu1 %v4313_v49  ;;  %4411 = vpow2.f32 %v3654_v10 }
  0xe9   : > { %v4301_v20 = vpack.i.bf16 %v1331_v8, %v1330_v3  ;;  %3915 = vmatpush3.bf16.msra.mxu1 %v4313_v49  ;;  %4413 = vpow2.f32 %v3657_v30 }
  0xea   : > { %4277 = vrot.lane.b32.xlu1 %v4276_v19, %s4801_s30  ;;  %3916 = vmatprep.subr.bf16.mxu1 %v4314_v32  ;;  %4415 = vpow2.f32 %v3658_v35 }
  0xeb   : > { %4417 = vpow2.f32 %v3661_v41 }
  0xec   : > { %4419 = vpow2.f32 %v3662_v16 }
  0xed   : > { %3917 = vmatpush3.bf16.msra.mxu1 %v4314_v32 }
  0xee   : > { %4282 = vrot.lane.b32.xlu1 %v4281_v44, %s4801_s30  ;;  %3918 = vmatprep.subr.bf16.mxu1 %v4315_v28 }
  0xef   : > { %4272 = vrot.lane.b32.xlu0 %v4271_v48, %s4801_s30 }
  0xf1   : > { %3919 = vmatpush3.bf16.msra.mxu1 %v4315_v28  ;;  %v4410_v47 = vpop.eup %4409 }
  0xf2   : > { %3920 = vmatprep.subr.bf16.mxu1 %v4316_v17  ;;  %v4412_v50 = vpop.eup %4411  ;;  %v1276_v54 = vadd.f32 1.0, %v4410_v47  ;;  %v5222_v47 = vld [vmem:[%s6415_s0] ss:$0 sm:$0xff] }
  0xf3   : > { %4292 = vrot.lane.b32.xlu0 %v4291_v62, %s4801_s30  ;;  %v4414_v55 = vpop.eup %4413  ;;  %v1277_v56 = vadd.f32 1.0, %v4412_v50 }
  0xf4   : > { %v4416_v58 = vpop.eup %4415  ;;  %4421 = vrcp.f32 %v1276_v54  ;;  %v1280_v63 = vadd.f32 1.0, %v4414_v55 }
  0xf5   : > { %3921 = vmatpush3.bf16.msra.mxu1 %v4316_v17  ;;  %v4418_v0 = vpop.eup %4417  ;;  %4423 = vrcp.f32 %v1277_v56  ;;  %v1281_v18 = vadd.f32 1.0, %v4416_v58 }
  0xf6   : > { %v4420_v19 = vpop.eup %4419  ;;  %4425 = vrcp.f32 %v1280_v63  ;;  %v1284_v2 = vadd.f32 1.0, %v4418_v0  ;;  %v5228_v63 = vld [vmem:[%s6416_s26] ss:$0 sm:$0xff]  ;;  %s4803_s26 = smov [#allocation2]  }
  0xf7   : > { %4302 = vrot.lane.b32.xlu0 %v4301_v20, %s4801_s30  ;;  %4427 = vrcp.f32 %v1281_v18  ;;  %v1285_v29 = vadd.f32 1.0, %v4420_v19 }
  0xf8   : > { %4429 = vrcp.f32 %v1284_v2 }
  0xf9   : > { %4431 = vrcp.f32 %v1285_v29 }
  0xfe   : > { %v4422_v4 = vpop.eup %4421 }
  0xff   : > { %v4424_v7 = vpop.eup %4423  ;;  %v1324_v14 = vmul.f32 %v4422_v4, %v676_v21 }
 0x100   : > { %v4426_v9 = vpop.eup %4425  ;;  %v1325_v44 = vmul.f32 %v4424_v7, %v677_v23 }
 0x101   : > { %v4428_v15 = vpop.eup %4427  ;;  %v1328_v57 = vmul.f32 %v4426_v9, %v680_v26 }
 0x102   : > { %v4430_v48 = vpop.eup %4429  ;;  %v4286_v22 = vpack.i.bf16 %v1325_v44, %v1324_v14  ;;  %v1329_v24 = vmul.f32 %v4428_v15, %v681_v11 }
 0x103   : > { %v4432_v62 = vpop.eup %4431  ;;  %v1332_v8 = vmul.f32 %v4430_v48, %v684_v38 }
 0x104   : > { %v4296_v3 = vpack.i.bf16 %v1329_v24, %v1328_v57  ;;  %v1333_v25 = vmul.f32 %v4432_v62, %v685_v39 }
 0x106   : > { %v4306_v20 = vpack.i.bf16 %v1333_v25, %v1332_v8 }
 0x112   : > { %1000 = vadd.xlane.f32.xlu1 %v999_v1 }
 0x123   : > { %4287 = vrot.lane.b32.xlu1 %v4286_v22, %s4801_s30 }
 0x127   : > { %4297 = vrot.lane.b32.xlu1 %v4296_v3, %s4801_s30 }
 0x12b   : > { %4307 = vrot.lane.b32.xlu1 %v4306_v20, %s4801_s30 }
 0x14a   : > { %v956_v31 = vpop.xlane.xlu0 %955 }
 0x14b   : > { %v1002_v42 = vmul.f32 0.015625, %v956_v31 }
 0x14d   : > { %v1018_v21 = vadd.f32 1e-05, %v1002_v42 }
 0x14e   : > { %v959_v23 = vpop.xlane.xlu1 %958  ;;  %v962_v49 = vpop.xlane.xlu0 %961 }
 0x14f   : > { %4433 = vrsqrt.f32 %v1018_v21  ;;  %v1003_v10 = vmul.f32 0.015625, %v959_v23  ;;  %v1004_v26 = vmul.f32 0.015625, %v962_v49 }
 0x151   : > { %v1019_v11 = vadd.f32 1e-05, %v1003_v10  ;;  %v1020_v30 = vadd.f32 1e-05, %v1004_v26 }
 0x152   : > { %v965_v32 = vpop.xlane.xlu1 %964  ;;  %v968_v35 = vpop.xlane.xlu0 %967 }
 0x153   : > { %4435 = vrsqrt.f32 %v1019_v11  ;;  %v1005_v38 = vmul.f32 0.015625, %v965_v32  ;;  %v1006_v39 = vmul.f32 0.015625, %v968_v35 }
 0x154   : > { %4437 = vrsqrt.f32 %v1020_v30 }
 0x155   : > { %v1021_v40 = vadd.f32 1e-05, %v1005_v38  ;;  %v1022_v41 = vadd.f32 1e-05, %v1006_v39 }
 0x156   : > { %v971_v28 = vpop.xlane.xlu1 %970  ;;  %v974_v16 = vpop.xlane.xlu0 %973 }
 0x157   : > { %4439 = vrsqrt.f32 %v1021_v40  ;;  %v1007_v43 = vmul.f32 0.015625, %v971_v28  ;;  %v1008_v54 = vmul.f32 0.015625, %v974_v16 }
 0x158   : > { %4441 = vrsqrt.f32 %v1022_v41 }
 0x159   : > { %v4434_v17 = vpop.eup %4433  ;;  %v1023_v50 = vadd.f32 1e-05, %v1007_v43  ;;  %v1024_v19 = vadd.f32 1e-05, %v1008_v54 }
 0x15a   : > { %v977_v55 = vpop.xlane.xlu1 %976  ;;  %v980_v56 = vpop.xlane.xlu0 %979  ;;  %v1050_v58 = vmul.f32 %v4434_v17, %v5045_v36 }
 0x15b   : > { %4443 = vrsqrt.f32 %v1023_v50  ;;  %v1009_v61 = vmul.f32 0.015625, %v977_v55  ;;  %v1010_v14 = vmul.f32 0.015625, %v980_v56 }
 0x15c   : > { %v1072_v0 = vmul.f32 %v5222_v47, %v1050_v58  ;;  %4445 = vrsqrt.f32 %v1024_v19 }
 0x15d   : > { %v4436_v18 = vpop.eup %4435  ;;  %v1025_v9 = vadd.f32 1e-05, %v1009_v61  ;;  %v1026_v20 = vadd.f32 1e-05, %v1010_v14 }
 0x15e   : > { %v4438_v1 = vpop.eup %4437  ;;  %v983_v2 = vpop.xlane.xlu1 %982  ;;  %v1051_v4 = vmul.f32 %v4436_v18, %v5056_v45  ;;  %v5233_v7 = vadd.f32 %v5228_v63, %v1072_v0 }
 0x15f   : > { %v986_v29 = vpop.xlane.xlu0 %985  ;;  %v1052_v36 = vmul.f32 %v4438_v1, %v5047_v37  ;;  %v1011_v44 = vmul.f32 0.015625, %v983_v2 }
 0x160   : > { %v1012_v15 = vmul.f32 0.015625, %v986_v29  ;;  %v1073_v48 = vmul.f32 %v5222_v47, %v1051_v4  ;;  %v3631_v22 = vmul.f32 -1.442695, %v5233_v7 }
 0x161   : > { %v4440_v57 = vpop.eup %4439  ;;  %v1074_v24 = vmul.f32 %v5222_v47, %v1052_v36  ;;  %v1027_v62 = vadd.f32 1e-05, %v1011_v44 }
 0x162   : > { %v4442_v3 = vpop.eup %4441  ;;  %v1053_v45 = vmul.f32 %v4440_v57, %v5058_v46  ;;  %v989_v8 = vpop.xlane.xlu1 %988  ;;  %v5241_v25 = vadd.f32 %v5228_v63, %v1073_v48  ;;  %4447 = vpow2.f32 %v3631_v22  ;;  %v1028_v21 = vadd.f32 1e-05, %v1012_v15 }
 0x163   : > { %v1054_v37 = vmul.f32 %v4442_v3, %v5075_v59  ;;  %4449 = vrsqrt.f32 %v1025_v9  ;;  %v1013_v31 = vmul.f32 0.015625, %v989_v8  ;;  %v992_v23 = vpop.xlane.xlu0 %991  ;;  %v5246_v49 = vadd.f32 %v5228_v63, %v1074_v24 }
 0x164   : > { %v1075_v42 = vmul.f32 %v5222_v47, %v1053_v45  ;;  %v3632_v10 = vmul.f32 -1.442695, %v5241_v25  ;;  %4451 = vrsqrt.f32 %v1027_v62  ;;  %v1014_v38 = vmul.f32 0.015625, %v992_v23 }
 0x165   : > { %v4444_v46 = vpop.eup %4443  ;;  %v1076_v26 = vmul.f32 %v5222_v47, %v1054_v37  ;;  %v3633_v32 = vmul.f32 -1.442695, %v5246_v49  ;;  %v1029_v35 = vadd.f32 1e-05, %v1013_v31 }
 0x166   : > { %v1055_v11 = vmul.f32 %v4444_v46, %v5078_v60  ;;  %v995_v30 = vpop.xlane.xlu1 %994  ;;  %v5252_v59 = vadd.f32 %v5228_v63, %v1075_v42  ;;  %4453 = vpow2.f32 %v3632_v10  ;;  %v4446_v17 = vpop.eup %4445  ;;  %v1030_v54 = vadd.f32 1e-05, %v1014_v38 }
 0x167   : > { %4455 = vrsqrt.f32 %v1026_v20  ;;  %v1015_v39 = vmul.f32 0.015625, %v995_v30  ;;  %v5258_v28 = vadd.f32 %v5228_v63, %v1076_v26  ;;  %v5268_v15 = vpop.xlane.xlu0 %997  ;;  %v1056_v57 = vmul.f32 %v4446_v17, %v5098_v12 }
 0x168   : > { %v1077_v40 = vmul.f32 %v5222_v47, %v1055_v11  ;;  %4457 = vrsqrt.f32 %v1028_v21  ;;  %v3634_v41 = vmul.f32 -1.442695, %v5252_v59 }
 0x169   : > { %v1031_v60 = vadd.f32 1e-05, %v1015_v39  ;;  %4459 = vpow2.f32 %v3633_v32  ;;  %v3635_v43 = vmul.f32 -1.442695, %v5258_v28  ;;  %v1078_v31 = vmul.f32 %v5222_v47, %v1056_v57 }
 0x16a   : > { %4461 = vpow2.f32 %v3634_v41  ;;  %v5261_v16 = vadd.f32 %v5228_v63, %v1077_v40  ;;  %v4278_v12 = vpop.permute.xlu1 %4277 }
 0x16b   : > { %4463 = vrsqrt.f32 %v1029_v35  ;;  %v5291_v38 = vadd.f32 %v5228_v63, %v1078_v31  ;;  %v4280_v40 = vunpack.i.h.bf16 %v4278_v12 }
 0x16c   : > { %v4448_v50 = vpop.eup %4447  ;;  %4465 = vrsqrt.f32 %v1031_v60  ;;  %v3636_v55 = vmul.f32 -1.442695, %v5261_v16 }
 0x16d   : > { %v4450_v56 = vpop.eup %4449  ;;  %4467 = vpow2.f32 %v3635_v43  ;;  %v1158_v58 = vadd.f32 1.0, %v4448_v50 }
 0x16e   : > { %4469 = vpow2.f32 %v3636_v55  ;;  %v4452_v61 = vpop.eup %4451  ;;  %v1057_v44 = vmul.f32 %v4450_v56, %v5101_v13  ;;  %v4273_v13 = vpop.permute.xlu0 %4272 }
 0x16f   : > { %4471 = vrcp.f32 %v1158_v58  ;;  %v1059_v29 = vmul.f32 %v4452_v61, %v5122_v34  ;;  %v4275_v23 = vunpack.i.h.bf16 %v4273_v13  ;;  %v4274_v26 = vunpack.i.l.bf16 %v4273_v13  ;;  %v4283_v60 = vpop.permute.xlu1 %4282 }
 0x170   : > { %v4454_v0 = vpop.eup %4453  ;;  %4473 = vrsqrt.f32 %v1030_v54  ;;  %v1079_v8 = vmul.f32 %v5222_v47, %v1057_v44 }
 0x171   : > { %v4456_v18 = vpop.eup %4455  ;;  %v1159_v19 = vadd.f32 1.0, %v4454_v0  ;;  %v1081_v62 = vmul.f32 %v5222_v47, %v1059_v29  ;;  %v4279_v0 = vunpack.i.l.bf16 %v4278_v12 }
 0x172   : > { %v4458_v1 = vpop.eup %4457  ;;  %v1058_v36 = vmul.f32 %v4456_v18, %v5119_v33  ;;  %v5287_v35 = vadd.f32 %v5228_v63, %v1079_v8  ;;  %v3637_v18 = vmul.f32 -1.442695, %v5291_v38 }
 0x173   : > { %v4460_v2 = vpop.eup %4459  ;;  %4475 = vrcp.f32 %v1159_v19  ;;  %v5278_v10 = vadd.f32 %v5228_v63, %v1081_v62  ;;  %v1060_v46 = vmul.f32 %v4458_v1, %v5138_v51  ;;  %v4285_v1 = vunpack.i.h.bf16 %v4283_v60 }
 0x174   : > { %v4462_v4 = vpop.eup %4461  ;;  %v1160_v9 = vadd.f32 1.0, %v4460_v2  ;;  %v1080_v3 = vmul.f32 %v5222_v47, %v1058_v36  ;;  %v3638_v58 = vmul.f32 -1.442695, %v5287_v35 }
 0x175   : > { %v4464_v14 = vpop.eup %4463  ;;  %v1161_v48 = vadd.f32 1.0, %v4462_v4 }
 0x176   : > { %v4466_v22 = vpop.eup %4465  ;;  %4477 = vrcp.f32 %v1160_v9  ;;  %v1061_v42 = vmul.f32 %v4464_v14, %v5141_v52  ;;  %v5283_v30 = vadd.f32 %v5228_v63, %v1080_v3 }
 0x177   : > { %v4468_v24 = vpop.eup %4467  ;;  %4479 = vrcp.f32 %v1161_v48  ;;  %v1063_v21 = vmul.f32 %v4466_v22, %v5155_v6  ;;  %v4284_v22 = vunpack.i.l.bf16 %v4283_v60  ;;  %v4293_v60 = vpop.permute.xlu0 %4292 }
 0x178   : > { %v4470_v34 = vpop.eup %4469  ;;  %v1162_v45 = vadd.f32 1.0, %v4468_v24  ;;  %v1083_v39 = vmul.f32 %v5222_v47, %v1061_v42  ;;  %v3639_v17 = vmul.f32 -1.442695, %v5283_v30 }
 0x179   : > { %v4472_v33 = vpop.eup %4471  ;;  %v1163_v37 = vadd.f32 1.0, %v4470_v34  ;;  %v1085_v51 = vmul.f32 %v5222_v47, %v1063_v21 }
 0x17a   : > { %v4474_v20 = vpop.eup %4473  ;;  %4481 = vrcp.f32 %v1162_v45  ;;  %v1206_v11 = vmul.f32 %v4472_v33, %v5233_v7  ;;  %v3640_v7 = vmul.f32 -1.442695, %v5278_v10  ;;  %v5306_v19 = vadd.f32 %v5228_v63, %v1083_v39 }
 0x17b   : > { %4483 = vrcp.f32 %v1163_v37  ;;  %v1062_v52 = vmul.f32 %v4474_v20, %v5152_v5  ;;  %v5310_v2 = vadd.f32 %v5228_v63, %v1085_v51 }
 0x17c   : > { %v1398_v5 = vsel %vm733_vm0, %v1206_v11, %v4274_v26  ;;  %4485 = vpow2.f32 %v3640_v7  ;;  %v3642_v57 = vmul.f32 -1.442695, %v5306_v19 }
 0x17d   : > { %v4476_v32 = vpop.eup %4475  ;;  %v1084_v54 = vmul.f32 %v5222_v47, %v1062_v52  ;;  %4487 = vpow2.f32 %v3639_v17  ;;  %v3644_v24 = vmul.f32 -1.442695, %v5310_v2 }
 0x17e   : > { %v1207_v6 = vmul.f32 %v4476_v32, %v5241_v25  ;;  %v1082_v25 = vmul.f32 %v5222_v47, %v1060_v46  ;;  %4489 = vpow2.f32 %v3638_v58 }
 0x17f   : > { %v5319_v44 = vadd.f32 %v5228_v63, %v1084_v54  ;;  %4491 = vpow2.f32 %v3637_v18 }
 0x180   : > { %v4478_v41 = vpop.eup %4477  ;;  %v1399_v43 = vsel %vm733_vm0, %v1207_v6, %v4275_v23  ;;  %4493 = vpow2.f32 %v3642_v57 }
 0x181   : > { %v4480_v50 = vpop.eup %4479  ;;  %v1208_v55 = vmul.f32 %v4478_v41, %v5246_v49  ;;  %v1414_v56 = vpack.c.bf16 %v1399_v43, %v1398_v5  ;;  %v3643_v45 = vmul.f32 -1.442695, %v5319_v44  ;;  %4495 = vpow2.f32 %v3644_v24 }
 0x182   : > { %v1209_v61 = vmul.f32 %v4480_v50, %v5252_v59  ;;  %v5315_v59 = vadd.f32 %v5228_v63, %v1082_v25  ;;  %v4295_v50 = vunpack.i.h.bf16 %v4293_v60 }
 0x183   : > { %3922 = vmatprep.mubr.msk.bf16.mxu1 %vm1477_vm1, %v1414_v56  ;;  %v1400_v4 = vsel %vm733_vm0, %v1208_v55, %v4279_v0  ;;  %v4294_v56 = vunpack.i.l.bf16 %v4293_v60 }
 0x184   : > { %v4482_v29 = vpop.eup %4481  ;;  %v1401_v49 = vsel %vm733_vm0, %v1209_v61, %v4280_v40 }
 0x185   : > { %v4484_v36 = vpop.eup %4483  ;;  %v1210_v9 = vmul.f32 %v4482_v29, %v5258_v28  ;;  %v1415_v14 = vpack.c.bf16 %v1401_v49, %v1400_v4  ;;  %v3641_v28 = vmul.f32 -1.442695, %v5315_v59 }
 0x186   : > { %v1211_v48 = vmul.f32 %v4484_v36, %v5261_v16  ;;  %v1016_v16 = vmul.f32 0.015625, %v5268_v15  ;;  %v4486_v33 = vpop.eup %4485 }
 0x187   : > { %3923 = vmatmul.mubr.msk.bf16.vlgmr.msra.gmra.mrb[0].mxu1 %vm1477_vm1, %v1415_v14  ;;  %v1402_v34 = vsel %vm733_vm0, %v1210_v9, %v4284_v22  ;;  %4497 = vpow2.f32 %v3641_v28  ;;  %v4488_v8 = vpop.eup %4487  ;;  %v1167_v31 = vadd.f32 1.0, %v4486_v33  ;;  %v4303_v22 = vpop.permute.xlu0 %4302 }
 0x188   : > { %v1403_v62 = vsel %vm733_vm0, %v1211_v48, %v4285_v1  ;;  %4499 = vpow2.f32 %v3643_v45  ;;  %v4490_v37 = vpop.eup %4489  ;;  %v1032_v13 = vadd.f32 1e-05, %v1016_v16  ;;  %v1166_v42 = vadd.f32 1.0, %v4488_v8 }
 0x189   : > { %v1416_v3 = vpack.c.bf16 %v1403_v62, %v1402_v34  ;;  %v4492_v20 = vpop.eup %4491  ;;  %v1165_v12 = vadd.f32 1.0, %v4490_v37  ;;  %v4305_v34 = vunpack.i.h.bf16 %v4303_v22  ;;  %v4304_v33 = vunpack.i.l.bf16 %v4303_v22 }
 0x18a   : > { %4501 = vrsqrt.f32 %v1032_v13  ;;  %v1164_v21 = vadd.f32 1.0, %v4492_v20  ;;  %v4494_v23 = vpop.eup %4493 }
 0x18b   : > { %3926 = vmatprep.mubr.msk.bf16.mxu1 %vm1477_vm1, %v1416_v3  ;;  %4503 = vrcp.f32 %v1167_v31  ;;  %v4496_v46 = vpop.eup %4495  ;;  %v1169_v11 = vadd.f32 1.0, %v4494_v23 }
 0x18c   : > { %4505 = vrcp.f32 %v1166_v42  ;;  %v1171_v32 = vadd.f32 1.0, %v4496_v46 }
 0x18d   : > { %4507 = vrcp.f32 %v1165_v12 }
 0x18e   : > { %4509 = vrcp.f32 %v1164_v21 }
 0x18f   : > { %4511 = vrcp.f32 %v1169_v11 }
 0x190   : > { %4513 = vrcp.f32 %v1171_v32 }
 0x191   : > { %v4498_v15 = vpop.eup %4497 }
 0x192   : > { %v4500_v26 = vpop.eup %4499  ;;  %v1168_v52 = vadd.f32 1.0, %v4498_v15 }
 0x193   : > { %v1170_v6 = vadd.f32 1.0, %v4500_v26 }
 0x194   : > { %v4502_v39 = vpop.eup %4501  ;;  %4515 = vrcp.f32 %v1168_v52 }
 0x195   : > { %v4504_v51 = vpop.eup %4503  ;;  %4517 = vrcp.f32 %v1170_v6  ;;  %v1064_v17 = vmul.f32 %v4502_v39, %v5164_v27 }
 0x196   : > { %v4506_v40 = vpop.eup %4505  ;;  %v1215_v25 = vmul.f32 %v4504_v51, %v5278_v10 }
 0x197   : > { %v4508_v41 = vpop.eup %4507  ;;  %v1214_v55 = vmul.f32 %v4506_v40, %v5283_v30  ;;  %v1086_v27 = vmul.f32 %v5222_v47, %v1064_v17 }
 0x198   : > { %v4510_v43 = vpop.eup %4509  ;;  %v1213_v58 = vmul.f32 %v4508_v41, %v5287_v35  ;;  %v1407_v49 = vsel %vm733_vm0, %v1215_v25, %v4295_v50 }
 0x199   : > { %v1212_v1 = vmul.f32 %v4510_v43, %v5291_v38  ;;  %v4512_v29 = vpop.eup %4511  ;;  %v1406_v9 = vsel %vm733_vm0, %v1214_v55, %v4294_v56  ;;  %v1108_v28 = vadd.f32 %v5228_v63, %v1086_v27 }
 0x19a   : > { %v4514_v4 = vpop.eup %4513  ;;  %v1418_v38 = vpack.c.bf16 %v1407_v49, %v1406_v9  ;;  %v1217_v3 = vmul.f32 %v4512_v29, %v5306_v19 }
 0x19b   : > { %v1219_v62 = vmul.f32 %v4514_v4, %v5310_v2  ;;  %v3645_v13 = vmul.f32 -1.442695, %v1108_v28 }
 0x19d   : > { %v1411_v2 = vsel %vm733_vm0, %v1219_v62, %v4305_v34 }
 0x19e   : > { %v4516_v30 = vpop.eup %4515 }
 0x19f   : > { %v1001_v7 = vpop.xlane.xlu1 %1000  ;;  %v4518_v48 = vpop.eup %4517  ;;  %v1216_v45 = vmul.f32 %v4516_v30, %v5315_v59 }
 0x1a0   : > { %v1017_v5 = vmul.f32 0.015625, %v1001_v7  ;;  %v1218_v16 = vmul.f32 %v4518_v48, %v5319_v44  ;;  %v3663_v7 = vld [vmem:[%s6417_s5] ss:$0 sm:$0xff]  ;;  %s6263_s5 = scalar_lea.vmem [#allocation2], %s3611_s28  ;;  %s4741_s28 = sshll.u32 %s4803_s26, 4  ;;  %s4742_s28 = int_to_ptr.vmem [resolvable:$false] %s4741_s28 }
 0x1a2   : > { %v1033_v54 = vadd.f32 1e-05, %v1017_v5  ;;  %v1410_v31 = vsel %vm733_vm0, %v1218_v16, %v4304_v33 }
 0x1a3   : > { %v4288_v61 = vpop.permute.xlu1 %4287  ;;  %v1420_v12 = vpack.c.bf16 %v1411_v2, %v1410_v31 }
 0x1a4   : > { %4519 = vrsqrt.f32 %v1033_v54  ;;  %v4290_v0 = vunpack.i.h.bf16 %v4288_v61  ;;  %v4289_v18 = vunpack.i.l.bf16 %v4288_v61 }
 0x1a5   : > { %4521 = vpow2.f32 %v3645_v13 }
 0x1a6   : > { %v1405_v10 = vsel %vm733_vm0, %v1213_v58, %v4290_v0  ;;  %v1404_v36 = vsel %vm733_vm0, %v1212_v1, %v4289_v18 }
 0x1a7   : > { %v4298_v35 = vpop.permute.xlu1 %4297  ;;  %v1417_v14 = vpack.c.bf16 %v1405_v10, %v1404_v36 }
 0x1a8   : > { %v4300_v57 = vunpack.i.h.bf16 %v4298_v35  ;;  %v4299_v24 = vunpack.i.l.bf16 %v4298_v35 }
 0x1a9   : > { %3927 = vmatmul.mubr.msk.bf16.gmra.mrb[4].mxu1 %vm1477_vm1, %v1417_v14 }
 0x1aa   : > { %3930 = vmatprep.mubr.msk.bf16.mxu1 %vm1477_vm1, %v1418_v38  ;;  %v1409_v8 = vsel %vm733_vm0, %v1217_v3, %v4300_v57  ;;  %v1408_v37 = vsel %vm733_vm0, %v1216_v45, %v4299_v24 }
 0x1ab   : > { %v1419_v19 = vpack.c.bf16 %v1409_v8, %v1408_v37 }
 0x1ae   : > { %v4520_v20 = vpop.eup %4519 }
 0x1af   : > { %v1065_v42 = vmul.f32 %v4520_v20, %v5211_v53  ;;  %v4522_v23 = vpop.eup %4521  ;;  %v4308_v53 = vpop.permute.xlu1 %4307 }
 0x1b0   : > { %v1172_v46 = vadd.f32 1.0, %v4522_v23  ;;  %v4310_v32 = vunpack.i.h.bf16 %v4308_v53  ;;  %v4309_v52 = vunpack.i.l.bf16 %v4308_v53 }
 0x1b1   : > { %v1087_v59 = vmul.f32 %v5222_v47, %v1065_v42  ;;  %3931 = vmatmul.mubr.msk.bf16.gmra.mrb[8].mxu1 %vm1477_vm1, %v1419_v19 }
 0x1b2   : > { %3934 = vmatprep.mubr.msk.bf16.mxu1 %vm1477_vm1, %v1420_v12 }
 0x1b3   : > { %v1109_v44 = vadd.f32 %v5228_v63, %v1087_v59 }
 0x1b5   : > { %v3646_v21 = vmul.f32 -1.442695, %v1109_v44 }
 0x1b7   : > { %4523 = vpow2.f32 %v3646_v21 }
 0x1b8   : > { %4525 = vrcp.f32 %v1172_v46 }
 0x1c1   : > { %v4524_v15 = vpop.eup %4523 }
 0x1c2   : > { %v1173_v26 = vadd.f32 1.0, %v4524_v15  ;;  %v4526_v11 = vpop.eup %4525 }
 0x1c3   : > { %v1220_v39 = vmul.f32 %v4526_v11, %v1108_v28 }
 0x1c4   : > { %4527 = vrcp.f32 %v1173_v26 }
 0x1c5   : > { %v1412_v40 = vsel %vm733_vm0, %v1220_v39, %v4309_v52 }
 0x1ce   : > { %v4528_v47 = vpop.eup %4527 }
 0x1cf   : > { %v1221_v6 = vmul.f32 %v4528_v47, %v1109_v44 }
 0x1d1   : > { %v1413_v51 = vsel %vm733_vm0, %v1221_v6, %v4310_v32 }
 0x1d2   : > { %v1421_v63 = vpack.c.bf16 %v1413_v51, %v1412_v40  ;;  %v4317_v40 = vld [vmem:[%s6383_s10] sm:$0xff]  }
 0x1d3   : > { %3886 = vmatprep.subr.bf16.mxu0 %v4317_v40 }
 0x1d4   : > { %3935 = vmatmul.mubr.msk.bf16.gmra.mrb[12].mxu1 %vm1477_vm1, %v1421_v63  ;;  %3887 = vmatpush3.bf16.msra.mxu0 %v4317_v40  ;;  %v4735_v40 = vld [vmem:[%s4968_s27 + $0x70] sm:$0xff] }
 0x25a   : > { %v3924_v41 = vpop.f32.mrb[0].mxu1 }
 0x25b   : > { %v1536_v60 = vpop.f32.mrb[1].mxu1  ;;  %v1545_v50 = vadd.f32 %v3924_v41, %v3663_v7 }
 0x25c   : > { %v1537_v5 = vadd.f32 %v3663_v7, %v1536_v60  ;;  %v3925_v43 = vpop.f32.mrb[2].mxu1 }
 0x25d   : > { %v1539_v17 = vpop.f32.mrb[3].mxu1  ;;  %v1548_v54 = vadd.f32 %v3925_v43, %v3663_v7 }
 0x25e   : > { %v1540_v25 = vadd.f32 %v3663_v7, %v1539_v17  ;;  %1601 = vadd.xlane.f32.xlu0 %v1537_v5 }
 0x260   : > { %1603 = vadd.xlane.f32.xlu1 %v1540_v25 }
 0x262   : > { %1605 = vadd.xlane.f32.xlu0 %v1545_v50 }
 0x266   : > { %1607 = vadd.xlane.f32.xlu0 %v1548_v54 }
 0x27c   : > { %v3928_v55 = vpop.f32.mrb[4].mxu1 }
 0x27d   : > { %v1552_v56 = vpop.f32.mrb[5].mxu1  ;;  %v1561_v1 = vadd.f32 %v3928_v55, %v3663_v7  ;;  %v4319_v55 = vld [vmem:[%s6383_s10 + $0x10] sm:$0xff]  }
 0x27e   : > { %v1553_v58 = vadd.f32 %v3663_v7, %v1552_v56  ;;  %v3929_v61 = vpop.f32.mrb[6].mxu1  ;;  %v4721_v56 = vld [vmem:[%s4968_s27] sm:$0xff] }
 0x27f   : > { %v1555_v0 = vpop.f32.mrb[7].mxu1  ;;  %v5363_v29 = vadd.f32 %v3929_v61, %v3663_v7 }
 0x280   : > { %v1556_v18 = vadd.f32 %v3663_v7, %v1555_v0  ;;  %1609 = vadd.xlane.f32.xlu0 %v1553_v58 }
 0x282   : > { %1611 = vadd.xlane.f32.xlu1 %v1556_v18 }
 0x284   : > { %v3932_v49 = vpop.f32.mrb[8].mxu1  ;;  %1613 = vadd.xlane.f32.xlu0 %v1561_v1 }
 0x285   : > { %v1568_v27 = vpop.f32.mrb[9].mxu1  ;;  %v5371_v9 = vadd.f32 %v3932_v49, %v3663_v7 }
 0x286   : > { %v5365_v4 = vadd.f32 %v3663_v7, %v1568_v27  ;;  %v3933_v10 = vpop.f32.mrb[10].mxu1  ;;  %1615 = vadd.xlane.f32.xlu1 %v5363_v29 }
 0x287   : > { %v1571_v36 = vpop.f32.mrb[11].mxu1  ;;  %v5374_v35 = vadd.f32 %v3933_v10, %v3663_v7  ;;  %v4320_v10 = vld [vmem:[%s6383_s10 + $0x18] sm:$0xff]  }
 0x288   : > { %v5368_v30 = vadd.f32 %v3663_v7, %v1571_v36  ;;  %1617 = vadd.xlane.f32.xlu0 %v5365_v4 }
 0x28a   : > { %1619 = vadd.xlane.f32.xlu1 %v5368_v30 }
 0x28c   : > { %1621 = vadd.xlane.f32.xlu0 %v5371_v9 }
 0x28e   : > { %1623 = vadd.xlane.f32.xlu1 %v5374_v35 }
 0x2a7   : > { %v3936_v14 = vpop.f32.mrb[12].mxu1 }
 0x2a8   : > { %v1584_v48 = vpop.f32.mrb[13].mxu1  ;;  %v5383_v62 = vadd.f32 %v3936_v14, %v3663_v7  ;;  %v4321_v14 = vld [vmem:[%s6381_s8] sm:$0xff]  }
 0x2a9   : > { %v5378_v22 = vadd.f32 %v3663_v7, %v1584_v48  ;;  %v3937_v57 = vpop.f32.mrb[14].mxu1  ;;  %v4723_v48 = vld [vmem:[%s4968_s27 + $0x10] sm:$0xff] }
 0x2aa   : > { %v1587_v24 = vpop.f32.mrb[15].mxu1  ;;  %v5386_v34 = vadd.f32 %v3937_v57, %v3663_v7  ;;  %v4724_v57 = vld [vmem:[%s4968_s27 + $0x18] sm:$0xff] }
 0x2ab   : > { %v5380_v38 = vadd.f32 %v3663_v7, %v1587_v24  ;;  %1625 = vadd.xlane.f32.xlu0 %v5378_v22  ;;  %v4725_v24 = vld [vmem:[%s4968_s27 + $0x20] sm:$0xff] }
 0x2ad   : > { %1627 = vadd.xlane.f32.xlu1 %v5380_v38 }
 0x2af   : > { %1629 = vadd.xlane.f32.xlu0 %v5383_v62 }
 0x2b1   : > { %1631 = vadd.xlane.f32.xlu1 %v5386_v34 }
 0x2eb   : > { %v1602_v28 = vpop.xlane.xlu0 %1601 }
 0x2ec   : > { %v1634_v3 = vmul.f32 0.0078125, %v1602_v28  ;;  %v4726_v28 = vld [vmem:[%s4968_s27 + $0x28] sm:$0xff] }
 0x2ed   : > { %v1604_v45 = vpop.xlane.xlu1 %1603 }
 0x2ee   : > { %v5390_v16 = vsub.f32 %v1537_v5, %v1634_v3  ;;  %v1635_v33 = vmul.f32 0.0078125, %v1604_v45  ;;  %v688_v3 = vpack.c.bf16 %v4726_v28, %v4725_v24  ;;  %v4322_v45 = vld [vmem:[%s6381_s8 + $0x8] sm:$0xff]  }
 0x2ef   : > { %v1606_v8 = vpop.xlane.xlu0 %1605 }
 0x2f0   : > { %v5392_v37 = vsub.f32 %v1540_v25, %v1635_v33  ;;  %v1636_v2 = vmul.f32 0.0078125, %v1606_v8  ;;  %v1666_v13 = vmul.f32 %v5390_v16, %v5390_v16  ;;  %v4323_v33 = vld [vmem:[%s6381_s8 + $0x10] sm:$0xff]  }
 0x2f1   : > { %v4727_v8 = vld [vmem:[%s4968_s27 + $0x30] sm:$0xff] }
 0x2f2   : > { %v5396_v20 = vsub.f32 %v1545_v50, %v1636_v2  ;;  %1682 = vadd.xlane.f32.xlu0 %v1666_v13  ;;  %v1667_v31 = vmul.f32 %v5392_v37, %v5392_v37  ;;  %v4318_v50 = vld [vmem:[%s6383_s10 + $0x8] sm:$0xff]   ;;  %v4728_v2 = vld [vmem:[%s4968_s27 + $0x38] sm:$0xff] }
 0x2f3   : > { %v1608_v42 = vpop.xlane.xlu0 %1607  ;;  %3888 = vmatprep.subr.bf16.mxu0 %v4318_v50  ;;  %v689_v13 = vpack.c.bf16 %v4728_v2, %v4727_v8  ;;  %v5532_v8 = vld [vmem:[%s6419_s7] ss:$0 sm:$0xff]  ;;  %s3533_s7 = sshll.u32 %s6263_s5, 4  ;;  %s6325_s7 = int_to_ptr.vmem [resolvable:$true] %s3533_s7 }
 0x2f4   : > { %v1637_v19 = vmul.f32 0.0078125, %v1608_v42  ;;  %1684 = vadd.xlane.f32.xlu1 %v1667_v31  ;;  %v1668_v12 = vmul.f32 %v5396_v20, %v5396_v20  ;;  %3889 = vmatpush3.bf16.msra.mxu0 %v4318_v50  ;;  %v4729_v31 = vld [vmem:[%s4968_s27 + $0x40] sm:$0xff]  ;;  %v4730_v42 = vld [vmem:[%s4968_s27 + $0x48] sm:$0xff]  ;;  %v4328_v50 = vld [vmem:[%s6381_s8 + $0x38] sm:$0xff]   ;;  %s4737_s23 = scalar_lea.vmem %s6325_s7, 2048  ;;  %p4744_p0 = scmp.lt.s32.totalorder %s6325_s7, %s4742_s28 }
 0x2f5   : > { %3890 = vmatprep.subr.bf16.mxu0 %v4319_v55  ;;  %p4738_p11 = scmp.ne.s32.totalorder %s6325_s7, %s4737_s23 }
 0x2f6   : > { %v5402_v59 = vsub.f32 %v1548_v54, %v1637_v19  ;;  %1686 = vadd.xlane.f32.xlu0 %v1668_v12  ;;  %v690_v19 = vpack.c.bf16 %v4730_v42, %v4729_v31  ;;  %v4324_v12 = vld [vmem:[%s6381_s8 + $0x18] sm:$0xff]  }
 0x2f7   : > { %p4739_p12 = pnand %p4738_p11, %p4949_p5 }
 0x2f8   : > { %v1669_v44 = vmul.f32 %v5402_v59, %v5402_v59  ;;  %3891 = vmatpush3.bf16.msra.mxu0 %v4319_v55 }
 0x2f9   : > { %3892 = vmatprep.subr.bf16.mxu0 %v4320_v10  ;;  %p4740_p13 = pneg %p4739_p12 }
 0x2fa   : > { %1688 = vadd.xlane.f32.xlu1 %v1669_v44  ;;  %v4325_v44 = vld [vmem:[%s6381_s8 + $0x20] sm:$0xff]  }
 0x2fc   : > { %3893 = vmatpush3.bf16.msra.mxu0 %v4320_v10 }
 0x2fd   : > { %3938 = vmatprep.subr.bf16.mxu0 %v4321_v14 }
 0x30d   : > { %v1610_v21 = vpop.xlane.xlu0 %1609 }
 0x30e   : > { %v1638_v23 = vmul.f32 0.0078125, %v1610_v21  ;;  %v4731_v21 = vld [vmem:[%s4968_s27 + $0x50] sm:$0xff] }
 0x30f   : > { %v1612_v46 = vpop.xlane.xlu1 %1611 }
 0x310   : > { %v5406_v15 = vsub.f32 %v1553_v58, %v1638_v23  ;;  %v1639_v26 = vmul.f32 0.0078125, %v1612_v46  ;;  %v4722_v58 = vld [vmem:[%s4968_s27 + $0x8] sm:$0xff]  ;;  %v4732_v23 = vld [vmem:[%s4968_s27 + $0x58] sm:$0xff] }
 0x311   : > { %v1614_v53 = vpop.xlane.xlu0 %1613  ;;  %v686_v61 = vpack.c.bf16 %v4722_v58, %v4721_v56  ;;  %v691_v46 = vpack.c.bf16 %v4732_v23, %v4731_v21 }
 0x312   : > { %v5408_v11 = vsub.f32 %v1556_v18, %v1639_v26  ;;  %v1640_v32 = vmul.f32 0.0078125, %v1614_v53  ;;  %v1670_v52 = vmul.f32 %v5406_v15, %v5406_v15  ;;  %v4733_v26 = vld [vmem:[%s4968_s27 + $0x60] sm:$0xff]  ;;  %v4734_v53 = vld [vmem:[%s4968_s27 + $0x68] sm:$0xff] }
 0x313   : > { %v1616_v47 = vpop.xlane.xlu1 %1615  ;;  %3894 = vmatprep.mubr.msk.bf16.mxu0 %vm733_vm0, %v686_v61 }
 0x314   : > { %v5412_v6 = vsub.f32 %v1561_v1, %v1640_v32  ;;  %v1641_v39 = vmul.f32 0.0078125, %v1616_v47  ;;  %1690 = vadd.xlane.f32.xlu0 %v1670_v52  ;;  %v1671_v51 = vmul.f32 %v5408_v11, %v5408_v11  ;;  %v692_v32 = vpack.c.bf16 %v4734_v53, %v4733_v26  ;;  %v4326_v52 = vld [vmem:[%s6381_s8 + $0x28] sm:$0xff]  }
 0x315   : > { %v1618_v63 = vpop.xlane.xlu0 %1617 }
 0x316   : > { %v5420_v7 = vsub.f32 %v5363_v29, %v1641_v39  ;;  %v1642_v41 = vmul.f32 0.0078125, %v1618_v63  ;;  %1692 = vadd.xlane.f32.xlu1 %v1671_v51  ;;  %v1672_v60 = vmul.f32 %v5412_v6, %v5412_v6  ;;  %v4327_v39 = vld [vmem:[%s6381_s8 + $0x30] sm:$0xff]   ;;  %v4736_v63 = vld [vmem:[%s4968_s27 + $0x78] sm:$0xff] }
 0x317   : > { %v1620_v5 = vpop.xlane.xlu1 %1619 }
 0x318   : > { %v5425_v43 = vsub.f32 %v5365_v4, %v1642_v41  ;;  %v1643_v17 = vmul.f32 0.0078125, %v1620_v5  ;;  %1694 = vadd.xlane.f32.xlu0 %v1672_v60  ;;  %v1673_v25 = vmul.f32 %v5420_v7, %v5420_v7  ;;  %v693_v41 = vpack.c.bf16 %v4736_v63, %v4735_v40 }
 0x319   : > { %v1622_v54 = vpop.xlane.xlu0 %1621 }
 0x31a   : > { %v5438_v0 = vsub.f32 %v5368_v30, %v1643_v17  ;;  %v1644_v18 = vmul.f32 0.0078125, %v1622_v54  ;;  %1696 = vadd.xlane.f32.xlu1 %v1673_v25  ;;  %v1674_v1 = vmul.f32 %v5425_v43, %v5425_v43 }
 0x31b   : > { %v1624_v29 = vpop.xlane.xlu1 %1623 }
 0x31c   : > { %v5444_v49 = vsub.f32 %v5371_v9, %v1644_v18  ;;  %v1645_v27 = vmul.f32 0.0078125, %v1624_v29  ;;  %1698 = vadd.xlane.f32.xlu0 %v1674_v1  ;;  %v1675_v4 = vmul.f32 %v5438_v0, %v5438_v0 }
 0x31e   : > { %v5452_v36 = vsub.f32 %v5374_v35, %v1645_v27  ;;  %1700 = vadd.xlane.f32.xlu1 %v1675_v4  ;;  %v1676_v30 = vmul.f32 %v5444_v49, %v5444_v49  ;;  %v687_v35 = vpack.c.bf16 %v4724_v57, %v4723_v48 }
 0x320   : > { %1702 = vadd.xlane.f32.xlu0 %v1676_v30  ;;  %v1677_v9 = vmul.f32 %v5452_v36, %v5452_v36  ;;  %3895 = vmatmul.mubr.msk.bf16.vlgmr.msra.gmra.mrb[0].mxu0 %vm733_vm0, %v687_v35 }
 0x321   : > { %3939 = vmatpush3.bf16.msra.mxu0 %v4321_v14  ;;  %3898 = vmatprep.mubr.msk.bf16.mxu0 %vm733_vm0, %v688_v3  ;;  %v5526_v3 = vld [vmem:[%s6418_s6] ss:$0 sm:$0xff]  ;;  %s3762_s6 = sshll.u32 %s4932_s2, 11  ;;  %s6332_s2 = scalar_lea.sflag [#allocation3], %s637_s21 }
 0x322   : > { %1704 = vadd.xlane.f32.xlu1 %v1677_v9  ;;  %3940 = vmatprep.subr.bf16.mxu0 %v4322_v45  ;;  %s6323_s0 = scalar_lea.hbm %s6393_s20, %s3762_s6  ;;  %s4743_s6 = scalar_lea.vmem %s4742_s28, 4096 }
 0x323   : > { %p4745_p1 = scmp.lt.s32.totalorder %s4743_s6, %s4737_s23 }
 0x325   : > { %3941 = vmatpush3.bf16.msra.mxu0 %v4322_v45  ;;  %p4746_p2 = por %p4745_p1, %p4744_p0 }
 0x326   : > { %3942 = vmatprep.subr.bf16.mxu0 %v4323_v33 }
 0x327   : > { %p4747_p3 = pnand %p4746_p2, %p4740_p13 }
 0x328   : > { %3899 = vmatmul.mubr.msk.bf16.gmra.mrb[4].mxu0 %vm733_vm0, %v689_v13 }
 0x329   : > { %3943 = vmatpush3.bf16.msra.mxu0 %v4323_v33  ;;  %3902 = vmatprep.mubr.msk.bf16.mxu0 %vm733_vm0, %v690_v19 }
 0x32a   : > { %3944 = vmatprep.subr.bf16.mxu0 %v4324_v12 }
 0x32d   : > { %3945 = vmatpush3.bf16.msra.mxu0 %v4324_v12 }
 0x32e   : > { %3946 = vmatprep.subr.bf16.mxu0 %v4325_v44 }
 0x330   : > { %3903 = vmatmul.mubr.msk.bf16.gmra.mrb[8].mxu0 %vm733_vm0, %v691_v46 }
 0x331   : > { %3947 = vmatpush3.bf16.msra.mxu0 %v4325_v44  ;;  %3906 = vmatprep.mubr.msk.bf16.mxu0 %vm733_vm0, %v692_v32 }
 0x332   : > { %3948 = vmatprep.subr.bf16.mxu0 %v4326_v52 }
 0x335   : > { %3949 = vmatpush3.bf16.msra.mxu0 %v4326_v52 }
 0x336   : > { %3950 = vmatprep.subr.bf16.mxu0 %v4327_v39 }
 0x338   : > { %v1626_v47 = vpop.xlane.xlu0 %1625  ;;  %3907 = vmatmul.mubr.msk.bf16.gmra.mrb[12].mxu0 %vm733_vm0, %v693_v41 }
 0x339   : > { %v1646_v51 = vmul.f32 0.0078125, %v1626_v47  ;;  %3951 = vmatpush3.bf16.msra.mxu0 %v4327_v39 }
 0x33a   : > { %v1628_v60 = vpop.xlane.xlu1 %1627  ;;  %3952 = vmatprep.subr.bf16.mxu0 %v4328_v50 }
 0x33b   : > { %v5500_v5 = vsub.f32 %v5378_v22, %v1646_v51  ;;  %v1647_v17 = vmul.f32 0.0078125, %v1628_v60 }
 0x33c   : > { %v1630_v25 = vpop.xlane.xlu0 %1629 }
 0x33d   : > { %v5506_v54 = vsub.f32 %v5380_v38, %v1647_v17  ;;  %v1648_v55 = vmul.f32 0.0078125, %v1630_v25  ;;  %v1678_v56 = vmul.f32 %v5500_v5, %v5500_v5  ;;  %3953 = vmatpush3.bf16.msra.mxu0 %v4328_v50 }
 0x33e   : > { %v1632_v58 = vpop.xlane.xlu1 %1631 }
 0x33f   : > { %v5512_v22 = vsub.f32 %v5383_v62, %v1648_v55  ;;  %v1649_v61 = vmul.f32 0.0078125, %v1632_v58  ;;  %1706 = vadd.xlane.f32.xlu0 %v1678_v56  ;;  %v1679_v18 = vmul.f32 %v5506_v54, %v5506_v54 }
 0x341   : > { %v5517_v38 = vsub.f32 %v5386_v34, %v1649_v61  ;;  %1708 = vadd.xlane.f32.xlu1 %v1679_v18  ;;  %v1680_v1 = vmul.f32 %v5512_v22, %v5512_v22 }
 0x343   : > { %1710 = vadd.xlane.f32.xlu0 %v1680_v1  ;;  %v1681_v29 = vmul.f32 %v5517_v38, %v5517_v38 }
 0x345   : > { %1712 = vadd.xlane.f32.xlu1 %v1681_v29 }
 0x37f   : > { %v1683_v62 = vpop.xlane.xlu0 %1682 }
 0x380   : > { %v1714_v27 = vmul.f32 0.0078125, %v1683_v62 }
 0x381   : > { %v1685_v4 = vpop.xlane.xlu1 %1684 }
 0x382   : > { %v1730_v10 = vadd.f32 1e-05, %v1714_v27  ;;  %v1715_v30 = vmul.f32 0.0078125, %v1685_v4 }
 0x383   : > { %v1687_v9 = vpop.xlane.xlu0 %1686 }
 0x384   : > { %4529 = vrsqrt.f32 %v1730_v10  ;;  %v1731_v14 = vadd.f32 1e-05, %v1715_v30  ;;  %v1716_v34 = vmul.f32 0.0078125, %v1687_v9 }
 0x386   : > { %4531 = vrsqrt.f32 %v1731_v14  ;;  %v1732_v48 = vadd.f32 1e-05, %v1716_v34 }
 0x387   : > { %v1689_v57 = vpop.xlane.xlu1 %1688 }
 0x388   : > { %4533 = vrsqrt.f32 %v1732_v48  ;;  %v1717_v35 = vmul.f32 0.0078125, %v1689_v57 }
 0x38a   : > { %v1733_v24 = vadd.f32 1e-05, %v1717_v35 }
 0x38c   : > { %4535 = vrsqrt.f32 %v1733_v24 }
 0x38e   : > { %v4530_v28 = vpop.eup %4529 }
 0x38f   : > { %v1762_v45 = vmul.f32 %v4530_v28, %v5390_v16 }
 0x390   : > { %v4532_v33 = vpop.eup %4531 }
 0x391   : > { %v1763_v2 = vmul.f32 %v4532_v33, %v5392_v37  ;;  %v1784_v13 = vmul.f32 %v5526_v3, %v1762_v45 }
 0x392   : > { %v4534_v31 = vpop.eup %4533 }
 0x393   : > { %v1764_v42 = vmul.f32 %v4534_v31, %v5396_v20  ;;  %v1785_v19 = vmul.f32 %v5526_v3, %v1763_v2  ;;  %v5539_v12 = vadd.f32 %v5532_v8, %v1784_v13 }
 0x395   : > { %v1786_v16 = vmul.f32 %v5526_v3, %v1764_v42  ;;  %v5543_v44 = vadd.f32 %v5532_v8, %v1785_v19  ;;  %v3680_v21 = vmul.f32 -1.442695, %v5539_v12 }
 0x396   : > { %v4536_v23 = vpop.eup %4535 }
 0x397   : > { %v1765_v37 = vmul.f32 %v4536_v23, %v5402_v59  ;;  %4537 = vpow2.f32 %v3680_v21  ;;  %v3681_v46 = vmul.f32 -1.442695, %v5543_v44  ;;  %v5549_v20 = vadd.f32 %v5532_v8, %v1786_v16 }
 0x399   : > { %v1787_v26 = vmul.f32 %v5526_v3, %v1765_v37  ;;  %4539 = vpow2.f32 %v3681_v46  ;;  %v3682_v53 = vmul.f32 -1.442695, %v5549_v20 }
 0x39b   : > { %v5554_v32 = vadd.f32 %v5532_v8, %v1787_v26  ;;  %4541 = vpow2.f32 %v3682_v53 }
 0x39d   : > { %v3683_v52 = vmul.f32 -1.442695, %v5554_v32 }
 0x39f   : > { %4543 = vpow2.f32 %v3683_v52 }
 0x3a1   : > { %v4538_v47 = vpop.eup %4537  ;;  %v1691_v59 = vpop.xlane.xlu0 %1690 }
 0x3a2   : > { %v1718_v39 = vmul.f32 0.0078125, %v1691_v59  ;;  %v1870_v51 = vadd.f32 1.0, %v4538_v47 }
 0x3a3   : > { %v4540_v40 = vpop.eup %4539  ;;  %v1693_v63 = vpop.xlane.xlu1 %1692 }
 0x3a4   : > { %v1734_v41 = vadd.f32 1e-05, %v1718_v39  ;;  %v1719_v60 = vmul.f32 0.0078125, %v1693_v63  ;;  %v1871_v17 = vadd.f32 1.0, %v4540_v40  ;;  %4545 = vrcp.f32 %v1870_v51 }
 0x3a5   : > { %v4542_v25 = vpop.eup %4541  ;;  %v1695_v50 = vpop.xlane.xlu0 %1694 }
 0x3a6   : > { %4547 = vrsqrt.f32 %v1734_v41  ;;  %v1735_v55 = vadd.f32 1e-05, %v1719_v60  ;;  %v1720_v56 = vmul.f32 0.0078125, %v1695_v50  ;;  %v1872_v61 = vadd.f32 1.0, %v4542_v25 }
 0x3a7   : > { %v1697_v58 = vpop.xlane.xlu1 %1696  ;;  %4549 = vrcp.f32 %v1871_v17 }
 0x3a8   : > { %4551 = vrsqrt.f32 %v1735_v55  ;;  %v1736_v18 = vadd.f32 1e-05, %v1720_v56  ;;  %v1721_v1 = vmul.f32 0.0078125, %v1697_v58 }
 0x3a9   : > { %v4544_v29 = vpop.eup %4543  ;;  %v1699_v62 = vpop.xlane.xlu0 %1698 }
 0x3aa   : > { %4553 = vrsqrt.f32 %v1736_v18  ;;  %v1737_v27 = vadd.f32 1e-05, %v1721_v1  ;;  %v1722_v4 = vmul.f32 0.0078125, %v1699_v62  ;;  %v1873_v10 = vadd.f32 1.0, %v4544_v29 }
 0x3ab   : > { %v1701_v30 = vpop.xlane.xlu1 %1700  ;;  %4555 = vrcp.f32 %v1872_v61 }
 0x3ac   : > { %4557 = vrsqrt.f32 %v1737_v27  ;;  %v1738_v9 = vadd.f32 1e-05, %v1722_v4  ;;  %v1723_v14 = vmul.f32 0.0078125, %v1701_v30 }
 0x3ad   : > { %v1703_v34 = vpop.xlane.xlu0 %1702  ;;  %4559 = vrcp.f32 %v1873_v10 }
 0x3ae   : > { %4561 = vrsqrt.f32 %v1738_v9  ;;  %v1739_v48 = vadd.f32 1e-05, %v1723_v14  ;;  %v1724_v57 = vmul.f32 0.0078125, %v1703_v34  ;;  %v4546_v35 = vpop.eup %4545 }
 0x3af   : > { %v1705_v24 = vpop.xlane.xlu1 %1704  ;;  %v1918_v19 = vmul.f32 %v4546_v35, %v5539_v12 }
 0x3b0   : > { %v4548_v28 = vpop.eup %4547  ;;  %4563 = vrsqrt.f32 %v1739_v48  ;;  %v1740_v45 = vadd.f32 1e-05, %v1724_v57  ;;  %v1725_v33 = vmul.f32 0.0078125, %v1705_v24 }
 0x3b1   : > { %v4550_v2 = vpop.eup %4549  ;;  %v1766_v13 = vmul.f32 %v4548_v28, %v5406_v15 }
 0x3b2   : > { %v4552_v31 = vpop.eup %4551  ;;  %4565 = vrsqrt.f32 %v1740_v45  ;;  %v1741_v42 = vadd.f32 1e-05, %v1725_v33  ;;  %v1919_v16 = vmul.f32 %v4550_v2, %v5543_v44 }
 0x3b3   : > { %v1767_v21 = vmul.f32 %v4552_v31, %v5408_v11  ;;  %v1788_v23 = vmul.f32 %v5526_v3, %v1766_v13 }
 0x3b4   : > { %v4554_v37 = vpop.eup %4553  ;;  %4567 = vrsqrt.f32 %v1741_v42  ;;  %v1934_v46 = vpack.c.bf16 %v1919_v16, %v1918_v19 }
 0x3b5   : > { %v4556_v26 = vpop.eup %4555  ;;  %v1789_v53 = vmul.f32 %v5526_v3, %v1767_v21  ;;  %v5564_v52 = vadd.f32 %v5532_v8, %v1788_v23  ;;  %v1768_v15 = vmul.f32 %v4554_v37, %v5412_v6 }
 0x3b6   : > { %v4558_v47 = vpop.eup %4557  ;;  %3954 = vmatprep.mubr.bf16.mxu0 %v1934_v46  ;;  %v1920_v40 = vmul.f32 %v4556_v26, %v5549_v20 }
 0x3b7   : > { %v4560_v12 = vpop.eup %4559  ;;  %v5568_v44 = vadd.f32 %v5532_v8, %v1789_v53  ;;  %v3684_v11 = vmul.f32 -1.442695, %v5564_v52  ;;  %v1769_v59 = vmul.f32 %v4558_v47, %v5420_v7  ;;  %v1790_v39 = vmul.f32 %v5526_v3, %v1768_v15 }
 0x3b8   : > { %v4562_v51 = vpop.eup %4561  ;;  %v1921_v63 = vmul.f32 %v4560_v12, %v5554_v32 }
 0x3b9   : > { %4569 = vpow2.f32 %v3684_v11  ;;  %v3685_v6 = vmul.f32 -1.442695, %v5568_v44  ;;  %v1791_v41 = vmul.f32 %v5526_v3, %v1769_v59  ;;  %v5578_v60 = vadd.f32 %v5532_v8, %v1790_v39 }
 0x3ba   : > { %v4564_v17 = vpop.eup %4563  ;;  %v1935_v25 = vpack.c.bf16 %v1921_v63, %v1920_v40  ;;  %v1770_v50 = vmul.f32 %v4562_v51, %v5425_v43 }
 0x3bb   : > { %4571 = vpow2.f32 %v3685_v6  ;;  %v5582_v7 = vadd.f32 %v5532_v8, %v1791_v41  ;;  %v3686_v20 = vmul.f32 -1.442695, %v5578_v60  ;;  %v1771_v32 = vmul.f32 %v4564_v17, %v5438_v0 }
 0x3bc   : > { %v4566_v55 = vpop.eup %4565  ;;  %3955 = vmatmul.mubr.bf16.vlgmr.msra.gmra.mrb[16].mxu0 %v1935_v25  ;;  %v1792_v56 = vmul.f32 %v5526_v3, %v1770_v50 }
 0x3bd   : > { %4573 = vpow2.f32 %v3686_v20  ;;  %v3687_v58 = vmul.f32 -1.442695, %v5582_v7  ;;  %v1793_v61 = vmul.f32 %v5526_v3, %v1771_v32  ;;  %v1772_v18 = vmul.f32 %v4566_v55, %v5444_v49 }
 0x3be   : > { %v4568_v43 = vpop.eup %4567  ;;  %v5591_v1 = vadd.f32 %v5532_v8, %v1792_v56 }
 0x3bf   : > { %4575 = vpow2.f32 %v3687_v58  ;;  %v5594_v29 = vadd.f32 %v5532_v8, %v1793_v61  ;;  %v1773_v0 = vmul.f32 %v4568_v43, %v5452_v36  ;;  %v1794_v62 = vmul.f32 %v5526_v3, %v1772_v18 }
 0x3c0   : > { %v3688_v27 = vmul.f32 -1.442695, %v5591_v1 }
 0x3c1   : > { %v3689_v4 = vmul.f32 -1.442695, %v5594_v29  ;;  %v1795_v10 = vmul.f32 %v5526_v3, %v1773_v0  ;;  %v5602_v49 = vadd.f32 %v5532_v8, %v1794_v62 }
 0x3c2   : > { %4577 = vpow2.f32 %v3688_v27 }
 0x3c3   : > { %v4570_v30 = vpop.eup %4569  ;;  %4579 = vpow2.f32 %v3689_v4  ;;  %v5605_v9 = vadd.f32 %v5532_v8, %v1795_v10  ;;  %v3690_v14 = vmul.f32 -1.442695, %v5602_v49 }
 0x3c4   : > { %v1874_v36 = vadd.f32 1.0, %v4570_v30 }
 0x3c5   : > { %v4572_v34 = vpop.eup %4571  ;;  %4581 = vpow2.f32 %v3690_v14  ;;  %v3691_v48 = vmul.f32 -1.442695, %v5605_v9 }
 0x3c6   : > { %v1875_v57 = vadd.f32 1.0, %v4572_v34  ;;  %4583 = vrcp.f32 %v1874_v36 }
 0x3c7   : > { %v4574_v35 = vpop.eup %4573  ;;  %4585 = vpow2.f32 %v3691_v48 }
 0x3c8   : > { %4587 = vrcp.f32 %v1875_v57  ;;  %v1876_v24 = vadd.f32 1.0, %v4574_v35 }
 0x3c9   : > { %v4576_v28 = vpop.eup %4575 }
 0x3ca   : > { %v1877_v45 = vadd.f32 1.0, %v4576_v28  ;;  %4589 = vrcp.f32 %v1876_v24 }
 0x3cc   : > { %v4578_v33 = vpop.eup %4577  ;;  %v1707_v2 = vpop.xlane.xlu0 %1706  ;;  %4591 = vrcp.f32 %v1877_v45 }
 0x3cd   : > { %v4580_v13 = vpop.eup %4579  ;;  %v1726_v31 = vmul.f32 0.0078125, %v1707_v2  ;;  %v1878_v42 = vadd.f32 1.0, %v4578_v33 }
 0x3ce   : > { %v1709_v19 = vpop.xlane.xlu1 %1708  ;;  %v1879_v16 = vadd.f32 1.0, %v4580_v13 }
 0x3cf   : > { %v4582_v21 = vpop.eup %4581  ;;  %v1742_v23 = vadd.f32 1e-05, %v1726_v31  ;;  %v1727_v37 = vmul.f32 0.0078125, %v1709_v19  ;;  %4593 = vrcp.f32 %v1878_v42 }
 0x3d0   : > { %v4584_v46 = vpop.eup %4583  ;;  %v1711_v26 = vpop.xlane.xlu0 %1710  ;;  %4595 = vrcp.f32 %v1879_v16  ;;  %v1880_v53 = vadd.f32 1.0, %v4582_v21 }
 0x3d1   : > { %v4586_v15 = vpop.eup %4585  ;;  %4597 = vrsqrt.f32 %v1742_v23  ;;  %v1743_v47 = vadd.f32 1e-05, %v1727_v37  ;;  %v1728_v12 = vmul.f32 0.0078125, %v1711_v26  ;;  %v1922_v39 = vmul.f32 %v4584_v46, %v5564_v52 }
 0x3d2   : > { %v4588_v11 = vpop.eup %4587  ;;  %v1713_v59 = vpop.xlane.xlu1 %1712  ;;  %v1881_v51 = vadd.f32 1.0, %v4586_v15  ;;  %4599 = vrcp.f32 %v1880_v53 }
 0x3d3   : > { %4601 = vrsqrt.f32 %v1743_v47  ;;  %v1744_v40 = vadd.f32 1e-05, %v1728_v12  ;;  %v1729_v63 = vmul.f32 0.0078125, %v1713_v59  ;;  %v1923_v6 = vmul.f32 %v4588_v11, %v5568_v44 }
 0x3d4   : > { %v4590_v41 = vpop.eup %4589  ;;  %4603 = vrcp.f32 %v1881_v51 }
 0x3d5   : > { %4605 = vrsqrt.f32 %v1744_v40  ;;  %v1745_v17 = vadd.f32 1e-05, %v1729_v63  ;;  %v1936_v25 = vpack.c.bf16 %v1923_v6, %v1922_v39  ;;  %v1924_v20 = vmul.f32 %v4590_v41, %v5578_v60  ;;  %v3696_v39 = vld [vmem:[%s6382_s9] ss:$0 sm:$0xff] }
 0x3d6   : > { %v4592_v50 = vpop.eup %4591 }
 0x3d7   : > { %4607 = vrsqrt.f32 %v1745_v17  ;;  %3958 = vmatprep.mubr.bf16.mxu0 %v1936_v25  ;;  %v1925_v32 = vmul.f32 %v4592_v50, %v5582_v7 }
 0x3d9   : > { %v4594_v52 = vpop.eup %4593  ;;  %v1937_v55 = vpack.c.bf16 %v1925_v32, %v1924_v20 }
 0x3da   : > { %v4596_v56 = vpop.eup %4595  ;;  %v1926_v61 = vmul.f32 %v4594_v52, %v5591_v1 }
 0x3db   : > { %v4598_v58 = vpop.eup %4597  ;;  %3959 = vmatmul.mubr.bf16.gmra.mrb[20].mxu0 %v1937_v55  ;;  %v1927_v44 = vmul.f32 %v4596_v56, %v5594_v29 }
 0x3dc   : > { %v4600_v18 = vpop.eup %4599  ;;  %v1774_v43 = vmul.f32 %v4598_v58, %v5500_v5 }
 0x3dd   : > { %v4602_v0 = vpop.eup %4601  ;;  %v1938_v62 = vpack.c.bf16 %v1927_v44, %v1926_v61  ;;  %v1928_v10 = vmul.f32 %v4600_v18, %v5602_v49 }
 0x3de   : > { %v4604_v27 = vpop.eup %4603  ;;  %v1775_v4 = vmul.f32 %v4602_v0, %v5506_v54  ;;  %v1796_v60 = vmul.f32 %v5526_v3, %v1774_v43 }
 0x3df   : > { %v4606_v7 = vpop.eup %4605  ;;  %3962 = vmatprep.mubr.bf16.mxu0 %v1938_v62  ;;  %v1929_v30 = vmul.f32 %v4604_v27, %v5605_v9 }
 0x3e0   : > { %v1797_v1 = vmul.f32 %v5526_v3, %v1775_v4  ;;  %v1818_v29 = vadd.f32 %v5532_v8, %v1796_v60  ;;  %v1776_v14 = vmul.f32 %v4606_v7, %v5512_v22 }
 0x3e1   : > { %v4608_v5 = vpop.eup %4607  ;;  %v1939_v36 = vpack.c.bf16 %v1929_v30, %v1928_v10 }
 0x3e2   : > { %v1819_v34 = vadd.f32 %v5532_v8, %v1797_v1  ;;  %v3692_v48 = vmul.f32 -1.442695, %v1818_v29  ;;  %v1777_v54 = vmul.f32 %v4608_v5, %v5517_v38  ;;  %v1798_v57 = vmul.f32 %v5526_v3, %v1776_v14 }
 0x3e3   : > { %3963 = vmatmul.mubr.bf16.gmra.mrb[24].mxu0 %v1939_v36 }
 0x3e4   : > { %4609 = vpow2.f32 %v3692_v48  ;;  %v3693_v49 = vmul.f32 -1.442695, %v1819_v34  ;;  %v1799_v9 = vmul.f32 %v5526_v3, %v1777_v54  ;;  %v1820_v35 = vadd.f32 %v5532_v8, %v1798_v57  ;;  %v4329_v48 = vld [vmem:[%s6387_s14] ss:$12 sps:$4 sm:$0xff]   ;;  %v4331_v54 = vld [vmem:[%s6387_s14 + $0x4] ss:$12 sps:$4 sm:$0xff]  }
 0x3e5   : > { %v4334_v57 = vld [vmem:[%s6387_s14 + $0x1c] ss:$12 sps:$4 sm:$0xff]   ;;  %2517 = vmatprep.subr.bf16.mxu1 %v4331_v54 }
 0x3e6   : > { %4611 = vpow2.f32 %v3693_v49  ;;  %v1821_v24 = vadd.f32 %v5532_v8, %v1799_v9  ;;  %v3694_v22 = vmul.f32 -1.442695, %v1820_v35  ;;  %v4335_v49 = vld [vmem:[%s6387_s14 + $0x8] ss:$12 sps:$4 sm:$0xff]   ;;  %2518 = vmatpush1.bf16.msra.mxu1 %v4329_v48  ;;  %v4332_v9 = vld [vmem:[%s6387_s14 + $0x18] ss:$12 sps:$4 sm:$0xff]  }
 0x3e7   : > { %3970 = vmatprep.subr.bf16.mxu0 %v4335_v49  ;;  %2519 = vmatprep.subr.bf16.mxu1 %v4334_v57 }
 0x3e8   : > { %4613 = vpow2.f32 %v3694_v22  ;;  %v3695_v28 = vmul.f32 -1.442695, %v1821_v24  ;;  %3971 = vmatpush3.bf16.msra.mxu0 %v4335_v49 }
 0x3ea   : > { %4615 = vpow2.f32 %v3695_v28  ;;  %2520 = vmatpush1.bf16.msra.mxu1 %v4332_v9 }
 0x3ee   : > { %v4610_v45 = vpop.eup %4609 }
 0x3ef   : > { %v1882_v33 = vadd.f32 1.0, %v4610_v45 }
 0x3f0   : > { %v4612_v2 = vpop.eup %4611 }
 0x3f1   : > { %v1883_v38 = vadd.f32 1.0, %v4612_v2  ;;  %4617 = vrcp.f32 %v1882_v33 }
 0x3f2   : > { %v4614_v13 = vpop.eup %4613 }
 0x3f3   : > { %4619 = vrcp.f32 %v1883_v38  ;;  %v1884_v31 = vadd.f32 1.0, %v4614_v13 }
 0x3f4   : > { %v4616_v42 = vpop.eup %4615 }
 0x3f5   : > { %v1885_v19 = vadd.f32 1.0, %v4616_v42  ;;  %4621 = vrcp.f32 %v1884_v31 }
 0x3f7   : > { %4623 = vrcp.f32 %v1885_v19 }
 0x3fb   : > { %v4618_v3 = vpop.eup %4617 }
 0x3fc   : > { %v1930_v21 = vmul.f32 %v4618_v3, %v1818_v29 }
 0x3fd   : > { %v4620_v16 = vpop.eup %4619 }
 0x3fe   : > { %v1931_v8 = vmul.f32 %v4620_v16, %v1819_v34 }
 0x3ff   : > { %v4622_v23 = vpop.eup %4621 }
 0x400   : > { %v1940_v37 = vpack.c.bf16 %v1931_v8, %v1930_v21  ;;  %v1932_v26 = vmul.f32 %v4622_v23, %v1820_v35  ;;  %v4338_v23 = vld [vmem:[%s6387_s14 + $0x34] ss:$12 sps:$4 sm:$0xff]  }
 0x401   : > { %v4624_v46 = vpop.eup %4623  ;;  %2521 = vmatprep.subr.bf16.mxu1 %v4338_v23  ;;  %v4355_v23 = vld [vmem:[%s6387_s14 + $0x80] ss:$12 sps:$4 sm:$0xff]  }
 0x402   : > { %3966 = vmatprep.mubr.bf16.mxu0 %v1940_v37  ;;  %v1933_v53 = vmul.f32 %v4624_v46, %v1821_v24  ;;  %v4339_v37 = vld [vmem:[%s6387_s14 + $0x20] ss:$12 sps:$4 sm:$0xff]  }
 0x403   : > { %3972 = vmatprep.subr.bf16.mxu0 %v4339_v37 }
 0x404   : > { %v1941_v15 = vpack.c.bf16 %v1933_v53, %v1932_v26  ;;  %v4336_v26 = vld [vmem:[%s6387_s14 + $0x30] ss:$12 sps:$4 sm:$0xff]   ;;  %3973 = vmatpush3.bf16.msra.mxu0 %v4339_v37 }
 0x405   : > { %2522 = vmatpush1.bf16.msra.mxu1 %v4336_v26 }
 0x406   : > { %3967 = vmatmul.mubr.bf16.gmra.mrb[28].mxu0 %v1941_v15 }
 0x40b   : > { %v5629_v47 = vpop.f32.mrb[12].mxu0 }
 0x40c   : > { %v5631_v12 = vpop.f32.mrb[13].mxu0 }
 0x40d   : > { %v5633_v11 = vpop.f32.mrb[14].mxu0 }
 0x40e   : > { %v5635_v59 = vpop.f32.mrb[15].mxu0 }
 0x40f   : > { %6420 = vst [vmem:[#allocation7_spill] sm:$0xff] %v5635_v59 }
 0x48f   : > { %v3956_v51 = vpop.f32.mrb[16].mxu0 }
 0x490   : > { %v2047_v40 = vpop.f32.mrb[17].mxu0  ;;  %v5645_v25 = vadd.f32 %v3956_v51, %v3696_v39 }
 0x491   : > { %v5640_v63 = vadd.f32 %v3696_v39, %v2047_v40  ;;  %v3957_v6 = vpop.f32.mrb[18].mxu0  ;;  %v4342_v40 = vld [vmem:[%s6387_s14 + $0x4c] ss:$12 sps:$4 sm:$0xff]  }
 0x492   : > { %v2050_v41 = vpop.f32.mrb[19].mxu0  ;;  %v5648_v50 = vadd.f32 %v3957_v6, %v3696_v39  ;;  %v4343_v6 = vld [vmem:[%s6387_s14 + $0x38] ss:$12 sps:$4 sm:$0xff]   ;;  %2523 = vmatprep.subr.bf16.mxu1 %v4342_v40 }
 0x493   : > { %v5642_v17 = vadd.f32 %v3696_v39, %v2050_v41  ;;  %2112 = vadd.xlane.f32.xlu0 %v5640_v63  ;;  %3974 = vmatprep.subr.bf16.mxu0 %v4343_v6 }
 0x494   : > { %3975 = vmatpush3.bf16.msra.mxu0 %v4343_v6  ;;  %v4802_v6 = vmov 0  }
 0x495   : > { %2114 = vadd.xlane.f32.xlu1 %v5642_v17  ;;  %2549 = vmatprep.mubr.bf16.mxu1 %v4802_v6 }
 0x497   : > { %2116 = vadd.xlane.f32.xlu0 %v5645_v25 }
 0x499   : > { %2118 = vadd.xlane.f32.xlu1 %v5648_v50 }
 0x4ae   : > { %v3960_v20 = vpop.f32.mrb[20].mxu0 }
 0x4af   : > { %v2063_v32 = vpop.f32.mrb[21].mxu0  ;;  %v5657_v61 = vadd.f32 %v3960_v20, %v3696_v39  ;;  %v4340_v20 = vld [vmem:[%s6387_s14 + $0x48] ss:$12 sps:$4 sm:$0xff]  }
 0x4b0   : > { %v5652_v52 = vadd.f32 %v3696_v39, %v2063_v32  ;;  %v3961_v55 = vpop.f32.mrb[22].mxu0  ;;  %2524 = vmatpush1.bf16.msra.mxu1 %v4340_v20 }
 0x4b1   : > { %v2066_v56 = vpop.f32.mrb[23].mxu0  ;;  %v5660_v44 = vadd.f32 %v3961_v55, %v3696_v39 }
 0x4b2   : > { %v5654_v58 = vadd.f32 %v3696_v39, %v2066_v56  ;;  %2120 = vadd.xlane.f32.xlu0 %v5652_v52 }
 0x4b4   : > { %2122 = vadd.xlane.f32.xlu1 %v5654_v58 }
 0x4b6   : > { %v3964_v18 = vpop.f32.mrb[24].mxu0  ;;  %2124 = vadd.xlane.f32.xlu0 %v5657_v61 }
 0x4b7   : > { %v2079_v43 = vpop.f32.mrb[25].mxu0  ;;  %v5669_v60 = vadd.f32 %v3964_v18, %v3696_v39 }
 0x4b8   : > { %v5663_v0 = vadd.f32 %v3696_v39, %v2079_v43  ;;  %v3965_v62 = vpop.f32.mrb[26].mxu0  ;;  %2126 = vadd.xlane.f32.xlu1 %v5660_v44 }
 0x4b9   : > { %v2082_v27 = vpop.f32.mrb[27].mxu0  ;;  %v5672_v7 = vadd.f32 %v3965_v62, %v3696_v39 }
 0x4ba   : > { %v5666_v4 = vadd.f32 %v3696_v39, %v2082_v27  ;;  %2128 = vadd.xlane.f32.xlu0 %v5663_v0 }
 0x4bc   : > { %2130 = vadd.xlane.f32.xlu1 %v5666_v4 }
 0x4be   : > { %2132 = vadd.xlane.f32.xlu0 %v5669_v60 }
 0x4c0   : > { %2134 = vadd.xlane.f32.xlu1 %v5672_v7 }
 0x4d9   : > { %v3968_v10 = vpop.f32.mrb[28].mxu0 }
 0x4da   : > { %v2095_v30 = vpop.f32.mrb[29].mxu0  ;;  %v5681_v36 = vadd.f32 %v3968_v10, %v3696_v39  ;;  %v4346_v10 = vld [vmem:[%s6387_s14 + $0x64] ss:$12 sps:$4 sm:$0xff]  }
 0x4db   : > { %v5676_v1 = vadd.f32 %v3696_v39, %v2095_v30  ;;  %v3969_v29 = vpop.f32.mrb[30].mxu0  ;;  %v4347_v30 = vld [vmem:[%s6387_s14 + $0x50] ss:$12 sps:$4 sm:$0xff]   ;;  %2525 = vmatprep.subr.bf16.mxu1 %v4346_v10 }
 0x4dc   : > { %v2098_v14 = vpop.f32.mrb[31].mxu0  ;;  %6423 = vst [vmem:[#allocation10_spill] sm:$0xff] %v5681_v36  ;;  %v5684_v34 = vadd.f32 %v3969_v29, %v3696_v39  ;;  %3976 = vmatprep.subr.bf16.mxu0 %v4347_v30 }
 0x4dd   : > { %6421 = vst [vmem:[#allocation8_spill] sm:$0xff] %v5676_v1  ;;  %v5678_v5 = vadd.f32 %v3696_v39, %v2098_v14  ;;  %2136 = vadd.xlane.f32.xlu0 %v5676_v1  ;;  %v4344_v14 = vld [vmem:[%s6387_s14 + $0x60] ss:$12 sps:$4 sm:$0xff]   ;;  %3977 = vmatpush3.bf16.msra.mxu0 %v4347_v30 }
 0x4de   : > { %6424 = vst [vmem:[#allocation11_spill] sm:$0xff] %v5684_v34  ;;  %2526 = vmatpush1.bf16.msra.mxu1 %v4344_v14 }
 0x4df   : > { %6422 = vst [vmem:[#allocation9_spill] sm:$0xff] %v5678_v5  ;;  %2138 = vadd.xlane.f32.xlu1 %v5678_v5 }
 0x4e1   : > { %2140 = vadd.xlane.f32.xlu0 %v5681_v36 }
 0x4e3   : > { %2142 = vadd.xlane.f32.xlu1 %v5684_v34 }
 0x520   : > { %v2113_v35 = vpop.xlane.xlu0 %2112 }
 0x521   : > { %v2144_v24 = vmul.f32 0.0078125, %v2113_v35 }
 0x522   : > { %v2115_v22 = vpop.xlane.xlu1 %2114 }
 0x523   : > { %v5704_v28 = vsub.f32 %v5640_v63, %v2144_v24  ;;  %v2145_v45 = vmul.f32 0.0078125, %v2115_v22  ;;  %v4350_v22 = vld [vmem:[%s6387_s14 + $0x7c] ss:$12 sps:$4 sm:$0xff]  }
 0x524   : > { %v2117_v33 = vpop.xlane.xlu0 %2116  ;;  %2527 = vmatprep.subr.bf16.mxu1 %v4350_v22 }
 0x525   : > { %v5707_v2 = vsub.f32 %v5642_v17, %v2145_v45  ;;  %v2146_v38 = vmul.f32 0.0078125, %v2117_v33  ;;  %v2176_v13 = vmul.f32 %v5704_v28, %v5704_v28  ;;  %v4351_v45 = vld [vmem:[%s6387_s14 + $0x68] ss:$12 sps:$4 sm:$0xff]  }
 0x526   : > { %v2119_v31 = vpop.xlane.xlu1 %2118  ;;  %3978 = vmatprep.subr.bf16.mxu0 %v4351_v45 }
 0x527   : > { %v5712_v42 = vsub.f32 %v5645_v25, %v2146_v38  ;;  %v2147_v19 = vmul.f32 0.0078125, %v2119_v31  ;;  %2192 = vadd.xlane.f32.xlu0 %v2176_v13  ;;  %v2177_v3 = vmul.f32 %v5707_v2, %v5707_v2  ;;  %v4348_v38 = vld [vmem:[%s6387_s14 + $0x78] ss:$12 sps:$4 sm:$0xff]   ;;  %3979 = vmatpush3.bf16.msra.mxu0 %v4351_v45 }
 0x528   : > { %2528 = vmatpush1.bf16.msra.mxu1 %v4348_v38  ;;  %3980 = vmatprep.subr.bf16.mxu0 %v4355_v23  ;;  %v2743_v38 = vld [vmem:[%s6389_s16] sm:$0xff] }
 0x529   : > { %v5717_v16 = vsub.f32 %v5648_v50, %v2147_v19  ;;  %2194 = vadd.xlane.f32.xlu1 %v2177_v3  ;;  %v2178_v21 = vmul.f32 %v5712_v42, %v5712_v42  ;;  %v4354_v3 = vld [vmem:[%s6387_s14 + $0x94] ss:$12 sps:$4 sm:$0xff]  }
 0x52a   : > { %2529 = vmatprep.subr.bf16.mxu1 %v4354_v3 }
 0x52b   : > { %2196 = vadd.xlane.f32.xlu0 %v2178_v21  ;;  %v2179_v8 = vmul.f32 %v5717_v16, %v5717_v16  ;;  %3981 = vmatpush3.bf16.msra.mxu0 %v4355_v23 }
 0x52d   : > { %2198 = vadd.xlane.f32.xlu1 %v2179_v8  ;;  %v4352_v8 = vld [vmem:[%s6387_s14 + $0x90] ss:$12 sps:$4 sm:$0xff]  }
 0x52e   : > { %2530 = vmatpush1.bf16.msra.mxu1 %v4352_v8 }
 0x53f   : > { %v2121_v46 = vpop.xlane.xlu0 %2120 }
 0x540   : > { %v2148_v53 = vmul.f32 0.0078125, %v2121_v46 }
 0x541   : > { %v2123_v15 = vpop.xlane.xlu1 %2122 }
 0x542   : > { %v5733_v39 = vsub.f32 %v5652_v52, %v2148_v53  ;;  %v2149_v51 = vmul.f32 0.0078125, %v2123_v15  ;;  %v4358_v53 = vld [vmem:[%s6387_s14 + $0xac] ss:$12 sps:$4 sm:$0xff]  }
 0x543   : > { %v2125_v41 = vpop.xlane.xlu0 %2124  ;;  %v4359_v15 = vld [vmem:[%s6387_s14 + $0x98] ss:$12 sps:$4 sm:$0xff]   ;;  %2531 = vmatprep.subr.bf16.mxu1 %v4358_v53 }
 0x544   : > { %v5745_v32 = vsub.f32 %v5654_v58, %v2149_v51  ;;  %v2150_v55 = vmul.f32 0.0078125, %v2125_v41  ;;  %v2180_v56 = vmul.f32 %v5733_v39, %v5733_v39  ;;  %v4356_v41 = vld [vmem:[%s6387_s14 + $0xa8] ss:$12 sps:$4 sm:$0xff]   ;;  %3982 = vmatprep.subr.bf16.mxu0 %v4359_v15 }
 0x545   : > { %v2127_v18 = vpop.xlane.xlu1 %2126  ;;  %2532 = vmatpush1.bf16.msra.mxu1 %v4356_v41  ;;  %3983 = vmatpush3.bf16.msra.mxu0 %v4359_v15 }
 0x546   : > { %v5750_v43 = vsub.f32 %v5657_v61, %v2150_v55  ;;  %v2151_v62 = vmul.f32 0.0078125, %v2127_v18  ;;  %2200 = vadd.xlane.f32.xlu0 %v2180_v56  ;;  %v2181_v27 = vmul.f32 %v5745_v32, %v5745_v32  ;;  %v4360_v55 = vld [vmem:[%s6387_s14 + $0xb0] ss:$12 sps:$4 sm:$0xff]  }
 0x547   : > { %v2129_v29 = vpop.xlane.xlu0 %2128  ;;  %3984 = vmatprep.subr.bf16.mxu0 %v4360_v55 }
 0x548   : > { %v5764_v48 = vsub.f32 %v5660_v44, %v2151_v62  ;;  %v2152_v54 = vmul.f32 0.0078125, %v2129_v29  ;;  %2202 = vadd.xlane.f32.xlu1 %v2181_v27  ;;  %v2182_v57 = vmul.f32 %v5750_v43, %v5750_v43 }
 0x549   : > { %v2131_v49 = vpop.xlane.xlu1 %2130  ;;  %3985 = vmatpush3.bf16.msra.mxu0 %v4360_v55 }
 0x54a   : > { %v5769_v9 = vsub.f32 %v5663_v0, %v2152_v54  ;;  %v2153_v35 = vmul.f32 0.0078125, %v2131_v49  ;;  %2204 = vadd.xlane.f32.xlu0 %v2182_v57  ;;  %v2183_v24 = vmul.f32 %v5764_v48, %v5764_v48 }
 0x54b   : > { %v2133_v33 = vpop.xlane.xlu0 %2132 }
 0x54c   : > { %v5783_v13 = vsub.f32 %v5666_v4, %v2153_v35  ;;  %v2154_v31 = vmul.f32 0.0078125, %v2133_v33  ;;  %2206 = vadd.xlane.f32.xlu1 %v2183_v24  ;;  %v2184_v19 = vmul.f32 %v5769_v9, %v5769_v9 }
 0x54d   : > { %v2135_v21 = vpop.xlane.xlu1 %2134 }
 0x54e   : > { %v5797_v37 = vsub.f32 %v5669_v60, %v2154_v31  ;;  %v2155_v46 = vmul.f32 0.0078125, %v2135_v21  ;;  %2208 = vadd.xlane.f32.xlu0 %v2184_v19  ;;  %v2185_v26 = vmul.f32 %v5783_v13, %v5783_v13  ;;  %v2744_v31 = vld [vmem:[%s6389_s16 + $0x8] sm:$0xff] }
 0x54f   : > { %v4116_v19 = vpack.c.bf16 %v2744_v31, %v2743_v38 }
 0x550   : > { %v5808_v51 = vsub.f32 %v5672_v7, %v2155_v46  ;;  %2210 = vadd.xlane.f32.xlu1 %v2185_v26  ;;  %v2186_v40 = vmul.f32 %v5797_v37, %v5797_v37 }
 0x551   : > { %4117 = vmatprep.subr.bf16.mxu0 %v4116_v19 }
 0x552   : > { %2212 = vadd.xlane.f32.xlu0 %v2186_v40  ;;  %v2187_v20 = vmul.f32 %v5808_v51, %v5808_v51 }
 0x554   : > { %2214 = vadd.xlane.f32.xlu1 %v2187_v20 }
 0x56a   : > { %v2137_v56 = vpop.xlane.xlu0 %2136 }
 0x56b   : > { %v2156_v18 = vmul.f32 0.0078125, %v2137_v56 }
 0x56c   : > { %v2139_v62 = vpop.xlane.xlu1 %2138 }
 0x56d   : > { %v5822_v27 = vsub.f32 %v5676_v1, %v2156_v18  ;;  %v2157_v10 = vmul.f32 0.0078125, %v2139_v62  ;;  %v5850_v18 = vld [vmem:[%s6385_s12] ss:$0 sm:$0xff] }
 0x56e   : > { %v2141_v30 = vpop.xlane.xlu0 %2140 }
 0x56f   : > { %v5825_v29 = vsub.f32 %v5678_v5, %v2157_v10  ;;  %v2158_v14 = vmul.f32 0.0078125, %v2141_v30  ;;  %v2188_v54 = vmul.f32 %v5822_v27, %v5822_v27 }
 0x570   : > { %v2143_v57 = vpop.xlane.xlu1 %2142 }
 0x571   : > { %v5830_v49 = vsub.f32 %v5681_v36, %v2158_v14  ;;  %v2159_v35 = vmul.f32 0.0078125, %v2143_v57  ;;  %2216 = vadd.xlane.f32.xlu0 %v2188_v54  ;;  %v2189_v24 = vmul.f32 %v5825_v29, %v5825_v29  ;;  %v5858_v57 = vld [vmem:[%s6386_s13] ss:$0 sm:$0xff] }
 0x573   : > { %v5835_v22 = vsub.f32 %v5684_v34, %v2159_v35  ;;  %2218 = vadd.xlane.f32.xlu1 %v2189_v24  ;;  %v2190_v45 = vmul.f32 %v5830_v49, %v5830_v49 }
 0x575   : > { %2220 = vadd.xlane.f32.xlu0 %v2190_v45  ;;  %v2191_v33 = vmul.f32 %v5835_v22, %v5835_v22 }
 0x577   : > { %2222 = vadd.xlane.f32.xlu1 %v2191_v33 }
 0x5b4   : > { %v2193_v3 = vpop.xlane.xlu0 %2192 }
 0x5b5   : > { %v2224_v21 = vmul.f32 0.0078125, %v2193_v3 }
 0x5b6   : > { %v2195_v8 = vpop.xlane.xlu1 %2194 }
 0x5b7   : > { %v2240_v23 = vadd.f32 1e-05, %v2224_v21  ;;  %v2225_v46 = vmul.f32 0.0078125, %v2195_v8  ;;  %v2745_v21 = vld [vmem:[%s6389_s16 + $0x10] sm:$0xff] }
 0x5b8   : > { %v2197_v26 = vpop.xlane.xlu0 %2196 }
 0x5b9   : > { %4625 = vrsqrt.f32 %v2240_v23  ;;  %v2241_v53 = vadd.f32 1e-05, %v2225_v46  ;;  %v2226_v15 = vmul.f32 0.0078125, %v2197_v26  ;;  %v2747_v26 = vld [vmem:[%s6389_s16 + $0x20] sm:$0xff] }
 0x5ba   : > { %v2199_v40 = vpop.xlane.xlu1 %2198 }
 0x5bb   : > { %4627 = vrsqrt.f32 %v2241_v53  ;;  %v2242_v41 = vadd.f32 1e-05, %v2226_v15  ;;  %v2227_v20 = vmul.f32 0.0078125, %v2199_v40  ;;  %v2748_v53 = vld [vmem:[%s6389_s16 + $0x28] sm:$0xff] }
 0x5bd   : > { %4629 = vrsqrt.f32 %v2242_v41  ;;  %v2243_v55 = vadd.f32 1e-05, %v2227_v20  ;;  %v4124_v41 = vpack.c.bf16 %v2748_v53, %v2747_v26 }
 0x5bf   : > { %4631 = vrsqrt.f32 %v2243_v55  ;;  %v2749_v55 = vld [vmem:[%s6389_s16 + $0x30] sm:$0xff] }
 0x5c3   : > { %v4626_v56 = vpop.eup %4625 }
 0x5c4   : > { %v2272_v62 = vmul.f32 %v4626_v56, %v5704_v28  ;;  %v2750_v56 = vld [vmem:[%s6389_s16 + $0x38] sm:$0xff] }
 0x5c5   : > { %v4628_v10 = vpop.eup %4627 }
 0x5c6   : > { %v2294_v30 = vmul.f32 %v5850_v18, %v2272_v62  ;;  %v2273_v14 = vmul.f32 %v4628_v10, %v5707_v2 }
 0x5c7   : > { %v4630_v54 = vpop.eup %4629 }
 0x5c8   : > { %v2295_v35 = vmul.f32 %v5850_v18, %v2273_v14  ;;  %v2274_v24 = vmul.f32 %v4630_v54, %v5712_v42  ;;  %v2316_v38 = vadd.f32 %v5858_v57, %v2294_v30  ;;  %v2746_v42 = vld [vmem:[%s6389_s16 + $0x18] sm:$0xff]  ;;  %v4128_v54 = vpack.c.bf16 %v2750_v56, %v2749_v55 }
 0x5c9   : > { %v4632_v45 = vpop.eup %4631  ;;  %v4120_v46 = vpack.c.bf16 %v2746_v42, %v2745_v21  ;;  %v2753_v42 = vld [vmem:[%s6389_s16 + $0x50] sm:$0xff] }
 0x5ca   : > { %v2296_v33 = vmul.f32 %v5850_v18, %v2274_v24  ;;  %v2275_v28 = vmul.f32 %v4632_v45, %v5717_v16  ;;  %v2317_v31 = vadd.f32 %v5858_v57, %v2295_v35  ;;  %v2751_v24 = vld [vmem:[%s6389_s16 + $0x40] sm:$0xff]  ;;  %v2752_v45 = vld [vmem:[%s6389_s16 + $0x48] sm:$0xff] }
 0x5cc   : > { %v2297_v2 = vmul.f32 %v5850_v18, %v2275_v28  ;;  %v2332_v3 = vpack.c.bf16 %v2317_v31, %v2316_v38  ;;  %v2318_v8 = vadd.f32 %v5858_v57, %v2296_v33 }
 0x5ce   : > { %2550 = vmatmul.mubr.bf16.vlgmr.msra.gmra.mrb[16].mxu1 %v2332_v3  ;;  %3986 = vmatprep.mubr.bf16.mxu0 %v2332_v3  ;;  %v2319_v16 = vadd.f32 %v5858_v57, %v2297_v2  ;;  %v4132_v3 = vpack.c.bf16 %v2752_v45, %v2751_v24 }
 0x5cf   : > { %2559 = vmatprep.mubr.bf16.mxu1 %v4802_v6 }
 0x5d0   : > { %v2333_v23 = vpack.c.bf16 %v2319_v16, %v2318_v8  ;;  %v2754_v8 = vld [vmem:[%s6389_s16 + $0x58] sm:$0xff] }
 0x5d2   : > { %3987 = vmatmul.mubr.bf16.vlgmr.msra.gmra.mrb[32].mxu0 %v2333_v23 }
 0x5d3   : > { %v2201_v15 = vpop.xlane.xlu0 %2200  ;;  %4119 = vmatpush3.bf16.msra.mxu0 %v4116_v19 }
 0x5d4   : > { %v2228_v40 = vmul.f32 0.0078125, %v2201_v15  ;;  %4121 = vmatprep.subr.bf16.mxu0 %v4120_v46  ;;  %v4136_v15 = vpack.c.bf16 %v2754_v8, %v2753_v42 }
 0x5d5   : > { %v2203_v20 = vpop.xlane.xlu1 %2202 }
 0x5d6   : > { %v2244_v62 = vadd.f32 1e-05, %v2228_v40  ;;  %v2229_v10 = vmul.f32 0.0078125, %v2203_v20  ;;  %2560 = vmatmul.mubr.bf16.gmra.mrb[20].mxu1 %v2333_v23 }
 0x5d7   : > { %v2205_v30 = vpop.xlane.xlu0 %2204  ;;  %2569 = vmatprep.mubr.bf16.mxu1 %v4802_v6  ;;  %4123 = vmatpush3.bf16.msra.mxu0 %v4120_v46 }
 0x5d8   : > { %4633 = vrsqrt.f32 %v2244_v62  ;;  %v2245_v19 = vadd.f32 1e-05, %v2229_v10  ;;  %v2230_v14 = vmul.f32 0.0078125, %v2205_v30  ;;  %4125 = vmatprep.subr.bf16.mxu0 %v4124_v41 }
 0x5d9   : > { %v2207_v35 = vpop.xlane.xlu1 %2206 }
 0x5da   : > { %4635 = vrsqrt.f32 %v2245_v19  ;;  %v2246_v33 = vadd.f32 1e-05, %v2230_v14  ;;  %v2231_v28 = vmul.f32 0.0078125, %v2207_v35 }
 0x5db   : > { %v2209_v38 = vpop.xlane.xlu0 %2208  ;;  %4127 = vmatpush3.bf16.msra.mxu0 %v4124_v41 }
 0x5dc   : > { %4637 = vrsqrt.f32 %v2246_v33  ;;  %v2247_v31 = vadd.f32 1e-05, %v2231_v28  ;;  %v2232_v2 = vmul.f32 0.0078125, %v2209_v38  ;;  %4129 = vmatprep.subr.bf16.mxu0 %v4128_v54 }
 0x5dd   : > { %v2211_v21 = vpop.xlane.xlu1 %2210 }
 0x5de   : > { %4639 = vrsqrt.f32 %v2247_v31  ;;  %v2248_v16 = vadd.f32 1e-05, %v2232_v2  ;;  %v2233_v23 = vmul.f32 0.0078125, %v2211_v21 }
 0x5df   : > { %v2213_v46 = vpop.xlane.xlu0 %2212  ;;  %4131 = vmatpush3.bf16.msra.mxu0 %v4128_v54 }
 0x5e0   : > { %4641 = vrsqrt.f32 %v2248_v16  ;;  %v2249_v26 = vadd.f32 1e-05, %v2233_v23  ;;  %v2234_v53 = vmul.f32 0.0078125, %v2213_v46  ;;  %4133 = vmatprep.subr.bf16.mxu0 %v4132_v3 }
 0x5e1   : > { %v2215_v40 = vpop.xlane.xlu1 %2214 }
 0x5e2   : > { %v4634_v41 = vpop.eup %4633  ;;  %4643 = vrsqrt.f32 %v2249_v26  ;;  %v2250_v20 = vadd.f32 1e-05, %v2234_v53  ;;  %v2235_v55 = vmul.f32 0.0078125, %v2215_v40 }
 0x5e3   : > { %v2276_v56 = vmul.f32 %v4634_v41, %v5733_v39  ;;  %4135 = vmatpush3.bf16.msra.mxu0 %v4132_v3 }
 0x5e4   : > { %v4636_v62 = vpop.eup %4635  ;;  %4645 = vrsqrt.f32 %v2250_v20  ;;  %v2251_v10 = vadd.f32 1e-05, %v2235_v55  ;;  %4137 = vmatprep.subr.bf16.mxu0 %v4136_v15 }
 0x5e5   : > { %v2277_v30 = vmul.f32 %v4636_v62, %v5745_v32  ;;  %v2298_v19 = vmul.f32 %v5850_v18, %v2276_v56 }
 0x5e6   : > { %v4638_v14 = vpop.eup %4637  ;;  %4647 = vrsqrt.f32 %v2251_v10 }
 0x5e7   : > { %v2299_v54 = vmul.f32 %v5850_v18, %v2277_v30  ;;  %v2278_v35 = vmul.f32 %v4638_v14, %v5750_v43  ;;  %4139 = vmatpush3.bf16.msra.mxu0 %v4136_v15  ;;  %v2320_v45 = vadd.f32 %v5858_v57, %v2298_v19 }
 0x5e8   : > { %v4640_v24 = vpop.eup %4639 }
 0x5e9   : > { %v2321_v39 = vadd.f32 %v5858_v57, %v2299_v54  ;;  %v2279_v33 = vmul.f32 %v4640_v24, %v5764_v48  ;;  %v2300_v28 = vmul.f32 %v5850_v18, %v2278_v35 }
 0x5ea   : > { %v4642_v38 = vpop.eup %4641 }
 0x5eb   : > { %v2334_v32 = vpack.c.bf16 %v2321_v39, %v2320_v45  ;;  %v2301_v31 = vmul.f32 %v5850_v18, %v2279_v33  ;;  %v2280_v2 = vmul.f32 %v4642_v38, %v5769_v9  ;;  %v2322_v21 = vadd.f32 %v5858_v57, %v2300_v28 }
 0x5ec   : > { %v4644_v3 = vpop.eup %4643 }
 0x5ed   : > { %2570 = vmatmul.mubr.bf16.gmra.mrb[24].mxu1 %v2334_v32  ;;  %3990 = vmatprep.mubr.bf16.mxu0 %v2334_v32  ;;  %v2323_v43 = vadd.f32 %v5858_v57, %v2301_v31  ;;  %v2281_v42 = vmul.f32 %v4644_v3, %v5783_v13  ;;  %v2302_v8 = vmul.f32 %v5850_v18, %v2280_v2 }
 0x5ee   : > { %v4646_v48 = vpop.eup %4645  ;;  %2579 = vmatprep.mubr.bf16.mxu1 %v4802_v6 }
 0x5ef   : > { %v2335_v16 = vpack.c.bf16 %v2323_v43, %v2322_v21  ;;  %v2303_v23 = vmul.f32 %v5850_v18, %v2281_v42  ;;  %v2282_v46 = vmul.f32 %v4646_v48, %v5797_v37  ;;  %v2324_v26 = vadd.f32 %v5858_v57, %v2302_v8 }
 0x5f0   : > { %v4648_v9 = vpop.eup %4647 }
 0x5f1   : > { %3991 = vmatmul.mubr.bf16.gmra.mrb[36].mxu0 %v2335_v16  ;;  %v2325_v53 = vadd.f32 %v5858_v57, %v2303_v23  ;;  %v2283_v15 = vmul.f32 %v4648_v9, %v5808_v51  ;;  %v2304_v13 = vmul.f32 %v5850_v18, %v2282_v46  ;;  %v2756_v9 = vld [vmem:[%s6389_s16 + $0x68] sm:$0xff] }
 0x5f3   : > { %v2336_v40 = vpack.c.bf16 %v2325_v53, %v2324_v26  ;;  %v2305_v41 = vmul.f32 %v5850_v18, %v2283_v15  ;;  %v2326_v20 = vadd.f32 %v5858_v57, %v2304_v13  ;;  %v2374_v53 = vlaneseq }
 0x5f5   : > { %2580 = vmatmul.mubr.bf16.gmra.mrb[28].mxu1 %v2335_v16  ;;  %3994 = vmatprep.mubr.bf16.mxu0 %v2336_v40  ;;  %v2327_v55 = vadd.f32 %v5858_v57, %v2305_v41  ;;  %v5954_v15 = vshrl.u32 %v2374_v53, 7 }
 0x5f6   : > { %2589 = vmatprep.mubr.bf16.mxu1 %v4802_v6 }
 0x5f7   : > { %v2337_v37 = vpack.c.bf16 %v2327_v55, %v2326_v20  ;;  %v2376_v13 = vsub.s32 0, %v5954_v15  ;;  %v2380_v41 = vsub.s32 1, %v5954_v15 }
 0x5f9   : > { %3995 = vmatmul.mubr.bf16.gmra.mrb[40].mxu0 %v2337_v37 }
 0x5fd   : > { %2590 = vmatmul.mubr.bf16.gmra.mrb[32].mxu1 %v2336_v40  ;;  %v5960_v40 = vld [vmem:[%s6388_s15] sm:$0x7] }
 0x5fe   : > { %v2217_v56 = vpop.xlane.xlu0 %2216  ;;  %2599 = vmatprep.mubr.bf16.mxu1 %v4802_v6  ;;  %v5964_v20 = vrot.slane %v5960_v40, %v2376_v13  ;;  %v5967_v55 = vrot.slane %v5960_v40, %v2380_v41 }
 0x5ff   : > { %v2236_v51 = vmul.f32 0.0078125, %v2217_v56 }
 0x600   : > { %v2219_v62 = vpop.xlane.xlu1 %2218 }
 0x601   : > { %v2252_v10 = vadd.f32 1e-05, %v2236_v51  ;;  %v2237_v30 = vmul.f32 0.0078125, %v2219_v62 }
 0x602   : > { %v2221_v19 = vpop.xlane.xlu0 %2220 }
 0x603   : > { %4649 = vrsqrt.f32 %v2252_v10  ;;  %v2253_v14 = vadd.f32 1e-05, %v2237_v30  ;;  %v2238_v54 = vmul.f32 0.0078125, %v2221_v19 }
 0x604   : > { %v2223_v35 = vpop.xlane.xlu1 %2222 }
 0x605   : > { %4651 = vrsqrt.f32 %v2253_v14  ;;  %v2254_v24 = vadd.f32 1e-05, %v2238_v54  ;;  %v2239_v45 = vmul.f32 0.0078125, %v2223_v35  ;;  %2600 = vmatmul.mubr.bf16.gmra.mrb[36].mxu1 %v2337_v37 }
 0x606   : > { %2609 = vmatprep.mubr.bf16.mxu1 %v4802_v6 }
 0x607   : > { %4653 = vrsqrt.f32 %v2254_v24  ;;  %v2255_v39 = vadd.f32 1e-05, %v2239_v45 }
 0x609   : > { %4655 = vrsqrt.f32 %v2255_v39 }
 0x60d   : > { %v4650_v33 = vpop.eup %4649 }
 0x60e   : > { %v2284_v28 = vmul.f32 %v4650_v33, %v5822_v27 }
 0x60f   : > { %v4652_v38 = vpop.eup %4651 }
 0x610   : > { %v2285_v32 = vmul.f32 %v4652_v38, %v5825_v29  ;;  %v2306_v31 = vmul.f32 %v5850_v18, %v2284_v28 }
 0x611   : > { %v4654_v2 = vpop.eup %4653 }
 0x612   : > { %v2307_v3 = vmul.f32 %v5850_v18, %v2285_v32  ;;  %v2286_v21 = vmul.f32 %v4654_v2, %v5830_v49  ;;  %v2328_v42 = vadd.f32 %v5858_v57, %v2306_v31 }
 0x613   : > { %v4656_v43 = vpop.eup %4655 }
 0x614   : > { %v2329_v8 = vadd.f32 %v5858_v57, %v2307_v3  ;;  %v2287_v48 = vmul.f32 %v4656_v43, %v5835_v22  ;;  %v2308_v16 = vmul.f32 %v5850_v18, %v2286_v21  ;;  %v2755_v22 = vld [vmem:[%s6389_s16 + $0x60] sm:$0xff] }
 0x616   : > { %v2338_v27 = vpack.c.bf16 %v2329_v8, %v2328_v42  ;;  %v2309_v23 = vmul.f32 %v5850_v18, %v2287_v48  ;;  %v2330_v29 = vadd.f32 %v5858_v57, %v2308_v16  ;;  %v4140_v18 = vpack.c.bf16 %v2756_v9, %v2755_v22 }
 0x618   : > { %2610 = vmatmul.mubr.bf16.gmra.mrb[40].mxu1 %v2338_v27  ;;  %3998 = vmatprep.mubr.bf16.mxu0 %v2338_v27  ;;  %v2331_v46 = vadd.f32 %v5858_v57, %v2309_v23  ;;  %v2757_v57 = vld [vmem:[%s6389_s16 + $0x70] sm:$0xff] }
 0x619   : > { %2619 = vmatprep.mubr.bf16.mxu1 %v4802_v6  ;;  %4141 = vmatprep.subr.bf16.mxu0 %v4140_v18  ;;  %v2758_v6 = vld [vmem:[%s6389_s16 + $0x78] sm:$0xff] }
 0x61a   : > { %v2339_v49 = vpack.c.bf16 %v2331_v46, %v2330_v29  ;;  %4143 = vmatpush3.bf16.msra.mxu0 %v4140_v18  ;;  %v4144_v26 = vpack.c.bf16 %v2758_v6, %v2757_v57 }
 0x61c   : > { %3999 = vmatmul.mubr.bf16.gmra.mrb[44].mxu0 %v2339_v49  ;;  %4145 = vmatprep.subr.bf16.mxu0 %v4144_v26 }
 0x61e   : > { %4147 = vmatpush3.bf16.msra.mxu0 %v4144_v26 }
 0x620   : > { %2620 = vmatmul.mubr.bf16.gmra.mrb[44].mxu1 %v2339_v49 }
 0x6a1   : > { %v2551_v37 = vpop.f32.mrb[16].mxu1 }
 0x6a2   : > { %v2552_v56 = vadd.f32 %v2551_v37, %v5964_v20  ;;  %v2553_v51 = vpop.f32.mrb[17].mxu1 }
 0x6a3   : > { %v2554_v62 = vadd.f32 %v2553_v51, %v5967_v55  ;;  %v2555_v10 = vpop.f32.mrb[18].mxu1 }
 0x6a4   : > { %v2556_v30 = vadd.f32 %v2555_v10, %v5964_v20  ;;  %v2557_v19 = vpop.f32.mrb[19].mxu1 }
 0x6a5   : > { %v2727_v14 = vmul.f32 %v2554_v62, %v2552_v56  ;;  %v2558_v54 = vadd.f32 %v2557_v19, %v5967_v55  ;;  %v5973_v35 = vpop.f32.mrb[32].mxu0 }
 0x6a6   : > { %v5975_v24 = vpop.f32.mrb[33].mxu0 }
 0x6a7   : > { %v2728_v45 = vmul.f32 %v2558_v54, %v2556_v30  ;;  %v5977_v39 = vpop.f32.mrb[34].mxu0  ;;  %4034 = vmatprep.mubr.f32.mxu0 %v2727_v14 }
 0x6a8   : > { %v5979_v33 = vpop.f32.mrb[35].mxu0 }
 0x6a9   : > { %v2561_v28 = vpop.f32.mrb[20].mxu1  ;;  %4035 = vmatmul.mubr.f32.vlgmr.msra.gmra.mrb[48].mxu0 %v2728_v45 }
 0x6aa   : > { %v2562_v38 = vadd.f32 %v2561_v28, %v5964_v20  ;;  %v2563_v32 = vpop.f32.mrb[21].mxu1 }
 0x6ab   : > { %v2564_v31 = vadd.f32 %v2563_v32, %v5967_v55  ;;  %v2565_v2 = vpop.f32.mrb[22].mxu1 }
 0x6ac   : > { %v2566_v3 = vadd.f32 %v2565_v2, %v5964_v20  ;;  %v2567_v21 = vpop.f32.mrb[23].mxu1 }
 0x6ad   : > { %v2729_v43 = vmul.f32 %v2564_v31, %v2562_v38  ;;  %v2568_v42 = vadd.f32 %v2567_v21, %v5967_v55 }
 0x6af   : > { %v2730_v8 = vmul.f32 %v2568_v42, %v2566_v3  ;;  %4037 = vmatprep.mubr.f32.mxu0 %v2729_v43 }
 0x6b1   : > { %4038 = vmatmul.mubr.f32.gmra.mrb[50].mxu0 %v2730_v8 }
 0x6c0   : > { %v2571_v48 = vpop.f32.mrb[24].mxu1 }
 0x6c1   : > { %v2572_v16 = vadd.f32 %v2571_v48, %v5964_v20  ;;  %v2573_v27 = vpop.f32.mrb[25].mxu1 }
 0x6c2   : > { %v2574_v23 = vadd.f32 %v2573_v27, %v5967_v55  ;;  %v2575_v29 = vpop.f32.mrb[26].mxu1 }
 0x6c3   : > { %v2576_v46 = vadd.f32 %v2575_v29, %v5964_v20  ;;  %v2577_v49 = vpop.f32.mrb[27].mxu1 }
 0x6c4   : > { %v2731_v22 = vmul.f32 %v2574_v23, %v2572_v16  ;;  %v2578_v9 = vadd.f32 %v2577_v49, %v5967_v55  ;;  %v5989_v18 = vpop.f32.mrb[36].mxu0 }
 0x6c5   : > { %v5991_v57 = vpop.f32.mrb[37].mxu0 }
 0x6c6   : > { %v2732_v6 = vmul.f32 %v2578_v9, %v2576_v46  ;;  %v5993_v26 = vpop.f32.mrb[38].mxu0  ;;  %4040 = vmatprep.mubr.f32.mxu0 %v2731_v22 }
 0x6c7   : > { %v5995_v53 = vpop.f32.mrb[39].mxu0 }
 0x6c8   : > { %v2581_v13 = vpop.f32.mrb[28].mxu1  ;;  %4041 = vmatmul.mubr.f32.gmra.mrb[52].mxu0 %v2732_v6 }
 0x6c9   : > { %v2582_v41 = vadd.f32 %v2581_v13, %v5964_v20  ;;  %v2583_v37 = vpop.f32.mrb[29].mxu1 }
 0x6ca   : > { %v2584_v56 = vadd.f32 %v2583_v37, %v5967_v55  ;;  %v2585_v51 = vpop.f32.mrb[30].mxu1 }
 0x6cb   : > { %v2586_v62 = vadd.f32 %v2585_v51, %v5964_v20  ;;  %v2587_v10 = vpop.f32.mrb[31].mxu1 }
 0x6cc   : > { %v2733_v30 = vmul.f32 %v2584_v56, %v2582_v41  ;;  %v2588_v19 = vadd.f32 %v2587_v10, %v5967_v55  ;;  %v6001_v14 = vpop.f32.mrb[40].mxu0 }
 0x6cd   : > { %v6003_v54 = vpop.f32.mrb[41].mxu0 }
 0x6ce   : > { %v2734_v45 = vmul.f32 %v2588_v19, %v2586_v62  ;;  %v6005_v28 = vpop.f32.mrb[42].mxu0  ;;  %4043 = vmatprep.mubr.f32.mxu0 %v2733_v30 }
 0x6cf   : > { %v6007_v38 = vpop.f32.mrb[43].mxu0 }
 0x6d0   : > { %v2591_v32 = vpop.f32.mrb[32].mxu1  ;;  %4044 = vmatmul.mubr.f32.gmra.mrb[54].mxu0 %v2734_v45 }
 0x6d1   : > { %v2592_v31 = vadd.f32 %v2591_v32, %v5964_v20  ;;  %v2593_v2 = vpop.f32.mrb[33].mxu1 }
 0x6d2   : > { %v2594_v3 = vadd.f32 %v2593_v2, %v5967_v55  ;;  %v2595_v21 = vpop.f32.mrb[34].mxu1 }
 0x6d3   : > { %v2596_v43 = vadd.f32 %v2595_v21, %v5964_v20  ;;  %v2597_v42 = vpop.f32.mrb[35].mxu1 }
 0x6d4   : > { %v2735_v8 = vmul.f32 %v2594_v3, %v2592_v31  ;;  %v2598_v48 = vadd.f32 %v2597_v42, %v5967_v55 }
 0x6d6   : > { %v2736_v16 = vmul.f32 %v2598_v48, %v2596_v43  ;;  %4046 = vmatprep.mubr.f32.mxu0 %v2735_v8 }
 0x6d8   : > { %v2601_v27 = vpop.f32.mrb[36].mxu1  ;;  %4047 = vmatmul.mubr.f32.gmra.mrb[56].mxu0 %v2736_v16 }
 0x6d9   : > { %v2602_v23 = vadd.f32 %v2601_v27, %v5964_v20  ;;  %v2603_v29 = vpop.f32.mrb[37].mxu1 }
 0x6da   : > { %v2604_v46 = vadd.f32 %v2603_v29, %v5967_v55  ;;  %v2605_v49 = vpop.f32.mrb[38].mxu1 }
 0x6db   : > { %v2606_v22 = vadd.f32 %v2605_v49, %v5964_v20  ;;  %v2607_v9 = vpop.f32.mrb[39].mxu1 }
 0x6dc   : > { %v2737_v6 = vmul.f32 %v2604_v46, %v2602_v23  ;;  %v2608_v13 = vadd.f32 %v2607_v9, %v5967_v55 }
 0x6de   : > { %v2738_v41 = vmul.f32 %v2608_v13, %v2606_v22  ;;  %4049 = vmatprep.mubr.f32.mxu0 %v2737_v6 }
 0x6e0   : > { %4050 = vmatmul.mubr.f32.gmra.mrb[58].mxu0 %v2738_v41 }
 0x6eb   : > { %v2611_v37 = vpop.f32.mrb[40].mxu1 }
 0x6ec   : > { %v2612_v56 = vadd.f32 %v2611_v37, %v5964_v20  ;;  %v2613_v51 = vpop.f32.mrb[41].mxu1 }
 0x6ed   : > { %v2614_v62 = vadd.f32 %v2613_v51, %v5967_v55  ;;  %v2615_v10 = vpop.f32.mrb[42].mxu1 }
 0x6ee   : > { %v2616_v30 = vadd.f32 %v2615_v10, %v5964_v20  ;;  %v2617_v19 = vpop.f32.mrb[43].mxu1 }
 0x6ef   : > { %v2739_v45 = vmul.f32 %v2614_v62, %v2612_v56  ;;  %v2618_v32 = vadd.f32 %v2617_v19, %v5967_v55  ;;  %v6021_v31 = vpop.f32.mrb[44].mxu0 }
 0x6f0   : > { %v6023_v2 = vpop.f32.mrb[45].mxu0 }
 0x6f1   : > { %v2740_v3 = vmul.f32 %v2618_v32, %v2616_v30  ;;  %v6025_v21 = vpop.f32.mrb[46].mxu0  ;;  %4052 = vmatprep.mubr.f32.mxu0 %v2739_v45 }
 0x6f2   : > { %v6027_v43 = vpop.f32.mrb[47].mxu0 }
 0x6f3   : > { %v2621_v42 = vpop.f32.mrb[44].mxu1  ;;  %4053 = vmatmul.mubr.f32.gmra.mrb[60].mxu0 %v2740_v3 }
 0x6f4   : > { %v2622_v8 = vadd.f32 %v2621_v42, %v5964_v20  ;;  %v2623_v48 = vpop.f32.mrb[45].mxu1 }
 0x6f5   : > { %v2624_v16 = vadd.f32 %v2623_v48, %v5967_v55  ;;  %v2625_v27 = vpop.f32.mrb[46].mxu1 }
 0x6f6   : > { %v2626_v23 = vadd.f32 %v2625_v27, %v5964_v20  ;;  %v2627_v29 = vpop.f32.mrb[47].mxu1 }
 0x6f7   : > { %v2741_v46 = vmul.f32 %v2624_v16, %v2622_v8  ;;  %v2628_v49 = vadd.f32 %v2627_v29, %v5967_v55 }
 0x6f9   : > { %v2742_v22 = vmul.f32 %v2628_v49, %v2626_v23  ;;  %4055 = vmatprep.mubr.f32.mxu0 %v2741_v46 }
 0x6fb   : > { %4056 = vmatmul.mubr.f32.gmra.mrb[62].mxu0 %v2742_v22 }
 0x77c   : > { %v4036_v9 = vpop.f32.mrb[48].mxu0 }
 0x77d   : > { %v2825_v6 = vpop.f32.mrb[49].mxu0  ;;  %v2908_v13 = vsel %vm2904_vm2, %v4036_v9, -inf }
 0x77e   : > { %2909 = vmax.xlane.f32.xlu1 %v2908_v13  ;;  %v2905_v41 = vsel %vm2904_vm2, %v2825_v6, -inf }
 0x77f   : > { %2906 = vmax.xlane.f32.xlu0 %v2905_v41 }
 0x784   : > { %v4039_v37 = vpop.f32.mrb[50].mxu0 }
 0x785   : > { %v2835_v56 = vpop.f32.mrb[51].mxu0  ;;  %v2914_v20 = vsel %vm2904_vm2, %v4039_v37, -inf }
 0x786   : > { %2915 = vmax.xlane.f32.xlu1 %v2914_v20  ;;  %v2911_v51 = vsel %vm2904_vm2, %v2835_v56, -inf }
 0x787   : > { %2912 = vmax.xlane.f32.xlu0 %v2911_v51 }
 0x79b   : > { %v6037_v55 = vpop.f32.mrb[52].mxu0 }
 0x79c   : > { %v6039_v62 = vpop.f32.mrb[53].mxu0  ;;  %v2920_v10 = vsel %vm2904_vm2, %v6037_v55, -inf }
 0x79d   : > { %2921 = vmax.xlane.f32.xlu1 %v2920_v10  ;;  %v2917_v30 = vsel %vm2904_vm2, %v6039_v62, -inf }
 0x79e   : > { %2918 = vmax.xlane.f32.xlu0 %v2917_v30 }
 0x7a3   : > { %v6045_v19 = vpop.f32.mrb[54].mxu0 }
 0x7a4   : > { %v6047_v45 = vpop.f32.mrb[55].mxu0  ;;  %v2926_v32 = vsel %vm2904_vm2, %v6045_v19, -inf }
 0x7a5   : > { %2927 = vmax.xlane.f32.xlu1 %v2926_v32  ;;  %v2923_v3 = vsel %vm2904_vm2, %v6047_v45, -inf }
 0x7a6   : > { %2924 = vmax.xlane.f32.xlu0 %v2923_v3 }
 0x7ab   : > { %v6053_v42 = vpop.f32.mrb[56].mxu0 }
 0x7ac   : > { %v6055_v8 = vpop.f32.mrb[57].mxu0  ;;  %v2932_v48 = vsel %vm2904_vm2, %v6053_v42, -inf }
 0x7ad   : > { %2933 = vmax.xlane.f32.xlu1 %v2932_v48  ;;  %v2929_v16 = vsel %vm2904_vm2, %v6055_v8, -inf }
 0x7ae   : > { %2930 = vmax.xlane.f32.xlu0 %v2929_v16 }
 0x7b3   : > { %v6061_v27 = vpop.f32.mrb[58].mxu0 }
 0x7b4   : > { %v6063_v23 = vpop.f32.mrb[59].mxu0  ;;  %v2938_v29 = vsel %vm2904_vm2, %v6061_v27, -inf }
 0x7b5   : > { %2939 = vmax.xlane.f32.xlu1 %v2938_v29  ;;  %v2935_v46 = vsel %vm2904_vm2, %v6063_v23, -inf }
 0x7b6   : > { %2936 = vmax.xlane.f32.xlu0 %v2935_v46 }
 0x7c6   : > { %v6069_v49 = vpop.f32.mrb[60].mxu0 }
 0x7c7   : > { %v6071_v22 = vpop.f32.mrb[61].mxu0  ;;  %v2944_v13 = vsel %vm2904_vm2, %v6069_v49, -inf }
 0x7c8   : > { %2945 = vmax.xlane.f32.xlu1 %v2944_v13  ;;  %v2941_v41 = vsel %vm2904_vm2, %v6071_v22, -inf }
 0x7c9   : > { %2942 = vmax.xlane.f32.xlu0 %v2941_v41 }
 0x7ce   : > { %v6077_v20 = vpop.f32.mrb[62].mxu0 }
 0x7cf   : > { %v6079_v51 = vpop.f32.mrb[63].mxu0  ;;  %v2950_v10 = vsel %vm2904_vm2, %v6077_v20, -inf }
 0x7d0   : > { %2951 = vmax.xlane.f32.xlu1 %v2950_v10  ;;  %v2947_v30 = vsel %vm2904_vm2, %v6079_v51, -inf }
 0x7d1   : > { %2948 = vmax.xlane.f32.xlu0 %v2947_v30 }
 0x80b   : > { %v2910_v32 = vpop.xlane.xlu1 %2909 }
 0x80c   : > { %v2954_v3 = vsub.f32 %v4036_v9, %v2910_v32  ;;  %v2907_v48 = vpop.xlane.xlu0 %2906 }
 0x80d   : > { %v2953_v16 = vsub.f32 %v2825_v6, %v2907_v48 }
 0x80e   : > { %v2971_v29 = vmul.f32 1.442695, %v2954_v3 }
 0x80f   : > { %v2969_v46 = vmul.f32 1.442695, %v2953_v16 }
 0x810   : > { %4657 = vpow2.f32 %v2971_v29 }
 0x811   : > { %4659 = vpow2.f32 %v2969_v46 }
 0x813   : > { %v2916_v13 = vpop.xlane.xlu1 %2915 }
 0x814   : > { %v2956_v41 = vsub.f32 %v4039_v37, %v2916_v13  ;;  %v2913_v5 = vpop.xlane.xlu0 %2912 }
 0x815   : > { %v2955_v34 = vsub.f32 %v2835_v56, %v2913_v5 }
 0x816   : > { %v2975_v1 = vmul.f32 1.442695, %v2956_v41 }
 0x817   : > { %v2973_v59 = vmul.f32 1.442695, %v2955_v34 }
 0x818   : > { %4661 = vpow2.f32 %v2975_v1 }
 0x819   : > { %4663 = vpow2.f32 %v2973_v59 }
 0x81a   : > { %v6085_v10 = vpop.eup %4657 }
 0x81b   : > { %v6087_v36 = vpop.eup %4659  ;;  %v3004_v9 = vsel %vm2904_vm2, %v6085_v10, 0.0 }
 0x81c   : > { %3005 = vadd.xlane.f32.xlu1 %v3004_v9  ;;  %v3001_v6 = vsel %vm2904_vm2, %v6087_v36, 0.0  ;;  %v3081_v9 = vld [vmem:[%s6390_s17] sm:$0xf] }
 0x81d   : > { %3002 = vadd.xlane.f32.xlu0 %v3001_v6  ;;  %4058 = vmatprep.subr.msk.mxu1 %vm3130_vm3, %v3081_v9 }
 0x81e   : > { %4059 = vmatpush3.msk.msra.mxu1 %vm3130_vm3, %v3081_v9 }
 0x822   : > { %v6093_v30 = vpop.eup %4661 }
 0x823   : > { %v6095_v37 = vpop.eup %4663  ;;  %v3010_v1 = vsel %vm2904_vm2, %v6093_v30, 0.0 }
 0x824   : > { %3011 = vadd.xlane.f32.xlu1 %v3010_v1  ;;  %v3007_v59 = vsel %vm2904_vm2, %v6095_v37, 0.0 }
 0x825   : > { %3008 = vadd.xlane.f32.xlu0 %v3007_v59 }
 0x82a   : > { %v2922_v5 = vpop.xlane.xlu1 %2921 }
 0x82b   : > { %v2958_v34 = vsub.f32 %v6037_v55, %v2922_v5  ;;  %v2919_v56 = vpop.xlane.xlu0 %2918 }
 0x82c   : > { %v2957_v32 = vsub.f32 %v6039_v62, %v2919_v56 }
 0x82d   : > { %v2979_v3 = vmul.f32 1.442695, %v2958_v34 }
 0x82e   : > { %v2977_v48 = vmul.f32 1.442695, %v2957_v32 }
 0x82f   : > { %4665 = vpow2.f32 %v2979_v3 }
 0x830   : > { %4667 = vpow2.f32 %v2977_v48 }
 0x832   : > { %v2928_v16 = vpop.xlane.xlu1 %2927 }
 0x833   : > { %v2960_v29 = vsub.f32 %v6045_v19, %v2928_v16  ;;  %v2925_v46 = vpop.xlane.xlu0 %2924 }
 0x834   : > { %v2959_v13 = vsub.f32 %v6047_v45, %v2925_v46 }
 0x835   : > { %v2983_v41 = vmul.f32 1.442695, %v2960_v29 }
 0x836   : > { %v2981_v55 = vmul.f32 1.442695, %v2959_v13 }
 0x837   : > { %4669 = vpow2.f32 %v2983_v41 }
 0x838   : > { %4671 = vpow2.f32 %v2981_v55 }
 0x839   : > { %v6108_v62 = vpop.eup %4665 }
 0x83a   : > { %v6110_v6 = vpop.eup %4667  ;;  %v2934_v1 = vpop.xlane.xlu1 %2933  ;;  %v3016_v19 = vsel %vm2904_vm2, %v6108_v62, 0.0 }
 0x83b   : > { %v2962_v45 = vsub.f32 %v6053_v42, %v2934_v1  ;;  %v2931_v59 = vpop.xlane.xlu0 %2930  ;;  %3017 = vadd.xlane.f32.xlu1 %v3016_v19  ;;  %v3013_v5 = vsel %vm2904_vm2, %v6110_v6, 0.0 }
 0x83c   : > { %v2961_v34 = vsub.f32 %v6055_v8, %v2931_v59  ;;  %3014 = vadd.xlane.f32.xlu0 %v3013_v5 }
 0x83d   : > { %v2987_v56 = vmul.f32 1.442695, %v2962_v45 }
 0x83e   : > { %v2985_v32 = vmul.f32 1.442695, %v2961_v34 }
 0x83f   : > { %4673 = vpow2.f32 %v2987_v56 }
 0x840   : > { %4675 = vpow2.f32 %v2985_v32 }
 0x841   : > { %v6118_v3 = vpop.eup %4669 }
 0x842   : > { %v6120_v48 = vpop.eup %4671  ;;  %v2940_v16 = vpop.xlane.xlu1 %2939  ;;  %v3022_v42 = vsel %vm2904_vm2, %v6118_v3, 0.0 }
 0x843   : > { %v2964_v29 = vsub.f32 %v6061_v27, %v2940_v16  ;;  %v2937_v46 = vpop.xlane.xlu0 %2936  ;;  %3023 = vadd.xlane.f32.xlu1 %v3022_v42  ;;  %v3019_v8 = vsel %vm2904_vm2, %v6120_v48, 0.0 }
 0x844   : > { %v2963_v13 = vsub.f32 %v6063_v23, %v2937_v46  ;;  %3020 = vadd.xlane.f32.xlu0 %v3019_v8 }
 0x845   : > { %v2991_v41 = vmul.f32 1.442695, %v2964_v29 }
 0x846   : > { %v2989_v9 = vmul.f32 1.442695, %v2963_v13 }
 0x847   : > { %4677 = vpow2.f32 %v2991_v41 }
 0x848   : > { %4679 = vpow2.f32 %v2989_v9 }
 0x849   : > { %v6128_v55 = vpop.eup %4673 }
 0x84a   : > { %v6130_v1 = vpop.eup %4675  ;;  %v3028_v19 = vsel %vm2904_vm2, %v6128_v55, 0.0 }
 0x84b   : > { %3029 = vadd.xlane.f32.xlu1 %v3028_v19  ;;  %v3025_v27 = vsel %vm2904_vm2, %v6130_v1, 0.0 }
 0x84c   : > { %3026 = vadd.xlane.f32.xlu0 %v3025_v27 }
 0x851   : > { %v6136_v45 = vpop.eup %4677 }
 0x852   : > { %v6138_v23 = vpop.eup %4679  ;;  %v3034_v59 = vsel %vm2904_vm2, %v6136_v45, 0.0 }
 0x853   : > { %3035 = vadd.xlane.f32.xlu1 %v3034_v59  ;;  %v3031_v5 = vsel %vm2904_vm2, %v6138_v23, 0.0 }
 0x854   : > { %3032 = vadd.xlane.f32.xlu0 %v3031_v5 }
 0x855   : > { %v2946_v34 = vpop.xlane.xlu1 %2945 }
 0x856   : > { %v2966_v56 = vsub.f32 %v6069_v49, %v2946_v34  ;;  %v2943_v32 = vpop.xlane.xlu0 %2942 }
 0x857   : > { %v2965_v16 = vsub.f32 %v6071_v22, %v2943_v32  ;;  %v4362_v32 = vld [vmem:[%s6391_s18 + $0x8] sm:$0xff]  }
 0x858   : > { %v2995_v42 = vmul.f32 1.442695, %v2966_v56  ;;  %v4361_v56 = vld [vmem:[%s6391_s18] sm:$0xff]  }
 0x859   : > { %v2993_v29 = vmul.f32 1.442695, %v2965_v16  ;;  %4084 = vmatprep.subr.bf16.mxu0 %v4361_v56  ;;  %4148 = vmatprep.subr.bf16.mxu1 %v4361_v56  ;;  %v4363_v16 = vld [vmem:[%s6391_s18 + $0x10] sm:$0xff]  }
 0x85a   : > { %4681 = vpow2.f32 %v2995_v42  ;;  %4085 = vmatpush3.bf16.msra.mxu0 %v4361_v56  ;;  %v4364_v42 = vld [vmem:[%s6391_s18 + $0x18] sm:$0xff]  }
 0x85b   : > { %4683 = vpow2.f32 %v2993_v29  ;;  %4086 = vmatprep.subr.bf16.mxu0 %v4362_v32  ;;  %v4365_v29 = vld [vmem:[%s6391_s18 + $0x20] sm:$0xff]  }
 0x85d   : > { %v2952_v46 = vpop.xlane.xlu1 %2951 }
 0x85e   : > { %v2968_v8 = vsub.f32 %v6077_v20, %v2952_v46  ;;  %v2949_v13 = vpop.xlane.xlu0 %2948  ;;  %4087 = vmatpush3.bf16.msra.mxu0 %v4362_v32 }
 0x85f   : > { %v2967_v41 = vsub.f32 %v6079_v51, %v2949_v13  ;;  %4088 = vmatprep.subr.bf16.mxu0 %v4363_v16 }
 0x860   : > { %v2999_v9 = vmul.f32 1.442695, %v2968_v8 }
 0x861   : > { %v2997_v19 = vmul.f32 1.442695, %v2967_v41 }
 0x862   : > { %4685 = vpow2.f32 %v2999_v9  ;;  %4089 = vmatpush3.bf16.msra.mxu0 %v4363_v16 }
 0x863   : > { %4687 = vpow2.f32 %v2997_v19  ;;  %4090 = vmatprep.subr.bf16.mxu0 %v4364_v42 }
 0x864   : > { %v6148_v27 = vpop.eup %4681 }
 0x865   : > { %v6150_v49 = vpop.eup %4683  ;;  %v3040_v22 = vsel %vm2904_vm2, %v6148_v27, 0.0 }
 0x866   : > { %3041 = vadd.xlane.f32.xlu1 %v3040_v22  ;;  %v3037_v59 = vsel %vm2904_vm2, %v6150_v49, 0.0  ;;  %4091 = vmatpush3.bf16.msra.mxu0 %v4364_v42 }
 0x867   : > { %3038 = vadd.xlane.f32.xlu0 %v3037_v59  ;;  %4092 = vmatprep.subr.bf16.mxu0 %v4365_v29 }
 0x86a   : > { %4093 = vmatpush3.bf16.msra.mxu0 %v4365_v29 }
 0x86c   : > { %v6156_v20 = vpop.eup %4685 }
 0x86d   : > { %v6158_v5 = vpop.eup %4687  ;;  %v3046_v51 = vsel %vm2904_vm2, %v6156_v20, 0.0 }
 0x86e   : > { %3047 = vadd.xlane.f32.xlu1 %v3046_v51  ;;  %v3043_v34 = vsel %vm2904_vm2, %v6158_v5, 0.0 }
 0x86f   : > { %3044 = vadd.xlane.f32.xlu0 %v3043_v34 }
 0x8a9   : > { %v3006_v46 = vpop.xlane.xlu1 %3005 }
 0x8aa   : > { %4689 = vrcp.f32 %v3006_v46  ;;  %v3003_v8 = vpop.xlane.xlu0 %3002 }
 0x8ab   : > { %4691 = vrcp.f32 %v3003_v8 }
 0x8b1   : > { %v3012_v13 = vpop.xlane.xlu1 %3011 }
 0x8b2   : > { %4693 = vrcp.f32 %v3012_v13  ;;  %v3009_v41 = vpop.xlane.xlu0 %3008 }
 0x8b3   : > { %4695 = vrcp.f32 %v3009_v41 }
 0x8b4   : > { %v4690_v9 = vpop.eup %4689 }
 0x8b5   : > { %v4692_v19 = vpop.eup %4691  ;;  %v3052_v59 = vmul.f32 %v4690_v9, %v6085_v10 }
 0x8b6   : > { %v3050_v22 = vmul.f32 %v4692_v19, %v6087_v36 }
 0x8b8   : > { %4060 = vmatprep.mubr.msk.f32.mxu1 %vm2904_vm2, %v3050_v22 }
 0x8b9   : > { %4061 = vmatmul.mubr.msk.f32.vlgmr.msra.gmra.mrb[48].mxu1 %vm2904_vm2, %v3052_v59 }
 0x8ba   : > { %4156 = vmatpush3.bf16.msra.mxu1 %v4361_v56 }
 0x8bb   : > { %4149 = vmatprep.subr.bf16.mxu1 %v4362_v32 }
 0x8bc   : > { %v4694_v51 = vpop.eup %4693 }
 0x8bd   : > { %v4696_v34 = vpop.eup %4695  ;;  %v3056_v8 = vmul.f32 %v4694_v51, %v6093_v30 }
 0x8be   : > { %v3054_v46 = vmul.f32 %v4696_v34, %v6095_v37  ;;  %4157 = vmatpush3.bf16.msra.mxu1 %v4362_v32 }
 0x8bf   : > { %4150 = vmatprep.subr.bf16.mxu1 %v4363_v16 }
 0x8c0   : > { %4063 = vmatprep.mubr.msk.f32.mxu1 %vm2904_vm2, %v3054_v46 }
 0x8c1   : > { %4064 = vmatmul.mubr.msk.f32.gmra.mrb[50].mxu1 %vm2904_vm2, %v3056_v8 }
 0x8c2   : > { %4158 = vmatpush3.bf16.msra.mxu1 %v4363_v16 }
 0x8c3   : > { %4151 = vmatprep.subr.bf16.mxu1 %v4364_v42 }
 0x8c6   : > { %4159 = vmatpush3.bf16.msra.mxu1 %v4364_v42 }
 0x8c7   : > { %4152 = vmatprep.subr.bf16.mxu1 %v4365_v29 }
 0x8c8   : > { %v3018_v36 = vpop.xlane.xlu1 %3017 }
 0x8c9   : > { %4697 = vrcp.f32 %v3018_v36  ;;  %v3015_v10 = vpop.xlane.xlu0 %3014 }
 0x8ca   : > { %4699 = vrcp.f32 %v3015_v10  ;;  %4160 = vmatpush3.bf16.msra.mxu1 %v4365_v29 }
 0x8d0   : > { %v3024_v56 = vpop.xlane.xlu1 %3023 }
 0x8d1   : > { %4701 = vrcp.f32 %v3024_v56  ;;  %v3021_v37 = vpop.xlane.xlu0 %3020 }
 0x8d2   : > { %4703 = vrcp.f32 %v3021_v37 }
 0x8d3   : > { %v4698_v32 = vpop.eup %4697 }
 0x8d4   : > { %v4700_v30 = vpop.eup %4699  ;;  %v3060_v41 = vmul.f32 %v4698_v32, %v6108_v62 }
 0x8d5   : > { %v3058_v13 = vmul.f32 %v4700_v30, %v6110_v6 }
 0x8d7   : > { %4066 = vmatprep.mubr.msk.f32.mxu1 %vm2904_vm2, %v3058_v13 }
 0x8d8   : > { %v3030_v16 = vpop.xlane.xlu1 %3029  ;;  %4067 = vmatmul.mubr.msk.f32.gmra.mrb[52].mxu1 %vm2904_vm2, %v3060_v41 }
 0x8d9   : > { %4705 = vrcp.f32 %v3030_v16  ;;  %v3027_v42 = vpop.xlane.xlu0 %3026 }
 0x8da   : > { %4707 = vrcp.f32 %v3027_v42 }
 0x8db   : > { %v4702_v9 = vpop.eup %4701 }
 0x8dc   : > { %v4704_v29 = vpop.eup %4703  ;;  %v3064_v22 = vmul.f32 %v4702_v9, %v6118_v3 }
 0x8dd   : > { %v3062_v19 = vmul.f32 %v4704_v29, %v6120_v48 }
 0x8df   : > { %4069 = vmatprep.mubr.msk.f32.mxu1 %vm2904_vm2, %v3062_v19 }
 0x8e0   : > { %v3036_v59 = vpop.xlane.xlu1 %3035  ;;  %4070 = vmatmul.mubr.msk.f32.gmra.mrb[54].mxu1 %vm2904_vm2, %v3064_v22 }
 0x8e1   : > { %4709 = vrcp.f32 %v3036_v59  ;;  %v3033_v62 = vpop.xlane.xlu0 %3032 }
 0x8e2   : > { %4711 = vrcp.f32 %v3033_v62 }
 0x8e3   : > { %v4706_v6 = vpop.eup %4705 }
 0x8e4   : > { %v4708_v51 = vpop.eup %4707  ;;  %v3068_v46 = vmul.f32 %v4706_v6, %v6128_v55 }
 0x8e5   : > { %v3066_v34 = vmul.f32 %v4708_v51, %v6130_v1 }
 0x8e7   : > { %4072 = vmatprep.mubr.msk.f32.mxu1 %vm2904_vm2, %v3066_v34 }
 0x8e8   : > { %4073 = vmatmul.mubr.msk.f32.gmra.mrb[56].mxu1 %vm2904_vm2, %v3068_v46 }
 0x8eb   : > { %v4710_v48 = vpop.eup %4709 }
 0x8ec   : > { %v4712_v3 = vpop.eup %4711  ;;  %v3072_v36 = vmul.f32 %v4710_v48, %v6136_v45 }
 0x8ed   : > { %v3070_v8 = vmul.f32 %v4712_v3, %v6138_v23 }
 0x8ef   : > { %4075 = vmatprep.mubr.msk.f32.mxu1 %vm2904_vm2, %v3070_v8 }
 0x8f0   : > { %4076 = vmatmul.mubr.msk.f32.gmra.mrb[58].mxu1 %vm2904_vm2, %v3072_v36 }
 0x8f3   : > { %v3042_v10 = vpop.xlane.xlu1 %3041 }
 0x8f4   : > { %4713 = vrcp.f32 %v3042_v10  ;;  %v3039_v56 = vpop.xlane.xlu0 %3038 }
 0x8f5   : > { %4715 = vrcp.f32 %v3039_v56 }
 0x8fb   : > { %v3048_v1 = vpop.xlane.xlu1 %3047 }
 0x8fc   : > { %4717 = vrcp.f32 %v3048_v1  ;;  %v3045_v55 = vpop.xlane.xlu0 %3044 }
 0x8fd   : > { %4719 = vrcp.f32 %v3045_v55 }
 0x8fe   : > { %v4714_v37 = vpop.eup %4713 }
 0x8ff   : > { %v4716_v32 = vpop.eup %4715  ;;  %v3076_v23 = vmul.f32 %v4714_v37, %v6148_v27  ;;  %v4367_v27 = vld [vmem:[%s6391_s18 + $0x30] sm:$0xff]  }
 0x900   : > { %v3074_v30 = vmul.f32 %v4716_v32, %v6150_v49  ;;  %v4366_v49 = vld [vmem:[%s6391_s18 + $0x28] sm:$0xff]  }
 0x901   : > { %4094 = vmatprep.subr.bf16.mxu0 %v4366_v49  ;;  %4153 = vmatprep.subr.bf16.mxu1 %v4366_v49 }
 0x902   : > { %4078 = vmatprep.mubr.msk.f32.mxu1 %vm2904_vm2, %v3074_v30  ;;  %4095 = vmatpush3.bf16.msra.mxu0 %v4366_v49 }
 0x903   : > { %4079 = vmatmul.mubr.msk.f32.gmra.mrb[60].mxu1 %vm2904_vm2, %v3076_v23  ;;  %4096 = vmatprep.subr.bf16.mxu0 %v4367_v27 }
 0x904   : > { %4161 = vmatpush3.bf16.msra.mxu1 %v4366_v49 }
 0x905   : > { %4154 = vmatprep.subr.bf16.mxu1 %v4367_v27 }
 0x906   : > { %v4718_v45 = vpop.eup %4717  ;;  %4097 = vmatpush3.bf16.msra.mxu0 %v4367_v27 }
 0x907   : > { %v4720_v13 = vpop.eup %4719  ;;  %v3080_v16 = vmul.f32 %v4718_v45, %v6156_v20  ;;  %v4368_v20 = vld [vmem:[%s6391_s18 + $0x38] sm:$0xff]  }
 0x908   : > { %v3078_v41 = vmul.f32 %v4720_v13, %v6158_v5  ;;  %4162 = vmatpush3.bf16.msra.mxu1 %v4367_v27  ;;  %4098 = vmatprep.subr.bf16.mxu0 %v4368_v20  ;;  %v2384_v5 = vsub.s32 2, %v5954_v15 }
 0x909   : > { %4155 = vmatprep.subr.bf16.mxu1 %v4368_v20 }
 0x90a   : > { %4081 = vmatprep.mubr.msk.f32.mxu1 %vm2904_vm2, %v3078_v41  ;;  %4099 = vmatpush3.bf16.msra.mxu0 %v4368_v20  ;;  %v2385_v42 = vrot.slane %v5960_v40, %v2384_v5 }
 0x90b   : > { %4082 = vmatmul.mubr.msk.f32.gmra.mrb[62].mxu1 %vm2904_vm2, %v3080_v16 }
 0x90c   : > { %4163 = vmatpush3.bf16.msra.mxu1 %v4368_v20  ;;  %v2668_v9 = vadd.f32 %v5979_v33, %v2385_v42  ;;  %v2665_v29 = vadd.f32 %v5975_v24, %v2385_v42  ;;  %v2676_v51 = vadd.f32 %v5977_v39, %v2385_v42  ;;  %v2673_v34 = vadd.f32 %v5973_v35, %v2385_v42 }
 0x90d   : > { %v2684_v40 = vadd.f32 %v5995_v53, %v2385_v42  ;;  %v2681_v24 = vadd.f32 %v5991_v57, %v2385_v42  ;;  %v2692_v39 = vadd.f32 %v5993_v26, %v2385_v42  ;;  %v2689_v35 = vadd.f32 %v5989_v18, %v2385_v42 }
 0x90e   : > { %v2700_v53 = vadd.f32 %v6007_v38, %v2385_v42  ;;  %v2697_v57 = vadd.f32 %v6003_v54, %v2385_v42  ;;  %v2708_v26 = vadd.f32 %v6005_v28, %v2385_v42  ;;  %v2705_v18 = vadd.f32 %v6001_v14, %v2385_v42 }
 0x90f   : > { %v2716_v38 = vadd.f32 %v6027_v43, %v2385_v42  ;;  %v2713_v54 = vadd.f32 %v6023_v2, %v2385_v42  ;;  %v2724_v14 = vadd.f32 %v6025_v21, %v2385_v42  ;;  %v2721_v28 = vadd.f32 %v6021_v31, %v2385_v42  ;;  %v6241_v2 = vld [vmem:[%s6384_s11] ss:$0 sm:$0xff] }
 0x910   : > { %v4170_v43 = vadd.f32 %v6241_v2, %v5648_v50  ;;  %v6249_v21 = vld [vmem:[%s6392_s19] ss:$0 sm:$0xff]  ;;  %v4173_v31 = vadd.f32 %v6241_v2, %v5642_v17  ;;  %v4164_v42 = vadd.f32 %v6241_v2, %v5645_v25  ;;  %v4179_v25 = vadd.f32 %v6241_v2, %v5652_v52 }
 0x912   : > { %v4171_v50 = vadd.f32 %v4170_v43, %v6249_v21  ;;  %v6429_v43 = vld [vmem:[#allocation9_spill] sm:$0xff] }
 0x98c   : > { %v4062_v19 = vpop.f32.mrb[48].mxu1 }
 0x98d   : > { %v3280_v22 = vmul.f32 %v4062_v19, %v2668_v9  ;;  %v3200_v59 = vpop.f32.mrb[49].mxu1 }
 0x98e   : > { %v3279_v62 = vmul.f32 %v3200_v59, %v2665_v29 }
 0x990   : > { %v3295_v6 = vpack.c.bf16 %v3280_v22, %v3279_v62 }
 0x992   : > { %4100 = vmatprep.mubr.bf16.mxu0 %v3295_v6 }
 0x994   : > { %v4065_v46 = vpop.f32.mrb[50].mxu1 }
 0x995   : > { %v3282_v48 = vmul.f32 %v4065_v46, %v2676_v51  ;;  %v3210_v3 = vpop.f32.mrb[51].mxu1 }
 0x996   : > { %v3281_v15 = vmul.f32 %v3210_v3, %v2673_v34 }
 0x998   : > { %v3296_v8 = vpack.c.bf16 %v3282_v48, %v3281_v15 }
 0x99a   : > { %4101 = vmatmul.mubr.bf16.vlgmr.msra.gmra.mrb[0].mxu0 %v3296_v8  ;;  %v4167_v8 = vadd.f32 %v6241_v2, %v5640_v63  ;;  %v4176_v63 = vadd.f32 %v6241_v2, %v5657_v61 }
 0x9ab   : > { %v4068_v33 = vpop.f32.mrb[52].mxu1 }
 0x9ac   : > { %v3284_v36 = vmul.f32 %v4068_v33, %v2684_v40  ;;  %v3220_v10 = vpop.f32.mrb[53].mxu1 }
 0x9ad   : > { %v3283_v56 = vmul.f32 %v3220_v10, %v2681_v24  ;;  %v4174_v10 = vadd.f32 %v4173_v31, %v6249_v21 }
 0x9af   : > { %v3297_v1 = vpack.c.bf16 %v3284_v36, %v3283_v56 }
 0x9b1   : > { %4104 = vmatprep.mubr.bf16.mxu0 %v3297_v1 }
 0x9b3   : > { %v4071_v55 = vpop.f32.mrb[54].mxu1 }
 0x9b4   : > { %v3286_v37 = vmul.f32 %v4071_v55, %v2692_v39  ;;  %v3230_v32 = vpop.f32.mrb[55].mxu1  ;;  %v4182_v55 = vadd.f32 %v6241_v2, %v5660_v44 }
 0x9b5   : > { %v3285_v30 = vmul.f32 %v3230_v32, %v2689_v35  ;;  %v4177_v32 = vadd.f32 %v4176_v63, %v6249_v21 }
 0x9b6   : > { %v4183_v61 = vadd.f32 %v4182_v55, %v6249_v21 }
 0x9b7   : > { %v3298_v23 = vpack.c.bf16 %v3286_v37, %v3285_v30  ;;  %v4185_v37 = vadd.f32 %v6241_v2, %v5654_v58  ;;  %v4188_v58 = vadd.f32 %v6241_v2, %v5669_v60 }
 0x9b9   : > { %4105 = vmatmul.mubr.bf16.gmra.mrb[4].mxu0 %v3298_v23  ;;  %v4180_v23 = vadd.f32 %v4179_v25, %v6249_v21  ;;  %v4186_v52 = vadd.f32 %v4185_v37, %v6249_v21 }
 0x9bb   : > { %v4074_v45 = vpop.f32.mrb[56].mxu1 }
 0x9bc   : > { %v3288_v13 = vmul.f32 %v4074_v45, %v2700_v53  ;;  %v3240_v41 = vpop.f32.mrb[57].mxu1 }
 0x9bd   : > { %v3287_v16 = vmul.f32 %v3240_v41, %v2697_v57 }
 0x9bf   : > { %v3299_v49 = vpack.c.bf16 %v3288_v13, %v3287_v16 }
 0x9c1   : > { %4108 = vmatprep.mubr.bf16.mxu0 %v3299_v49  ;;  %v4191_v49 = vadd.f32 %v6241_v2, %v5663_v0 }
 0x9c3   : > { %v4077_v27 = vpop.f32.mrb[58].mxu1 }
 0x9c4   : > { %v3290_v20 = vmul.f32 %v4077_v27, %v2708_v26  ;;  %v3250_v5 = vpop.f32.mrb[59].mxu1  ;;  %v4194_v26 = vadd.f32 %v6241_v2, %v5672_v7  ;;  %v4189_v27 = vadd.f32 %v4188_v58, %v6249_v21 }
 0x9c5   : > { %v3289_v9 = vmul.f32 %v3250_v5, %v2705_v18  ;;  %v4197_v18 = vadd.f32 %v6241_v2, %v5666_v4  ;;  %v4192_v5 = vadd.f32 %v4191_v49, %v6249_v21 }
 0x9c6   : > { %v4195_v60 = vadd.f32 %v4194_v26, %v6249_v21 }
 0x9c7   : > { %v3300_v29 = vpack.c.bf16 %v3290_v20, %v3289_v9  ;;  %v4198_v0 = vadd.f32 %v4197_v18, %v6249_v21 }
 0x9c9   : > { %4109 = vmatmul.mubr.bf16.gmra.mrb[8].mxu0 %v3300_v29 }
 0x9d6   : > { %v4080_v19 = vpop.f32.mrb[60].mxu1 }
 0x9d7   : > { %v3292_v22 = vmul.f32 %v4080_v19, %v2716_v38  ;;  %v3260_v59 = vpop.f32.mrb[61].mxu1 }
 0x9d8   : > { %v3291_v62 = vmul.f32 %v3260_v59, %v2713_v54  ;;  %v841_v59 = vadd.f32 %v6241_v2, %v5631_v12 }
 0x9da   : > { %v3301_v6 = vpack.c.bf16 %v3292_v22, %v3291_v62  ;;  %v849_v22 = vadd.f32 %v5629_v47, %v6241_v2  ;;  %v852_v62 = vadd.f32 %v5633_v11, %v6241_v2 }
 0x9dc   : > { %4112 = vmatprep.mubr.bf16.mxu1 %v3301_v6  ;;  %v6425_v6 = vld [vmem:[#allocation10_spill] sm:$0xff] }
 0x9de   : > { %v4083_v51 = vpop.f32.mrb[62].mxu1 }
 0x9df   : > { %v3294_v34 = vmul.f32 %v4083_v51, %v2724_v14  ;;  %v3270_v46 = vpop.f32.mrb[63].mxu1  ;;  %v4201_v14 = vadd.f32 %v6425_v6, %v849_v22 }
 0x9e0   : > { %v3293_v48 = vmul.f32 %v3270_v46, %v2721_v28  ;;  %v6426_v28 = vld [vmem:[#allocation7_spill] sm:$0xff] }
 0x9e1   : > { %v844_v51 = vadd.f32 %v6241_v2, %v6426_v28  ;;  %v4202_v47 = vadd.f32 %v4201_v14, %v6249_v21 }
 0x9e2   : > { %v3302_v3 = vpack.c.bf16 %v3294_v34, %v3293_v48  ;;  %v6427_v34 = vld [vmem:[#allocation8_spill] sm:$0xff]  ;;  %v6428_v48 = vld [vmem:[#allocation11_spill] sm:$0xff] }
 0x9e3   : > { %v4205_v46 = vadd.f32 %v6427_v34, %v841_v59  ;;  %v4213_v31 = vadd.f32 %v6429_v43, %v844_v51 }
 0x9e4   : > { %4113 = vmatmul.mubr.bf16.vlgmr.msra.gmra.mrb[64].mxu1 %v3302_v3  ;;  %v4209_v3 = vadd.f32 %v6428_v48, %v852_v62 }
 0x9e5   : > { %v4206_v12 = vadd.f32 %v4205_v46, %v6249_v21 }
 0x9e6   : > { %v4210_v2 = vadd.f32 %v4209_v3, %v6249_v21 }
 0xa6d   : > { %v4102_v15 = vpop.f32.mrb[0].mxu0 }
 0xa6e   : > { %v4165_v40 = vadd.f32 %v4164_v42, %v4102_v15  ;;  %v3408_v24 = vpop.f32.mrb[1].mxu0 }
 0xa6f   : > { %v4168_v33 = vadd.f32 %v4167_v8, %v3408_v24  ;;  %v4103_v36 = vpop.f32.mrb[2].mxu0  ;;  %v4214_v24 = vadd.f32 %v4213_v31, %v6249_v21 }
 0xa70   : > { %v4166_v56 = vadd.f32 %v4165_v40, %v6249_v21  ;;  %v4172_v17 = vadd.f32 %v4171_v50, %v4103_v36  ;;  %v3411_v1 = vpop.f32.mrb[3].mxu0 }
 0xa71   : > { %v4169_v39 = vadd.f32 %v4168_v33, %v6249_v21  ;;  %v4175_v35 = vadd.f32 %v4174_v10, %v3411_v1 }
 0xa72   : > { %3505 = vst [vmem:[%s6263_s5 + $0x10] sm:$0xff] %v4166_v56  ;;  %3506 = vst [vmem:[%s6263_s5 + $0x18] sm:$0xff] %v4172_v17 }
 0xa73   : > { %3503 = vst [vmem:[%s6263_s5] sm:$0xff] %v4169_v39  ;;  %3504 = vst [vmem:[%s6263_s5 + $0x8] sm:$0xff] %v4175_v35 }
 0xa8c   : > { %v4106_v30 = vpop.f32.mrb[4].mxu0 }
 0xa8d   : > { %v4178_v53 = vadd.f32 %v4177_v32, %v4106_v30  ;;  %v3424_v57 = vpop.f32.mrb[5].mxu0 }
 0xa8e   : > { %v4181_v45 = vadd.f32 %v4180_v23, %v3424_v57  ;;  %v4107_v13 = vpop.f32.mrb[6].mxu0 }
 0xa8f   : > { %3509 = vst [vmem:[%s6263_s5 + $0x30] sm:$0xff] %v4178_v53  ;;  %v4184_v44 = vadd.f32 %v4183_v61, %v4107_v13  ;;  %v3427_v41 = vpop.f32.mrb[7].mxu0 }
 0xa90   : > { %3507 = vst [vmem:[%s6263_s5 + $0x20] sm:$0xff] %v4181_v45  ;;  %v4187_v16 = vadd.f32 %v4186_v52, %v3427_v41 }
 0xa91   : > { %3510 = vst [vmem:[%s6263_s5 + $0x38] sm:$0xff] %v4184_v44 }
 0xa92   : > { %3508 = vst [vmem:[%s6263_s5 + $0x28] sm:$0xff] %v4187_v16 }
 0xa9c   : > { %v4110_v20 = vpop.f32.mrb[8].mxu0 }
 0xa9d   : > { %v4190_v9 = vadd.f32 %v4189_v27, %v4110_v20  ;;  %v3440_v29 = vpop.f32.mrb[9].mxu0 }
 0xa9e   : > { %v4193_v38 = vadd.f32 %v4192_v5, %v3440_v29  ;;  %v4111_v54 = vpop.f32.mrb[10].mxu0 }
 0xa9f   : > { %3513 = vst [vmem:[%s6263_s5 + $0x50] sm:$0xff] %v4190_v9  ;;  %v4196_v7 = vadd.f32 %v4195_v60, %v4111_v54  ;;  %v3443_v19 = vpop.f32.mrb[11].mxu0 }
 0xaa0   : > { %3511 = vst [vmem:[%s6263_s5 + $0x40] sm:$0xff] %v4193_v38  ;;  %v4199_v4 = vadd.f32 %v4198_v0, %v3443_v19 }
 0xaa1   : > { %3514 = vst [vmem:[%s6263_s5 + $0x58] sm:$0xff] %v4196_v7 }
 0xaa2   : > { %3512 = vst [vmem:[%s6263_s5 + $0x48] sm:$0xff] %v4199_v4 }
 0xab7   : > { %v4114_v42 = vpop.f32.mrb[64].mxu1 }
 0xab8   : > { %v4203_v11 = vadd.f32 %v4202_v47, %v4114_v42  ;;  %v3456_v15 = vpop.f32.mrb[65].mxu1 }
 0xab9   : > { %v4207_v8 = vadd.f32 %v4206_v12, %v3456_v15  ;;  %v4115_v40 = vpop.f32.mrb[66].mxu1 }
 0xaba   : > { %3517 = vst [vmem:[%s6263_s5 + $0x70] sm:$0xff] %v4203_v11  ;;  %v4211_v50 = vadd.f32 %v4210_v2, %v4115_v40  ;;  %v3459_v33 = vpop.f32.mrb[67].mxu1 }
 0xabb   : > { %3515 = vst [vmem:[%s6263_s5 + $0x60] sm:$0xff] %v4207_v8  ;;  %v4215_v36 = vadd.f32 %v4214_v24, %v3459_v33 }
 0xabc   : > { %3518 = vst [vmem:[%s6263_s5 + $0x78] sm:$0xff] %v4211_v50 }
 0xabd   : > { %3516 = vst [vmem:[%s6263_s5 + $0x68] sm:$0xff] %v4215_v36 }
 0xabe   : > { %4750 = shalt.err (!%p4747_p3)
}
 0xabf   : > { %s4751_s21 = scalar_lea.hbm %s6323_s0, 2048  ;;  %s4755_s27 = scalar_lea.hbm %s6393_s20, 4096 }
 0xac0   : > { %p4752_p4 = scmp.ne.s32.totalorder %s6323_s0, %s4751_s21  ;;  %p4756_p9 = scmp.lt.u32.totalorder %s6323_s0, %s6393_s20 }
 0xac1   : > { %p4757_p10 = scmp.lt.u32.totalorder %s4755_s27, %s4751_s21  ;;  %p4759_p12 = scmp.lt.u32.totalorder %s4751_s21, %s6323_s0 }
 0xac2   : > { %p4753_p7 = pnand %p4752_p4, %p4949_p5 }
 0xac3   : > { %p4758_p11 = por %p4757_p10, %p4756_p9 }
 0xac4   : > { %p4754_p8 = pneg %p4753_p7 }
 0xac5   : > { %p4760_p13 = por %p4759_p12, %p4758_p11 }
 0xac7   : > { %p4761_p0 = pnand %p4760_p13, %p4754_p8 }
 0xac9   : > { %4764 = shalt.err (!%p4761_p0)
}
 0xaca   : > { %s4804_s23 = smov 128   ;;  %s4805_s6 = smov 8  }
 0xacb   : > { %4228 = dma.vmem_to_hbm [thread:$0]  (%p4949_p5), %s6325_s7, 2048, %s6323_s0, %s6332_s2, %s4804_s23, %s4804_s23, %s4805_s6  }
 0xacc PF: > { %p4234_p1 = scmp.ge.s32.totalorder %s4799_s24, 2  ;;  %s3548_s5 = sand.u32 1, %s4787_s1  }
 0xacd   : > { %s3549_s21 = scalar_lea.sflag [#allocation3], %s3548_s5 }
 0xace   : > { %p4231_p2 = pnand %p4234_p1, %p4953_p6 }
 0xad0   : > { %4782 = dma.done.wait (!%p4231_p2), %s3549_s21, 2048  }
 0xad1   : > { %4784 = vsyncadd (!%p4231_p2), %s3549_s21, 4294965248  ;;  %s6430_s30 = sld [smem:[#allocation5_spill]]  ;;  %s6431_s23 = sld [smem:[#allocation6_spill]] }
 0xad2   : > { %p30_p3 = scmp.ge.s32.totalorder %s4936_s3, 4   ;;  %s6432_s1 = smov %s4791_s22 }
 0xad3   : > { %s6434_s24 = smov %s4936_s3 }
 0xad4   :  { %32 = sbr.rel (!%p30_p3) target bundleno = 12 (0xc), region = 138 }
 0xad7   : > { %s6433_s22 = smov %s6430_s30 }
 0xadb   :  { %3554 = vsyncpa [#allocation3], 1 }
 0xadc   :  { %3556 = vsyncpa [#allocation3 + $0x1], 1 }

// kernel: tpu_custom_call.1
= control target key start
LH: loop header
LB: loop body
LE: loop exit
PB: predicated region body
PF: predicated region fallthrough
CT: control target
= control target key end

     0   :  { %s6373_s0 = inlined_call_operand.vmem [shape: f32[256,64], index: 0, kind: input, shape index: {}]   ;;  %s6374_s1 = inlined_call_operand.vmem [shape: f32[256,32], index: 1, kind: input, shape index: {}]   ;;  %s6375_s2 = inlined_call_operand.vmem [shape: f32[1,64], index: 2, kind: input, shape index: {}]   ;;  %s6376_s3 = inlined_call_operand.vmem [shape: f32[1,64], index: 3, kind: input, shape index: {}]   ;;  %s6377_s4 = inlined_call_operand.vmem [shape: bf16[96,128], index: 4, kind: input, shape index: {}]   ;;  %s6378_s5 = inlined_call_operand.vmem [shape: f32[1,128], index: 5, kind: input, shape index: {}]   ;;  %s6379_s6 = inlined_call_operand.vmem [shape: f32[1,128], index: 6, kind: input, shape index: {}]   ;;  %s6380_s7 = inlined_call_operand.vmem [shape: f32[1,128], index: 7, kind: input, shape index: {}]   ;;  %s6381_s8 = inlined_call_operand.vmem [shape: bf16[128,128], index: 8, kind: input, shape index: {}]   ;;  %s6382_s9 = inlined_call_operand.vmem [shape: f32[1,128], index: 9, kind: input, shape index: {}]   ;;  %s6383_s10 = inlined_call_operand.vmem [shape: bf16[64,128], index: 10, kind: input, shape index: {}]   ;;  %s6384_s11 = inlined_call_operand.vmem [shape: f32[1,128], index: 11, kind: input, shape index: {}]   ;;  %s6385_s12 = inlined_call_operand.vmem [shape: f32[1,128], index: 12, kind: input, shape index: {}]   ;;  %s6386_s13 = inlined_call_operand.vmem [shape: f32[1,128], index: 13, kind: input, shape index: {}]   ;;  %s6387_s14 = inlined_call_operand.vmem [shape: bf16[128,384], index: 14, kind: input, shape index: {}]   ;;  %s6388_s15 = inlined_call_operand.vmem [shape: f32[1,384], index: 15, kind: input, shape index: {}]   ;;  %s6389_s16 = inlined_call_operand.vmem [shape: f32[128,4], index: 16, kind: input, shape index: {}]   ;;  %s6390_s17 = inlined_call_operand.vmem [shape: f32[4,128], index: 17, kind: input, shape index: {}]   ;;  %s6391_s18 = inlined_call_operand.vmem [shape: bf16[128,128], index: 18, kind: input, shape index: {}]   ;;  %s6392_s19 = inlined_call_operand.vmem [shape: f32[1,128], index: 19, kind: input, shape index: {}]   ;;  %s6393_s20 = inlined_call_operand.hbm [shape: f32[256,128], index: 20, kind: output, shape index: {}]  }
   0x1   :  { %6400 = sst [smem:[#allocation12_spill]] %s6373_s0 }
   0x2   :  { %6401 = sst [smem:[#allocation13_spill]] %s6374_s1 }
   0x3   :  { %6402 = sst [smem:[#allocation14_spill]] %s6375_s2 }
   0x4   :  { %6403 = sst [smem:[#allocation15_spill]] %s6376_s3 }
   0x5   :  { %6404 = sst [smem:[#allocation16_spill]] %s6377_s4 }
   0x6   :  { %6405 = sst [smem:[#allocation17_spill]] %s6378_s5 }
   0x7   :  { %6406 = sst [smem:[#allocation18_spill]] %s6379_s6 }
   0x8   :  { %6407 = sst [smem:[#allocation19_spill]] %s6380_s7 }
   0x9   :  { %25 = vsyncpa [#allocation3], 0 }
   0xa   :  { %27 = vsyncpa [#allocation3 + $0x1], 0  ;;  %s4911_s1 = smov 0   ;;  %s4913_s22 = smov 0  }
   0xb   :  { %s4915_s23 = smov 0   ;;  %s4917_s24 = smov 0  }
   0xc LB: > { %6408 = sst [smem:[#allocation5_spill]] %s4795_s23  ;;  %s4932_s2 = sadd.s32 4294967295, %s4799_s24   ;;  %s4799_s24 = sphi %s4917_s24, %s6434_s24   ;;  %s4795_s23 = sphi %s4915_s23, %s6431_s23   ;;  %s4791_s22 = sphi %s4913_s22, %s6433_s22   ;;  %s4787_s1 = sphi %s4911_s1, %s6432_s1  }
   0xd   : > { %s3607_s25 = sadd.s32 4294967294, %s4799_s24   ;;  %s4936_s3 = sadd.s32 1, %s4799_s24  }
   0xe   : > { %s470_s26 = sadd.s32 1, %s4795_s23  ;;  %s467_s27 = ssub.s32 %s4799_s24, %s4936_s3 }
   0xf   : > { %p480_p0 = scmp.ne.s32.totalorder %s4795_s23, %s4791_s22  ;;  %p468_p1 = scmp.eq.s32.totalorder %s467_s27, 0 }
  0x10   : > { %p481_p2 = scmp.eq.s32.totalorder %s4932_s2, 1  ;;  %p486_p3 = scmp.ne.s32.totalorder %s4791_s22, %s4787_s1 }
  0x11   : > { %p487_p4 = scmp.eq.s32.totalorder %s3607_s25, 1  ;;  %p3610_p7 = scmp.ge.s32.totalorder %s4799_s24, 1 }
  0x12   : > { %s4947_s28 = scalar_select %p468_p1, %s4795_s23, %s470_s26  }
  0x13   : > { %p4949_p5 = por %p481_p2, %p480_p0  ;;  %p4953_p6 = por %p487_p4, %p486_p3 }
  0x14   : > { %6409 = sst [smem:[#allocation6_spill]] %s4947_s28  ;;  %p577_p8 = scmp.lt.s32.totalorder %s4799_s24, 3 }
  0x16   : > { %p578_p9 = pnand %p3610_p7, %p577_p8 }
  0x18   : > { %581 = sbr.rel (%p578_p9) target bundleno = 2764 (0xacc), region = 100 }
  0x1f   : > { %s3612_s30 = sshll.u32 %s4932_s2, 4  ;;  %vm733_vm0 = vcmask 523264   ;;  %s6412_s26 = sld [smem:[#allocation12_spill]]  ;;  %vm1477_vm1 = vcmask 785408   ;;  %vm2904_vm2 = vcmask 31744   ;;  %vm3130_vm3 = vcmask 1043456  }
  0x20   : > { %p641_p10 = scmp.lt.s32.totalorder %s3612_s30, 31  ;;  %s6414_s25 = sld [smem:[#allocation16_spill]] }
  0x21   : > { %s6417_s5 = sld [smem:[#allocation17_spill]]  ;;  %s6418_s6 = sld [smem:[#allocation18_spill]] }
  0x22   : > { %s6436_s30 = smov (!%p641_p10, %s3612_s30), 31  ;;  %s6419_s7 = sld [smem:[#allocation19_spill]] }
  0x23   : > { %s3613_s0 = sshll.u32 %s6436_s30, 3  ;;  %s4801_s30 = smov 64  }
  0x24   : > { %s637_s21 = sand.u32 1, %s4791_s22  }
  0x25   : > { %s4968_s27 = scalar_lea.vmem %s6412_s26, %s3613_s0  ;;  %s6413_s26 = sld [smem:[#allocation13_spill]] }
  0x26   : > { %v654_v0 = vld [vmem:[%s4968_s27] sm:$0xff]  ;;  %v656_v1 = vld [vmem:[%s4968_s27 + $0x10] sm:$0xff]  ;;  %v655_v2 = vld [vmem:[%s4968_s27 + $0x8] sm:$0xff] }
  0x27   : > { %v857_v3 = vsel %vm733_vm0, %v654_v0, 0.0  ;;  %v863_v4 = vsel %vm733_vm0, %v656_v1, 0.0  ;;  %v657_v5 = vld [vmem:[%s4968_s27 + $0x18] sm:$0xff]  ;;  %v4977_v6 = vld [vmem:[%s4968_s27 + $0x20] sm:$0xff]  ;;  %v860_v7 = vsel %vm733_vm0, %v655_v2, 0.0  ;;  %v4982_v9 = vld [vmem:[%s4968_s27 + $0x28] sm:$0xff] }
  0x28   : > { %858 = vadd.xlane.f32.xlu0 %v857_v3  ;;  %864 = vadd.xlane.f32.xlu1 %v863_v4  ;;  %v866_v8 = vsel %vm733_vm0, %v657_v5, 0.0  ;;  %v4985_v10 = vld [vmem:[%s4968_s27 + $0x30] sm:$0xff]  ;;  %v4988_v11 = vld [vmem:[%s4968_s27 + $0x38] sm:$0xff]  ;;  %v869_v12 = vsel %vm733_vm0, %v4977_v6, 0.0  ;;  %v872_v13 = vsel %vm733_vm0, %v4982_v9, 0.0  ;;  %v4999_v16 = vld [vmem:[%s4968_s27 + $0x40] sm:$0xff] }
  0x29   : > { %v875_v14 = vsel %vm733_vm0, %v4985_v10, 0.0  ;;  %v878_v15 = vsel %vm733_vm0, %v4988_v11, 0.0  ;;  %v5002_v17 = vld [vmem:[%s4968_s27 + $0x48] sm:$0xff]  ;;  %v5005_v18 = vld [vmem:[%s4968_s27 + $0x50] sm:$0xff]  ;;  %v5008_v19 = vld [vmem:[%s4968_s27 + $0x58] sm:$0xff]  ;;  %v881_v20 = vsel %vm733_vm0, %v4999_v16, 0.0 }
  0x2a   : > { %v5013_v21 = vld [vmem:[%s4968_s27 + $0x60] sm:$0xff]  ;;  %v884_v22 = vsel %vm733_vm0, %v5002_v17, 0.0  ;;  %v5018_v23 = vld [vmem:[%s4968_s27 + $0x68] sm:$0xff]  ;;  %v887_v24 = vsel %vm733_vm0, %v5005_v18, 0.0  ;;  %v890_v25 = vsel %vm733_vm0, %v5008_v19, 0.0  ;;  %v5029_v28 = vld [vmem:[%s4968_s27 + $0x70] sm:$0xff] }
  0x2b   : > { %v893_v26 = vsel %vm733_vm0, %v5013_v21, 0.0  ;;  %v896_v27 = vsel %vm733_vm0, %v5018_v23, 0.0  ;;  %v5032_v29 = vld [vmem:[%s4968_s27 + $0x78] sm:$0xff]  ;;  %v899_v30 = vsel %vm733_vm0, %v5029_v28, 0.0  ;;  %s5043_s28 = scalar_lea.vmem %s6413_s26, %s3613_s0  ;;  %s6415_s0 = sld [smem:[#allocation14_spill]] }
  0x2c   : > { %861 = vadd.xlane.f32.xlu0 %v860_v7  ;;  %867 = vadd.xlane.f32.xlu1 %v866_v8  ;;  %v902_v31 = vsel %vm733_vm0, %v5032_v29, 0.0  ;;  %v5054_v44 = vld [vmem:[%s5043_s28 + $0x10] sm:$0xff]  ;;  %v5062_v48 = vld [vmem:[%s5043_s28 + $0x18] sm:$0xff]  ;;  %v5071_v57 = vld [vmem:[%s5043_s28 + $0x20] sm:$0xff]  ;;  %s6416_s26 = sld [smem:[#allocation15_spill]] }
  0x2d   : > { %v3649_v52 = vmul.f32 -1.442695, %v5054_v44  ;;  %v3650_v58 = vmul.f32 -1.442695, %v5062_v48  ;;  %v5082_v62 = vld [vmem:[%s5043_s28 + $0x28] sm:$0xff]  ;;  %v5087_v3 = vld [vmem:[%s5043_s28] sm:$0xff] }
  0x2e   : > { %v5094_v8 = vld [vmem:[%s5043_s28 + $0x8] sm:$0xff] }
  0x2f   : > { %4369 = vpow2.f32 %v3649_v52 }
  0x30   : > { %870 = vadd.xlane.f32.xlu0 %v869_v12  ;;  %873 = vadd.xlane.f32.xlu1 %v872_v13  ;;  %4371 = vpow2.f32 %v3650_v58 }
  0x34   : > { %876 = vadd.xlane.f32.xlu0 %v875_v14  ;;  %879 = vadd.xlane.f32.xlu1 %v878_v15  ;;  %v3647_v15 = vmul.f32 -1.442695, %v5087_v3 }
  0x38   : > { %882 = vadd.xlane.f32.xlu0 %v881_v20  ;;  %885 = vadd.xlane.f32.xlu1 %v884_v22  ;;  %v5106_v20 = vld [vmem:[%s5043_s28 + $0x40] sm:$0xff] }
  0x3c   : > { %888 = vadd.xlane.f32.xlu0 %v887_v24  ;;  %891 = vadd.xlane.f32.xlu1 %v890_v25 }
  0x40   : > { %894 = vadd.xlane.f32.xlu0 %v893_v26  ;;  %897 = vadd.xlane.f32.xlu1 %v896_v27 }
  0x44   : > { %900 = vadd.xlane.f32.xlu0 %v899_v30  ;;  %903 = vadd.xlane.f32.xlu1 %v902_v31  ;;  %v5115_v31 = vld [vmem:[%s5043_s28 + $0x48] sm:$0xff] }
  0xb5   : > { %v859_v32 = vpop.xlane.xlu0 %858  ;;  %v865_v33 = vpop.xlane.xlu1 %864 }
  0xb6   : > { %v906_v34 = vmul.f32 0.015625, %v859_v32  ;;  %v908_v35 = vmul.f32 0.015625, %v865_v33  ;;  %v3655_v32 = vmul.f32 -1.442695, %v5106_v20 }
  0xb8   : > { %v5045_v36 = vsub.f32 %v654_v0, %v906_v34  ;;  %v5047_v37 = vsub.f32 %v656_v1, %v908_v35 }
  0xb9   : > { %v862_v38 = vpop.xlane.xlu0 %861  ;;  %v868_v39 = vpop.xlane.xlu1 %867 }
  0xba   : > { %v907_v40 = vmul.f32 0.015625, %v862_v38  ;;  %v909_v41 = vmul.f32 0.015625, %v868_v39  ;;  %v938_v42 = vmul.f32 %v5045_v36, %v5045_v36  ;;  %v940_v43 = vmul.f32 %v5047_v37, %v5047_v37 }
  0xbc   : > { %v5056_v45 = vsub.f32 %v655_v2, %v907_v40  ;;  %v5058_v46 = vsub.f32 %v657_v5, %v909_v41  ;;  %v954_v47 = vsel %vm733_vm0, %v938_v42, 0.0  ;;  %v960_v51 = vsel %vm733_vm0, %v940_v43, 0.0  ;;  %v5128_v42 = vld [vmem:[%s5043_s28 + $0x60] sm:$0xff] }
  0xbd   : > { %955 = vadd.xlane.f32.xlu0 %v954_v47  ;;  %v871_v49 = vpop.xlane.xlu0 %870  ;;  %v874_v50 = vpop.xlane.xlu1 %873  ;;  %v3651_v2 = vmul.f32 -1.442695, %v5071_v57  ;;  %v3656_v41 = vmul.f32 -1.442695, %v5115_v31 }
  0xbe   : > { %v910_v53 = vmul.f32 0.015625, %v871_v49  ;;  %v911_v54 = vmul.f32 0.015625, %v874_v50  ;;  %v939_v55 = vmul.f32 %v5056_v45, %v5056_v45  ;;  %v941_v56 = vmul.f32 %v5058_v46, %v5058_v46  ;;  %v5135_v49 = vld [vmem:[%s5043_s28 + $0x68] sm:$0xff]  ;;  %v4370_v50 = vpop.eup %4369 }
  0xbf   : > { %4373 = vpow2.f32 %v3651_v2 }
  0xc0   : > { %v5075_v59 = vsub.f32 %v4977_v6, %v910_v53  ;;  %v5078_v60 = vsub.f32 %v4982_v9, %v911_v54  ;;  %v957_v61 = vsel %vm733_vm0, %v939_v55, 0.0  ;;  %v963_v1 = vsel %vm733_vm0, %v941_v56, 0.0  ;;  %v4372_v55 = vpop.eup %4371 }
  0xc1   : > { %961 = vadd.xlane.f32.xlu0 %v960_v51  ;;  %958 = vadd.xlane.f32.xlu1 %v957_v61  ;;  %v877_v63 = vpop.xlane.xlu0 %876  ;;  %v880_v0 = vpop.xlane.xlu1 %879  ;;  %v3652_v9 = vmul.f32 -1.442695, %v5082_v62  ;;  %v3659_v54 = vmul.f32 -1.442695, %v5128_v42 }
  0xc2   : > { %v912_v4 = vmul.f32 0.015625, %v877_v63  ;;  %v913_v5 = vmul.f32 0.015625, %v880_v0  ;;  %v942_v6 = vmul.f32 %v5075_v59, %v5075_v59  ;;  %v943_v7 = vmul.f32 %v5078_v60, %v5078_v60 }
  0xc3   : > { %4375 = vpow2.f32 %v3652_v9  ;;  %v3660_v63 = vmul.f32 -1.442695, %v5135_v49 }
  0xc4   : > { %v5098_v12 = vsub.f32 %v4985_v10, %v912_v4  ;;  %v5101_v13 = vsub.f32 %v4988_v11, %v913_v5  ;;  %v966_v14 = vsel %vm733_vm0, %v942_v6, 0.0  ;;  %v969_v25 = vsel %vm733_vm0, %v943_v7, 0.0 }
  0xc5   : > { %964 = vadd.xlane.f32.xlu1 %v963_v1  ;;  %967 = vadd.xlane.f32.xlu0 %v966_v14  ;;  %v883_v22 = vpop.xlane.xlu0 %882  ;;  %v886_v24 = vpop.xlane.xlu1 %885  ;;  %v3648_v10 = vmul.f32 -1.442695, %v5094_v8  ;;  %4377 = vpow2.f32 %v3647_v15  ;;  %v1272_v4 = vadd.f32 1.0, %v4370_v50  ;;  %v1273_v15 = vadd.f32 1.0, %v4372_v55 }
  0xc6   : > { %v914_v26 = vmul.f32 0.015625, %v883_v22  ;;  %v915_v27 = vmul.f32 0.015625, %v886_v24  ;;  %v944_v11 = vmul.f32 %v5098_v12, %v5098_v12  ;;  %v945_v30 = vmul.f32 %v5101_v13, %v5101_v13 }
  0xc7   : > { %4379 = vpow2.f32 %v3648_v10 }
  0xc8   : > { %v5119_v33 = vsub.f32 %v4999_v16, %v914_v26  ;;  %v5122_v34 = vsub.f32 %v5002_v17, %v915_v27  ;;  %v972_v35 = vsel %vm733_vm0, %v944_v11, 0.0  ;;  %v975_v40 = vsel %vm733_vm0, %v945_v30, 0.0 }
  0xc9   : > { %970 = vadd.xlane.f32.xlu1 %v969_v25  ;;  %973 = vadd.xlane.f32.xlu0 %v972_v35  ;;  %v889_v38 = vpop.xlane.xlu0 %888  ;;  %v892_v39 = vpop.xlane.xlu1 %891  ;;  %4381 = vpow2.f32 %v3655_v32 }
  0xca   : > { %v916_v16 = vmul.f32 0.015625, %v889_v38  ;;  %v917_v43 = vmul.f32 0.015625, %v892_v39  ;;  %v946_v17 = vmul.f32 %v5119_v33, %v5119_v33  ;;  %v947_v47 = vmul.f32 %v5122_v34, %v5122_v34  ;;  %v4374_v2 = vpop.eup %4373 }
  0xcb   : > { %4383 = vpow2.f32 %v3656_v41  ;;  %v1274_v26 = vadd.f32 1.0, %v4374_v2 }
  0xcc   : > { %v5138_v51 = vsub.f32 %v5005_v18, %v916_v16  ;;  %v5141_v52 = vsub.f32 %v5008_v19, %v917_v43  ;;  %v978_v53 = vsel %vm733_vm0, %v946_v17, 0.0  ;;  %v981_v61 = vsel %vm733_vm0, %v947_v47, 0.0 }
  0xcd   : > { %976 = vadd.xlane.f32.xlu1 %v975_v40  ;;  %979 = vadd.xlane.f32.xlu0 %v978_v53  ;;  %v895_v56 = vpop.xlane.xlu0 %894  ;;  %v898_v58 = vpop.xlane.xlu1 %897  ;;  %4385 = vpow2.f32 %v3659_v54 }
  0xce   : > { %v918_v0 = vmul.f32 0.015625, %v895_v56  ;;  %v919_v18 = vmul.f32 0.015625, %v898_v58  ;;  %v948_v19 = vmul.f32 %v5138_v51, %v5138_v51  ;;  %v949_v1 = vmul.f32 %v5141_v52, %v5141_v52  ;;  %v4376_v9 = vpop.eup %4375 }
  0xcf   : > { %4387 = vpow2.f32 %v3660_v63  ;;  %v4378_v22 = vpop.eup %4377  ;;  %v1275_v30 = vadd.f32 1.0, %v4376_v9 }
  0xd0   : > { %v5152_v5 = vsub.f32 %v5013_v21, %v918_v0  ;;  %v5155_v6 = vsub.f32 %v5018_v23, %v919_v18  ;;  %v984_v7 = vsel %vm733_vm0, %v948_v19, 0.0  ;;  %v987_v25 = vsel %vm733_vm0, %v949_v1, 0.0 }
  0xd1   : > { %982 = vadd.xlane.f32.xlu1 %v981_v61  ;;  %985 = vadd.xlane.f32.xlu0 %v984_v7  ;;  %v901_v14 = vpop.xlane.xlu0 %900  ;;  %v4380_v10 = vpop.eup %4379  ;;  %4389 = vrcp.f32 %v1272_v4  ;;  %v1270_v35 = vadd.f32 1.0, %v4378_v22 }
  0xd2   : > { %v920_v24 = vmul.f32 0.015625, %v901_v14  ;;  %v950_v21 = vmul.f32 %v5152_v5, %v5152_v5  ;;  %v951_v23 = vmul.f32 %v5155_v6, %v5155_v6  ;;  %4391 = vrcp.f32 %v1273_v15 }
  0xd3   : > { %v4382_v32 = vpop.eup %4381  ;;  %v1271_v40 = vadd.f32 1.0, %v4380_v10  ;;  %4393 = vrcp.f32 %v1274_v26  ;;  %v680_v26 = vld [vmem:[%s5043_s28 + $0x50] sm:$0xff] }
  0xd4   : > { %v5164_v27 = vsub.f32 %v5029_v28, %v920_v24  ;;  %v990_v11 = vsel %vm733_vm0, %v950_v21, 0.0  ;;  %v993_v38 = vsel %vm733_vm0, %v951_v23, 0.0  ;;  %4395 = vrcp.f32 %v1275_v30  ;;  %v676_v21 = vld [vmem:[%s5043_s28 + $0x30] sm:$0xff]  ;;  %v677_v23 = vld [vmem:[%s5043_s28 + $0x38] sm:$0xff] }
  0xd5   : > { %988 = vadd.xlane.f32.xlu1 %v987_v25  ;;  %991 = vadd.xlane.f32.xlu0 %v990_v11  ;;  %v4384_v41 = vpop.eup %4383  ;;  %4397 = vrcp.f32 %v1270_v35  ;;  %v1278_v16 = vadd.f32 1.0, %v4382_v32  ;;  %v4311_v25 = vld [vmem:[%s6414_s25] sm:$0xff]   ;;  %v3654_v10 = vmul.f32 -1.442695, %v677_v23  ;;  %v681_v11 = vld [vmem:[%s5043_s28 + $0x58] sm:$0xff] }
  0xd6   : > { %v952_v39 = vmul.f32 %v5164_v27, %v5164_v27  ;;  %4399 = vrcp.f32 %v1271_v40  ;;  %v1279_v17 = vadd.f32 1.0, %v4384_v41  ;;  %3910 = vmatprep.subr.bf16.mxu1 %v4311_v25  ;;  %v3657_v30 = vmul.f32 -1.442695, %v680_v26  ;;  %v4314_v32 = vld [vmem:[%s6414_s25 + $0x18] sm:$0xff]   ;;  %v904_v40 = vpop.xlane.xlu1 %903 }
  0xd7   : > { %v4386_v43 = vpop.eup %4385  ;;  %4401 = vrcp.f32 %v1278_v16  ;;  %3911 = vmatpush3.bf16.msra.mxu1 %v4311_v25  ;;  %v3658_v35 = vmul.f32 -1.442695, %v681_v11 }
  0xd8   : > { %v996_v28 = vsel %vm733_vm0, %v952_v39, 0.0  ;;  %v1282_v50 = vadd.f32 1.0, %v4386_v43  ;;  %4403 = vrcp.f32 %v1279_v17  ;;  %v685_v39 = vld [vmem:[%s5043_s28 + $0x78] sm:$0xff]  ;;  %v921_v43 = vmul.f32 0.015625, %v904_v40  ;;  %v4316_v17 = vld [vmem:[%s6414_s25 + $0x28] sm:$0xff]  }
  0xd9   : > { %994 = vadd.xlane.f32.xlu1 %v993_v38  ;;  %997 = vadd.xlane.f32.xlu0 %v996_v28  ;;  %v4388_v47 = vpop.eup %4387  ;;  %v684_v38 = vld [vmem:[%s5043_s28 + $0x70] sm:$0xff]  ;;  %v4315_v28 = vld [vmem:[%s6414_s25 + $0x20] sm:$0xff]   ;;  %v3662_v16 = vmul.f32 -1.442695, %v685_v39  ;;  %s3611_s28 = sshll.u32 %s637_s21, 7 }
  0xda   : > { %v1283_v54 = vadd.f32 1.0, %v4388_v47  ;;  %4405 = vrcp.f32 %v1282_v50  ;;  %v3661_v41 = vmul.f32 -1.442695, %v684_v38 }
  0xdb   : > { %v4390_v53 = vpop.eup %4389 }
  0xdc   : > { %v4392_v55 = vpop.eup %4391  ;;  %v1320_v61 = vmul.f32 %v4390_v53, %v5054_v44  ;;  %4407 = vrcp.f32 %v1283_v54  ;;  %v5211_v53 = vsub.f32 %v5032_v29, %v921_v43 }
  0xdd   : > { %v4394_v56 = vpop.eup %4393  ;;  %v1321_v63 = vmul.f32 %v4392_v55, %v5062_v48 }
  0xde   : > { %v4396_v58 = vpop.eup %4395  ;;  %v1322_v1 = vmul.f32 %v4394_v56, %v5071_v57 }
  0xdf   : > { %v4398_v0 = vpop.eup %4397  ;;  %v4276_v19 = vpack.i.bf16 %v1321_v63, %v1320_v61  ;;  %v1323_v2 = vmul.f32 %v4396_v58, %v5082_v62  ;;  %v953_v61 = vmul.f32 %v5211_v53, %v5211_v53 }
  0xe0   : > { %v4400_v18 = vpop.eup %4399  ;;  %v1318_v7 = vmul.f32 %v4398_v0, %v5087_v3 }
  0xe1   : > { %v4402_v4 = vpop.eup %4401  ;;  %v1319_v9 = vmul.f32 %v4400_v18, %v5094_v8  ;;  %v4281_v44 = vpack.i.bf16 %v1323_v2, %v1322_v1  ;;  %v999_v1 = vsel %vm733_vm0, %v953_v61, 0.0 }
  0xe2   : > { %v4404_v14 = vpop.eup %4403  ;;  %v1326_v22 = vmul.f32 %v4402_v4, %v5106_v20 }
  0xe3   : > { %v4271_v48 = vpack.i.bf16 %v1319_v9, %v1318_v7  ;;  %v1327_v57 = vmul.f32 %v4404_v14, %v5115_v31  ;;  %v4312_v31 = vld [vmem:[%s6414_s25 + $0x8] sm:$0xff]  }
  0xe4   : > { %v4406_v15 = vpop.eup %4405  ;;  %3912 = vmatprep.subr.bf16.mxu1 %v4312_v31 }
  0xe5   : > { %v4291_v62 = vpack.i.bf16 %v1327_v57, %v1326_v22  ;;  %v1330_v3 = vmul.f32 %v4406_v15, %v5128_v42  ;;  %3913 = vmatpush3.bf16.msra.mxu1 %v4312_v31  ;;  %v3653_v42 = vmul.f32 -1.442695, %v676_v21 }
  0xe6   : > { %v4408_v24 = vpop.eup %4407 }
  0xe7   : > { %v1331_v8 = vmul.f32 %v4408_v24, %v5135_v49  ;;  %v4313_v49 = vld [vmem:[%s6414_s25 + $0x10] sm:$0xff]   ;;  %4409 = vpow2.f32 %v3653_v42 }
  0xe8   : > { %3914 = vmatprep.subr.bf16.mxu1 %v4313_v49  ;;  %4411 = vpow2.f32 %v3654_v10 }
  0xe9   : > { %v4301_v20 = vpack.i.bf16 %v1331_v8, %v1330_v3  ;;  %3915 = vmatpush3.bf16.msra.mxu1 %v4313_v49  ;;  %4413 = vpow2.f32 %v3657_v30 }
  0xea   : > { %4277 = vrot.lane.b32.xlu1 %v4276_v19, %s4801_s30  ;;  %3916 = vmatprep.subr.bf16.mxu1 %v4314_v32  ;;  %4415 = vpow2.f32 %v3658_v35 }
  0xeb   : > { %4417 = vpow2.f32 %v3661_v41 }
  0xec   : > { %4419 = vpow2.f32 %v3662_v16 }
  0xed   : > { %3917 = vmatpush3.bf16.msra.mxu1 %v4314_v32 }
  0xee   : > { %4282 = vrot.lane.b32.xlu1 %v4281_v44, %s4801_s30  ;;  %3918 = vmatprep.subr.bf16.mxu1 %v4315_v28 }
  0xef   : > { %4272 = vrot.lane.b32.xlu0 %v4271_v48, %s4801_s30 }
  0xf1   : > { %3919 = vmatpush3.bf16.msra.mxu1 %v4315_v28  ;;  %v4410_v47 = vpop.eup %4409 }
  0xf2   : > { %3920 = vmatprep.subr.bf16.mxu1 %v4316_v17  ;;  %v4412_v50 = vpop.eup %4411  ;;  %v1276_v54 = vadd.f32 1.0, %v4410_v47  ;;  %v5222_v47 = vld [vmem:[%s6415_s0] ss:$0 sm:$0xff] }
  0xf3   : > { %4292 = vrot.lane.b32.xlu0 %v4291_v62, %s4801_s30  ;;  %v4414_v55 = vpop.eup %4413  ;;  %v1277_v56 = vadd.f32 1.0, %v4412_v50 }
  0xf4   : > { %v4416_v58 = vpop.eup %4415  ;;  %4421 = vrcp.f32 %v1276_v54  ;;  %v1280_v63 = vadd.f32 1.0, %v4414_v55 }
  0xf5   : > { %3921 = vmatpush3.bf16.msra.mxu1 %v4316_v17  ;;  %v4418_v0 = vpop.eup %4417  ;;  %4423 = vrcp.f32 %v1277_v56  ;;  %v1281_v18 = vadd.f32 1.0, %v4416_v58 }
  0xf6   : > { %v4420_v19 = vpop.eup %4419  ;;  %4425 = vrcp.f32 %v1280_v63  ;;  %v1284_v2 = vadd.f32 1.0, %v4418_v0  ;;  %v5228_v63 = vld [vmem:[%s6416_s26] ss:$0 sm:$0xff]  ;;  %s4803_s26 = smov [#allocation2]  }
  0xf7   : > { %4302 = vrot.lane.b32.xlu0 %v4301_v20, %s4801_s30  ;;  %4427 = vrcp.f32 %v1281_v18  ;;  %v1285_v29 = vadd.f32 1.0, %v4420_v19 }
  0xf8   : > { %4429 = vrcp.f32 %v1284_v2 }
  0xf9   : > { %4431 = vrcp.f32 %v1285_v29 }
  0xfe   : > { %v4422_v4 = vpop.eup %4421 }
  0xff   : > { %v4424_v7 = vpop.eup %4423  ;;  %v1324_v14 = vmul.f32 %v4422_v4, %v676_v21 }
 0x100   : > { %v4426_v9 = vpop.eup %4425  ;;  %v1325_v44 = vmul.f32 %v4424_v7, %v677_v23 }
 0x101   : > { %v4428_v15 = vpop.eup %4427  ;;  %v1328_v57 = vmul.f32 %v4426_v9, %v680_v26 }
 0x102   : > { %v4430_v48 = vpop.eup %4429  ;;  %v4286_v22 = vpack.i.bf16 %v1325_v44, %v1324_v14  ;;  %v1329_v24 = vmul.f32 %v4428_v15, %v681_v11 }
 0x103   : > { %v4432_v62 = vpop.eup %4431  ;;  %v1332_v8 = vmul.f32 %v4430_v48, %v684_v38 }
 0x104   : > { %v4296_v3 = vpack.i.bf16 %v1329_v24, %v1328_v57  ;;  %v1333_v25 = vmul.f32 %v4432_v62, %v685_v39 }
 0x106   : > { %v4306_v20 = vpack.i.bf16 %v1333_v25, %v1332_v8 }
 0x112   : > { %1000 = vadd.xlane.f32.xlu1 %v999_v1 }
 0x123   : > { %4287 = vrot.lane.b32.xlu1 %v4286_v22, %s4801_s30 }
 0x127   : > { %4297 = vrot.lane.b32.xlu1 %v4296_v3, %s4801_s30 }
 0x12b   : > { %4307 = vrot.lane.b32.xlu1 %v4306_v20, %s4801_s30 }
 0x14a   : > { %v956_v31 = vpop.xlane.xlu0 %955 }
 0x14b   : > { %v1002_v42 = vmul.f32 0.015625, %v956_v31 }
 0x14d   : > { %v1018_v21 = vadd.f32 1e-05, %v1002_v42 }
 0x14e   : > { %v959_v23 = vpop.xlane.xlu1 %958  ;;  %v962_v49 = vpop.xlane.xlu0 %961 }
 0x14f   : > { %4433 = vrsqrt.f32 %v1018_v21  ;;  %v1003_v10 = vmul.f32 0.015625, %v959_v23  ;;  %v1004_v26 = vmul.f32 0.015625, %v962_v49 }
 0x151   : > { %v1019_v11 = vadd.f32 1e-05, %v1003_v10  ;;  %v1020_v30 = vadd.f32 1e-05, %v1004_v26 }
 0x152   : > { %v965_v32 = vpop.xlane.xlu1 %964  ;;  %v968_v35 = vpop.xlane.xlu0 %967 }
 0x153   : > { %4435 = vrsqrt.f32 %v1019_v11  ;;  %v1005_v38 = vmul.f32 0.015625, %v965_v32  ;;  %v1006_v39 = vmul.f32 0.015625, %v968_v35 }
 0x154   : > { %4437 = vrsqrt.f32 %v1020_v30 }
 0x155   : > { %v1021_v40 = vadd.f32 1e-05, %v1005_v38  ;;  %v1022_v41 = vadd.f32 1e-05, %v1006_v39 }
 0x156   : > { %v971_v28 = vpop.xlane.xlu1 %970  ;;  %v974_v16 = vpop.xlane.xlu0 %973 }
 0x157   : > { %4439 = vrsqrt.f32 %v1021_v40  ;;  %v1007_v43 = vmul.f32 0.015625, %v971_v28  ;;  %v1008_v54 = vmul.f32 0.015625, %v974_v16 }
 0x158   : > { %4441 = vrsqrt.f32 %v1022_v41 }
 0x159   : > { %v4434_v17 = vpop.eup %4433  ;;  %v1023_v50 = vadd.f32 1e-05, %v1007_v43  ;;  %v1024_v19 = vadd.f32 1e-05, %v1008_v54 }
 0x15a   : > { %v977_v55 = vpop.xlane.xlu1 %976  ;;  %v980_v56 = vpop.xlane.xlu0 %979  ;;  %v1050_v58 = vmul.f32 %v4434_v17, %v5045_v36 }
 0x15b   : > { %4443 = vrsqrt.f32 %v1023_v50  ;;  %v1009_v61 = vmul.f32 0.015625, %v977_v55  ;;  %v1010_v14 = vmul.f32 0.015625, %v980_v56 }
 0x15c   : > { %v1072_v0 = vmul.f32 %v5222_v47, %v1050_v58  ;;  %4445 = vrsqrt.f32 %v1024_v19 }
 0x15d   : > { %v4436_v18 = vpop.eup %4435  ;;  %v1025_v9 = vadd.f32 1e-05, %v1009_v61  ;;  %v1026_v20 = vadd.f32 1e-05, %v1010_v14 }
 0x15e   : > { %v4438_v1 = vpop.eup %4437  ;;  %v983_v2 = vpop.xlane.xlu1 %982  ;;  %v1051_v4 = vmul.f32 %v4436_v18, %v5056_v45  ;;  %v5233_v7 = vadd.f32 %v5228_v63, %v1072_v0 }
 0x15f   : > { %v986_v29 = vpop.xlane.xlu0 %985  ;;  %v1052_v36 = vmul.f32 %v4438_v1, %v5047_v37  ;;  %v1011_v44 = vmul.f32 0.015625, %v983_v2 }
 0x160   : > { %v1012_v15 = vmul.f32 0.015625, %v986_v29  ;;  %v1073_v48 = vmul.f32 %v5222_v47, %v1051_v4  ;;  %v3631_v22 = vmul.f32 -1.442695, %v5233_v7 }
 0x161   : > { %v4440_v57 = vpop.eup %4439  ;;  %v1074_v24 = vmul.f32 %v5222_v47, %v1052_v36  ;;  %v1027_v62 = vadd.f32 1e-05, %v1011_v44 }
 0x162   : > { %v4442_v3 = vpop.eup %4441  ;;  %v1053_v45 = vmul.f32 %v4440_v57, %v5058_v46  ;;  %v989_v8 = vpop.xlane.xlu1 %988  ;;  %v5241_v25 = vadd.f32 %v5228_v63, %v1073_v48  ;;  %4447 = vpow2.f32 %v3631_v22  ;;  %v1028_v21 = vadd.f32 1e-05, %v1012_v15 }
 0x163   : > { %v1054_v37 = vmul.f32 %v4442_v3, %v5075_v59  ;;  %4449 = vrsqrt.f32 %v1025_v9  ;;  %v1013_v31 = vmul.f32 0.015625, %v989_v8  ;;  %v992_v23 = vpop.xlane.xlu0 %991  ;;  %v5246_v49 = vadd.f32 %v5228_v63, %v1074_v24 }
 0x164   : > { %v1075_v42 = vmul.f32 %v5222_v47, %v1053_v45  ;;  %v3632_v10 = vmul.f32 -1.442695, %v5241_v25  ;;  %4451 = vrsqrt.f32 %v1027_v62  ;;  %v1014_v38 = vmul.f32 0.015625, %v992_v23 }
 0x165   : > { %v4444_v46 = vpop.eup %4443  ;;  %v1076_v26 = vmul.f32 %v5222_v47, %v1054_v37  ;;  %v3633_v32 = vmul.f32 -1.442695, %v5246_v49  ;;  %v1029_v35 = vadd.f32 1e-05, %v1013_v31 }
 0x166   : > { %v1055_v11 = vmul.f32 %v4444_v46, %v5078_v60  ;;  %v995_v30 = vpop.xlane.xlu1 %994  ;;  %v5252_v59 = vadd.f32 %v5228_v63, %v1075_v42  ;;  %4453 = vpow2.f32 %v3632_v10  ;;  %v4446_v17 = vpop.eup %4445  ;;  %v1030_v54 = vadd.f32 1e-05, %v1014_v38 }
 0x167   : > { %4455 = vrsqrt.f32 %v1026_v20  ;;  %v1015_v39 = vmul.f32 0.015625, %v995_v30  ;;  %v5258_v28 = vadd.f32 %v5228_v63, %v1076_v26  ;;  %v5268_v15 = vpop.xlane.xlu0 %997  ;;  %v1056_v57 = vmul.f32 %v4446_v17, %v5098_v12 }
 0x168   : > { %v1077_v40 = vmul.f32 %v5222_v47, %v1055_v11  ;;  %4457 = vrsqrt.f32 %v1028_v21  ;;  %v3634_v41 = vmul.f32 -1.442695, %v5252_v59 }
 0x169   : > { %v1031_v60 = vadd.f32 1e-05, %v1015_v39  ;;  %4459 = vpow2.f32 %v3633_v32  ;;  %v3635_v43 = vmul.f32 -1.442695, %v5258_v28  ;;  %v1078_v31 = vmul.f32 %v5222_v47, %v1056_v57 }
 0x16a   : > { %4461 = vpow2.f32 %v3634_v41  ;;  %v5261_v16 = vadd.f32 %v5228_v63, %v1077_v40  ;;  %v4278_v12 = vpop.permute.xlu1 %4277 }
 0x16b   : > { %4463 = vrsqrt.f32 %v1029_v35  ;;  %v5291_v38 = vadd.f32 %v5228_v63, %v1078_v31  ;;  %v4280_v40 = vunpack.i.h.bf16 %v4278_v12 }
 0x16c   : > { %v4448_v50 = vpop.eup %4447  ;;  %4465 = vrsqrt.f32 %v1031_v60  ;;  %v3636_v55 = vmul.f32 -1.442695, %v5261_v16 }
 0x16d   : > { %v4450_v56 = vpop.eup %4449  ;;  %4467 = vpow2.f32 %v3635_v43  ;;  %v1158_v58 = vadd.f32 1.0, %v4448_v50 }
 0x16e   : > { %4469 = vpow2.f32 %v3636_v55  ;;  %v4452_v61 = vpop.eup %4451  ;;  %v1057_v44 = vmul.f32 %v4450_v56, %v5101_v13  ;;  %v4273_v13 = vpop.permute.xlu0 %4272 }
 0x16f   : > { %4471 = vrcp.f32 %v1158_v58  ;;  %v1059_v29 = vmul.f32 %v4452_v61, %v5122_v34  ;;  %v4275_v23 = vunpack.i.h.bf16 %v4273_v13  ;;  %v4274_v26 = vunpack.i.l.bf16 %v4273_v13  ;;  %v4283_v60 = vpop.permute.xlu1 %4282 }
 0x170   : > { %v4454_v0 = vpop.eup %4453  ;;  %4473 = vrsqrt.f32 %v1030_v54  ;;  %v1079_v8 = vmul.f32 %v5222_v47, %v1057_v44 }
 0x171   : > { %v4456_v18 = vpop.eup %4455  ;;  %v1159_v19 = vadd.f32 1.0, %v4454_v0  ;;  %v1081_v62 = vmul.f32 %v5222_v47, %v1059_v29  ;;  %v4279_v0 = vunpack.i.l.bf16 %v4278_v12 }
 0x172   : > { %v4458_v1 = vpop.eup %4457  ;;  %v1058_v36 = vmul.f32 %v4456_v18, %v5119_v33  ;;  %v5287_v35 = vadd.f32 %v5228_v63, %v1079_v8  ;;  %v3637_v18 = vmul.f32 -1.442695, %v5291_v38 }
 0x173   : > { %v4460_v2 = vpop.eup %4459  ;;  %4475 = vrcp.f32 %v1159_v19  ;;  %v5278_v10 = vadd.f32 %v5228_v63, %v1081_v62  ;;  %v1060_v46 = vmul.f32 %v4458_v1, %v5138_v51  ;;  %v4285_v1 = vunpack.i.h.bf16 %v4283_v60 }
 0x174   : > { %v4462_v4 = vpop.eup %4461  ;;  %v1160_v9 = vadd.f32 1.0, %v4460_v2  ;;  %v1080_v3 = vmul.f32 %v5222_v47, %v1058_v36  ;;  %v3638_v58 = vmul.f32 -1.442695, %v5287_v35 }
 0x175   : > { %v4464_v14 = vpop.eup %4463  ;;  %v1161_v48 = vadd.f32 1.0, %v4462_v4 }
 0x176   : > { %v4466_v22 = vpop.eup %4465  ;;  %4477 = vrcp.f32 %v1160_v9  ;;  %v1061_v42 = vmul.f32 %v4464_v14, %v5141_v52  ;;  %v5283_v30 = vadd.f32 %v5228_v63, %v1080_v3 }
 0x177   : > { %v4468_v24 = vpop.eup %4467  ;;  %4479 = vrcp.f32 %v1161_v48  ;;  %v1063_v21 = vmul.f32 %v4466_v22, %v5155_v6  ;;  %v4284_v22 = vunpack.i.l.bf16 %v4283_v60  ;;  %v4293_v60 = vpop.permute.xlu0 %4292 }
 0x178   : > { %v4470_v34 = vpop.eup %4469  ;;  %v1162_v45 = vadd.f32 1.0, %v4468_v24  ;;  %v1083_v39 = vmul.f32 %v5222_v47, %v1061_v42  ;;  %v3639_v17 = vmul.f32 -1.442695, %v5283_v30 }
 0x179   : > { %v4472_v33 = vpop.eup %4471  ;;  %v1163_v37 = vadd.f32 1.0, %v4470_v34  ;;  %v1085_v51 = vmul.f32 %v5222_v47, %v1063_v21 }
 0x17a   : > { %v4474_v20 = vpop.eup %4473  ;;  %4481 = vrcp.f32 %v1162_v45  ;;  %v1206_v11 = vmul.f32 %v4472_v33, %v5233_v7  ;;  %v3640_v7 = vmul.f32 -1.442695, %v5278_v10  ;;  %v5306_v19 = vadd.f32 %v5228_v63, %v1083_v39 }
 0x17b   : > { %4483 = vrcp.f32 %v1163_v37  ;;  %v1062_v52 = vmul.f32 %v4474_v20, %v5152_v5  ;;  %v5310_v2 = vadd.f32 %v5228_v63, %v1085_v51 }
 0x17c   : > { %v1398_v5 = vsel %vm733_vm0, %v1206_v11, %v4274_v26  ;;  %4485 = vpow2.f32 %v3640_v7  ;;  %v3642_v57 = vmul.f32 -1.442695, %v5306_v19 }
 0x17d   : > { %v4476_v32 = vpop.eup %4475  ;;  %v1084_v54 = vmul.f32 %v5222_v47, %v1062_v52  ;;  %4487 = vpow2.f32 %v3639_v17  ;;  %v3644_v24 = vmul.f32 -1.442695, %v5310_v2 }
 0x17e   : > { %v1207_v6 = vmul.f32 %v4476_v32, %v5241_v25  ;;  %v1082_v25 = vmul.f32 %v5222_v47, %v1060_v46  ;;  %4489 = vpow2.f32 %v3638_v58 }
 0x17f   : > { %v5319_v44 = vadd.f32 %v5228_v63, %v1084_v54  ;;  %4491 = vpow2.f32 %v3637_v18 }
 0x180   : > { %v4478_v41 = vpop.eup %4477  ;;  %v1399_v43 = vsel %vm733_vm0, %v1207_v6, %v4275_v23  ;;  %4493 = vpow2.f32 %v3642_v57 }
 0x181   : > { %v4480_v50 = vpop.eup %4479  ;;  %v1208_v55 = vmul.f32 %v4478_v41, %v5246_v49  ;;  %v1414_v56 = vpack.c.bf16 %v1399_v43, %v1398_v5  ;;  %v3643_v45 = vmul.f32 -1.442695, %v5319_v44  ;;  %4495 = vpow2.f32 %v3644_v24 }
 0x182   : > { %v1209_v61 = vmul.f32 %v4480_v50, %v5252_v59  ;;  %v5315_v59 = vadd.f32 %v5228_v63, %v1082_v25  ;;  %v4295_v50 = vunpack.i.h.bf16 %v4293_v60 }
 0x183   : > { %3922 = vmatprep.mubr.msk.bf16.mxu1 %vm1477_vm1, %v1414_v56  ;;  %v1400_v4 = vsel %vm733_vm0, %v1208_v55, %v4279_v0  ;;  %v4294_v56 = vunpack.i.l.bf16 %v4293_v60 }
 0x184   : > { %v4482_v29 = vpop.eup %4481  ;;  %v1401_v49 = vsel %vm733_vm0, %v1209_v61, %v4280_v40 }
 0x185   : > { %v4484_v36 = vpop.eup %4483  ;;  %v1210_v9 = vmul.f32 %v4482_v29, %v5258_v28  ;;  %v1415_v14 = vpack.c.bf16 %v1401_v49, %v1400_v4  ;;  %v3641_v28 = vmul.f32 -1.442695, %v5315_v59 }
 0x186   : > { %v1211_v48 = vmul.f32 %v4484_v36, %v5261_v16  ;;  %v1016_v16 = vmul.f32 0.015625, %v5268_v15  ;;  %v4486_v33 = vpop.eup %4485 }
 0x187   : > { %3923 = vmatmul.mubr.msk.bf16.vlgmr.msra.gmra.mrb[0].mxu1 %vm1477_vm1, %v1415_v14  ;;  %v1402_v34 = vsel %vm733_vm0, %v1210_v9, %v4284_v22  ;;  %4497 = vpow2.f32 %v3641_v28  ;;  %v4488_v8 = vpop.eup %4487  ;;  %v1167_v31 = vadd.f32 1.0, %v4486_v33  ;;  %v4303_v22 = vpop.permute.xlu0 %4302 }
 0x188   : > { %v1403_v62 = vsel %vm733_vm0, %v1211_v48, %v4285_v1  ;;  %4499 = vpow2.f32 %v3643_v45  ;;  %v4490_v37 = vpop.eup %4489  ;;  %v1032_v13 = vadd.f32 1e-05, %v1016_v16  ;;  %v1166_v42 = vadd.f32 1.0, %v4488_v8 }
 0x189   : > { %v1416_v3 = vpack.c.bf16 %v1403_v62, %v1402_v34  ;;  %v4492_v20 = vpop.eup %4491  ;;  %v1165_v12 = vadd.f32 1.0, %v4490_v37  ;;  %v4305_v34 = vunpack.i.h.bf16 %v4303_v22  ;;  %v4304_v33 = vunpack.i.l.bf16 %v4303_v22 }
 0x18a   : > { %4501 = vrsqrt.f32 %v1032_v13  ;;  %v1164_v21 = vadd.f32 1.0, %v4492_v20  ;;  %v4494_v23 = vpop.eup %4493 }
 0x18b   : > { %3926 = vmatprep.mubr.msk.bf16.mxu1 %vm1477_vm1, %v1416_v3  ;;  %4503 = vrcp.f32 %v1167_v31  ;;  %v4496_v46 = vpop.eup %4495  ;;  %v1169_v11 = vadd.f32 1.0, %v4494_v23 }
 0x18c   : > { %4505 = vrcp.f32 %v1166_v42  ;;  %v1171_v32 = vadd.f32 1.0, %v4496_v46 }
 0x18d   : > { %4507 = vrcp.f32 %v1165_v12 }
 0x18e   : > { %4509 = vrcp.f32 %v1164_v21 }
 0x18f   : > { %4511 = vrcp.f32 %v1169_v11 }
 0x190   : > { %4513 = vrcp.f32 %v1171_v32 }
 0x191   : > { %v4498_v15 = vpop.eup %4497 }
 0x192   : > { %v4500_v26 = vpop.eup %4499  ;;  %v1168_v52 = vadd.f32 1.0, %v4498_v15 }
 0x193   : > { %v1170_v6 = vadd.f32 1.0, %v4500_v26 }
 0x194   : > { %v4502_v39 = vpop.eup %4501  ;;  %4515 = vrcp.f32 %v1168_v52 }
 0x195   : > { %v4504_v51 = vpop.eup %4503  ;;  %4517 = vrcp.f32 %v1170_v6  ;;  %v1064_v17 = vmul.f32 %v4502_v39, %v5164_v27 }
 0x196   : > { %v4506_v40 = vpop.eup %4505  ;;  %v1215_v25 = vmul.f32 %v4504_v51, %v5278_v10 }
 0x197   : > { %v4508_v41 = vpop.eup %4507  ;;  %v1214_v55 = vmul.f32 %v4506_v40, %v5283_v30  ;;  %v1086_v27 = vmul.f32 %v5222_v47, %v1064_v17 }
 0x198   : > { %v4510_v43 = vpop.eup %4509  ;;  %v1213_v58 = vmul.f32 %v4508_v41, %v5287_v35  ;;  %v1407_v49 = vsel %vm733_vm0, %v1215_v25, %v4295_v50 }
 0x199   : > { %v1212_v1 = vmul.f32 %v4510_v43, %v5291_v38  ;;  %v4512_v29 = vpop.eup %4511  ;;  %v1406_v9 = vsel %vm733_vm0, %v1214_v55, %v4294_v56  ;;  %v1108_v28 = vadd.f32 %v5228_v63, %v1086_v27 }
 0x19a   : > { %v4514_v4 = vpop.eup %4513  ;;  %v1418_v38 = vpack.c.bf16 %v1407_v49, %v1406_v9  ;;  %v1217_v3 = vmul.f32 %v4512_v29, %v5306_v19 }
 0x19b   : > { %v1219_v62 = vmul.f32 %v4514_v4, %v5310_v2  ;;  %v3645_v13 = vmul.f32 -1.442695, %v1108_v28 }
 0x19d   : > { %v1411_v2 = vsel %vm733_vm0, %v1219_v62, %v4305_v34 }
 0x19e   : > { %v4516_v30 = vpop.eup %4515 }
 0x19f   : > { %v1001_v7 = vpop.xlane.xlu1 %1000  ;;  %v4518_v48 = vpop.eup %4517  ;;  %v1216_v45 = vmul.f32 %v4516_v30, %v5315_v59 }
 0x1a0   : > { %v1017_v5 = vmul.f32 0.015625, %v1001_v7  ;;  %v1218_v16 = vmul.f32 %v4518_v48, %v5319_v44  ;;  %v3663_v7 = vld [vmem:[%s6417_s5] ss:$0 sm:$0xff]  ;;  %s6263_s5 = scalar_lea.vmem [#allocation2], %s3611_s28  ;;  %s4741_s28 = sshll.u32 %s4803_s26, 4  ;;  %s4742_s28 = int_to_ptr.vmem [resolvable:$false] %s4741_s28 }
 0x1a2   : > { %v1033_v54 = vadd.f32 1e-05, %v1017_v5  ;;  %v1410_v31 = vsel %vm733_vm0, %v1218_v16, %v4304_v33 }
 0x1a3   : > { %v4288_v61 = vpop.permute.xlu1 %4287  ;;  %v1420_v12 = vpack.c.bf16 %v1411_v2, %v1410_v31 }
 0x1a4   : > { %4519 = vrsqrt.f32 %v1033_v54  ;;  %v4290_v0 = vunpack.i.h.bf16 %v4288_v61  ;;  %v4289_v18 = vunpack.i.l.bf16 %v4288_v61 }
 0x1a5   : > { %4521 = vpow2.f32 %v3645_v13 }
 0x1a6   : > { %v1405_v10 = vsel %vm733_vm0, %v1213_v58, %v4290_v0  ;;  %v1404_v36 = vsel %vm733_vm0, %v1212_v1, %v4289_v18 }
 0x1a7   : > { %v4298_v35 = vpop.permute.xlu1 %4297  ;;  %v1417_v14 = vpack.c.bf16 %v1405_v10, %v1404_v36 }
 0x1a8   : > { %v4300_v57 = vunpack.i.h.bf16 %v4298_v35  ;;  %v4299_v24 = vunpack.i.l.bf16 %v4298_v35 }
 0x1a9   : > { %3927 = vmatmul.mubr.msk.bf16.gmra.mrb[4].mxu1 %vm1477_vm1, %v1417_v14 }
 0x1aa   : > { %3930 = vmatprep.mubr.msk.bf16.mxu1 %vm1477_vm1, %v1418_v38  ;;  %v1409_v8 = vsel %vm733_vm0, %v1217_v3, %v4300_v57  ;;  %v1408_v37 = vsel %vm733_vm0, %v1216_v45, %v4299_v24 }
 0x1ab   : > { %v1419_v19 = vpack.c.bf16 %v1409_v8, %v1408_v37 }
 0x1ae   : > { %v4520_v20 = vpop.eup %4519 }
 0x1af   : > { %v1065_v42 = vmul.f32 %v4520_v20, %v5211_v53  ;;  %v4522_v23 = vpop.eup %4521  ;;  %v4308_v53 = vpop.permute.xlu1 %4307 }
 0x1b0   : > { %v1172_v46 = vadd.f32 1.0, %v4522_v23  ;;  %v4310_v32 = vunpack.i.h.bf16 %v4308_v53  ;;  %v4309_v52 = vunpack.i.l.bf16 %v4308_v53 }
 0x1b1   : > { %v1087_v59 = vmul.f32 %v5222_v47, %v1065_v42  ;;  %3931 = vmatmul.mubr.msk.bf16.gmra.mrb[8].mxu1 %vm1477_vm1, %v1419_v19 }
 0x1b2   : > { %3934 = vmatprep.mubr.msk.bf16.mxu1 %vm1477_vm1, %v1420_v12 }
 0x1b3   : > { %v1109_v44 = vadd.f32 %v5228_v63, %v1087_v59 }
 0x1b5   : > { %v3646_v21 = vmul.f32 -1.442695, %v1109_v44 }
 0x1b7   : > { %4523 = vpow2.f32 %v3646_v21 }
 0x1b8   : > { %4525 = vrcp.f32 %v1172_v46 }
 0x1c1   : > { %v4524_v15 = vpop.eup %4523 }
 0x1c2   : > { %v1173_v26 = vadd.f32 1.0, %v4524_v15  ;;  %v4526_v11 = vpop.eup %4525 }
 0x1c3   : > { %v1220_v39 = vmul.f32 %v4526_v11, %v1108_v28 }
 0x1c4   : > { %4527 = vrcp.f32 %v1173_v26 }
 0x1c5   : > { %v1412_v40 = vsel %vm733_vm0, %v1220_v39, %v4309_v52 }
 0x1ce   : > { %v4528_v47 = vpop.eup %4527 }
 0x1cf   : > { %v1221_v6 = vmul.f32 %v4528_v47, %v1109_v44 }
 0x1d1   : > { %v1413_v51 = vsel %vm733_vm0, %v1221_v6, %v4310_v32 }
 0x1d2   : > { %v1421_v63 = vpack.c.bf16 %v1413_v51, %v1412_v40  ;;  %v4317_v40 = vld [vmem:[%s6383_s10] sm:$0xff]  }
 0x1d3   : > { %3886 = vmatprep.subr.bf16.mxu0 %v4317_v40 }
 0x1d4   : > { %3935 = vmatmul.mubr.msk.bf16.gmra.mrb[12].mxu1 %vm1477_vm1, %v1421_v63  ;;  %3887 = vmatpush3.bf16.msra.mxu0 %v4317_v40  ;;  %v4735_v40 = vld [vmem:[%s4968_s27 + $0x70] sm:$0xff] }
 0x25a   : > { %v3924_v41 = vpop.f32.mrb[0].mxu1 }
 0x25b   : > { %v1536_v60 = vpop.f32.mrb[1].mxu1  ;;  %v1545_v50 = vadd.f32 %v3924_v41, %v3663_v7 }
 0x25c   : > { %v1537_v5 = vadd.f32 %v3663_v7, %v1536_v60  ;;  %v3925_v43 = vpop.f32.mrb[2].mxu1 }
 0x25d   : > { %v1539_v17 = vpop.f32.mrb[3].mxu1  ;;  %v1548_v54 = vadd.f32 %v3925_v43, %v3663_v7 }
 0x25e   : > { %v1540_v25 = vadd.f32 %v3663_v7, %v1539_v17  ;;  %1601 = vadd.xlane.f32.xlu0 %v1537_v5 }
 0x260   : > { %1603 = vadd.xlane.f32.xlu1 %v1540_v25 }
 0x262   : > { %1605 = vadd.xlane.f32.xlu0 %v1545_v50 }
 0x266   : > { %1607 = vadd.xlane.f32.xlu0 %v1548_v54 }
 0x27c   : > { %v3928_v55 = vpop.f32.mrb[4].mxu1 }
 0x27d   : > { %v1552_v56 = vpop.f32.mrb[5].mxu1  ;;  %v1561_v1 = vadd.f32 %v3928_v55, %v3663_v7  ;;  %v4319_v55 = vld [vmem:[%s6383_s10 + $0x10] sm:$0xff]  }
 0x27e   : > { %v1553_v58 = vadd.f32 %v3663_v7, %v1552_v56  ;;  %v3929_v61 = vpop.f32.mrb[6].mxu1  ;;  %v4721_v56 = vld [vmem:[%s4968_s27] sm:$0xff] }
 0x27f   : > { %v1555_v0 = vpop.f32.mrb[7].mxu1  ;;  %v5363_v29 = vadd.f32 %v3929_v61, %v3663_v7 }
 0x280   : > { %v1556_v18 = vadd.f32 %v3663_v7, %v1555_v0  ;;  %1609 = vadd.xlane.f32.xlu0 %v1553_v58 }
 0x282   : > { %1611 = vadd.xlane.f32.xlu1 %v1556_v18 }
 0x284   : > { %v3932_v49 = vpop.f32.mrb[8].mxu1  ;;  %1613 = vadd.xlane.f32.xlu0 %v1561_v1 }
 0x285   : > { %v1568_v27 = vpop.f32.mrb[9].mxu1  ;;  %v5371_v9 = vadd.f32 %v3932_v49, %v3663_v7 }
 0x286   : > { %v5365_v4 = vadd.f32 %v3663_v7, %v1568_v27  ;;  %v3933_v10 = vpop.f32.mrb[10].mxu1  ;;  %1615 = vadd.xlane.f32.xlu1 %v5363_v29 }
 0x287   : > { %v1571_v36 = vpop.f32.mrb[11].mxu1  ;;  %v5374_v35 = vadd.f32 %v3933_v10, %v3663_v7  ;;  %v4320_v10 = vld [vmem:[%s6383_s10 + $0x18] sm:$0xff]  }
 0x288   : > { %v5368_v30 = vadd.f32 %v3663_v7, %v1571_v36  ;;  %1617 = vadd.xlane.f32.xlu0 %v5365_v4 }
 0x28a   : > { %1619 = vadd.xlane.f32.xlu1 %v5368_v30 }
 0x28c   : > { %1621 = vadd.xlane.f32.xlu0 %v5371_v9 }
 0x28e   : > { %1623 = vadd.xlane.f32.xlu1 %v5374_v35 }
 0x2a7   : > { %v3936_v14 = vpop.f32.mrb[12].mxu1 }
 0x2a8   : > { %v1584_v48 = vpop.f32.mrb[13].mxu1  ;;  %v5383_v62 = vadd.f32 %v3936_v14, %v3663_v7  ;;  %v4321_v14 = vld [vmem:[%s6381_s8] sm:$0xff]  }
 0x2a9   : > { %v5378_v22 = vadd.f32 %v3663_v7, %v1584_v48  ;;  %v3937_v57 = vpop.f32.mrb[14].mxu1  ;;  %v4723_v48 = vld [vmem:[%s4968_s27 + $0x10] sm:$0xff] }
 0x2aa   : > { %v1587_v24 = vpop.f32.mrb[15].mxu1  ;;  %v5386_v34 = vadd.f32 %v3937_v57, %v3663_v7  ;;  %v4724_v57 = vld [vmem:[%s4968_s27 + $0x18] sm:$0xff] }
 0x2ab   : > { %v5380_v38 = vadd.f32 %v3663_v7, %v1587_v24  ;;  %1625 = vadd.xlane.f32.xlu0 %v5378_v22  ;;  %v4725_v24 = vld [vmem:[%s4968_s27 + $0x20] sm:$0xff] }
 0x2ad   : > { %1627 = vadd.xlane.f32.xlu1 %v5380_v38 }
 0x2af   : > { %1629 = vadd.xlane.f32.xlu0 %v5383_v62 }
 0x2b1   : > { %1631 = vadd.xlane.f32.xlu1 %v5386_v34 }
 0x2eb   : > { %v1602_v28 = vpop.xlane.xlu0 %1601 }
 0x2ec   : > { %v1634_v3 = vmul.f32 0.0078125, %v1602_v28  ;;  %v4726_v28 = vld [vmem:[%s4968_s27 + $0x28] sm:$0xff] }
 0x2ed   : > { %v1604_v45 = vpop.xlane.xlu1 %1603 }
 0x2ee   : > { %v5390_v16 = vsub.f32 %v1537_v5, %v1634_v3  ;;  %v1635_v33 = vmul.f32 0.0078125, %v1604_v45  ;;  %v688_v3 = vpack.c.bf16 %v4726_v28, %v4725_v24  ;;  %v4322_v45 = vld [vmem:[%s6381_s8 + $0x8] sm:$0xff]  }
 0x2ef   : > { %v1606_v8 = vpop.xlane.xlu0 %1605 }
 0x2f0   : > { %v5392_v37 = vsub.f32 %v1540_v25, %v1635_v33  ;;  %v1636_v2 = vmul.f32 0.0078125, %v1606_v8  ;;  %v1666_v13 = vmul.f32 %v5390_v16, %v5390_v16  ;;  %v4323_v33 = vld [vmem:[%s6381_s8 + $0x10] sm:$0xff]  }
 0x2f1   : > { %v4727_v8 = vld [vmem:[%s4968_s27 + $0x30] sm:$0xff] }
 0x2f2   : > { %v5396_v20 = vsub.f32 %v1545_v50, %v1636_v2  ;;  %1682 = vadd.xlane.f32.xlu0 %v1666_v13  ;;  %v1667_v31 = vmul.f32 %v5392_v37, %v5392_v37  ;;  %v4318_v50 = vld [vmem:[%s6383_s10 + $0x8] sm:$0xff]   ;;  %v4728_v2 = vld [vmem:[%s4968_s27 + $0x38] sm:$0xff] }
 0x2f3   : > { %v1608_v42 = vpop.xlane.xlu0 %1607  ;;  %3888 = vmatprep.subr.bf16.mxu0 %v4318_v50  ;;  %v689_v13 = vpack.c.bf16 %v4728_v2, %v4727_v8  ;;  %v5532_v8 = vld [vmem:[%s6419_s7] ss:$0 sm:$0xff]  ;;  %s3533_s7 = sshll.u32 %s6263_s5, 4  ;;  %s6325_s7 = int_to_ptr.vmem [resolvable:$true] %s3533_s7 }
 0x2f4   : > { %v1637_v19 = vmul.f32 0.0078125, %v1608_v42  ;;  %1684 = vadd.xlane.f32.xlu1 %v1667_v31  ;;  %v1668_v12 = vmul.f32 %v5396_v20, %v5396_v20  ;;  %3889 = vmatpush3.bf16.msra.mxu0 %v4318_v50  ;;  %v4729_v31 = vld [vmem:[%s4968_s27 + $0x40] sm:$0xff]  ;;  %v4730_v42 = vld [vmem:[%s4968_s27 + $0x48] sm:$0xff]  ;;  %v4328_v50 = vld [vmem:[%s6381_s8 + $0x38] sm:$0xff]   ;;  %s4737_s23 = scalar_lea.vmem %s6325_s7, 2048  ;;  %p4744_p0 = scmp.lt.s32.totalorder %s6325_s7, %s4742_s28 }
 0x2f5   : > { %3890 = vmatprep.subr.bf16.mxu0 %v4319_v55  ;;  %p4738_p11 = scmp.ne.s32.totalorder %s6325_s7, %s4737_s23 }
 0x2f6   : > { %v5402_v59 = vsub.f32 %v1548_v54, %v1637_v19  ;;  %1686 = vadd.xlane.f32.xlu0 %v1668_v12  ;;  %v690_v19 = vpack.c.bf16 %v4730_v42, %v4729_v31  ;;  %v4324_v12 = vld [vmem:[%s6381_s8 + $0x18] sm:$0xff]  }
 0x2f7   : > { %p4739_p12 = pnand %p4738_p11, %p4949_p5 }
 0x2f8   : > { %v1669_v44 = vmul.f32 %v5402_v59, %v5402_v59  ;;  %3891 = vmatpush3.bf16.msra.mxu0 %v4319_v55 }
 0x2f9   : > { %3892 = vmatprep.subr.bf16.mxu0 %v4320_v10  ;;  %p4740_p13 = pneg %p4739_p12 }
 0x2fa   : > { %1688 = vadd.xlane.f32.xlu1 %v1669_v44  ;;  %v4325_v44 = vld [vmem:[%s6381_s8 + $0x20] sm:$0xff]  }
 0x2fc   : > { %3893 = vmatpush3.bf16.msra.mxu0 %v4320_v10 }
 0x2fd   : > { %3938 = vmatprep.subr.bf16.mxu0 %v4321_v14 }
 0x30d   : > { %v1610_v21 = vpop.xlane.xlu0 %1609 }
 0x30e   : > { %v1638_v23 = vmul.f32 0.0078125, %v1610_v21  ;;  %v4731_v21 = vld [vmem:[%s4968_s27 + $0x50] sm:$0xff] }
 0x30f   : > { %v1612_v46 = vpop.xlane.xlu1 %1611 }
 0x310   : > { %v5406_v15 = vsub.f32 %v1553_v58, %v1638_v23  ;;  %v1639_v26 = vmul.f32 0.0078125, %v1612_v46  ;;  %v4722_v58 = vld [vmem:[%s4968_s27 + $0x8] sm:$0xff]  ;;  %v4732_v23 = vld [vmem:[%s4968_s27 + $0x58] sm:$0xff] }
 0x311   : > { %v1614_v53 = vpop.xlane.xlu0 %1613  ;;  %v686_v61 = vpack.c.bf16 %v4722_v58, %v4721_v56  ;;  %v691_v46 = vpack.c.bf16 %v4732_v23, %v4731_v21 }
 0x312   : > { %v5408_v11 = vsub.f32 %v1556_v18, %v1639_v26  ;;  %v1640_v32 = vmul.f32 0.0078125, %v1614_v53  ;;  %v1670_v52 = vmul.f32 %v5406_v15, %v5406_v15  ;;  %v4733_v26 = vld [vmem:[%s4968_s27 + $0x60] sm:$0xff]  ;;  %v4734_v53 = vld [vmem:[%s4968_s27 + $0x68] sm:$0xff] }
 0x313   : > { %v1616_v47 = vpop.xlane.xlu1 %1615  ;;  %3894 = vmatprep.mubr.msk.bf16.mxu0 %vm733_vm0, %v686_v61 }
 0x314   : > { %v5412_v6 = vsub.f32 %v1561_v1, %v1640_v32  ;;  %v1641_v39 = vmul.f32 0.0078125, %v1616_v47  ;;  %1690 = vadd.xlane.f32.xlu0 %v1670_v52  ;;  %v1671_v51 = vmul.f32 %v5408_v11, %v5408_v11  ;;  %v692_v32 = vpack.c.bf16 %v4734_v53, %v4733_v26  ;;  %v4326_v52 = vld [vmem:[%s6381_s8 + $0x28] sm:$0xff]  }
 0x315   : > { %v1618_v63 = vpop.xlane.xlu0 %1617 }
 0x316   : > { %v5420_v7 = vsub.f32 %v5363_v29, %v1641_v39  ;;  %v1642_v41 = vmul.f32 0.0078125, %v1618_v63  ;;  %1692 = vadd.xlane.f32.xlu1 %v1671_v51  ;;  %v1672_v60 = vmul.f32 %v5412_v6, %v5412_v6  ;;  %v4327_v39 = vld [vmem:[%s6381_s8 + $0x30] sm:$0xff]   ;;  %v4736_v63 = vld [vmem:[%s4968_s27 + $0x78] sm:$0xff] }
 0x317   : > { %v1620_v5 = vpop.xlane.xlu1 %1619 }
 0x318   : > { %v5425_v43 = vsub.f32 %v5365_v4, %v1642_v41  ;;  %v1643_v17 = vmul.f32 0.0078125, %v1620_v5  ;;  %1694 = vadd.xlane.f32.xlu0 %v1672_v60  ;;  %v1673_v25 = vmul.f32 %v5420_v7, %v5420_v7  ;;  %v693_v41 = vpack.c.bf16 %v4736_v63, %v4735_v40 }
 0x319   : > { %v1622_v54 = vpop.xlane.xlu0 %1621 }
 0x31a   : > { %v5438_v0 = vsub.f32 %v5368_v30, %v1643_v17  ;;  %v1644_v18 = vmul.f32 0.0078125, %v1622_v54  ;;  %1696 = vadd.xlane.f32.xlu1 %v1673_v25  ;;  %v1674_v1 = vmul.f32 %v5425_v43, %v5425_v43 }
 0x31b   : > { %v1624_v29 = vpop.xlane.xlu1 %1623 }
 0x31c   : > { %v5444_v49 = vsub.f32 %v5371_v9, %v1644_v18  ;;  %v1645_v27 = vmul.f32 0.0078125, %v1624_v29  ;;  %1698 = vadd.xlane.f32.xlu0 %v1674_v1  ;;  %v1675_v4 = vmul.f32 %v5438_v0, %v5438_v0 }
 0x31e   : > { %v5452_v36 = vsub.f32 %v5374_v35, %v1645_v27  ;;  %1700 = vadd.xlane.f32.xlu1 %v1675_v4  ;;  %v1676_v30 = vmul.f32 %v5444_v49, %v5444_v49  ;;  %v687_v35 = vpack.c.bf16 %v4724_v57, %v4723_v48 }
 0x320   : > { %1702 = vadd.xlane.f32.xlu0 %v1676_v30  ;;  %v1677_v9 = vmul.f32 %v5452_v36, %v5452_v36  ;;  %3895 = vmatmul.mubr.msk.bf16.vlgmr.msra.gmra.mrb[0].mxu0 %vm733_vm0, %v687_v35 }
 0x321   : > { %3939 = vmatpush3.bf16.msra.mxu0 %v4321_v14  ;;  %3898 = vmatprep.mubr.msk.bf16.mxu0 %vm733_vm0, %v688_v3  ;;  %v5526_v3 = vld [vmem:[%s6418_s6] ss:$0 sm:$0xff]  ;;  %s3762_s6 = sshll.u32 %s4932_s2, 11  ;;  %s6332_s2 = scalar_lea.sflag [#allocation3], %s637_s21 }
 0x322   : > { %1704 = vadd.xlane.f32.xlu1 %v1677_v9  ;;  %3940 = vmatprep.subr.bf16.mxu0 %v4322_v45  ;;  %s6323_s0 = scalar_lea.hbm %s6393_s20, %s3762_s6  ;;  %s4743_s6 = scalar_lea.vmem %s4742_s28, 4096 }
 0x323   : > { %p4745_p1 = scmp.lt.s32.totalorder %s4743_s6, %s4737_s23 }
 0x325   : > { %3941 = vmatpush3.bf16.msra.mxu0 %v4322_v45  ;;  %p4746_p2 = por %p4745_p1, %p4744_p0 }
 0x326   : > { %3942 = vmatprep.subr.bf16.mxu0 %v4323_v33 }
 0x327   : > { %p4747_p3 = pnand %p4746_p2, %p4740_p13 }
 0x328   : > { %3899 = vmatmul.mubr.msk.bf16.gmra.mrb[4].mxu0 %vm733_vm0, %v689_v13 }
 0x329   : > { %3943 = vmatpush3.bf16.msra.mxu0 %v4323_v33  ;;  %3902 = vmatprep.mubr.msk.bf16.mxu0 %vm733_vm0, %v690_v19 }
 0x32a   : > { %3944 = vmatprep.subr.bf16.mxu0 %v4324_v12 }
 0x32d   : > { %3945 = vmatpush3.bf16.msra.mxu0 %v4324_v12 }
 0x32e   : > { %3946 = vmatprep.subr.bf16.mxu0 %v4325_v44 }
 0x330   : > { %3903 = vmatmul.mubr.msk.bf16.gmra.mrb[8].mxu0 %vm733_vm0, %v691_v46 }
 0x331   : > { %3947 = vmatpush3.bf16.msra.mxu0 %v4325_v44  ;;  %3906 = vmatprep.mubr.msk.bf16.mxu0 %vm733_vm0, %v692_v32 }
 0x332   : > { %3948 = vmatprep.subr.bf16.mxu0 %v4326_v52 }
 0x335   : > { %3949 = vmatpush3.bf16.msra.mxu0 %v4326_v52 }
 0x336   : > { %3950 = vmatprep.subr.bf16.mxu0 %v4327_v39 }
 0x338   : > { %v1626_v47 = vpop.xlane.xlu0 %1625  ;;  %3907 = vmatmul.mubr.msk.bf16.gmra.mrb[12].mxu0 %vm733_vm0, %v693_v41 }
 0x339   : > { %v1646_v51 = vmul.f32 0.0078125, %v1626_v47  ;;  %3951 = vmatpush3.bf16.msra.mxu0 %v4327_v39 }
 0x33a   : > { %v1628_v60 = vpop.xlane.xlu1 %1627  ;;  %3952 = vmatprep.subr.bf16.mxu0 %v4328_v50 }
 0x33b   : > { %v5500_v5 = vsub.f32 %v5378_v22, %v1646_v51  ;;  %v1647_v17 = vmul.f32 0.0078125, %v1628_v60 }
 0x33c   : > { %v1630_v25 = vpop.xlane.xlu0 %1629 }
 0x33d   : > { %v5506_v54 = vsub.f32 %v5380_v38, %v1647_v17  ;;  %v1648_v55 = vmul.f32 0.0078125, %v1630_v25  ;;  %v1678_v56 = vmul.f32 %v5500_v5, %v5500_v5  ;;  %3953 = vmatpush3.bf16.msra.mxu0 %v4328_v50 }
 0x33e   : > { %v1632_v58 = vpop.xlane.xlu1 %1631 }
 0x33f   : > { %v5512_v22 = vsub.f32 %v5383_v62, %v1648_v55  ;;  %v1649_v61 = vmul.f32 0.0078125, %v1632_v58  ;;  %1706 = vadd.xlane.f32.xlu0 %v1678_v56  ;;  %v1679_v18 = vmul.f32 %v5506_v54, %v5506_v54 }
 0x341   : > { %v5517_v38 = vsub.f32 %v5386_v34, %v1649_v61  ;;  %1708 = vadd.xlane.f32.xlu1 %v1679_v18  ;;  %v1680_v1 = vmul.f32 %v5512_v22, %v5512_v22 }
 0x343   : > { %1710 = vadd.xlane.f32.xlu0 %v1680_v1  ;;  %v1681_v29 = vmul.f32 %v5517_v38, %v5517_v38 }
 0x345   : > { %1712 = vadd.xlane.f32.xlu1 %v1681_v29 }
 0x37f   : > { %v1683_v62 = vpop.xlane.xlu0 %1682 }
 0x380   : > { %v1714_v27 = vmul.f32 0.0078125, %v1683_v62 }
 0x381   : > { %v1685_v4 = vpop.xlane.xlu1 %1684 }
 0x382   : > { %v1730_v10 = vadd.f32 1e-05, %v1714_v27  ;;  %v1715_v30 = vmul.f32 0.0078125, %v1685_v4 }
 0x383   : > { %v1687_v9 = vpop.xlane.xlu0 %1686 }
 0x384   : > { %4529 = vrsqrt.f32 %v1730_v10  ;;  %v1731_v14 = vadd.f32 1e-05, %v1715_v30  ;;  %v1716_v34 = vmul.f32 0.0078125, %v1687_v9 }
 0x386   : > { %4531 = vrsqrt.f32 %v1731_v14  ;;  %v1732_v48 = vadd.f32 1e-05, %v1716_v34 }
 0x387   : > { %v1689_v57 = vpop.xlane.xlu1 %1688 }
 0x388   : > { %4533 = vrsqrt.f32 %v1732_v48  ;;  %v1717_v35 = vmul.f32 0.0078125, %v1689_v57 }
 0x38a   : > { %v1733_v24 = vadd.f32 1e-05, %v1717_v35 }
 0x38c   : > { %4535 = vrsqrt.f32 %v1733_v24 }
 0x38e   : > { %v4530_v28 = vpop.eup %4529 }
 0x38f   : > { %v1762_v45 = vmul.f32 %v4530_v28, %v5390_v16 }
 0x390   : > { %v4532_v33 = vpop.eup %4531 }
 0x391   : > { %v1763_v2 = vmul.f32 %v4532_v33, %v5392_v37  ;;  %v1784_v13 = vmul.f32 %v5526_v3, %v1762_v45 }
 0x392   : > { %v4534_v31 = vpop.eup %4533 }
 0x393   : > { %v1764_v42 = vmul.f32 %v4534_v31, %v5396_v20  ;;  %v1785_v19 = vmul.f32 %v5526_v3, %v1763_v2  ;;  %v5539_v12 = vadd.f32 %v5532_v8, %v1784_v13 }
 0x395   : > { %v1786_v16 = vmul.f32 %v5526_v3, %v1764_v42  ;;  %v5543_v44 = vadd.f32 %v5532_v8, %v1785_v19  ;;  %v3680_v21 = vmul.f32 -1.442695, %v5539_v12 }
 0x396   : > { %v4536_v23 = vpop.eup %4535 }
 0x397   : > { %v1765_v37 = vmul.f32 %v4536_v23, %v5402_v59  ;;  %4537 = vpow2.f32 %v3680_v21  ;;  %v3681_v46 = vmul.f32 -1.442695, %v5543_v44  ;;  %v5549_v20 = vadd.f32 %v5532_v8, %v1786_v16 }
 0x399   : > { %v1787_v26 = vmul.f32 %v5526_v3, %v1765_v37  ;;  %4539 = vpow2.f32 %v3681_v46  ;;  %v3682_v53 = vmul.f32 -1.442695, %v5549_v20 }
 0x39b   : > { %v5554_v32 = vadd.f32 %v5532_v8, %v1787_v26  ;;  %4541 = vpow2.f32 %v3682_v53 }
 0x39d   : > { %v3683_v52 = vmul.f32 -1.442695, %v5554_v32 }
 0x39f   : > { %4543 = vpow2.f32 %v3683_v52 }
 0x3a1   : > { %v4538_v47 = vpop.eup %4537  ;;  %v1691_v59 = vpop.xlane.xlu0 %1690 }
 0x3a2   : > { %v1718_v39 = vmul.f32 0.0078125, %v1691_v59  ;;  %v1870_v51 = vadd.f32 1.0, %v4538_v47 }
 0x3a3   : > { %v4540_v40 = vpop.eup %4539  ;;  %v1693_v63 = vpop.xlane.xlu1 %1692 }
 0x3a4   : > { %v1734_v41 = vadd.f32 1e-05, %v1718_v39  ;;  %v1719_v60 = vmul.f32 0.0078125, %v1693_v63  ;;  %v1871_v17 = vadd.f32 1.0, %v4540_v40  ;;  %4545 = vrcp.f32 %v1870_v51 }
 0x3a5   : > { %v4542_v25 = vpop.eup %4541  ;;  %v1695_v50 = vpop.xlane.xlu0 %1694 }
 0x3a6   : > { %4547 = vrsqrt.f32 %v1734_v41  ;;  %v1735_v55 = vadd.f32 1e-05, %v1719_v60  ;;  %v1720_v56 = vmul.f32 0.0078125, %v1695_v50  ;;  %v1872_v61 = vadd.f32 1.0, %v4542_v25 }
 0x3a7   : > { %v1697_v58 = vpop.xlane.xlu1 %1696  ;;  %4549 = vrcp.f32 %v1871_v17 }
 0x3a8   : > { %4551 = vrsqrt.f32 %v1735_v55  ;;  %v1736_v18 = vadd.f32 1e-05, %v1720_v56  ;;  %v1721_v1 = vmul.f32 0.0078125, %v1697_v58 }
 0x3a9   : > { %v4544_v29 = vpop.eup %4543  ;;  %v1699_v62 = vpop.xlane.xlu0 %1698 }
 0x3aa   : > { %4553 = vrsqrt.f32 %v1736_v18  ;;  %v1737_v27 = vadd.f32 1e-05, %v1721_v1  ;;  %v1722_v4 = vmul.f32 0.0078125, %v1699_v62  ;;  %v1873_v10 = vadd.f32 1.0, %v4544_v29 }
 0x3ab   : > { %v1701_v30 = vpop.xlane.xlu1 %1700  ;;  %4555 = vrcp.f32 %v1872_v61 }
 0x3ac   : > { %4557 = vrsqrt.f32 %v1737_v27  ;;  %v1738_v9 = vadd.f32 1e-05, %v1722_v4  ;;  %v1723_v14 = vmul.f32 0.0078125, %v1701_v30 }
 0x3ad   : > { %v1703_v34 = vpop.xlane.xlu0 %1702  ;;  %4559 = vrcp.f32 %v1873_v10 }
 0x3ae   : > { %4561 = vrsqrt.f32 %v1738_v9  ;;  %v1739_v48 = vadd.f32 1e-05, %v1723_v14  ;;  %v1724_v57 = vmul.f32 0.0078125, %v1703_v34  ;;  %v4546_v35 = vpop.eup %4545 }
 0x3af   : > { %v1705_v24 = vpop.xlane.xlu1 %1704  ;;  %v1918_v19 = vmul.f32 %v4546_v35, %v5539_v12 }
 0x3b0   : > { %v4548_v28 = vpop.eup %4547  ;;  %4563 = vrsqrt.f32 %v1739_v48  ;;  %v1740_v45 = vadd.f32 1e-05, %v1724_v57  ;;  %v1725_v33 = vmul.f32 0.0078125, %v1705_v24 }
 0x3b1   : > { %v4550_v2 = vpop.eup %4549  ;;  %v1766_v13 = vmul.f32 %v4548_v28, %v5406_v15 }
 0x3b2   : > { %v4552_v31 = vpop.eup %4551  ;;  %4565 = vrsqrt.f32 %v1740_v45  ;;  %v1741_v42 = vadd.f32 1e-05, %v1725_v33  ;;  %v1919_v16 = vmul.f32 %v4550_v2, %v5543_v44 }
 0x3b3   : > { %v1767_v21 = vmul.f32 %v4552_v31, %v5408_v11  ;;  %v1788_v23 = vmul.f32 %v5526_v3, %v1766_v13 }
 0x3b4   : > { %v4554_v37 = vpop.eup %4553  ;;  %4567 = vrsqrt.f32 %v1741_v42  ;;  %v1934_v46 = vpack.c.bf16 %v1919_v16, %v1918_v19 }
 0x3b5   : > { %v4556_v26 = vpop.eup %4555  ;;  %v1789_v53 = vmul.f32 %v5526_v3, %v1767_v21  ;;  %v5564_v52 = vadd.f32 %v5532_v8, %v1788_v23  ;;  %v1768_v15 = vmul.f32 %v4554_v37, %v5412_v6 }
 0x3b6   : > { %v4558_v47 = vpop.eup %4557  ;;  %3954 = vmatprep.mubr.bf16.mxu0 %v1934_v46  ;;  %v1920_v40 = vmul.f32 %v4556_v26, %v5549_v20 }
 0x3b7   : > { %v4560_v12 = vpop.eup %4559  ;;  %v5568_v44 = vadd.f32 %v5532_v8, %v1789_v53  ;;  %v3684_v11 = vmul.f32 -1.442695, %v5564_v52  ;;  %v1769_v59 = vmul.f32 %v4558_v47, %v5420_v7  ;;  %v1790_v39 = vmul.f32 %v5526_v3, %v1768_v15 }
 0x3b8   : > { %v4562_v51 = vpop.eup %4561  ;;  %v1921_v63 = vmul.f32 %v4560_v12, %v5554_v32 }
 0x3b9   : > { %4569 = vpow2.f32 %v3684_v11  ;;  %v3685_v6 = vmul.f32 -1.442695, %v5568_v44  ;;  %v1791_v41 = vmul.f32 %v5526_v3, %v1769_v59  ;;  %v5578_v60 = vadd.f32 %v5532_v8, %v1790_v39 }
 0x3ba   : > { %v4564_v17 = vpop.eup %4563  ;;  %v1935_v25 = vpack.c.bf16 %v1921_v63, %v1920_v40  ;;  %v1770_v50 = vmul.f32 %v4562_v51, %v5425_v43 }
 0x3bb   : > { %4571 = vpow2.f32 %v3685_v6  ;;  %v5582_v7 = vadd.f32 %v5532_v8, %v1791_v41  ;;  %v3686_v20 = vmul.f32 -1.442695, %v5578_v60  ;;  %v1771_v32 = vmul.f32 %v4564_v17, %v5438_v0 }
 0x3bc   : > { %v4566_v55 = vpop.eup %4565  ;;  %3955 = vmatmul.mubr.bf16.vlgmr.msra.gmra.mrb[16].mxu0 %v1935_v25  ;;  %v1792_v56 = vmul.f32 %v5526_v3, %v1770_v50 }
 0x3bd   : > { %4573 = vpow2.f32 %v3686_v20  ;;  %v3687_v58 = vmul.f32 -1.442695, %v5582_v7  ;;  %v1793_v61 = vmul.f32 %v5526_v3, %v1771_v32  ;;  %v1772_v18 = vmul.f32 %v4566_v55, %v5444_v49 }
 0x3be   : > { %v4568_v43 = vpop.eup %4567  ;;  %v5591_v1 = vadd.f32 %v5532_v8, %v1792_v56 }
 0x3bf   : > { %4575 = vpow2.f32 %v3687_v58  ;;  %v5594_v29 = vadd.f32 %v5532_v8, %v1793_v61  ;;  %v1773_v0 = vmul.f32 %v4568_v43, %v5452_v36  ;;  %v1794_v62 = vmul.f32 %v5526_v3, %v1772_v18 }
 0x3c0   : > { %v3688_v27 = vmul.f32 -1.442695, %v5591_v1 }
 0x3c1   : > { %v3689_v4 = vmul.f32 -1.442695, %v5594_v29  ;;  %v1795_v10 = vmul.f32 %v5526_v3, %v1773_v0  ;;  %v5602_v49 = vadd.f32 %v5532_v8, %v1794_v62 }
 0x3c2   : > { %4577 = vpow2.f32 %v3688_v27 }
 0x3c3   : > { %v4570_v30 = vpop.eup %4569  ;;  %4579 = vpow2.f32 %v3689_v4  ;;  %v5605_v9 = vadd.f32 %v5532_v8, %v1795_v10  ;;  %v3690_v14 = vmul.f32 -1.442695, %v5602_v49 }
 0x3c4   : > { %v1874_v36 = vadd.f32 1.0, %v4570_v30 }
 0x3c5   : > { %v4572_v34 = vpop.eup %4571  ;;  %4581 = vpow2.f32 %v3690_v14  ;;  %v3691_v48 = vmul.f32 -1.442695, %v5605_v9 }
 0x3c6   : > { %v1875_v57 = vadd.f32 1.0, %v4572_v34  ;;  %4583 = vrcp.f32 %v1874_v36 }
 0x3c7   : > { %v4574_v35 = vpop.eup %4573  ;;  %4585 = vpow2.f32 %v3691_v48 }
 0x3c8   : > { %4587 = vrcp.f32 %v1875_v57  ;;  %v1876_v24 = vadd.f32 1.0, %v4574_v35 }
 0x3c9   : > { %v4576_v28 = vpop.eup %4575 }
 0x3ca   : > { %v1877_v45 = vadd.f32 1.0, %v4576_v28  ;;  %4589 = vrcp.f32 %v1876_v24 }
 0x3cc   : > { %v4578_v33 = vpop.eup %4577  ;;  %v1707_v2 = vpop.xlane.xlu0 %1706  ;;  %4591 = vrcp.f32 %v1877_v45 }
 0x3cd   : > { %v4580_v13 = vpop.eup %4579  ;;  %v1726_v31 = vmul.f32 0.0078125, %v1707_v2  ;;  %v1878_v42 = vadd.f32 1.0, %v4578_v33 }
 0x3ce   : > { %v1709_v19 = vpop.xlane.xlu1 %1708  ;;  %v1879_v16 = vadd.f32 1.0, %v4580_v13 }
 0x3cf   : > { %v4582_v21 = vpop.eup %4581  ;;  %v1742_v23 = vadd.f32 1e-05, %v1726_v31  ;;  %v1727_v37 = vmul.f32 0.0078125, %v1709_v19  ;;  %4593 = vrcp.f32 %v1878_v42 }
 0x3d0   : > { %v4584_v46 = vpop.eup %4583  ;;  %v1711_v26 = vpop.xlane.xlu0 %1710  ;;  %4595 = vrcp.f32 %v1879_v16  ;;  %v1880_v53 = vadd.f32 1.0, %v4582_v21 }
 0x3d1   : > { %v4586_v15 = vpop.eup %4585  ;;  %4597 = vrsqrt.f32 %v1742_v23  ;;  %v1743_v47 = vadd.f32 1e-05, %v1727_v37  ;;  %v1728_v12 = vmul.f32 0.0078125, %v1711_v26  ;;  %v1922_v39 = vmul.f32 %v4584_v46, %v5564_v52 }
 0x3d2   : > { %v4588_v11 = vpop.eup %4587  ;;  %v1713_v59 = vpop.xlane.xlu1 %1712  ;;  %v1881_v51 = vadd.f32 1.0, %v4586_v15  ;;  %4599 = vrcp.f32 %v1880_v53 }
 0x3d3   : > { %4601 = vrsqrt.f32 %v1743_v47  ;;  %v1744_v40 = vadd.f32 1e-05, %v1728_v12  ;;  %v1729_v63 = vmul.f32 0.0078125, %v1713_v59  ;;  %v1923_v6 = vmul.f32 %v4588_v11, %v5568_v44 }
 0x3d4   : > { %v4590_v41 = vpop.eup %4589  ;;  %4603 = vrcp.f32 %v1881_v51 }
 0x3d5   : > { %4605 = vrsqrt.f32 %v1744_v40  ;;  %v1745_v17 = vadd.f32 1e-05, %v1729_v63  ;;  %v1936_v25 = vpack.c.bf16 %v1923_v6, %v1922_v39  ;;  %v1924_v20 = vmul.f32 %v4590_v41, %v5578_v60  ;;  %v3696_v39 = vld [vmem:[%s6382_s9] ss:$0 sm:$0xff] }
 0x3d6   : > { %v4592_v50 = vpop.eup %4591 }
 0x3d7   : > { %4607 = vrsqrt.f32 %v1745_v17  ;;  %3958 = vmatprep.mubr.bf16.mxu0 %v1936_v25  ;;  %v1925_v32 = vmul.f32 %v4592_v50, %v5582_v7 }
 0x3d9   : > { %v4594_v52 = vpop.eup %4593  ;;  %v1937_v55 = vpack.c.bf16 %v1925_v32, %v1924_v20 }
 0x3da   : > { %v4596_v56 = vpop.eup %4595  ;;  %v1926_v61 = vmul.f32 %v4594_v52, %v5591_v1 }
 0x3db   : > { %v4598_v58 = vpop.eup %4597  ;;  %3959 = vmatmul.mubr.bf16.gmra.mrb[20].mxu0 %v1937_v55  ;;  %v1927_v44 = vmul.f32 %v4596_v56, %v5594_v29 }
 0x3dc   : > { %v4600_v18 = vpop.eup %4599  ;;  %v1774_v43 = vmul.f32 %v4598_v58, %v5500_v5 }
 0x3dd   : > { %v4602_v0 = vpop.eup %4601  ;;  %v1938_v62 = vpack.c.bf16 %v1927_v44, %v1926_v61  ;;  %v1928_v10 = vmul.f32 %v4600_v18, %v5602_v49 }
 0x3de   : > { %v4604_v27 = vpop.eup %4603  ;;  %v1775_v4 = vmul.f32 %v4602_v0, %v5506_v54  ;;  %v1796_v60 = vmul.f32 %v5526_v3, %v1774_v43 }
 0x3df   : > { %v4606_v7 = vpop.eup %4605  ;;  %3962 = vmatprep.mubr.bf16.mxu0 %v1938_v62  ;;  %v1929_v30 = vmul.f32 %v4604_v27, %v5605_v9 }
 0x3e0   : > { %v1797_v1 = vmul.f32 %v5526_v3, %v1775_v4  ;;  %v1818_v29 = vadd.f32 %v5532_v8, %v1796_v60  ;;  %v1776_v14 = vmul.f32 %v4606_v7, %v5512_v22 }
 0x3e1   : > { %v4608_v5 = vpop.eup %4607  ;;  %v1939_v36 = vpack.c.bf16 %v1929_v30, %v1928_v10 }
 0x3e2   : > { %v1819_v34 = vadd.f32 %v5532_v8, %v1797_v1  ;;  %v3692_v48 = vmul.f32 -1.442695, %v1818_v29  ;;  %v1777_v54 = vmul.f32 %v4608_v5, %v5517_v38  ;;  %v1798_v57 = vmul.f32 %v5526_v3, %v1776_v14 }
 0x3e3   : > { %3963 = vmatmul.mubr.bf16.gmra.mrb[24].mxu0 %v1939_v36 }
 0x3e4   : > { %4609 = vpow2.f32 %v3692_v48  ;;  %v3693_v49 = vmul.f32 -1.442695, %v1819_v34  ;;  %v1799_v9 = vmul.f32 %v5526_v3, %v1777_v54  ;;  %v1820_v35 = vadd.f32 %v5532_v8, %v1798_v57  ;;  %v4329_v48 = vld [vmem:[%s6387_s14] ss:$12 sps:$4 sm:$0xff]   ;;  %v4331_v54 = vld [vmem:[%s6387_s14 + $0x4] ss:$12 sps:$4 sm:$0xff]  }
 0x3e5   : > { %v4334_v57 = vld [vmem:[%s6387_s14 + $0x1c] ss:$12 sps:$4 sm:$0xff]   ;;  %2517 = vmatprep.subr.bf16.mxu1 %v4331_v54 }
 0x3e6   : > { %4611 = vpow2.f32 %v3693_v49  ;;  %v1821_v24 = vadd.f32 %v5532_v8, %v1799_v9  ;;  %v3694_v22 = vmul.f32 -1.442695, %v1820_v35  ;;  %v4335_v49 = vld [vmem:[%s6387_s14 + $0x8] ss:$12 sps:$4 sm:$0xff]   ;;  %2518 = vmatpush1.bf16.msra.mxu1 %v4329_v48  ;;  %v4332_v9 = vld [vmem:[%s6387_s14 + $0x18] ss:$12 sps:$4 sm:$0xff]  }
 0x3e7   : > { %3970 = vmatprep.subr.bf16.mxu0 %v4335_v49  ;;  %2519 = vmatprep.subr.bf16.mxu1 %v4334_v57 }
 0x3e8   : > { %4613 = vpow2.f32 %v3694_v22  ;;  %v3695_v28 = vmul.f32 -1.442695, %v1821_v24  ;;  %3971 = vmatpush3.bf16.msra.mxu0 %v4335_v49 }
 0x3ea   : > { %4615 = vpow2.f32 %v3695_v28  ;;  %2520 = vmatpush1.bf16.msra.mxu1 %v4332_v9 }
 0x3ee   : > { %v4610_v45 = vpop.eup %4609 }
 0x3ef   : > { %v1882_v33 = vadd.f32 1.0, %v4610_v45 }
 0x3f0   : > { %v4612_v2 = vpop.eup %4611 }
 0x3f1   : > { %v1883_v38 = vadd.f32 1.0, %v4612_v2  ;;  %4617 = vrcp.f32 %v1882_v33 }
 0x3f2   : > { %v4614_v13 = vpop.eup %4613 }
 0x3f3   : > { %4619 = vrcp.f32 %v1883_v38  ;;  %v1884_v31 = vadd.f32 1.0, %v4614_v13 }
 0x3f4   : > { %v4616_v42 = vpop.eup %4615 }
 0x3f5   : > { %v1885_v19 = vadd.f32 1.0, %v4616_v42  ;;  %4621 = vrcp.f32 %v1884_v31 }
 0x3f7   : > { %4623 = vrcp.f32 %v1885_v19 }
 0x3fb   : > { %v4618_v3 = vpop.eup %4617 }
 0x3fc   : > { %v1930_v21 = vmul.f32 %v4618_v3, %v1818_v29 }
 0x3fd   : > { %v4620_v16 = vpop.eup %4619 }
 0x3fe   : > { %v1931_v8 = vmul.f32 %v4620_v16, %v1819_v34 }
 0x3ff   : > { %v4622_v23 = vpop.eup %4621 }
 0x400   : > { %v1940_v37 = vpack.c.bf16 %v1931_v8, %v1930_v21  ;;  %v1932_v26 = vmul.f32 %v4622_v23, %v1820_v35  ;;  %v4338_v23 = vld [vmem:[%s6387_s14 + $0x34] ss:$12 sps:$4 sm:$0xff]  }
 0x401   : > { %v4624_v46 = vpop.eup %4623  ;;  %2521 = vmatprep.subr.bf16.mxu1 %v4338_v23  ;;  %v4355_v23 = vld [vmem:[%s6387_s14 + $0x80] ss:$12 sps:$4 sm:$0xff]  }
 0x402   : > { %3966 = vmatprep.mubr.bf16.mxu0 %v1940_v37  ;;  %v1933_v53 = vmul.f32 %v4624_v46, %v1821_v24  ;;  %v4339_v37 = vld [vmem:[%s6387_s14 + $0x20] ss:$12 sps:$4 sm:$0xff]  }
 0x403   : > { %3972 = vmatprep.subr.bf16.mxu0 %v4339_v37 }
 0x404   : > { %v1941_v15 = vpack.c.bf16 %v1933_v53, %v1932_v26  ;;  %v4336_v26 = vld [vmem:[%s6387_s14 + $0x30] ss:$12 sps:$4 sm:$0xff]   ;;  %3973 = vmatpush3.bf16.msra.mxu0 %v4339_v37 }
 0x405   : > { %2522 = vmatpush1.bf16.msra.mxu1 %v4336_v26 }
 0x406   : > { %3967 = vmatmul.mubr.bf16.gmra.mrb[28].mxu0 %v1941_v15 }
 0x40b   : > { %v5629_v47 = vpop.f32.mrb[12].mxu0 }
 0x40c   : > { %v5631_v12 = vpop.f32.mrb[13].mxu0 }
 0x40d   : > { %v5633_v11 = vpop.f32.mrb[14].mxu0 }
 0x40e   : > { %v5635_v59 = vpop.f32.mrb[15].mxu0 }
 0x40f   : > { %6420 = vst [vmem:[#allocation7_spill] sm:$0xff] %v5635_v59 }
 0x48f   : > { %v3956_v51 = vpop.f32.mrb[16].mxu0 }
 0x490   : > { %v2047_v40 = vpop.f32.mrb[17].mxu0  ;;  %v5645_v25 = vadd.f32 %v3956_v51, %v3696_v39 }
 0x491   : > { %v5640_v63 = vadd.f32 %v3696_v39, %v2047_v40  ;;  %v3957_v6 = vpop.f32.mrb[18].mxu0  ;;  %v4342_v40 = vld [vmem:[%s6387_s14 + $0x4c] ss:$12 sps:$4 sm:$0xff]  }
 0x492   : > { %v2050_v41 = vpop.f32.mrb[19].mxu0  ;;  %v5648_v50 = vadd.f32 %v3957_v6, %v3696_v39  ;;  %v4343_v6 = vld [vmem:[%s6387_s14 + $0x38] ss:$12 sps:$4 sm:$0xff]   ;;  %2523 = vmatprep.subr.bf16.mxu1 %v4342_v40 }
 0x493   : > { %v5642_v17 = vadd.f32 %v3696_v39, %v2050_v41  ;;  %2112 = vadd.xlane.f32.xlu0 %v5640_v63  ;;  %3974 = vmatprep.subr.bf16.mxu0 %v4343_v6 }
 0x494   : > { %3975 = vmatpush3.bf16.msra.mxu0 %v4343_v6  ;;  %v4802_v6 = vmov 0  }
 0x495   : > { %2114 = vadd.xlane.f32.xlu1 %v5642_v17  ;;  %2549 = vmatprep.mubr.bf16.mxu1 %v4802_v6 }
 0x497   : > { %2116 = vadd.xlane.f32.xlu0 %v5645_v25 }
 0x499   : > { %2118 = vadd.xlane.f32.xlu1 %v5648_v50 }
 0x4ae   : > { %v3960_v20 = vpop.f32.mrb[20].mxu0 }
 0x4af   : > { %v2063_v32 = vpop.f32.mrb[21].mxu0  ;;  %v5657_v61 = vadd.f32 %v3960_v20, %v3696_v39  ;;  %v4340_v20 = vld [vmem:[%s6387_s14 + $0x48] ss:$12 sps:$4 sm:$0xff]  }
 0x4b0   : > { %v5652_v52 = vadd.f32 %v3696_v39, %v2063_v32  ;;  %v3961_v55 = vpop.f32.mrb[22].mxu0  ;;  %2524 = vmatpush1.bf16.msra.mxu1 %v4340_v20 }
 0x4b1   : > { %v2066_v56 = vpop.f32.mrb[23].mxu0  ;;  %v5660_v44 = vadd.f32 %v3961_v55, %v3696_v39 }
 0x4b2   : > { %v5654_v58 = vadd.f32 %v3696_v39, %v2066_v56  ;;  %2120 = vadd.xlane.f32.xlu0 %v5652_v52 }
 0x4b4   : > { %2122 = vadd.xlane.f32.xlu1 %v5654_v58 }
 0x4b6   : > { %v3964_v18 = vpop.f32.mrb[24].mxu0  ;;  %2124 = vadd.xlane.f32.xlu0 %v5657_v61 }
 0x4b7   : > { %v2079_v43 = vpop.f32.mrb[25].mxu0  ;;  %v5669_v60 = vadd.f32 %v3964_v18, %v3696_v39 }
 0x4b8   : > { %v5663_v0 = vadd.f32 %v3696_v39, %v2079_v43  ;;  %v3965_v62 = vpop.f32.mrb[26].mxu0  ;;  %2126 = vadd.xlane.f32.xlu1 %v5660_v44 }
 0x4b9   : > { %v2082_v27 = vpop.f32.mrb[27].mxu0  ;;  %v5672_v7 = vadd.f32 %v3965_v62, %v3696_v39 }
 0x4ba   : > { %v5666_v4 = vadd.f32 %v3696_v39, %v2082_v27  ;;  %2128 = vadd.xlane.f32.xlu0 %v5663_v0 }
 0x4bc   : > { %2130 = vadd.xlane.f32.xlu1 %v5666_v4 }
 0x4be   : > { %2132 = vadd.xlane.f32.xlu0 %v5669_v60 }
 0x4c0   : > { %2134 = vadd.xlane.f32.xlu1 %v5672_v7 }
 0x4d9   : > { %v3968_v10 = vpop.f32.mrb[28].mxu0 }
 0x4da   : > { %v2095_v30 = vpop.f32.mrb[29].mxu0  ;;  %v5681_v36 = vadd.f32 %v3968_v10, %v3696_v39  ;;  %v4346_v10 = vld [vmem:[%s6387_s14 + $0x64] ss:$12 sps:$4 sm:$0xff]  }
 0x4db   : > { %v5676_v1 = vadd.f32 %v3696_v39, %v2095_v30  ;;  %v3969_v29 = vpop.f32.mrb[30].mxu0  ;;  %v4347_v30 = vld [vmem:[%s6387_s14 + $0x50] ss:$12 sps:$4 sm:$0xff]   ;;  %2525 = vmatprep.subr.bf16.mxu1 %v4346_v10 }
 0x4dc   : > { %v2098_v14 = vpop.f32.mrb[31].mxu0  ;;  %6423 = vst [vmem:[#allocation10_spill] sm:$0xff] %v5681_v36  ;;  %v5684_v34 = vadd.f32 %v3969_v29, %v3696_v39  ;;  %3976 = vmatprep.subr.bf16.mxu0 %v4347_v30 }
 0x4dd   : > { %6421 = vst [vmem:[#allocation8_spill] sm:$0xff] %v5676_v1  ;;  %v5678_v5 = vadd.f32 %v3696_v39, %v2098_v14  ;;  %2136 = vadd.xlane.f32.xlu0 %v5676_v1  ;;  %v4344_v14 = vld [vmem:[%s6387_s14 + $0x60] ss:$12 sps:$4 sm:$0xff]   ;;  %3977 = vmatpush3.bf16.msra.mxu0 %v4347_v30 }
 0x4de   : > { %6424 = vst [vmem:[#allocation11_spill] sm:$0xff] %v5684_v34  ;;  %2526 = vmatpush1.bf16.msra.mxu1 %v4344_v14 }
 0x4df   : > { %6422 = vst [vmem:[#allocation9_spill] sm:$0xff] %v5678_v5  ;;  %2138 = vadd.xlane.f32.xlu1 %v5678_v5 }
 0x4e1   : > { %2140 = vadd.xlane.f32.xlu0 %v5681_v36 }
 0x4e3   : > { %2142 = vadd.xlane.f32.xlu1 %v5684_v34 }
 0x520   : > { %v2113_v35 = vpop.xlane.xlu0 %2112 }
 0x521   : > { %v2144_v24 = vmul.f32 0.0078125, %v2113_v35 }
 0x522   : > { %v2115_v22 = vpop.xlane.xlu1 %2114 }
 0x523   : > { %v5704_v28 = vsub.f32 %v5640_v63, %v2144_v24  ;;  %v2145_v45 = vmul.f32 0.0078125, %v2115_v22  ;;  %v4350_v22 = vld [vmem:[%s6387_s14 + $0x7c] ss:$12 sps:$4 sm:$0xff]  }
 0x524   : > { %v2117_v33 = vpop.xlane.xlu0 %2116  ;;  %2527 = vmatprep.subr.bf16.mxu1 %v4350_v22 }
 0x525   : > { %v5707_v2 = vsub.f32 %v5642_v17, %v2145_v45  ;;  %v2146_v38 = vmul.f32 0.0078125, %v2117_v33  ;;  %v2176_v13 = vmul.f32 %v5704_v28, %v5704_v28  ;;  %v4351_v45 = vld [vmem:[%s6387_s14 + $0x68] ss:$12 sps:$4 sm:$0xff]  }
 0x526   : > { %v2119_v31 = vpop.xlane.xlu1 %2118  ;;  %3978 = vmatprep.subr.bf16.mxu0 %v4351_v45 }
 0x527   : > { %v5712_v42 = vsub.f32 %v5645_v25, %v2146_v38  ;;  %v2147_v19 = vmul.f32 0.0078125, %v2119_v31  ;;  %2192 = vadd.xlane.f32.xlu0 %v2176_v13  ;;  %v2177_v3 = vmul.f32 %v5707_v2, %v5707_v2  ;;  %v4348_v38 = vld [vmem:[%s6387_s14 + $0x78] ss:$12 sps:$4 sm:$0xff]   ;;  %3979 = vmatpush3.bf16.msra.mxu0 %v4351_v45 }
 0x528   : > { %2528 = vmatpush1.bf16.msra.mxu1 %v4348_v38  ;;  %3980 = vmatprep.subr.bf16.mxu0 %v4355_v23  ;;  %v2743_v38 = vld [vmem:[%s6389_s16] sm:$0xff] }
 0x529   : > { %v5717_v16 = vsub.f32 %v5648_v50, %v2147_v19  ;;  %2194 = vadd.xlane.f32.xlu1 %v2177_v3  ;;  %v2178_v21 = vmul.f32 %v5712_v42, %v5712_v42  ;;  %v4354_v3 = vld [vmem:[%s6387_s14 + $0x94] ss:$12 sps:$4 sm:$0xff]  }
 0x52a   : > { %2529 = vmatprep.subr.bf16.mxu1 %v4354_v3 }
 0x52b   : > { %2196 = vadd.xlane.f32.xlu0 %v2178_v21  ;;  %v2179_v8 = vmul.f32 %v5717_v16, %v5717_v16  ;;  %3981 = vmatpush3.bf16.msra.mxu0 %v4355_v23 }
 0x52d   : > { %2198 = vadd.xlane.f32.xlu1 %v2179_v8  ;;  %v4352_v8 = vld [vmem:[%s6387_s14 + $0x90] ss:$12 sps:$4 sm:$0xff]  }
 0x52e   : > { %2530 = vmatpush1.bf16.msra.mxu1 %v4352_v8 }
 0x53f   : > { %v2121_v46 = vpop.xlane.xlu0 %2120 }
 0x540   : > { %v2148_v53 = vmul.f32 0.0078125, %v2121_v46 }
 0x541   : > { %v2123_v15 = vpop.xlane.xlu1 %2122 }
 0x542   : > { %v5733_v39 = vsub.f32 %v5652_v52, %v2148_v53  ;;  %v2149_v51 = vmul.f32 0.0078125, %v2123_v15  ;;  %v4358_v53 = vld [vmem:[%s6387_s14 + $0xac] ss:$12 sps:$4 sm:$0xff]  }
 0x543   : > { %v2125_v41 = vpop.xlane.xlu0 %2124  ;;  %v4359_v15 = vld [vmem:[%s6387_s14 + $0x98] ss:$12 sps:$4 sm:$0xff]   ;;  %2531 = vmatprep.subr.bf16.mxu1 %v4358_v53 }
 0x544   : > { %v5745_v32 = vsub.f32 %v5654_v58, %v2149_v51  ;;  %v2150_v55 = vmul.f32 0.0078125, %v2125_v41  ;;  %v2180_v56 = vmul.f32 %v5733_v39, %v5733_v39  ;;  %v4356_v41 = vld [vmem:[%s6387_s14 + $0xa8] ss:$12 sps:$4 sm:$0xff]   ;;  %3982 = vmatprep.subr.bf16.mxu0 %v4359_v15 }
 0x545   : > { %v2127_v18 = vpop.xlane.xlu1 %2126  ;;  %2532 = vmatpush1.bf16.msra.mxu1 %v4356_v41  ;;  %3983 = vmatpush3.bf16.msra.mxu0 %v4359_v15 }
 0x546   : > { %v5750_v43 = vsub.f32 %v5657_v61, %v2150_v55  ;;  %v2151_v62 = vmul.f32 0.0078125, %v2127_v18  ;;  %2200 = vadd.xlane.f32.xlu0 %v2180_v56  ;;  %v2181_v27 = vmul.f32 %v5745_v32, %v5745_v32  ;;  %v4360_v55 = vld [vmem:[%s6387_s14 + $0xb0] ss:$12 sps:$4 sm:$0xff]  }
 0x547   : > { %v2129_v29 = vpop.xlane.xlu0 %2128  ;;  %3984 = vmatprep.subr.bf16.mxu0 %v4360_v55 }
 0x548   : > { %v5764_v48 = vsub.f32 %v5660_v44, %v2151_v62  ;;  %v2152_v54 = vmul.f32 0.0078125, %v2129_v29  ;;  %2202 = vadd.xlane.f32.xlu1 %v2181_v27  ;;  %v2182_v57 = vmul.f32 %v5750_v43, %v5750_v43 }
 0x549   : > { %v2131_v49 = vpop.xlane.xlu1 %2130  ;;  %3985 = vmatpush3.bf16.msra.mxu0 %v4360_v55 }
 0x54a   : > { %v5769_v9 = vsub.f32 %v5663_v0, %v2152_v54  ;;  %v2153_v35 = vmul.f32 0.0078125, %v2131_v49  ;;  %2204 = vadd.xlane.f32.xlu0 %v2182_v57  ;;  %v2183_v24 = vmul.f32 %v5764_v48, %v5764_v48 }
 0x54b   : > { %v2133_v33 = vpop.xlane.xlu0 %2132 }
 0x54c   : > { %v5783_v13 = vsub.f32 %v5666_v4, %v2153_v35  ;;  %v2154_v31 = vmul.f32 0.0078125, %v2133_v33  ;;  %2206 = vadd.xlane.f32.xlu1 %v2183_v24  ;;  %v2184_v19 = vmul.f32 %v5769_v9, %v5769_v9 }
 0x54d   : > { %v2135_v21 = vpop.xlane.xlu1 %2134 }
 0x54e   : > { %v5797_v37 = vsub.f32 %v5669_v60, %v2154_v31  ;;  %v2155_v46 = vmul.f32 0.0078125, %v2135_v21  ;;  %2208 = vadd.xlane.f32.xlu0 %v2184_v19  ;;  %v2185_v26 = vmul.f32 %v5783_v13, %v5783_v13  ;;  %v2744_v31 = vld [vmem:[%s6389_s16 + $0x8] sm:$0xff] }
 0x54f   : > { %v4116_v19 = vpack.c.bf16 %v2744_v31, %v2743_v38 }
 0x550   : > { %v5808_v51 = vsub.f32 %v5672_v7, %v2155_v46  ;;  %2210 = vadd.xlane.f32.xlu1 %v2185_v26  ;;  %v2186_v40 = vmul.f32 %v5797_v37, %v5797_v37 }
 0x551   : > { %4117 = vmatprep.subr.bf16.mxu0 %v4116_v19 }
 0x552   : > { %2212 = vadd.xlane.f32.xlu0 %v2186_v40  ;;  %v2187_v20 = vmul.f32 %v5808_v51, %v5808_v51 }
 0x554   : > { %2214 = vadd.xlane.f32.xlu1 %v2187_v20 }
 0x56a   : > { %v2137_v56 = vpop.xlane.xlu0 %2136 }
 0x56b   : > { %v2156_v18 = vmul.f32 0.0078125, %v2137_v56 }
 0x56c   : > { %v2139_v62 = vpop.xlane.xlu1 %2138 }
 0x56d   : > { %v5822_v27 = vsub.f32 %v5676_v1, %v2156_v18  ;;  %v2157_v10 = vmul.f32 0.0078125, %v2139_v62  ;;  %v5850_v18 = vld [vmem:[%s6385_s12] ss:$0 sm:$0xff] }
 0x56e   : > { %v2141_v30 = vpop.xlane.xlu0 %2140 }
 0x56f   : > { %v5825_v29 = vsub.f32 %v5678_v5, %v2157_v10  ;;  %v2158_v14 = vmul.f32 0.0078125, %v2141_v30  ;;  %v2188_v54 = vmul.f32 %v5822_v27, %v5822_v27 }
 0x570   : > { %v2143_v57 = vpop.xlane.xlu1 %2142 }
 0x571   : > { %v5830_v49 = vsub.f32 %v5681_v36, %v2158_v14  ;;  %v2159_v35 = vmul.f32 0.0078125, %v2143_v57  ;;  %2216 = vadd.xlane.f32.xlu0 %v2188_v54  ;;  %v2189_v24 = vmul.f32 %v5825_v29, %v5825_v29  ;;  %v5858_v57 = vld [vmem:[%s6386_s13] ss:$0 sm:$0xff] }
 0x573   : > { %v5835_v22 = vsub.f32 %v5684_v34, %v2159_v35  ;;  %2218 = vadd.xlane.f32.xlu1 %v2189_v24  ;;  %v2190_v45 = vmul.f32 %v5830_v49, %v5830_v49 }
 0x575   : > { %2220 = vadd.xlane.f32.xlu0 %v2190_v45  ;;  %v2191_v33 = vmul.f32 %v5835_v22, %v5835_v22 }
 0x577   : > { %2222 = vadd.xlane.f32.xlu1 %v2191_v33 }
 0x5b4   : > { %v2193_v3 = vpop.xlane.xlu0 %2192 }
 0x5b5   : > { %v2224_v21 = vmul.f32 0.0078125, %v2193_v3 }
 0x5b6   : > { %v2195_v8 = vpop.xlane.xlu1 %2194 }
 0x5b7   : > { %v2240_v23 = vadd.f32 1e-05, %v2224_v21  ;;  %v2225_v46 = vmul.f32 0.0078125, %v2195_v8  ;;  %v2745_v21 = vld [vmem:[%s6389_s16 + $0x10] sm:$0xff] }
 0x5b8   : > { %v2197_v26 = vpop.xlane.xlu0 %2196 }
 0x5b9   : > { %4625 = vrsqrt.f32 %v2240_v23  ;;  %v2241_v53 = vadd.f32 1e-05, %v2225_v46  ;;  %v2226_v15 = vmul.f32 0.0078125, %v2197_v26  ;;  %v2747_v26 = vld [vmem:[%s6389_s16 + $0x20] sm:$0xff] }
 0x5ba   : > { %v2199_v40 = vpop.xlane.xlu1 %2198 }
 0x5bb   : > { %4627 = vrsqrt.f32 %v2241_v53  ;;  %v2242_v41 = vadd.f32 1e-05, %v2226_v15  ;;  %v2227_v20 = vmul.f32 0.0078125, %v2199_v40  ;;  %v2748_v53 = vld [vmem:[%s6389_s16 + $0x28] sm:$0xff] }
 0x5bd   : > { %4629 = vrsqrt.f32 %v2242_v41  ;;  %v2243_v55 = vadd.f32 1e-05, %v2227_v20  ;;  %v4124_v41 = vpack.c.bf16 %v2748_v53, %v2747_v26 }
 0x5bf   : > { %4631 = vrsqrt.f32 %v2243_v55  ;;  %v2749_v55 = vld [vmem:[%s6389_s16 + $0x30] sm:$0xff] }
 0x5c3   : > { %v4626_v56 = vpop.eup %4625 }
 0x5c4   : > { %v2272_v62 = vmul.f32 %v4626_v56, %v5704_v28  ;;  %v2750_v56 = vld [vmem:[%s6389_s16 + $0x38] sm:$0xff] }
 0x5c5   : > { %v4628_v10 = vpop.eup %4627 }
 0x5c6   : > { %v2294_v30 = vmul.f32 %v5850_v18, %v2272_v62  ;;  %v2273_v14 = vmul.f32 %v4628_v10, %v5707_v2 }
 0x5c7   : > { %v4630_v54 = vpop.eup %4629 }
 0x5c8   : > { %v2295_v35 = vmul.f32 %v5850_v18, %v2273_v14  ;;  %v2274_v24 = vmul.f32 %v4630_v54, %v5712_v42  ;;  %v2316_v38 = vadd.f32 %v5858_v57, %v2294_v30  ;;  %v2746_v42 = vld [vmem:[%s6389_s16 + $0x18] sm:$0xff]  ;;  %v4128_v54 = vpack.c.bf16 %v2750_v56, %v2749_v55 }
 0x5c9   : > { %v4632_v45 = vpop.eup %4631  ;;  %v4120_v46 = vpack.c.bf16 %v2746_v42, %v2745_v21  ;;  %v2753_v42 = vld [vmem:[%s6389_s16 + $0x50] sm:$0xff] }
 0x5ca   : > { %v2296_v33 = vmul.f32 %v5850_v18, %v2274_v24  ;;  %v2275_v28 = vmul.f32 %v4632_v45, %v5717_v16  ;;  %v2317_v31 = vadd.f32 %v5858_v57, %v2295_v35  ;;  %v2751_v24 = vld [vmem:[%s6389_s16 + $0x40] sm:$0xff]  ;;  %v2752_v45 = vld [vmem:[%s6389_s16 + $0x48] sm:$0xff] }
 0x5cc   : > { %v2297_v2 = vmul.f32 %v5850_v18, %v2275_v28  ;;  %v2332_v3 = vpack.c.bf16 %v2317_v31, %v2316_v38  ;;  %v2318_v8 = vadd.f32 %v5858_v57, %v2296_v33 }
 0x5ce   : > { %2550 = vmatmul.mubr.bf16.vlgmr.msra.gmra.mrb[16].mxu1 %v2332_v3  ;;  %3986 = vmatprep.mubr.bf16.mxu0 %v2332_v3  ;;  %v2319_v16 = vadd.f32 %v5858_v57, %v2297_v2  ;;  %v4132_v3 = vpack.c.bf16 %v2752_v45, %v2751_v24 }
 0x5cf   : > { %2559 = vmatprep.mubr.bf16.mxu1 %v4802_v6 }
 0x5d0   : > { %v2333_v23 = vpack.c.bf16 %v2319_v16, %v2318_v8  ;;  %v2754_v8 = vld [vmem:[%s6389_s16 + $0x58] sm:$0xff] }
 0x5d2   : > { %3987 = vmatmul.mubr.bf16.vlgmr.msra.gmra.mrb[32].mxu0 %v2333_v23 }
 0x5d3   : > { %v2201_v15 = vpop.xlane.xlu0 %2200  ;;  %4119 = vmatpush3.bf16.msra.mxu0 %v4116_v19 }
 0x5d4   : > { %v2228_v40 = vmul.f32 0.0078125, %v2201_v15  ;;  %4121 = vmatprep.subr.bf16.mxu0 %v4120_v46  ;;  %v4136_v15 = vpack.c.bf16 %v2754_v8, %v2753_v42 }
 0x5d5   : > { %v2203_v20 = vpop.xlane.xlu1 %2202 }
 0x5d6   : > { %v2244_v62 = vadd.f32 1e-05, %v2228_v40  ;;  %v2229_v10 = vmul.f32 0.0078125, %v2203_v20  ;;  %2560 = vmatmul.mubr.bf16.gmra.mrb[20].mxu1 %v2333_v23 }
 0x5d7   : > { %v2205_v30 = vpop.xlane.xlu0 %2204  ;;  %2569 = vmatprep.mubr.bf16.mxu1 %v4802_v6  ;;  %4123 = vmatpush3.bf16.msra.mxu0 %v4120_v46 }
 0x5d8   : > { %4633 = vrsqrt.f32 %v2244_v62  ;;  %v2245_v19 = vadd.f32 1e-05, %v2229_v10  ;;  %v2230_v14 = vmul.f32 0.0078125, %v2205_v30  ;;  %4125 = vmatprep.subr.bf16.mxu0 %v4124_v41 }
 0x5d9   : > { %v2207_v35 = vpop.xlane.xlu1 %2206 }
 0x5da   : > { %4635 = vrsqrt.f32 %v2245_v19  ;;  %v2246_v33 = vadd.f32 1e-05, %v2230_v14  ;;  %v2231_v28 = vmul.f32 0.0078125, %v2207_v35 }
 0x5db   : > { %v2209_v38 = vpop.xlane.xlu0 %2208  ;;  %4127 = vmatpush3.bf16.msra.mxu0 %v4124_v41 }
 0x5dc   : > { %4637 = vrsqrt.f32 %v2246_v33  ;;  %v2247_v31 = vadd.f32 1e-05, %v2231_v28  ;;  %v2232_v2 = vmul.f32 0.0078125, %v2209_v38  ;;  %4129 = vmatprep.subr.bf16.mxu0 %v4128_v54 }
 0x5dd   : > { %v2211_v21 = vpop.xlane.xlu1 %2210 }
 0x5de   : > { %4639 = vrsqrt.f32 %v2247_v31  ;;  %v2248_v16 = vadd.f32 1e-05, %v2232_v2  ;;  %v2233_v23 = vmul.f32 0.0078125, %v2211_v21 }
 0x5df   : > { %v2213_v46 = vpop.xlane.xlu0 %2212  ;;  %4131 = vmatpush3.bf16.msra.mxu0 %v4128_v54 }
 0x5e0   : > { %4641 = vrsqrt.f32 %v2248_v16  ;;  %v2249_v26 = vadd.f32 1e-05, %v2233_v23  ;;  %v2234_v53 = vmul.f32 0.0078125, %v2213_v46  ;;  %4133 = vmatprep.subr.bf16.mxu0 %v4132_v3 }
 0x5e1   : > { %v2215_v40 = vpop.xlane.xlu1 %2214 }
 0x5e2   : > { %v4634_v41 = vpop.eup %4633  ;;  %4643 = vrsqrt.f32 %v2249_v26  ;;  %v2250_v20 = vadd.f32 1e-05, %v2234_v53  ;;  %v2235_v55 = vmul.f32 0.0078125, %v2215_v40 }
 0x5e3   : > { %v2276_v56 = vmul.f32 %v4634_v41, %v5733_v39  ;;  %4135 = vmatpush3.bf16.msra.mxu0 %v4132_v3 }
 0x5e4   : > { %v4636_v62 = vpop.eup %4635  ;;  %4645 = vrsqrt.f32 %v2250_v20  ;;  %v2251_v10 = vadd.f32 1e-05, %v2235_v55  ;;  %4137 = vmatprep.subr.bf16.mxu0 %v4136_v15 }
 0x5e5   : > { %v2277_v30 = vmul.f32 %v4636_v62, %v5745_v32  ;;  %v2298_v19 = vmul.f32 %v5850_v18, %v2276_v56 }
 0x5e6   : > { %v4638_v14 = vpop.eup %4637  ;;  %4647 = vrsqrt.f32 %v2251_v10 }
 0x5e7   : > { %v2299_v54 = vmul.f32 %v5850_v18, %v2277_v30  ;;  %v2278_v35 = vmul.f32 %v4638_v14, %v5750_v43  ;;  %4139 = vmatpush3.bf16.msra.mxu0 %v4136_v15  ;;  %v2320_v45 = vadd.f32 %v5858_v57, %v2298_v19 }
 0x5e8   : > { %v4640_v24 = vpop.eup %4639 }
 0x5e9   : > { %v2321_v39 = vadd.f32 %v5858_v57, %v2299_v54  ;;  %v2279_v33 = vmul.f32 %v4640_v24, %v5764_v48  ;;  %v2300_v28 = vmul.f32 %v5850_v18, %v2278_v35 }
 0x5ea   : > { %v4642_v38 = vpop.eup %4641 }
 0x5eb   : > { %v2334_v32 = vpack.c.bf16 %v2321_v39, %v2320_v45  ;;  %v2301_v31 = vmul.f32 %v5850_v18, %v2279_v33  ;;  %v2280_v2 = vmul.f32 %v4642_v38, %v5769_v9  ;;  %v2322_v21 = vadd.f32 %v5858_v57, %v2300_v28 }
 0x5ec   : > { %v4644_v3 = vpop.eup %4643 }
 0x5ed   : > { %2570 = vmatmul.mubr.bf16.gmra.mrb[24].mxu1 %v2334_v32  ;;  %3990 = vmatprep.mubr.bf16.mxu0 %v2334_v32  ;;  %v2323_v43 = vadd.f32 %v5858_v57, %v2301_v31  ;;  %v2281_v42 = vmul.f32 %v4644_v3, %v5783_v13  ;;  %v2302_v8 = vmul.f32 %v5850_v18, %v2280_v2 }
 0x5ee   : > { %v4646_v48 = vpop.eup %4645  ;;  %2579 = vmatprep.mubr.bf16.mxu1 %v4802_v6 }
 0x5ef   : > { %v2335_v16 = vpack.c.bf16 %v2323_v43, %v2322_v21  ;;  %v2303_v23 = vmul.f32 %v5850_v18, %v2281_v42  ;;  %v2282_v46 = vmul.f32 %v4646_v48, %v5797_v37  ;;  %v2324_v26 = vadd.f32 %v5858_v57, %v2302_v8 }
 0x5f0   : > { %v4648_v9 = vpop.eup %4647 }
 0x5f1   : > { %3991 = vmatmul.mubr.bf16.gmra.mrb[36].mxu0 %v2335_v16  ;;  %v2325_v53 = vadd.f32 %v5858_v57, %v2303_v23  ;;  %v2283_v15 = vmul.f32 %v4648_v9, %v5808_v51  ;;  %v2304_v13 = vmul.f32 %v5850_v18, %v2282_v46  ;;  %v2756_v9 = vld [vmem:[%s6389_s16 + $0x68] sm:$0xff] }
 0x5f3   : > { %v2336_v40 = vpack.c.bf16 %v2325_v53, %v2324_v26  ;;  %v2305_v41 = vmul.f32 %v5850_v18, %v2283_v15  ;;  %v2326_v20 = vadd.f32 %v5858_v57, %v2304_v13  ;;  %v2374_v53 = vlaneseq }
 0x5f5   : > { %2580 = vmatmul.mubr.bf16.gmra.mrb[28].mxu1 %v2335_v16  ;;  %3994 = vmatprep.mubr.bf16.mxu0 %v2336_v40  ;;  %v2327_v55 = vadd.f32 %v5858_v57, %v2305_v41  ;;  %v5954_v15 = vshrl.u32 %v2374_v53, 7 }
 0x5f6   : > { %2589 = vmatprep.mubr.bf16.mxu1 %v4802_v6 }
 0x5f7   : > { %v2337_v37 = vpack.c.bf16 %v2327_v55, %v2326_v20  ;;  %v2376_v13 = vsub.s32 0, %v5954_v15  ;;  %v2380_v41 = vsub.s32 1, %v5954_v15 }
 0x5f9   : > { %3995 = vmatmul.mubr.bf16.gmra.mrb[40].mxu0 %v2337_v37 }
 0x5fd   : > { %2590 = vmatmul.mubr.bf16.gmra.mrb[32].mxu1 %v2336_v40  ;;  %v5960_v40 = vld [vmem:[%s6388_s15] sm:$0x7] }
 0x5fe   : > { %v2217_v56 = vpop.xlane.xlu0 %2216  ;;  %2599 = vmatprep.mubr.bf16.mxu1 %v4802_v6  ;;  %v5964_v20 = vrot.slane %v5960_v40, %v2376_v13  ;;  %v5967_v55 = vrot.slane %v5960_v40, %v2380_v41 }
 0x5ff   : > { %v2236_v51 = vmul.f32 0.0078125, %v2217_v56 }
 0x600   : > { %v2219_v62 = vpop.xlane.xlu1 %2218 }
 0x601   : > { %v2252_v10 = vadd.f32 1e-05, %v2236_v51  ;;  %v2237_v30 = vmul.f32 0.0078125, %v2219_v62 }
 0x602   : > { %v2221_v19 = vpop.xlane.xlu0 %2220 }
 0x603   : > { %4649 = vrsqrt.f32 %v2252_v10  ;;  %v2253_v14 = vadd.f32 1e-05, %v2237_v30  ;;  %v2238_v54 = vmul.f32 0.0078125, %v2221_v19 }
 0x604   : > { %v2223_v35 = vpop.xlane.xlu1 %2222 }
 0x605   : > { %4651 = vrsqrt.f32 %v2253_v14  ;;  %v2254_v24 = vadd.f32 1e-05, %v2238_v54  ;;  %v2239_v45 = vmul.f32 0.0078125, %v2223_v35  ;;  %2600 = vmatmul.mubr.bf16.gmra.mrb[36].mxu1 %v2337_v37 }
 0x606   : > { %2609 = vmatprep.mubr.bf16.mxu1 %v4802_v6 }
 0x607   : > { %4653 = vrsqrt.f32 %v2254_v24  ;;  %v2255_v39 = vadd.f32 1e-05, %v2239_v45 }
 0x609   : > { %4655 = vrsqrt.f32 %v2255_v39 }
 0x60d   : > { %v4650_v33 = vpop.eup %4649 }
 0x60e   : > { %v2284_v28 = vmul.f32 %v4650_v33, %v5822_v27 }
 0x60f   : > { %v4652_v38 = vpop.eup %4651 }
 0x610   : > { %v2285_v32 = vmul.f32 %v4652_v38, %v5825_v29  ;;  %v2306_v31 = vmul.f32 %v5850_v18, %v2284_v28 }
 0x611   : > { %v4654_v2 = vpop.eup %4653 }
 0x612   : > { %v2307_v3 = vmul.f32 %v5850_v18, %v2285_v32  ;;  %v2286_v21 = vmul.f32 %v4654_v2, %v5830_v49  ;;  %v2328_v42 = vadd.f32 %v5858_v57, %v2306_v31 }
 0x613   : > { %v4656_v43 = vpop.eup %4655 }
 0x614   : > { %v2329_v8 = vadd.f32 %v5858_v57, %v2307_v3  ;;  %v2287_v48 = vmul.f32 %v4656_v43, %v5835_v22  ;;  %v2308_v16 = vmul.f32 %v5850_v18, %v2286_v21  ;;  %v2755_v22 = vld [vmem:[%s6389_s16 + $0x60] sm:$0xff] }
 0x616   : > { %v2338_v27 = vpack.c.bf16 %v2329_v8, %v2328_v42  ;;  %v2309_v23 = vmul.f32 %v5850_v18, %v2287_v48  ;;  %v2330_v29 = vadd.f32 %v5858_v57, %v2308_v16  ;;  %v4140_v18 = vpack.c.bf16 %v2756_v9, %v2755_v22 }
 0x618   : > { %2610 = vmatmul.mubr.bf16.gmra.mrb[40].mxu1 %v2338_v27  ;;  %3998 = vmatprep.mubr.bf16.mxu0 %v2338_v27  ;;  %v2331_v46 = vadd.f32 %v5858_v57, %v2309_v23  ;;  %v2757_v57 = vld [vmem:[%s6389_s16 + $0x70] sm:$0xff] }
 0x619   : > { %2619 = vmatprep.mubr.bf16.mxu1 %v4802_v6  ;;  %4141 = vmatprep.subr.bf16.mxu0 %v4140_v18  ;;  %v2758_v6 = vld [vmem:[%s6389_s16 + $0x78] sm:$0xff] }
 0x61a   : > { %v2339_v49 = vpack.c.bf16 %v2331_v46, %v2330_v29  ;;  %4143 = vmatpush3.bf16.msra.mxu0 %v4140_v18  ;;  %v4144_v26 = vpack.c.bf16 %v2758_v6, %v2757_v57 }
 0x61c   : > { %3999 = vmatmul.mubr.bf16.gmra.mrb[44].mxu0 %v2339_v49  ;;  %4145 = vmatprep.subr.bf16.mxu0 %v4144_v26 }
 0x61e   : > { %4147 = vmatpush3.bf16.msra.mxu0 %v4144_v26 }
 0x620   : > { %2620 = vmatmul.mubr.bf16.gmra.mrb[44].mxu1 %v2339_v49 }
 0x6a1   : > { %v2551_v37 = vpop.f32.mrb[16].mxu1 }
 0x6a2   : > { %v2552_v56 = vadd.f32 %v2551_v37, %v5964_v20  ;;  %v2553_v51 = vpop.f32.mrb[17].mxu1 }
 0x6a3   : > { %v2554_v62 = vadd.f32 %v2553_v51, %v5967_v55  ;;  %v2555_v10 = vpop.f32.mrb[18].mxu1 }
 0x6a4   : > { %v2556_v30 = vadd.f32 %v2555_v10, %v5964_v20  ;;  %v2557_v19 = vpop.f32.mrb[19].mxu1 }
 0x6a5   : > { %v2727_v14 = vmul.f32 %v2554_v62, %v2552_v56  ;;  %v2558_v54 = vadd.f32 %v2557_v19, %v5967_v55  ;;  %v5973_v35 = vpop.f32.mrb[32].mxu0 }
 0x6a6   : > { %v5975_v24 = vpop.f32.mrb[33].mxu0 }
 0x6a7   : > { %v2728_v45 = vmul.f32 %v2558_v54, %v2556_v30  ;;  %v5977_v39 = vpop.f32.mrb[34].mxu0  ;;  %4034 = vmatprep.mubr.f32.mxu0 %v2727_v14 }
 0x6a8   : > { %v5979_v33 = vpop.f32.mrb[35].mxu0 }
 0x6a9   : > { %v2561_v28 = vpop.f32.mrb[20].mxu1  ;;  %4035 = vmatmul.mubr.f32.vlgmr.msra.gmra.mrb[48].mxu0 %v2728_v45 }
 0x6aa   : > { %v2562_v38 = vadd.f32 %v2561_v28, %v5964_v20  ;;  %v2563_v32 = vpop.f32.mrb[21].mxu1 }
 0x6ab   : > { %v2564_v31 = vadd.f32 %v2563_v32, %v5967_v55  ;;  %v2565_v2 = vpop.f32.mrb[22].mxu1 }
 0x6ac   : > { %v2566_v3 = vadd.f32 %v2565_v2, %v5964_v20  ;;  %v2567_v21 = vpop.f32.mrb[23].mxu1 }
 0x6ad   : > { %v2729_v43 = vmul.f32 %v2564_v31, %v2562_v38  ;;  %v2568_v42 = vadd.f32 %v2567_v21, %v5967_v55 }
 0x6af   : > { %v2730_v8 = vmul.f32 %v2568_v42, %v2566_v3  ;;  %4037 = vmatprep.mubr.f32.mxu0 %v2729_v43 }
 0x6b1   : > { %4038 = vmatmul.mubr.f32.gmra.mrb[50].mxu0 %v2730_v8 }
 0x6c0   : > { %v2571_v48 = vpop.f32.mrb[24].mxu1 }
 0x6c1   : > { %v2572_v16 = vadd.f32 %v2571_v48, %v5964_v20  ;;  %v2573_v27 = vpop.f32.mrb[25].mxu1 }
 0x6c2   : > { %v2574_v23 = vadd.f32 %v2573_v27, %v5967_v55  ;;  %v2575_v29 = vpop.f32.mrb[26].mxu1 }
 0x6c3   : > { %v2576_v46 = vadd.f32 %v2575_v29, %v5964_v20  ;;  %v2577_v49 = vpop.f32.mrb[27].mxu1 }
 0x6c4   : > { %v2731_v22 = vmul.f32 %v2574_v23, %v2572_v16  ;;  %v2578_v9 = vadd.f32 %v2577_v49, %v5967_v55  ;;  %v5989_v18 = vpop.f32.mrb[36].mxu0 }
 0x6c5   : > { %v5991_v57 = vpop.f32.mrb[37].mxu0 }
 0x6c6   : > { %v2732_v6 = vmul.f32 %v2578_v9, %v2576_v46  ;;  %v5993_v26 = vpop.f32.mrb[38].mxu0  ;;  %4040 = vmatprep.mubr.f32.mxu0 %v2731_v22 }
 0x6c7   : > { %v5995_v53 = vpop.f32.mrb[39].mxu0 }
 0x6c8   : > { %v2581_v13 = vpop.f32.mrb[28].mxu1  ;;  %4041 = vmatmul.mubr.f32.gmra.mrb[52].mxu0 %v2732_v6 }
 0x6c9   : > { %v2582_v41 = vadd.f32 %v2581_v13, %v5964_v20  ;;  %v2583_v37 = vpop.f32.mrb[29].mxu1 }
 0x6ca   : > { %v2584_v56 = vadd.f32 %v2583_v37, %v5967_v55  ;;  %v2585_v51 = vpop.f32.mrb[30].mxu1 }
 0x6cb   : > { %v2586_v62 = vadd.f32 %v2585_v51, %v5964_v20  ;;  %v2587_v10 = vpop.f32.mrb[31].mxu1 }
 0x6cc   : > { %v2733_v30 = vmul.f32 %v2584_v56, %v2582_v41  ;;  %v2588_v19 = vadd.f32 %v2587_v10, %v5967_v55  ;;  %v6001_v14 = vpop.f32.mrb[40].mxu0 }
 0x6cd   : > { %v6003_v54 = vpop.f32.mrb[41].mxu0 }
 0x6ce   : > { %v2734_v45 = vmul.f32 %v2588_v19, %v2586_v62  ;;  %v6005_v28 = vpop.f32.mrb[42].mxu0  ;;  %4043 = vmatprep.mubr.f32.mxu0 %v2733_v30 }
 0x6cf   : > { %v6007_v38 = vpop.f32.mrb[43].mxu0 }
 0x6d0   : > { %v2591_v32 = vpop.f32.mrb[32].mxu1  ;;  %4044 = vmatmul.mubr.f32.gmra.mrb[54].mxu0 %v2734_v45 }
 0x6d1   : > { %v2592_v31 = vadd.f32 %v2591_v32, %v5964_v20  ;;  %v2593_v2 = vpop.f32.mrb[33].mxu1 }
 0x6d2   : > { %v2594_v3 = vadd.f32 %v2593_v2, %v5967_v55  ;;  %v2595_v21 = vpop.f32.mrb[34].mxu1 }
 0x6d3   : > { %v2596_v43 = vadd.f32 %v2595_v21, %v5964_v20  ;;  %v2597_v42 = vpop.f32.mrb[35].mxu1 }
 0x6d4   : > { %v2735_v8 = vmul.f32 %v2594_v3, %v2592_v31  ;;  %v2598_v48 = vadd.f32 %v2597_v42, %v5967_v55 }
 0x6d6   : > { %v2736_v16 = vmul.f32 %v2598_v48, %v2596_v43  ;;  %4046 = vmatprep.mubr.f32.mxu0 %v2735_v8 }
 0x6d8   : > { %v2601_v27 = vpop.f32.mrb[36].mxu1  ;;  %4047 = vmatmul.mubr.f32.gmra.mrb[56].mxu0 %v2736_v16 }
 0x6d9   : > { %v2602_v23 = vadd.f32 %v2601_v27, %v5964_v20  ;;  %v2603_v29 = vpop.f32.mrb[37].mxu1 }
 0x6da   : > { %v2604_v46 = vadd.f32 %v2603_v29, %v5967_v55  ;;  %v2605_v49 = vpop.f32.mrb[38].mxu1 }
 0x6db   : > { %v2606_v22 = vadd.f32 %v2605_v49, %v5964_v20  ;;  %v2607_v9 = vpop.f32.mrb[39].mxu1 }
 0x6dc   : > { %v2737_v6 = vmul.f32 %v2604_v46, %v2602_v23  ;;  %v2608_v13 = vadd.f32 %v2607_v9, %v5967_v55 }
 0x6de   : > { %v2738_v41 = vmul.f32 %v2608_v13, %v2606_v22  ;;  %4049 = vmatprep.mubr.f32.mxu0 %v2737_v6 }
 0x6e0   : > { %4050 = vmatmul.mubr.f32.gmra.mrb[58].mxu0 %v2738_v41 }
 0x6eb   : > { %v2611_v37 = vpop.f32.mrb[40].mxu1 }
 0x6ec   : > { %v2612_v56 = vadd.f32 %v2611_v37, %v5964_v20  ;;  %v2613_v51 = vpop.f32.mrb[41].mxu1 }
 0x6ed   : > { %v2614_v62 = vadd.f32 %v2613_v51, %v5967_v55  ;;  %v2615_v10 = vpop.f32.mrb[42].mxu1 }
 0x6ee   : > { %v2616_v30 = vadd.f32 %v2615_v10, %v5964_v20  ;;  %v2617_v19 = vpop.f32.mrb[43].mxu1 }
 0x6ef   : > { %v2739_v45 = vmul.f32 %v2614_v62, %v2612_v56  ;;  %v2618_v32 = vadd.f32 %v2617_v19, %v5967_v55  ;;  %v6021_v31 = vpop.f32.mrb[44].mxu0 }
 0x6f0   : > { %v6023_v2 = vpop.f32.mrb[45].mxu0 }
 0x6f1   : > { %v2740_v3 = vmul.f32 %v2618_v32, %v2616_v30  ;;  %v6025_v21 = vpop.f32.mrb[46].mxu0  ;;  %4052 = vmatprep.mubr.f32.mxu0 %v2739_v45 }
 0x6f2   : > { %v6027_v43 = vpop.f32.mrb[47].mxu0 }
 0x6f3   : > { %v2621_v42 = vpop.f32.mrb[44].mxu1  ;;  %4053 = vmatmul.mubr.f32.gmra.mrb[60].mxu0 %v2740_v3 }
 0x6f4   : > { %v2622_v8 = vadd.f32 %v2621_v42, %v5964_v20  ;;  %v2623_v48 = vpop.f32.mrb[45].mxu1 }
 0x6f5   : > { %v2624_v16 = vadd.f32 %v2623_v48, %v5967_v55  ;;  %v2625_v27 = vpop.f32.mrb[46].mxu1 }
 0x6f6   : > { %v2626_v23 = vadd.f32 %v2625_v27, %v5964_v20  ;;  %v2627_v29 = vpop.f32.mrb[47].mxu1 }
 0x6f7   : > { %v2741_v46 = vmul.f32 %v2624_v16, %v2622_v8  ;;  %v2628_v49 = vadd.f32 %v2627_v29, %v5967_v55 }
 0x6f9   : > { %v2742_v22 = vmul.f32 %v2628_v49, %v2626_v23  ;;  %4055 = vmatprep.mubr.f32.mxu0 %v2741_v46 }
 0x6fb   : > { %4056 = vmatmul.mubr.f32.gmra.mrb[62].mxu0 %v2742_v22 }
 0x77c   : > { %v4036_v9 = vpop.f32.mrb[48].mxu0 }
 0x77d   : > { %v2825_v6 = vpop.f32.mrb[49].mxu0  ;;  %v2908_v13 = vsel %vm2904_vm2, %v4036_v9, -inf }
 0x77e   : > { %2909 = vmax.xlane.f32.xlu1 %v2908_v13  ;;  %v2905_v41 = vsel %vm2904_vm2, %v2825_v6, -inf }
 0x77f   : > { %2906 = vmax.xlane.f32.xlu0 %v2905_v41 }
 0x784   : > { %v4039_v37 = vpop.f32.mrb[50].mxu0 }
 0x785   : > { %v2835_v56 = vpop.f32.mrb[51].mxu0  ;;  %v2914_v20 = vsel %vm2904_vm2, %v4039_v37, -inf }
 0x786   : > { %2915 = vmax.xlane.f32.xlu1 %v2914_v20  ;;  %v2911_v51 = vsel %vm2904_vm2, %v2835_v56, -inf }
 0x787   : > { %2912 = vmax.xlane.f32.xlu0 %v2911_v51 }
 0x79b   : > { %v6037_v55 = vpop.f32.mrb[52].mxu0 }
 0x79c   : > { %v6039_v62 = vpop.f32.mrb[53].mxu0  ;;  %v2920_v10 = vsel %vm2904_vm2, %v6037_v55, -inf }
 0x79d   : > { %2921 = vmax.xlane.f32.xlu1 %v2920_v10  ;;  %v2917_v30 = vsel %vm2904_vm2, %v6039_v62, -inf }
 0x79e   : > { %2918 = vmax.xlane.f32.xlu0 %v2917_v30 }
 0x7a3   : > { %v6045_v19 = vpop.f32.mrb[54].mxu0 }
 0x7a4   : > { %v6047_v45 = vpop.f32.mrb[55].mxu0  ;;  %v2926_v32 = vsel %vm2904_vm2, %v6045_v19, -inf }
 0x7a5   : > { %2927 = vmax.xlane.f32.xlu1 %v2926_v32  ;;  %v2923_v3 = vsel %vm2904_vm2, %v6047_v45, -inf }
 0x7a6   : > { %2924 = vmax.xlane.f32.xlu0 %v2923_v3 }
 0x7ab   : > { %v6053_v42 = vpop.f32.mrb[56].mxu0 }
 0x7ac   : > { %v6055_v8 = vpop.f32.mrb[57].mxu0  ;;  %v2932_v48 = vsel %vm2904_vm2, %v6053_v42, -inf }
 0x7ad   : > { %2933 = vmax.xlane.f32.xlu1 %v2932_v48  ;;  %v2929_v16 = vsel %vm2904_vm2, %v6055_v8, -inf }
 0x7ae   : > { %2930 = vmax.xlane.f32.xlu0 %v2929_v16 }
 0x7b3   : > { %v6061_v27 = vpop.f32.mrb[58].mxu0 }
 0x7b4   : > { %v6063_v23 = vpop.f32.mrb[59].mxu0  ;;  %v2938_v29 = vsel %vm2904_vm2, %v6061_v27, -inf }
 0x7b5   : > { %2939 = vmax.xlane.f32.xlu1 %v2938_v29  ;;  %v2935_v46 = vsel %vm2904_vm2, %v6063_v23, -inf }
 0x7b6   : > { %2936 = vmax.xlane.f32.xlu0 %v2935_v46 }
 0x7c6   : > { %v6069_v49 = vpop.f32.mrb[60].mxu0 }
 0x7c7   : > { %v6071_v22 = vpop.f32.mrb[61].mxu0  ;;  %v2944_v13 = vsel %vm2904_vm2, %v6069_v49, -inf }
 0x7c8   : > { %2945 = vmax.xlane.f32.xlu1 %v2944_v13  ;;  %v2941_v41 = vsel %vm2904_vm2, %v6071_v22, -inf }
 0x7c9   : > { %2942 = vmax.xlane.f32.xlu0 %v2941_v41 }
 0x7ce   : > { %v6077_v20 = vpop.f32.mrb[62].mxu0 }
 0x7cf   : > { %v6079_v51 = vpop.f32.mrb[63].mxu0  ;;  %v2950_v10 = vsel %vm2904_vm2, %v6077_v20, -inf }
 0x7d0   : > { %2951 = vmax.xlane.f32.xlu1 %v2950_v10  ;;  %v2947_v30 = vsel %vm2904_vm2, %v6079_v51, -inf }
 0x7d1   : > { %2948 = vmax.xlane.f32.xlu0 %v2947_v30 }
 0x80b   : > { %v2910_v32 = vpop.xlane.xlu1 %2909 }
 0x80c   : > { %v2954_v3 = vsub.f32 %v4036_v9, %v2910_v32  ;;  %v2907_v48 = vpop.xlane.xlu0 %2906 }
 0x80d   : > { %v2953_v16 = vsub.f32 %v2825_v6, %v2907_v48 }
 0x80e   : > { %v2971_v29 = vmul.f32 1.442695, %v2954_v3 }
 0x80f   : > { %v2969_v46 = vmul.f32 1.442695, %v2953_v16 }
 0x810   : > { %4657 = vpow2.f32 %v2971_v29 }
 0x811   : > { %4659 = vpow2.f32 %v2969_v46 }
 0x813   : > { %v2916_v13 = vpop.xlane.xlu1 %2915 }
 0x814   : > { %v2956_v41 = vsub.f32 %v4039_v37, %v2916_v13  ;;  %v2913_v5 = vpop.xlane.xlu0 %2912 }
 0x815   : > { %v2955_v34 = vsub.f32 %v2835_v56, %v2913_v5 }
 0x816   : > { %v2975_v1 = vmul.f32 1.442695, %v2956_v41 }
 0x817   : > { %v2973_v59 = vmul.f32 1.442695, %v2955_v34 }
 0x818   : > { %4661 = vpow2.f32 %v2975_v1 }
 0x819   : > { %4663 = vpow2.f32 %v2973_v59 }
 0x81a   : > { %v6085_v10 = vpop.eup %4657 }
 0x81b   : > { %v6087_v36 = vpop.eup %4659  ;;  %v3004_v9 = vsel %vm2904_vm2, %v6085_v10, 0.0 }
 0x81c   : > { %3005 = vadd.xlane.f32.xlu1 %v3004_v9  ;;  %v3001_v6 = vsel %vm2904_vm2, %v6087_v36, 0.0  ;;  %v3081_v9 = vld [vmem:[%s6390_s17] sm:$0xf] }
 0x81d   : > { %3002 = vadd.xlane.f32.xlu0 %v3001_v6  ;;  %4058 = vmatprep.subr.msk.mxu1 %vm3130_vm3, %v3081_v9 }
 0x81e   : > { %4059 = vmatpush3.msk.msra.mxu1 %vm3130_vm3, %v3081_v9 }
 0x822   : > { %v6093_v30 = vpop.eup %4661 }
 0x823   : > { %v6095_v37 = vpop.eup %4663  ;;  %v3010_v1 = vsel %vm2904_vm2, %v6093_v30, 0.0 }
 0x824   : > { %3011 = vadd.xlane.f32.xlu1 %v3010_v1  ;;  %v3007_v59 = vsel %vm2904_vm2, %v6095_v37, 0.0 }
 0x825   : > { %3008 = vadd.xlane.f32.xlu0 %v3007_v59 }
 0x82a   : > { %v2922_v5 = vpop.xlane.xlu1 %2921 }
 0x82b   : > { %v2958_v34 = vsub.f32 %v6037_v55, %v2922_v5  ;;  %v2919_v56 = vpop.xlane.xlu0 %2918 }
 0x82c   : > { %v2957_v32 = vsub.f32 %v6039_v62, %v2919_v56 }
 0x82d   : > { %v2979_v3 = vmul.f32 1.442695, %v2958_v34 }
 0x82e   : > { %v2977_v48 = vmul.f32 1.442695, %v2957_v32 }
 0x82f   : > { %4665 = vpow2.f32 %v2979_v3 }
 0x830   : > { %4667 = vpow2.f32 %v2977_v48 }
 0x832   : > { %v2928_v16 = vpop.xlane.xlu1 %2927 }
 0x833   : > { %v2960_v29 = vsub.f32 %v6045_v19, %v2928_v16  ;;  %v2925_v46 = vpop.xlane.xlu0 %2924 }
 0x834   : > { %v2959_v13 = vsub.f32 %v6047_v45, %v2925_v46 }
 0x835   : > { %v2983_v41 = vmul.f32 1.442695, %v2960_v29 }
 0x836   : > { %v2981_v55 = vmul.f32 1.442695, %v2959_v13 }
 0x837   : > { %4669 = vpow2.f32 %v2983_v41 }
 0x838   : > { %4671 = vpow2.f32 %v2981_v55 }
 0x839   : > { %v6108_v62 = vpop.eup %4665 }
 0x83a   : > { %v6110_v6 = vpop.eup %4667  ;;  %v2934_v1 = vpop.xlane.xlu1 %2933  ;;  %v3016_v19 = vsel %vm2904_vm2, %v6108_v62, 0.0 }
 0x83b   : > { %v2962_v45 = vsub.f32 %v6053_v42, %v2934_v1  ;;  %v2931_v59 = vpop.xlane.xlu0 %2930  ;;  %3017 = vadd.xlane.f32.xlu1 %v3016_v19  ;;  %v3013_v5 = vsel %vm2904_vm2, %v6110_v6, 0.0 }
 0x83c   : > { %v2961_v34 = vsub.f32 %v6055_v8, %v2931_v59  ;;  %3014 = vadd.xlane.f32.xlu0 %v3013_v5 }
 0x83d   : > { %v2987_v56 = vmul.f32 1.442695, %v2962_v45 }
 0x83e   : > { %v2985_v32 = vmul.f32 1.442695, %v2961_v34 }
 0x83f   : > { %4673 = vpow2.f32 %v2987_v56 }
 0x840   : > { %4675 = vpow2.f32 %v2985_v32 }
 0x841   : > { %v6118_v3 = vpop.eup %4669 }
 0x842   : > { %v6120_v48 = vpop.eup %4671  ;;  %v2940_v16 = vpop.xlane.xlu1 %2939  ;;  %v3022_v42 = vsel %vm2904_vm2, %v6118_v3, 0.0 }
 0x843   : > { %v2964_v29 = vsub.f32 %v6061_v27, %v2940_v16  ;;  %v2937_v46 = vpop.xlane.xlu0 %2936  ;;  %3023 = vadd.xlane.f32.xlu1 %v3022_v42  ;;  %v3019_v8 = vsel %vm2904_vm2, %v6120_v48, 0.0 }
 0x844   : > { %v2963_v13 = vsub.f32 %v6063_v23, %v2937_v46  ;;  %3020 = vadd.xlane.f32.xlu0 %v3019_v8 }
 0x845   : > { %v2991_v41 = vmul.f32 1.442695, %v2964_v29 }
 0x846   : > { %v2989_v9 = vmul.f32 1.442695, %v2963_v13 }
 0x847   : > { %4677 = vpow2.f32 %v2991_v41 }
 0x848   : > { %4679 = vpow2.f32 %v2989_v9 }
 0x849   : > { %v6128_v55 = vpop.eup %4673 }
 0x84a   : > { %v6130_v1 = vpop.eup %4675  ;;  %v3028_v19 = vsel %vm2904_vm2, %v6128_v55, 0.0 }
 0x84b   : > { %3029 = vadd.xlane.f32.xlu1 %v3028_v19  ;;  %v3025_v27 = vsel %vm2904_vm2, %v6130_v1, 0.0 }
 0x84c   : > { %3026 = vadd.xlane.f32.xlu0 %v3025_v27 }
 0x851   : > { %v6136_v45 = vpop.eup %4677 }
 0x852   : > { %v6138_v23 = vpop.eup %4679  ;;  %v3034_v59 = vsel %vm2904_vm2, %v6136_v45, 0.0 }
 0x853   : > { %3035 = vadd.xlane.f32.xlu1 %v3034_v59  ;;  %v3031_v5 = vsel %vm2904_vm2, %v6138_v23, 0.0 }
 0x854   : > { %3032 = vadd.xlane.f32.xlu0 %v3031_v5 }
 0x855   : > { %v2946_v34 = vpop.xlane.xlu1 %2945 }
 0x856   : > { %v2966_v56 = vsub.f32 %v6069_v49, %v2946_v34  ;;  %v2943_v32 = vpop.xlane.xlu0 %2942 }
 0x857   : > { %v2965_v16 = vsub.f32 %v6071_v22, %v2943_v32  ;;  %v4362_v32 = vld [vmem:[%s6391_s18 + $0x8] sm:$0xff]  }
 0x858   : > { %v2995_v42 = vmul.f32 1.442695, %v2966_v56  ;;  %v4361_v56 = vld [vmem:[%s6391_s18] sm:$0xff]  }
 0x859   : > { %v2993_v29 = vmul.f32 1.442695, %v2965_v16  ;;  %4084 = vmatprep.subr.bf16.mxu0 %v4361_v56  ;;  %4148 = vmatprep.subr.bf16.mxu1 %v4361_v56  ;;  %v4363_v16 = vld [vmem:[%s6391_s18 + $0x10] sm:$0xff]  }
 0x85a   : > { %4681 = vpow2.f32 %v2995_v42  ;;  %4085 = vmatpush3.bf16.msra.mxu0 %v4361_v56  ;;  %v4364_v42 = vld [vmem:[%s6391_s18 + $0x18] sm:$0xff]  }
 0x85b   : > { %4683 = vpow2.f32 %v2993_v29  ;;  %4086 = vmatprep.subr.bf16.mxu0 %v4362_v32  ;;  %v4365_v29 = vld [vmem:[%s6391_s18 + $0x20] sm:$0xff]  }
 0x85d   : > { %v2952_v46 = vpop.xlane.xlu1 %2951 }
 0x85e   : > { %v2968_v8 = vsub.f32 %v6077_v20, %v2952_v46  ;;  %v2949_v13 = vpop.xlane.xlu0 %2948  ;;  %4087 = vmatpush3.bf16.msra.mxu0 %v4362_v32 }
 0x85f   : > { %v2967_v41 = vsub.f32 %v6079_v51, %v2949_v13  ;;  %4088 = vmatprep.subr.bf16.mxu0 %v4363_v16 }
 0x860   : > { %v2999_v9 = vmul.f32 1.442695, %v2968_v8 }
 0x861   : > { %v2997_v19 = vmul.f32 1.442695, %v2967_v41 }
 0x862   : > { %4685 = vpow2.f32 %v2999_v9  ;;  %4089 = vmatpush3.bf16.msra.mxu0 %v4363_v16 }
 0x863   : > { %4687 = vpow2.f32 %v2997_v19  ;;  %4090 = vmatprep.subr.bf16.mxu0 %v4364_v42 }
 0x864   : > { %v6148_v27 = vpop.eup %4681 }
 0x865   : > { %v6150_v49 = vpop.eup %4683  ;;  %v3040_v22 = vsel %vm2904_vm2, %v6148_v27, 0.0 }
 0x866   : > { %3041 = vadd.xlane.f32.xlu1 %v3040_v22  ;;  %v3037_v59 = vsel %vm2904_vm2, %v6150_v49, 0.0  ;;  %4091 = vmatpush3.bf16.msra.mxu0 %v4364_v42 }
 0x867   : > { %3038 = vadd.xlane.f32.xlu0 %v3037_v59  ;;  %4092 = vmatprep.subr.bf16.mxu0 %v4365_v29 }
 0x86a   : > { %4093 = vmatpush3.bf16.msra.mxu0 %v4365_v29 }
 0x86c   : > { %v6156_v20 = vpop.eup %4685 }
 0x86d   : > { %v6158_v5 = vpop.eup %4687  ;;  %v3046_v51 = vsel %vm2904_vm2, %v6156_v20, 0.0 }
 0x86e   : > { %3047 = vadd.xlane.f32.xlu1 %v3046_v51  ;;  %v3043_v34 = vsel %vm2904_vm2, %v6158_v5, 0.0 }
 0x86f   : > { %3044 = vadd.xlane.f32.xlu0 %v3043_v34 }
 0x8a9   : > { %v3006_v46 = vpop.xlane.xlu1 %3005 }
 0x8aa   : > { %4689 = vrcp.f32 %v3006_v46  ;;  %v3003_v8 = vpop.xlane.xlu0 %3002 }
 0x8ab   : > { %4691 = vrcp.f32 %v3003_v8 }
 0x8b1   : > { %v3012_v13 = vpop.xlane.xlu1 %3011 }
 0x8b2   : > { %4693 = vrcp.f32 %v3012_v13  ;;  %v3009_v41 = vpop.xlane.xlu0 %3008 }
 0x8b3   : > { %4695 = vrcp.f32 %v3009_v41 }
 0x8b4   : > { %v4690_v9 = vpop.eup %4689 }
 0x8b5   : > { %v4692_v19 = vpop.eup %4691  ;;  %v3052_v59 = vmul.f32 %v4690_v9, %v6085_v10 }
 0x8b6   : > { %v3050_v22 = vmul.f32 %v4692_v19, %v6087_v36 }
 0x8b8   : > { %4060 = vmatprep.mubr.msk.f32.mxu1 %vm2904_vm2, %v3050_v22 }
 0x8b9   : > { %4061 = vmatmul.mubr.msk.f32.vlgmr.msra.gmra.mrb[48].mxu1 %vm2904_vm2, %v3052_v59 }
 0x8ba   : > { %4156 = vmatpush3.bf16.msra.mxu1 %v4361_v56 }
 0x8bb   : > { %4149 = vmatprep.subr.bf16.mxu1 %v4362_v32 }
 0x8bc   : > { %v4694_v51 = vpop.eup %4693 }
 0x8bd   : > { %v4696_v34 = vpop.eup %4695  ;;  %v3056_v8 = vmul.f32 %v4694_v51, %v6093_v30 }
 0x8be   : > { %v3054_v46 = vmul.f32 %v4696_v34, %v6095_v37  ;;  %4157 = vmatpush3.bf16.msra.mxu1 %v4362_v32 }
 0x8bf   : > { %4150 = vmatprep.subr.bf16.mxu1 %v4363_v16 }
 0x8c0   : > { %4063 = vmatprep.mubr.msk.f32.mxu1 %vm2904_vm2, %v3054_v46 }
 0x8c1   : > { %4064 = vmatmul.mubr.msk.f32.gmra.mrb[50].mxu1 %vm2904_vm2, %v3056_v8 }
 0x8c2   : > { %4158 = vmatpush3.bf16.msra.mxu1 %v4363_v16 }
 0x8c3   : > { %4151 = vmatprep.subr.bf16.mxu1 %v4364_v42 }
 0x8c6   : > { %4159 = vmatpush3.bf16.msra.mxu1 %v4364_v42 }
 0x8c7   : > { %4152 = vmatprep.subr.bf16.mxu1 %v4365_v29 }
 0x8c8   : > { %v3018_v36 = vpop.xlane.xlu1 %3017 }
 0x8c9   : > { %4697 = vrcp.f32 %v3018_v36  ;;  %v3015_v10 = vpop.xlane.xlu0 %3014 }
 0x8ca   : > { %4699 = vrcp.f32 %v3015_v10  ;;  %4160 = vmatpush3.bf16.msra.mxu1 %v4365_v29 }
 0x8d0   : > { %v3024_v56 = vpop.xlane.xlu1 %3023 }
 0x8d1   : > { %4701 = vrcp.f32 %v3024_v56  ;;  %v3021_v37 = vpop.xlane.xlu0 %3020 }
 0x8d2   : > { %4703 = vrcp.f32 %v3021_v37 }
 0x8d3   : > { %v4698_v32 = vpop.eup %4697 }
 0x8d4   : > { %v4700_v30 = vpop.eup %4699  ;;  %v3060_v41 = vmul.f32 %v4698_v32, %v6108_v62 }
 0x8d5   : > { %v3058_v13 = vmul.f32 %v4700_v30, %v6110_v6 }
 0x8d7   : > { %4066 = vmatprep.mubr.msk.f32.mxu1 %vm2904_vm2, %v3058_v13 }
 0x8d8   : > { %v3030_v16 = vpop.xlane.xlu1 %3029  ;;  %4067 = vmatmul.mubr.msk.f32.gmra.mrb[52].mxu1 %vm2904_vm2, %v3060_v41 }
 0x8d9   : > { %4705 = vrcp.f32 %v3030_v16  ;;  %v3027_v42 = vpop.xlane.xlu0 %3026 }
 0x8da   : > { %4707 = vrcp.f32 %v3027_v42 }
 0x8db   : > { %v4702_v9 = vpop.eup %4701 }
 0x8dc   : > { %v4704_v29 = vpop.eup %4703  ;;  %v3064_v22 = vmul.f32 %v4702_v9, %v6118_v3 }
 0x8dd   : > { %v3062_v19 = vmul.f32 %v4704_v29, %v6120_v48 }
 0x8df   : > { %4069 = vmatprep.mubr.msk.f32.mxu1 %vm2904_vm2, %v3062_v19 }
 0x8e0   : > { %v3036_v59 = vpop.xlane.xlu1 %3035  ;;  %4070 = vmatmul.mubr.msk.f32.gmra.mrb[54].mxu1 %vm2904_vm2, %v3064_v22 }
 0x8e1   : > { %4709 = vrcp.f32 %v3036_v59  ;;  %v3033_v62 = vpop.xlane.xlu0 %3032 }
 0x8e2   : > { %4711 = vrcp.f32 %v3033_v62 }
 0x8e3   : > { %v4706_v6 = vpop.eup %4705 }
 0x8e4   : > { %v4708_v51 = vpop.eup %4707  ;;  %v3068_v46 = vmul.f32 %v4706_v6, %v6128_v55 }
 0x8e5   : > { %v3066_v34 = vmul.f32 %v4708_v51, %v6130_v1 }
 0x8e7   : > { %4072 = vmatprep.mubr.msk.f32.mxu1 %vm2904_vm2, %v3066_v34 }
 0x8e8   : > { %4073 = vmatmul.mubr.msk.f32.gmra.mrb[56].mxu1 %vm2904_vm2, %v3068_v46 }
 0x8eb   : > { %v4710_v48 = vpop.eup %4709 }
 0x8ec   : > { %v4712_v3 = vpop.eup %4711  ;;  %v3072_v36 = vmul.f32 %v4710_v48, %v6136_v45 }
 0x8ed   : > { %v3070_v8 = vmul.f32 %v4712_v3, %v6138_v23 }
 0x8ef   : > { %4075 = vmatprep.mubr.msk.f32.mxu1 %vm2904_vm2, %v3070_v8 }
 0x8f0   : > { %4076 = vmatmul.mubr.msk.f32.gmra.mrb[58].mxu1 %vm2904_vm2, %v3072_v36 }
 0x8f3   : > { %v3042_v10 = vpop.xlane.xlu1 %3041 }
 0x8f4   : > { %4713 = vrcp.f32 %v3042_v10  ;;  %v3039_v56 = vpop.xlane.xlu0 %3038 }
 0x8f5   : > { %4715 = vrcp.f32 %v3039_v56 }
 0x8fb   : > { %v3048_v1 = vpop.xlane.xlu1 %3047 }
 0x8fc   : > { %4717 = vrcp.f32 %v3048_v1  ;;  %v3045_v55 = vpop.xlane.xlu0 %3044 }
 0x8fd   : > { %4719 = vrcp.f32 %v3045_v55 }
 0x8fe   : > { %v4714_v37 = vpop.eup %4713 }
 0x8ff   : > { %v4716_v32 = vpop.eup %4715  ;;  %v3076_v23 = vmul.f32 %v4714_v37, %v6148_v27  ;;  %v4367_v27 = vld [vmem:[%s6391_s18 + $0x30] sm:$0xff]  }
 0x900   : > { %v3074_v30 = vmul.f32 %v4716_v32, %v6150_v49  ;;  %v4366_v49 = vld [vmem:[%s6391_s18 + $0x28] sm:$0xff]  }
 0x901   : > { %4094 = vmatprep.subr.bf16.mxu0 %v4366_v49  ;;  %4153 = vmatprep.subr.bf16.mxu1 %v4366_v49 }
 0x902   : > { %4078 = vmatprep.mubr.msk.f32.mxu1 %vm2904_vm2, %v3074_v30  ;;  %4095 = vmatpush3.bf16.msra.mxu0 %v4366_v49 }
 0x903   : > { %4079 = vmatmul.mubr.msk.f32.gmra.mrb[60].mxu1 %vm2904_vm2, %v3076_v23  ;;  %4096 = vmatprep.subr.bf16.mxu0 %v4367_v27 }
 0x904   : > { %4161 = vmatpush3.bf16.msra.mxu1 %v4366_v49 }
 0x905   : > { %4154 = vmatprep.subr.bf16.mxu1 %v4367_v27 }
 0x906   : > { %v4718_v45 = vpop.eup %4717  ;;  %4097 = vmatpush3.bf16.msra.mxu0 %v4367_v27 }
 0x907   : > { %v4720_v13 = vpop.eup %4719  ;;  %v3080_v16 = vmul.f32 %v4718_v45, %v6156_v20  ;;  %v4368_v20 = vld [vmem:[%s6391_s18 + $0x38] sm:$0xff]  }
 0x908   : > { %v3078_v41 = vmul.f32 %v4720_v13, %v6158_v5  ;;  %4162 = vmatpush3.bf16.msra.mxu1 %v4367_v27  ;;  %4098 = vmatprep.subr.bf16.mxu0 %v4368_v20  ;;  %v2384_v5 = vsub.s32 2, %v5954_v15 }
 0x909   : > { %4155 = vmatprep.subr.bf16.mxu1 %v4368_v20 }
 0x90a   : > { %4081 = vmatprep.mubr.msk.f32.mxu1 %vm2904_vm2, %v3078_v41  ;;  %4099 = vmatpush3.bf16.msra.mxu0 %v4368_v20  ;;  %v2385_v42 = vrot.slane %v5960_v40, %v2384_v5 }
 0x90b   : > { %4082 = vmatmul.mubr.msk.f32.gmra.mrb[62].mxu1 %vm2904_vm2, %v3080_v16 }
 0x90c   : > { %4163 = vmatpush3.bf16.msra.mxu1 %v4368_v20  ;;  %v2668_v9 = vadd.f32 %v5979_v33, %v2385_v42  ;;  %v2665_v29 = vadd.f32 %v5975_v24, %v2385_v42  ;;  %v2676_v51 = vadd.f32 %v5977_v39, %v2385_v42  ;;  %v2673_v34 = vadd.f32 %v5973_v35, %v2385_v42 }
 0x90d   : > { %v2684_v40 = vadd.f32 %v5995_v53, %v2385_v42  ;;  %v2681_v24 = vadd.f32 %v5991_v57, %v2385_v42  ;;  %v2692_v39 = vadd.f32 %v5993_v26, %v2385_v42  ;;  %v2689_v35 = vadd.f32 %v5989_v18, %v2385_v42 }
 0x90e   : > { %v2700_v53 = vadd.f32 %v6007_v38, %v2385_v42  ;;  %v2697_v57 = vadd.f32 %v6003_v54, %v2385_v42  ;;  %v2708_v26 = vadd.f32 %v6005_v28, %v2385_v42  ;;  %v2705_v18 = vadd.f32 %v6001_v14, %v2385_v42 }
 0x90f   : > { %v2716_v38 = vadd.f32 %v6027_v43, %v2385_v42  ;;  %v2713_v54 = vadd.f32 %v6023_v2, %v2385_v42  ;;  %v2724_v14 = vadd.f32 %v6025_v21, %v2385_v42  ;;  %v2721_v28 = vadd.f32 %v6021_v31, %v2385_v42  ;;  %v6241_v2 = vld [vmem:[%s6384_s11] ss:$0 sm:$0xff] }
 0x910   : > { %v4170_v43 = vadd.f32 %v6241_v2, %v5648_v50  ;;  %v6249_v21 = vld [vmem:[%s6392_s19] ss:$0 sm:$0xff]  ;;  %v4173_v31 = vadd.f32 %v6241_v2, %v5642_v17  ;;  %v4164_v42 = vadd.f32 %v6241_v2, %v5645_v25  ;;  %v4179_v25 = vadd.f32 %v6241_v2, %v5652_v52 }
 0x912   : > { %v4171_v50 = vadd.f32 %v4170_v43, %v6249_v21  ;;  %v6429_v43 = vld [vmem:[#allocation9_spill] sm:$0xff] }
 0x98c   : > { %v4062_v19 = vpop.f32.mrb[48].mxu1 }
 0x98d   : > { %v3280_v22 = vmul.f32 %v4062_v19, %v2668_v9  ;;  %v3200_v59 = vpop.f32.mrb[49].mxu1 }
 0x98e   : > { %v3279_v62 = vmul.f32 %v3200_v59, %v2665_v29 }
 0x990   : > { %v3295_v6 = vpack.c.bf16 %v3280_v22, %v3279_v62 }
 0x992   : > { %4100 = vmatprep.mubr.bf16.mxu0 %v3295_v6 }
 0x994   : > { %v4065_v46 = vpop.f32.mrb[50].mxu1 }
 0x995   : > { %v3282_v48 = vmul.f32 %v4065_v46, %v2676_v51  ;;  %v3210_v3 = vpop.f32.mrb[51].mxu1 }
 0x996   : > { %v3281_v15 = vmul.f32 %v3210_v3, %v2673_v34 }
 0x998   : > { %v3296_v8 = vpack.c.bf16 %v3282_v48, %v3281_v15 }
 0x99a   : > { %4101 = vmatmul.mubr.bf16.vlgmr.msra.gmra.mrb[0].mxu0 %v3296_v8  ;;  %v4167_v8 = vadd.f32 %v6241_v2, %v5640_v63  ;;  %v4176_v63 = vadd.f32 %v6241_v2, %v5657_v61 }
 0x9ab   : > { %v4068_v33 = vpop.f32.mrb[52].mxu1 }
 0x9ac   : > { %v3284_v36 = vmul.f32 %v4068_v33, %v2684_v40  ;;  %v3220_v10 = vpop.f32.mrb[53].mxu1 }
 0x9ad   : > { %v3283_v56 = vmul.f32 %v3220_v10, %v2681_v24  ;;  %v4174_v10 = vadd.f32 %v4173_v31, %v6249_v21 }
 0x9af   : > { %v3297_v1 = vpack.c.bf16 %v3284_v36, %v3283_v56 }
 0x9b1   : > { %4104 = vmatprep.mubr.bf16.mxu0 %v3297_v1 }
 0x9b3   : > { %v4071_v55 = vpop.f32.mrb[54].mxu1 }
 0x9b4   : > { %v3286_v37 = vmul.f32 %v4071_v55, %v2692_v39  ;;  %v3230_v32 = vpop.f32.mrb[55].mxu1  ;;  %v4182_v55 = vadd.f32 %v6241_v2, %v5660_v44 }
 0x9b5   : > { %v3285_v30 = vmul.f32 %v3230_v32, %v2689_v35  ;;  %v4177_v32 = vadd.f32 %v4176_v63, %v6249_v21 }
 0x9b6   : > { %v4183_v61 = vadd.f32 %v4182_v55, %v6249_v21 }
 0x9b7   : > { %v3298_v23 = vpack.c.bf16 %v3286_v37, %v3285_v30  ;;  %v4185_v37 = vadd.f32 %v6241_v2, %v5654_v58  ;;  %v4188_v58 = vadd.f32 %v6241_v2, %v5669_v60 }
 0x9b9   : > { %4105 = vmatmul.mubr.bf16.gmra.mrb[4].mxu0 %v3298_v23  ;;  %v4180_v23 = vadd.f32 %v4179_v25, %v6249_v21  ;;  %v4186_v52 = vadd.f32 %v4185_v37, %v6249_v21 }
 0x9bb   : > { %v4074_v45 = vpop.f32.mrb[56].mxu1 }
 0x9bc   : > { %v3288_v13 = vmul.f32 %v4074_v45, %v2700_v53  ;;  %v3240_v41 = vpop.f32.mrb[57].mxu1 }
 0x9bd   : > { %v3287_v16 = vmul.f32 %v3240_v41, %v2697_v57 }
 0x9bf   : > { %v3299_v49 = vpack.c.bf16 %v3288_v13, %v3287_v16 }
 0x9c1   : > { %4108 = vmatprep.mubr.bf16.mxu0 %v3299_v49  ;;  %v4191_v49 = vadd.f32 %v6241_v2, %v5663_v0 }
 0x9c3   : > { %v4077_v27 = vpop.f32.mrb[58].mxu1 }
 0x9c4   : > { %v3290_v20 = vmul.f32 %v4077_v27, %v2708_v26  ;;  %v3250_v5 = vpop.f32.mrb[59].mxu1  ;;  %v4194_v26 = vadd.f32 %v6241_v2, %v5672_v7  ;;  %v4189_v27 = vadd.f32 %v4188_v58, %v6249_v21 }
 0x9c5   : > { %v3289_v9 = vmul.f32 %v3250_v5, %v2705_v18  ;;  %v4197_v18 = vadd.f32 %v6241_v2, %v5666_v4  ;;  %v4192_v5 = vadd.f32 %v4191_v49, %v6249_v21 }
 0x9c6   : > { %v4195_v60 = vadd.f32 %v4194_v26, %v6249_v21 }
 0x9c7   : > { %v3300_v29 = vpack.c.bf16 %v3290_v20, %v3289_v9  ;;  %v4198_v0 = vadd.f32 %v4197_v18, %v6249_v21 }
 0x9c9   : > { %4109 = vmatmul.mubr.bf16.gmra.mrb[8].mxu0 %v3300_v29 }
 0x9d6   : > { %v4080_v19 = vpop.f32.mrb[60].mxu1 }
 0x9d7   : > { %v3292_v22 = vmul.f32 %v4080_v19, %v2716_v38  ;;  %v3260_v59 = vpop.f32.mrb[61].mxu1 }
 0x9d8   : > { %v3291_v62 = vmul.f32 %v3260_v59, %v2713_v54  ;;  %v841_v59 = vadd.f32 %v6241_v2, %v5631_v12 }
 0x9da   : > { %v3301_v6 = vpack.c.bf16 %v3292_v22, %v3291_v62  ;;  %v849_v22 = vadd.f32 %v5629_v47, %v6241_v2  ;;  %v852_v62 = vadd.f32 %v5633_v11, %v6241_v2 }
 0x9dc   : > { %4112 = vmatprep.mubr.bf16.mxu1 %v3301_v6  ;;  %v6425_v6 = vld [vmem:[#allocation10_spill] sm:$0xff] }
 0x9de   : > { %v4083_v51 = vpop.f32.mrb[62].mxu1 }
 0x9df   : > { %v3294_v34 = vmul.f32 %v4083_v51, %v2724_v14  ;;  %v3270_v46 = vpop.f32.mrb[63].mxu1  ;;  %v4201_v14 = vadd.f32 %v6425_v6, %v849_v22 }
 0x9e0   : > { %v3293_v48 = vmul.f32 %v3270_v46, %v2721_v28  ;;  %v6426_v28 = vld [vmem:[#allocation7_spill] sm:$0xff] }
 0x9e1   : > { %v844_v51 = vadd.f32 %v6241_v2, %v6426_v28  ;;  %v4202_v47 = vadd.f32 %v4201_v14, %v6249_v21 }
 0x9e2   : > { %v3302_v3 = vpack.c.bf16 %v3294_v34, %v3293_v48  ;;  %v6427_v34 = vld [vmem:[#allocation8_spill] sm:$0xff]  ;;  %v6428_v48 = vld [vmem:[#allocation11_spill] sm:$0xff] }
 0x9e3   : > { %v4205_v46 = vadd.f32 %v6427_v34, %v841_v59  ;;  %v4213_v31 = vadd.f32 %v6429_v43, %v844_v51 }
 0x9e4   : > { %4113 = vmatmul.mubr.bf16.vlgmr.msra.gmra.mrb[64].mxu1 %v3302_v3  ;;  %v4209_v3 = vadd.f32 %v6428_v48, %v852_v62 }
 0x9e5   : > { %v4206_v12 = vadd.f32 %v4205_v46, %v6249_v21 }
 0x9e6   : > { %v4210_v2 = vadd.f32 %v4209_v3, %v6249_v21 }
 0xa6d   : > { %v4102_v15 = vpop.f32.mrb[0].mxu0 }
 0xa6e   : > { %v4165_v40 = vadd.f32 %v4164_v42, %v4102_v15  ;;  %v3408_v24 = vpop.f32.mrb[1].mxu0 }
 0xa6f   : > { %v4168_v33 = vadd.f32 %v4167_v8, %v3408_v24  ;;  %v4103_v36 = vpop.f32.mrb[2].mxu0  ;;  %v4214_v24 = vadd.f32 %v4213_v31, %v6249_v21 }
 0xa70   : > { %v4166_v56 = vadd.f32 %v4165_v40, %v6249_v21  ;;  %v4172_v17 = vadd.f32 %v4171_v50, %v4103_v36  ;;  %v3411_v1 = vpop.f32.mrb[3].mxu0 }
 0xa71   : > { %v4169_v39 = vadd.f32 %v4168_v33, %v6249_v21  ;;  %v4175_v35 = vadd.f32 %v4174_v10, %v3411_v1 }
 0xa72   : > { %3505 = vst [vmem:[%s6263_s5 + $0x10] sm:$0xff] %v4166_v56  ;;  %3506 = vst [vmem:[%s6263_s5 + $0x18] sm:$0xff] %v4172_v17 }
 0xa73   : > { %3503 = vst [vmem:[%s6263_s5] sm:$0xff] %v4169_v39  ;;  %3504 = vst [vmem:[%s6263_s5 + $0x8] sm:$0xff] %v4175_v35 }
 0xa8c   : > { %v4106_v30 = vpop.f32.mrb[4].mxu0 }
 0xa8d   : > { %v4178_v53 = vadd.f32 %v4177_v32, %v4106_v30  ;;  %v3424_v57 = vpop.f32.mrb[5].mxu0 }
 0xa8e   : > { %v4181_v45 = vadd.f32 %v4180_v23, %v3424_v57  ;;  %v4107_v13 = vpop.f32.mrb[6].mxu0 }
 0xa8f   : > { %3509 = vst [vmem:[%s6263_s5 + $0x30] sm:$0xff] %v4178_v53  ;;  %v4184_v44 = vadd.f32 %v4183_v61, %v4107_v13  ;;  %v3427_v41 = vpop.f32.mrb[7].mxu0 }
 0xa90   : > { %3507 = vst [vmem:[%s6263_s5 + $0x20] sm:$0xff] %v4181_v45  ;;  %v4187_v16 = vadd.f32 %v4186_v52, %v3427_v41 }
 0xa91   : > { %3510 = vst [vmem:[%s6263_s5 + $0x38] sm:$0xff] %v4184_v44 }
 0xa92   : > { %3508 = vst [vmem:[%s6263_s5 + $0x28] sm:$0xff] %v4187_v16 }
 0xa9c   : > { %v4110_v20 = vpop.f32.mrb[8].mxu0 }
 0xa9d   : > { %v4190_v9 = vadd.f32 %v4189_v27, %v4110_v20  ;;  %v3440_v29 = vpop.f32.mrb[9].mxu0 }
 0xa9e   : > { %v4193_v38 = vadd.f32 %v4192_v5, %v3440_v29  ;;  %v4111_v54 = vpop.f32.mrb[10].mxu0 }
 0xa9f   : > { %3513 = vst [vmem:[%s6263_s5 + $0x50] sm:$0xff] %v4190_v9  ;;  %v4196_v7 = vadd.f32 %v4195_v60, %v4111_v54  ;;  %v3443_v19 = vpop.f32.mrb[11].mxu0 }
 0xaa0   : > { %3511 = vst [vmem:[%s6263_s5 + $0x40] sm:$0xff] %v4193_v38  ;;  %v4199_v4 = vadd.f32 %v4198_v0, %v3443_v19 }
 0xaa1   : > { %3514 = vst [vmem:[%s6263_s5 + $0x58] sm:$0xff] %v4196_v7 }
 0xaa2   : > { %3512 = vst [vmem:[%s6263_s5 + $0x48] sm:$0xff] %v4199_v4 }
 0xab7   : > { %v4114_v42 = vpop.f32.mrb[64].mxu1 }
 0xab8   : > { %v4203_v11 = vadd.f32 %v4202_v47, %v4114_v42  ;;  %v3456_v15 = vpop.f32.mrb[65].mxu1 }
 0xab9   : > { %v4207_v8 = vadd.f32 %v4206_v12, %v3456_v15  ;;  %v4115_v40 = vpop.f32.mrb[66].mxu1 }
 0xaba   : > { %3517 = vst [vmem:[%s6263_s5 + $0x70] sm:$0xff] %v4203_v11  ;;  %v4211_v50 = vadd.f32 %v4210_v2, %v4115_v40  ;;  %v3459_v33 = vpop.f32.mrb[67].mxu1 }
 0xabb   : > { %3515 = vst [vmem:[%s6263_s5 + $0x60] sm:$0xff] %v4207_v8  ;;  %v4215_v36 = vadd.f32 %v4214_v24, %v3459_v33 }
 0xabc   : > { %3518 = vst [vmem:[%s6263_s5 + $0x78] sm:$0xff] %v4211_v50 }
 0xabd   : > { %3516 = vst [vmem:[%s6263_s5 + $0x68] sm:$0xff] %v4215_v36 }
 0xabe   : > { %4750 = shalt.err (!%p4747_p3)
}
 0xabf   : > { %s4751_s21 = scalar_lea.hbm %s6323_s0, 2048  ;;  %s4755_s27 = scalar_lea.hbm %s6393_s20, 4096 }
 0xac0   : > { %p4752_p4 = scmp.ne.s32.totalorder %s6323_s0, %s4751_s21  ;;  %p4756_p9 = scmp.lt.u32.totalorder %s6323_s0, %s6393_s20 }
 0xac1   : > { %p4757_p10 = scmp.lt.u32.totalorder %s4755_s27, %s4751_s21  ;;  %p4759_p12 = scmp.lt.u32.totalorder %s4751_s21, %s6323_s0 }
 0xac2   : > { %p4753_p7 = pnand %p4752_p4, %p4949_p5 }
 0xac3   : > { %p4758_p11 = por %p4757_p10, %p4756_p9 }
 0xac4   : > { %p4754_p8 = pneg %p4753_p7 }
 0xac5   : > { %p4760_p13 = por %p4759_p12, %p4758_p11 }
 0xac7   : > { %p4761_p0 = pnand %p4760_p13, %p4754_p8 }
 0xac9   : > { %4764 = shalt.err (!%p4761_p0)
}
 0xaca   : > { %s4804_s23 = smov 128   ;;  %s4805_s6 = smov 8  }
 0xacb   : > { %4228 = dma.vmem_to_hbm [thread:$0]  (%p4949_p5), %s6325_s7, 2048, %s6323_s0, %s6332_s2, %s4804_s23, %s4804_s23, %s4805_s6  }
 0xacc PF: > { %p4234_p1 = scmp.ge.s32.totalorder %s4799_s24, 2  ;;  %s3548_s5 = sand.u32 1, %s4787_s1  }
 0xacd   : > { %s3549_s21 = scalar_lea.sflag [#allocation3], %s3548_s5 }
 0xace   : > { %p4231_p2 = pnand %p4234_p1, %p4953_p6 }
 0xad0   : > { %4782 = dma.done.wait (!%p4231_p2), %s3549_s21, 2048  }
 0xad1   : > { %4784 = vsyncadd (!%p4231_p2), %s3549_s21, 4294965248  ;;  %s6430_s30 = sld [smem:[#allocation5_spill]]  ;;  %s6431_s23 = sld [smem:[#allocation6_spill]] }
 0xad2   : > { %p30_p3 = scmp.ge.s32.totalorder %s4936_s3, 4   ;;  %s6432_s1 = smov %s4791_s22 }
 0xad3   : > { %s6434_s24 = smov %s4936_s3 }
 0xad4   :  { %32 = sbr.rel (!%p30_p3) target bundleno = 12 (0xc), region = 138 }
 0xad7   : > { %s6433_s22 = smov %s6430_s30 }
 0xadb   :  { %3554 = vsyncpa [#allocation3], 1 }
 0xadc   :  { %3556 = vsyncpa [#allocation3 + $0x1], 1 }

</bundles_post_ra>
